<compile_context>
chip_gen: v7x
topology: tpu7x:2x2x1
jax: 0.10.0
libtpu: 0.0.40
codegen_flags: <defaults>
</compile_context>

<pallas_src>
import math

import jax
import jax.numpy as jnp
import numpy as np
from jax.experimental import pallas as pl
from jax.experimental.pallas import tpu as pltpu

# Only affects the plain-JAX wrapper glue and the reference model; every in-kernel
# dot_general sets `precision=` explicitly (review: drop 'highest' for in-kernel dots).
jax.config.update("jax_default_matmul_precision", "highest")

# ----------------------- module hyper-parameters (small) -----------------------
DIM_MODEL = 32                 # dim_model
N_HEAD = 4                     # n_head
DIM_FF = 64                    # dim_feedforward
WINDOW_SIZE = 4                # window_size (small -> small LocalisedEncoding table)
MIN_WAVELENGTH = 1e-3
PEAK_MIN_WL = 1e-3
PEAK_MAX_WL = 1e4
HEAD_DIM = DIM_MODEL // N_HEAD           # 8
DIM_HALF = DIM_MODEL // 2                # 16 (pos_enc d_model)
DIM_MZ = int(DIM_MODEL * 0.5)            # 16 (partial_encode=0.5)
N_SIN = DIM_MZ // 2
N_COS = DIM_MZ - N_SIN
LN_EPS = 1e-5
NEG = -1e30

BATCH = 8
N_PEAKS = 8
SEQ = N_PEAKS + 1

# ----------------------- batch blocking (per grid step) ------------------------
B_BLK = 4                      # spectra per grid step (grid length BATCH/B_BLK = 2)
R = B_BLK * SEQ                # 36 token rows per step
RH = R * N_HEAD                # 144 (query, head) rows per step
BSS = B_BLK * SEQ * SEQ        # 324 relative-mass pe columns per step
BSS_PAD = 384                  # lane-dense padding (3 * 128)

# set True on v6e/v7x to feed single-pass bf16 operands to every in-kernel dot
MXU_BF16 = False

# ----------------------- packed constant slab layouts --------------------------
# slab_d : width DIM_MODEL (32)
D_WO = 0                       # (D, D)  output projection
D_W2 = D_WO + DIM_MODEL        # (F, D)  second FFN weight
D_WVPE = D_W2 + DIM_FF         # (C, D)  pe-channel rows of Wv
D_WKPE = D_WVPE + DIM_HALF     # (C, D)  pe-channel rows of Wk
D_HMSK = D_WKPE + DIM_HALF     # (RH, D) 0/1 head mask
D_BO = D_HMSK + RH
D_B2 = D_BO + 1
D_LN1G = D_B2 + 1
D_LN1B = D_LN1G + 1
D_LN2G = D_LN1B + 1
D_LN2B = D_LN2G + 1
D_TOTAL = D_LN2B + 1
# slab_r : width R (36)
R_REP = 0                      # (RH, R) 0/1 query-row replication
R_ADD = RH                     # (RH, R) additive -inf cross-batch mask
# slab_ss : width BSS_PAD (384)
S_BLK2 = 0                     # (RH, BSS_PAD) 0/1 per-(query,batch) pe-block mask
S_FOLDT = RH                   # (R, BSS_PAD)  0/1 (batch,key) <- (batch,i,j) fold
# slab_qkv : width 3*DIM_MODEL (96):   rows [0,D) = [Wq|Wk|Wv], row D = [bq|bk|bv]
# slab_ff  : width DIM_FF (64):        rows [0,D) = W1, row D = b1


# ------------------------------ buffers & params ------------------------------
def make_buffers():
    # depthcharge MassEncoder sinusoidal wavelength terms (reconstructed)
    base = PEAK_MIN_WL / (2.0 * math.pi)
    scale = PEAK_MAX_WL / PEAK_MIN_WL
    sin_term = base * scale ** (np.arange(N_SIN, dtype=np.float64) / (N_SIN - 1))
    cos_term = base * scale ** (np.arange(N_COS, dtype=np.float64) / (N_COS - 1))

    # LocalisedEncoding pre-computed table (casanovo_style=False branch)
    max_len = int((WINDOW_SIZE + 1) * 2 / MIN_WAVELENGTH)
    position = np.arange(max_len, dtype=np.float64)[:, None] - max_len // 2
    div_term = np.exp(np.arange(0, DIM_HALF, 2, dtype=np.float64)
                      * (-math.log(10000.0) / DIM_HALF))
    pe = np.zeros((max_len, DIM_HALF), np.float32)
    pe[:, 0::2] = np.sin(position * div_term)
    pe[:, 1::2] = np.cos(position * div_term)

    return {
        "sin_term": jnp.asarray(sin_term, jnp.float32)[None, :],   # (1, N_SIN)
        "cos_term": jnp.asarray(cos_term, jnp.float32)[None, :],   # (1, N_COS)
        "pe": jnp.asarray(pe),                                     # (max_len, D/2)
    }


def init_params(key):
    ks = jax.random.split(key, 16)
    s = 0.1
    d, f = DIM_MODEL, DIM_FF
    w_in = s * jax.random.normal(ks[0], (3 * d, d), jnp.float32)   # MHA in_proj_weight
    b_in = s * jax.random.normal(ks[1], (3 * d,), jnp.float32)     # MHA in_proj_bias
    wq, wk, wv = w_in[:d], w_in[d:2 * d], w_in[2 * d:]
    return {
        "latent": jax.random.normal(ks[2], (1, d), jnp.float32),          # latent_spectrum
        "w_int_t": s * jax.random.normal(ks[3], (1, d), jnp.float32),     # Linear(1,d,bias=False).weight.T
        "wq_t": wq.T, "wk_t": wk.T, "wv_t": wv.T,
        "bq": b_in[:d][None, :], "bk": b_in[d:2 * d][None, :], "bv": b_in[2 * d:][None, :],
        "wk_pe_t": wk[:, DIM_HALF:].T,       # (C, D) pe-channel contribution to K
        "wv_pe_t": wv[:, DIM_HALF:].T,       # (C, D) pe-channel contribution to V
        "wo_t": (s * jax.random.normal(ks[4], (d, d), jnp.float32)).T,
        "bo": (s * jax.random.normal(ks[5], (d,), jnp.float32))[None, :],
        "w1_t": (s * jax.random.normal(ks[6], (f, d), jnp.float32)).T,
        "b1": (s * jax.random.normal(ks[7], (f,), jnp.float32))[None, :],
        "w2_t": (s * jax.random.normal(ks[8], (d, f), jnp.float32)).T,
        "b2": (s * jax.random.normal(ks[9], (d,), jnp.float32))[None, :],
        "ln1_g": 1.0 + 0.05 * jax.random.normal(ks[10], (1, d), jnp.float32),
        "ln1_b": 0.05 * jax.random.normal(ks[11], (1, d), jnp.float32),
        "ln2_g": 1.0 + 0.05 * jax.random.normal(ks[12], (1, d), jnp.float32),
        "ln2_b": 0.05 * jax.random.normal(ks[13], (1, d), jnp.float32),
    }


def pack_consts(params):
    """Pack weights and all 0/1 selector / additive masks into resident constant slabs."""
    D, C, S, E = DIM_MODEL, DIM_HALF, SEQ, HEAD_DIM
    np_ = lambda a: np.asarray(a, np.float32)

    # (query, head) rows are ordered rr = h * R + r, with r = b_local * S + i
    rr = np.arange(RH)
    r_of = rr % R
    h_of = rr // R
    rcol = np.arange(R)
    c2 = np.arange(BSS)                       # c2 = (b_local * S + i) * S + j

    rep = (rcol[None, :] == r_of[:, None]).astype(np.float32)                      # (RH, R)
    addblk = np.where(rcol[None, :] // S == r_of[:, None] // S, 0.0, NEG)          # (RH, R)
    hmask = ((np.arange(D)[None, :] // E) == h_of[:, None]).astype(np.float32)     # (RH, D)
    blk2 = (c2[None, :] // S == r_of[:, None]).astype(np.float32)                  # (RH, BSS)
    foldt = ((c2[None, :] // (S * S) == rcol[:, None] // S)
             & (c2[None, :] % S == rcol[:, None] % S)).astype(np.float32)          # (R, BSS)
    blk2 = np.pad(blk2, ((0, 0), (0, BSS_PAD - BSS)))
    foldt = np.pad(foldt, ((0, 0), (0, BSS_PAD - BSS)))

    slab_d = np.concatenate([
        np_(params["wo_t"]), np_(params["w2_t"]),
        np_(params["wv_pe_t"]), np_(params["wk_pe_t"]), hmask,
        np_(params["bo"]), np_(params["b2"]),
        np_(params["ln1_g"]), np_(params["ln1_b"]),
        np_(params["ln2_g"]), np_(params["ln2_b"])], axis=0).astype(np.float32)
    assert slab_d.shape == (D_TOTAL, D)

    slab_r = np.concatenate([rep, addblk], axis=0).astype(np.float32)              # (2RH, R)
    slab_ss = np.concatenate([blk2, foldt], axis=0).astype(np.float32)             # (RH+R, 384)

    wqkv = np.concatenate([np_(params["wq_t"]), np_(params["wk_t"]),
                           np_(params["wv_t"])], axis=1)                           # (D, 3D)
    bqkv = np.concatenate([np_(params["bq"]), np_(params["bk"]),
                           np_(params["bv"])], axis=1)                             # (1, 3D)
    slab_qkv = np.concatenate([wqkv, bqkv], axis=0).astype(np.float32)             # (D+1, 3D)
    slab_ff = np.concatenate([np_(params["w1_t"]), np_(params["b1"])],
                             axis=0).astype(np.float32)                            # (D+1, F)

    j = lambda a: jnp.asarray(a, jnp.float32)
    return {"slab_d": j(slab_d), "slab_r": j(slab_r), "slab_ss": j(slab_ss),
            "slab_qkv": j(slab_qkv), "slab_ff": j(slab_ff)}


# --------------------------- fused Pallas kernel ---------------------------
def _fused_encoder_kernel(x_ref, penm_ref, d_ref, r_ref, ss_ref, qkv_ref, ff_ref,
                          out_ref):
    """One grid step = B_BLK spectra: localised MHSA + FFN + both LayerNorms."""
    f32 = jnp.float32
    DATA = jax.lax.Precision.HIGHEST     # exact f32 path, only on the data dots
    SEL = jax.lax.Precision.DEFAULT      # single bf16 MXU pass for 0/1 selector dots
    D, C, F, E = DIM_MODEL, DIM_HALF, DIM_FF, HEAD_DIM

    def mm(a, b, dims, prec):            # 2-D matmul; transposes fold into dims
        if MXU_BF16:
            a = a.astype(jnp.bfloat16)
            b = b.astype(jnp.bfloat16)
            prec = jax.lax.Precision.DEFAULT
        return jax.lax.dot_general(a, b, (dims, ((), ())),
                                   preferred_element_type=f32, precision=prec)

    def row(i):                          # single packed (1, D) constant row
        return d_ref[i:i + 1, :]

    # ---- resident constants (DMA'd once, constant index_map) ----
    wo = d_ref[D_WO:D_WO + D, :]
    w2 = d_ref[D_W2:D_W2 + F, :]
    wvpe = d_ref[D_WVPE:D_WVPE + C, :]
    wkpe = d_ref[D_WKPE:D_WKPE + C, :]
    hmask = d_ref[D_HMSK:D_HMSK + RH, :]
    rep = r_ref[R_REP:R_REP + RH, :]
    addblk = r_ref[R_ADD:R_ADD + RH, :]
    blk2 = ss_ref[S_BLK2:S_BLK2 + RH, :]
    foldt = ss_ref[S_FOLDT:S_FOLDT + R, :]
    wqkv = qkv_ref[0:D, :]
    bqkv = qkv_ref[D:D + 1, :]
    w1 = ff_ref[0:D, :]
    b1 = ff_ref[D:D + 1, :]

    # ---- per-step data ----
    x = x_ref[0]                                  # (R, D) embedded tokens (incl. pe0)
    pe_cm = penm_ref[0, 0:C, :]                   # (C, BSS_PAD) relative-mass pe cols
    nmask = penm_ref[0, C:C + 1, 0:R]             # (1, R) additive key-padding mask

    # ---- fused q/k/v projection (merged Wq|Wk|Wv -> one dot) ----
    xqkv = mm(x, wqkv, ((1,), (0,)), DATA) + bqkv                  # (R, 3D)
    q = xqkv[:, 0:D]
    k = xqkv[:, D:2 * D]
    v = xqkv[:, 2 * D:3 * D]

    # ---- localised multi-head self-attention (rows rr = h*R + b*S + i) ----
    q_exp = mm(rep, q, ((1,), (0,)), SEL) * hmask                  # (RH, D)
    sb = mm(q_exp, k, ((1,), (1,)), DATA)                          # (RH, R) base scores
    # low-rank relative-mass correction: scores_pe[rr, j] = pe_rel[b,i,j,:].g[rr,:]
    g = mm(q_exp, wkpe, ((1,), (1,)), DATA)                        # (RH, C)
    t = mm(g, pe_cm, ((1,), (0,)), DATA) * blk2                    # (RH, BSS_PAD)
    sp = mm(t, foldt, ((1,), (1,)), SEL)                           # (RH, R)

    scores = (sb + sp) * (1.0 / math.sqrt(E)) + nmask + addblk     # pad + cross-batch
    scores = scores - jnp.max(scores, axis=-1, keepdims=True)
    num = jnp.exp(scores)
    p = num * pl.reciprocal(jnp.sum(num, axis=-1, keepdims=True), approx=True)

    pv = mm(p, v, ((1,), (0,)), DATA)                              # (RH, D)
    pj = mm(p, foldt, ((1,), (0,)), SEL) * blk2                    # (RH, BSS_PAD)
    ppe = mm(pj, pe_cm, ((1,), (1,)), DATA)                        # (RH, C)
    pvpe = mm(ppe, wvpe, ((1,), (0,)), DATA)                       # (RH, D)

    ctx = (pv + pvpe) * hmask                                      # (RH, D)
    attn = ctx[0:R, :]                                             # head merge: slice-adds
    for h in range(1, N_HEAD):
        attn = attn + ctx[h * R:(h + 1) * R, :]
    y = mm(attn, wo, ((1,), (0,)), DATA) + row(D_BO)               # (R, D)

    def layer_norm(val, grow, brow):
        mu = jnp.mean(val, axis=-1, keepdims=True)
        var = jnp.mean((val - mu) ** 2, axis=-1, keepdims=True)
        return (val - mu) * jax.lax.rsqrt(var + LN_EPS) * grow + brow

    h1 = layer_norm(x + y, row(D_LN1G), row(D_LN1B))
    hid = jnp.maximum(mm(h1, w1, ((1,), (0,)), DATA) + b1, 0.0)    # (R, F)
    ff = mm(hid, w2, ((1,), (0,)), DATA) + row(D_B2)               # (R, D)
    out_ref[0] = layer_norm(h1 + ff, row(D_LN2G), row(D_LN2B))


# ------------------------------- module forward -------------------------------
def localised_spectrum_encoder(spectra, params, buffers, consts):
    """Forward of LocalisedSpectrumEncoder -> (latent (B,P+1,D), padding mask (B,P+1))."""
    B, P, _ = spectra.shape
    S = P + 1
    assert P == N_PEAKS and S == SEQ
    spectra = spectra.astype(jnp.float32)
    w = jnp.float32(WINDOW_SIZE)
    pe_table = buffers["pe"]

    NB = (B + B_BLK - 1) // B_BLK
    Bp = NB * B_BLK
    spectra_p = jnp.pad(spectra, ((0, Bp - B), (0, 0), (0, 0)))

    # padding mask: ~spectra.sum(dim=2).bool(); latent column never padded
    zeros_p = spectra_p.sum(axis=2) == 0
    mask_p = jnp.concatenate([jnp.zeros((Bp, 1), bool), zeros_p], axis=1)        # (Bp, S)

    # ---- peak encoding + latent prepend + zero-mass positional bias (plain JAX:
    #      sin/cos elementwise, no guaranteed Mosaic lowering; a few KB total) ----
    mz = spectra_p[:, :, 0:1]
    enc = jnp.concatenate([jnp.sin(mz / buffers["sin_term"]),
                           jnp.cos(mz / buffers["cos_term"]),
                           jnp.zeros((Bp, P, DIM_MODEL - DIM_MZ), jnp.float32)], axis=-1)
    peaks = enc + spectra_p[:, :, 1:2] * params["w_int_t"]
    latent = jnp.broadcast_to(params["latent"][None, :, :], (Bp, 1, DIM_MODEL))
    x = jnp.concatenate([latent, peaks], axis=1)                                 # (Bp, S, D)
    idx0 = ((jnp.float32(0.0) + 1.0 + w) / jnp.float32(MIN_WAVELENGTH)).astype(jnp.int32)
    # PyTorch mutates the residual path in place (`q` is a reshape *view* of src), so
    # the zero-mass positional row is folded into x here, exactly like the reference.
    x = x.at[:, :, DIM_HALF:].add(pe_table[idx0])
    x_in = x.reshape(NB, R, DIM_MODEL)

    # ---- localised relative-mass encoding (latent token mass = 0) ----
    # TODO(synk): pe_table[idx] is a data-dependent embedding gather; it stays in plain
    # JAX glue (~5 KB/spectrum).  Move it in-kernel (table resident in VMEM + SMEM
    # indices) only if SEQ grows.
    m = jnp.concatenate([jnp.zeros((Bp, 1), jnp.float32), spectra_p[:, :, 0]], axis=1)
    diff = jnp.clip(m[:, None, :] - m[:, :, None], -w, w)                        # [b,i,j]=m_j-m_i
    idx = ((diff + 1.0 + w) / jnp.float32(MIN_WAVELENGTH)).astype(jnp.int32)
    pe_rel = pe_table[idx]                                                       # (Bp,S,S,C)
    pe_t = jnp.transpose(pe_rel, (0, 3, 1, 2)).reshape(NB, B_BLK, DIM_HALF, S, S)
    pe_cm = jnp.transpose(pe_t, (0, 2, 1, 3, 4)).reshape(NB, DIM_HALF, BSS)
    pe_cm = jnp.pad(pe_cm, ((0, 0), (0, 0), (0, BSS_PAD - BSS)))

    nmask = jnp.where(mask_p, jnp.float32(NEG), 0.0).reshape(NB, 1, R)
    nmask = jnp.pad(nmask, ((0, 0), (0, 0), (0, BSS_PAD - R)))
    pe_nm = jnp.concatenate([pe_cm, nmask], axis=1)                              # (NB,C+1,384)

    out = pl.pallas_call(
        _fused_encoder_kernel,
        out_shape=jax.ShapeDtypeStruct((NB, R, DIM_MODEL), jnp.float32),
        grid=(NB,),
        in_specs=[
            pl.BlockSpec((1, R, DIM_MODEL), lambda nb: (nb, 0, 0)),
            pl.BlockSpec((1, DIM_HALF + 1, BSS_PAD), lambda nb: (nb, 0, 0)),
            pl.BlockSpec(consts["slab_d"].shape, lambda nb: (0, 0)),
            pl.BlockSpec(consts["slab_r"].shape, lambda nb: (0, 0)),
            pl.BlockSpec(consts["slab_ss"].shape, lambda nb: (0, 0)),
            pl.BlockSpec(consts["slab_qkv"].shape, lambda nb: (0, 0)),
            pl.BlockSpec(consts["slab_ff"].shape, lambda nb: (0, 0)),
        ],
        out_specs=pl.BlockSpec((1, R, DIM_MODEL), lambda nb: (nb, 0, 0)),
        compiler_params=pltpu.CompilerParams(dimension_semantics=("parallel",)),
    )(x_in, pe_nm, consts["slab_d"], consts["slab_r"], consts["slab_ss"],
      consts["slab_qkv"], consts["slab_ff"])

    out = out.reshape(Bp, S, DIM_MODEL)[:B]
    return out, mask_p[:B]


# ------------------------- plain-JAX reference (check) -------------------------
def reference_forward(spectra, params, buffers):
    B, P, _ = spectra.shape
    S, D = P + 1, DIM_MODEL
    pe = buffers["pe"]
    w = jnp.float32(WINDOW_SIZE)

    zeros = spectra.sum(axis=2) == 0
    mask = jnp.concatenate([jnp.zeros((B, 1), bool), zeros], axis=1)

    mz = spectra[:, :, 0:1]
    enc = jnp.concatenate([jnp.sin(mz / buffers["sin_term"]),
                           jnp.cos(mz / buffers["cos_term"]),
                           jnp.zeros((B, P, D - DIM_MZ), jnp.float32)], axis=-1)
    peaks = enc + spectra[:, :, 1:2] * params["w_int_t"]
    latent = jnp.broadcast_to(params["latent"][None, :, :], (B, 1, D))
    x = jnp.concatenate([latent, peaks], axis=1)

    m = jnp.concatenate([jnp.zeros((B, 1), jnp.float32), spectra[:, :, 0]], axis=1)
    idx0 = ((jnp.float32(0.0) + 1.0 + w) / jnp.float32(MIN_WAVELENGTH)).astype(jnp.int32)
    x = x.at[:, :, DIM_HALF:].add(pe[idx0])            # in-place view mutation in PyTorch

    diff = jnp.clip(m[:, None, :] - m[:, :, None], -w, w)
    idx = ((diff + 1.0 + w) / jnp.float32(MIN_WAVELENGTH)).astype(jnp.int32)
    pe_rel = pe[idx]

    kv = x[:, None, :, :] + jnp.concatenate(
        [jnp.zeros((B, S, S, DIM_HALF), jnp.float32), pe_rel], axis=-1)      # (B,Sq,Sk,D)
    q = x @ params["wq_t"] + params["bq"]
    k = kv @ params["wk_t"] + params["bk"]
    v = kv @ params["wv_t"] + params["bv"]
    qh = q.reshape(B, S, N_HEAD, HEAD_DIM)
    kh = k.reshape(B, S, S, N_HEAD, HEAD_DIM)
    vh = v.reshape(B, S, S, N_HEAD, HEAD_DIM)
    scores = jnp.einsum("bihe,bijhe->bhij", qh, kh) / math.sqrt(HEAD_DIM)
    scores = scores + jnp.where(mask, NEG, 0.0)[:, None, None, :]
    p = jax.nn.softmax(scores, axis=-1)
    attn = jnp.einsum("bhij,bijhe->bihe", p, vh).reshape(B, S, D)
    y = attn @ params["wo_t"] + params["bo"]

    def layer_norm(val, g, b):
        mu = jnp.mean(val, axis=-1, keepdims=True)
        var = jnp.mean((val - mu) ** 2, axis=-1, keepdims=True)
        return (val - mu) * jax.lax.rsqrt(var + LN_EPS) * g + b

    h1 = layer_norm(x + y, params["ln1_g"], params["ln1_b"])
    ff = jnp.maximum(h1 @ params["w1_t"] + params["b1"], 0.0) @ params["w2_t"] + params["b2"]
    out = layer_norm(h1 + ff, params["ln2_g"], params["ln2_b"])
    return out, mask


# ------------------------------------ main ------------------------------------
if __name__ == "__main__":
    key = jax.random.PRNGKey(0)
    k_param, k_mz, k_int = jax.random.split(key, 3)
    params = init_params(k_param)
    buffers = make_buffers()
    consts = pack_consts(params)

    mz = jax.random.uniform(k_mz, (BATCH, N_PEAKS, 1), jnp.float32, 0.5, 8.0)
    inten = jax.random.uniform(k_int, (BATCH, N_PEAKS, 1), jnp.float32, 0.0, 1.0)
    spectra = jnp.concatenate([mz, inten], axis=-1)          # (B, n_peaks, 2)
    spectra = spectra.at[1, -2:, :].set(0.0)                 # zero-padded peaks -> masked
    spectra = spectra.at[5, -3:, :].set(0.0)

    fwd = jax.jit(localised_spectrum_encoder)
    out, mask = fwd(spectra, params, buffers, consts)
    jax.block_until_ready(out)

    ref_out, ref_mask = reference_forward(spectra, params, buffers)
    np.testing.assert_allclose(np.asarray(out), np.asarray(ref_out), rtol=5e-3, atol=5e-3)
    assert bool(jnp.all(mask == ref_mask))
    assert out.shape == (BATCH, N_PEAKS + 1, DIM_MODEL)
    print("KERNEL_OK")
</pallas_src>

<mosaic_0001>
module attributes {stable_mosaic.version = 11 : i64} {
  func.func @_fused_encoder_kernel(%arg0: i32, %arg1: memref<1x36x32xf32, #tpu.memory_space<vmem>>, %arg2: memref<1x17x384xf32, #tpu.memory_space<vmem>>, %arg3: memref<278x32xf32, #tpu.memory_space<vmem>>, %arg4: memref<288x36xf32, #tpu.memory_space<vmem>>, %arg5: memref<180x384xf32, #tpu.memory_space<vmem>>, %arg6: memref<33x96xf32, #tpu.memory_space<vmem>>, %arg7: memref<33x64xf32, #tpu.memory_space<vmem>>, %arg8: memref<1x36x32xf32, #tpu.memory_space<vmem>>) attributes {dimension_semantics = [#tpu.dimension_semantics<parallel>], iteration_bounds = array<i64: 2>, scalar_prefetch = 0 : i64, scratch_operands = 0 : i64, tpu.core_type = #tpu.core_type<tc>, window_params = [{transform_indices = @transform_0, window_bounds = array<i64: 1, 36, 32>}, {transform_indices = @transform_1, window_bounds = array<i64: 1, 17, 384>}, {pipeline_mode = #tpu.pipeline_mode<synchronous>, transform_indices = @transform_2, window_bounds = array<i64: 278, 32>}, {pipeline_mode = #tpu.pipeline_mode<synchronous>, transform_indices = @transform_3, window_bounds = array<i64: 288, 36>}, {pipeline_mode = #tpu.pipeline_mode<synchronous>, transform_indices = @transform_4, window_bounds = array<i64: 180, 384>}, {pipeline_mode = #tpu.pipeline_mode<synchronous>, transform_indices = @transform_5, window_bounds = array<i64: 33, 96>}, {pipeline_mode = #tpu.pipeline_mode<synchronous>, transform_indices = @transform_6, window_bounds = array<i64: 33, 64>}, {transform_indices = @transform_7, window_bounds = array<i64: 1, 36, 32>}]} {
    %c0 = arith.constant 0 : index
    %c0_0 = arith.constant 0 : index
    %0 = vector.load %arg3[%c0, %c0_0] : memref<278x32xf32, #tpu.memory_space<vmem>>, vector<32x32xf32>
    %c32 = arith.constant 32 : index
    %c0_1 = arith.constant 0 : index
    %1 = vector.load %arg3[%c32, %c0_1] : memref<278x32xf32, #tpu.memory_space<vmem>>, vector<64x32xf32>
    %c96 = arith.constant 96 : index
    %c0_2 = arith.constant 0 : index
    %2 = vector.load %arg3[%c96, %c0_2] : memref<278x32xf32, #tpu.memory_space<vmem>>, vector<16x32xf32>
    %c112 = arith.constant 112 : index
    %c0_3 = arith.constant 0 : index
    %3 = vector.load %arg3[%c112, %c0_3] : memref<278x32xf32, #tpu.memory_space<vmem>>, vector<16x32xf32>
    %c128 = arith.constant 128 : index
    %c0_4 = arith.constant 0 : index
    %4 = vector.load %arg3[%c128, %c0_4] : memref<278x32xf32, #tpu.memory_space<vmem>>, vector<144x32xf32>
    %c0_5 = arith.constant 0 : index
    %c0_6 = arith.constant 0 : index
    %5 = vector.load %arg4[%c0_5, %c0_6] : memref<288x36xf32, #tpu.memory_space<vmem>>, vector<144x36xf32>
    %c144 = arith.constant 144 : index
    %c0_7 = arith.constant 0 : index
    %6 = vector.load %arg4[%c144, %c0_7] : memref<288x36xf32, #tpu.memory_space<vmem>>, vector<144x36xf32>
    %c0_8 = arith.constant 0 : index
    %c0_9 = arith.constant 0 : index
    %7 = vector.load %arg5[%c0_8, %c0_9] : memref<180x384xf32, #tpu.memory_space<vmem>>, vector<144x384xf32>
    %c144_10 = arith.constant 144 : index
    %c0_11 = arith.constant 0 : index
    %8 = vector.load %arg5[%c144_10, %c0_11] : memref<180x384xf32, #tpu.memory_space<vmem>>, vector<36x384xf32>
    %c0_12 = arith.constant 0 : index
    %c0_13 = arith.constant 0 : index
    %9 = vector.load %arg6[%c0_12, %c0_13] : memref<33x96xf32, #tpu.memory_space<vmem>>, vector<32x96xf32>
    %c32_14 = arith.constant 32 : index
    %c0_15 = arith.constant 0 : index
    %10 = vector.load %arg6[%c32_14, %c0_15] : memref<33x96xf32, #tpu.memory_space<vmem>>, vector<1x96xf32>
    %c0_16 = arith.constant 0 : index
    %c0_17 = arith.constant 0 : index
    %11 = vector.load %arg7[%c0_16, %c0_17] : memref<33x64xf32, #tpu.memory_space<vmem>>, vector<32x64xf32>
    %c32_18 = arith.constant 32 : index
    %c0_19 = arith.constant 0 : index
    %12 = vector.load %arg7[%c32_18, %c0_19] : memref<33x64xf32, #tpu.memory_space<vmem>>, vector<1x64xf32>
    %c0_20 = arith.constant 0 : index
    %c0_21 = arith.constant 0 : index
    %c0_22 = arith.constant 0 : index
    %13 = vector.load %arg1[%c0_20, %c0_21, %c0_22] : memref<1x36x32xf32, #tpu.memory_space<vmem>>, vector<1x36x32xf32>
    %14 = vector.shape_cast %13 : vector<1x36x32xf32> to vector<36x32xf32>
    %c0_23 = arith.constant 0 : index
    %c0_24 = arith.constant 0 : index
    %c0_25 = arith.constant 0 : index
    %15 = vector.load %arg2[%c0_23, %c0_24, %c0_25] : memref<1x17x384xf32, #tpu.memory_space<vmem>>, vector<1x16x384xf32>
    %16 = vector.shape_cast %15 : vector<1x16x384xf32> to vector<16x384xf32>
    %c0_26 = arith.constant 0 : index
    %c16 = arith.constant 16 : index
    %c0_27 = arith.constant 0 : index
    %17 = vector.load %arg2[%c0_26, %c16, %c0_27] : memref<1x17x384xf32, #tpu.memory_space<vmem>>, vector<1x1x36xf32>
    %18 = vector.shape_cast %17 : vector<1x1x36xf32> to vector<1x36xf32>
    %cst = arith.constant dense<0.000000e+00> : vector<36x96xf32>
    %19 = tpu.matmul %14, %9, %cst {dimension_numbers = #tpu.dot_dimension_numbers<[1], [0], [0], [1], [0, 0, 1, 1], [], []>, precision = #tpu.contract_precision<fp32>} : vector<36x32xf32>, vector<32x96xf32>, vector<36x96xf32> -> vector<36x96xf32>
    %20 = vector.broadcast %10 : vector<1x96xf32> to vector<36x96xf32>
    %21 = arith.addf %19, %20 : vector<36x96xf32>
    %22 = vector.extract_strided_slice %21 {offsets = [0, 0], sizes = [36, 32], strides = [1, 1]} : vector<36x96xf32> to vector<36x32xf32>
    %23 = vector.extract_strided_slice %21 {offsets = [0, 32], sizes = [36, 32], strides = [1, 1]} : vector<36x96xf32> to vector<36x32xf32>
    %24 = vector.extract_strided_slice %21 {offsets = [0, 64], sizes = [36, 32], strides = [1, 1]} : vector<36x96xf32> to vector<36x32xf32>
    %cst_28 = arith.constant dense<0.000000e+00> : vector<144x32xf32>
    %25 = tpu.matmul %5, %22, %cst_28 {dimension_numbers = #tpu.dot_dimension_numbers<[1], [0], [0], [1], [0, 0, 1, 1], [], []>} : vector<144x36xf32>, vector<36x32xf32>, vector<144x32xf32> -> vector<144x32xf32>
    %26 = arith.mulf %25, %4 : vector<144x32xf32>
    %cst_29 = arith.constant dense<0.000000e+00> : vector<144x36xf32>
    %27 = tpu.matmul %26, %23, %cst_29 {dimension_numbers = #tpu.dot_dimension_numbers<[1], [1], [0], [0], [0, 0, 1, 0], [], []>, precision = #tpu.contract_precision<fp32>} : vector<144x32xf32>, vector<36x32xf32>, vector<144x36xf32> -> vector<144x36xf32>
    %cst_30 = arith.constant dense<0.000000e+00> : vector<144x16xf32>
    %28 = tpu.matmul %26, %3, %cst_30 {dimension_numbers = #tpu.dot_dimension_numbers<[1], [1], [0], [0], [0, 0, 1, 0], [], []>, precision = #tpu.contract_precision<fp32>} : vector<144x32xf32>, vector<16x32xf32>, vector<144x16xf32> -> vector<144x16xf32>
    %cst_31 = arith.constant dense<0.000000e+00> : vector<144x384xf32>
    %29 = tpu.matmul %28, %16, %cst_31 {dimension_numbers = #tpu.dot_dimension_numbers<[1], [0], [0], [1], [0, 0, 1, 1], [], []>, precision = #tpu.contract_precision<fp32>} : vector<144x16xf32>, vector<16x384xf32>, vector<144x384xf32> -> vector<144x384xf32>
    %30 = arith.mulf %29, %7 : vector<144x384xf32>
    %cst_32 = arith.constant dense<0.000000e+00> : vector<144x36xf32>
    %31 = tpu.matmul %30, %8, %cst_32 {dimension_numbers = #tpu.dot_dimension_numbers<[1], [1], [0], [0], [0, 0, 1, 0], [], []>} : vector<144x384xf32>, vector<36x384xf32>, vector<144x36xf32> -> vector<144x36xf32>
    %32 = arith.addf %27, %31 : vector<144x36xf32>
    %cst_33 = arith.constant 0.353553385 : f32
    %33 = vector.broadcast %cst_33 : f32 to vector<144x36xf32>
    %34 = arith.mulf %32, %33 : vector<144x36xf32>
    %35 = vector.broadcast %18 : vector<1x36xf32> to vector<144x36xf32>
    %36 = arith.addf %34, %35 : vector<144x36xf32>
    %37 = arith.addf %36, %6 : vector<144x36xf32>
    %cst_34 = arith.constant dense<0xFF800000> : vector<144xf32>
    %38 = vector.multi_reduction <maximumf>, %37, %cst_34 [1] : vector<144x36xf32> to vector<144xf32>
    %39 = vector.shape_cast %38 : vector<144xf32> to vector<144x1xf32>
    %40 = vector.broadcast %39 : vector<144x1xf32> to vector<144x36xf32>
    %41 = arith.subf %37, %40 : vector<144x36xf32>
    %42 = math.exp %41 : vector<144x36xf32>
    %cst_35 = arith.constant dense<0.000000e+00> : vector<144xf32>
    %43 = vector.multi_reduction <add>, %42, %cst_35 [1] : vector<144x36xf32> to vector<144xf32>
    %44 = vector.shape_cast %43 : vector<144xf32> to vector<144x1xf32>
    %45 = tpu.reciprocal %44 {approx = true} : vector<144x1xf32> -> vector<144x1xf32>
    %46 = vector.broadcast %45 : vector<144x1xf32> to vector<144x36xf32>
    %47 = arith.mulf %42, %46 : vector<144x36xf32>
    %cst_36 = arith.constant dense<0.000000e+00> : vector<144x32xf32>
    %48 = tpu.matmul %47, %24, %cst_36 {dimension_numbers = #tpu.dot_dimension_numbers<[1], [0], [0], [1], [0, 0, 1, 1], [], []>, precision = #tpu.contract_precision<fp32>} : vector<144x36xf32>, vector<36x32xf32>, vector<144x32xf32> -> vector<144x32xf32>
    %cst_37 = arith.constant dense<0.000000e+00> : vector<144x384xf32>
    %49 = tpu.matmul %47, %8, %cst_37 {dimension_numbers = #tpu.dot_dimension_numbers<[1], [0], [0], [1], [0, 0, 1, 1], [], []>} : vector<144x36xf32>, vector<36x384xf32>, vector<144x384xf32> -> vector<144x384xf32>
    %50 = arith.mulf %49, %7 : vector<144x384xf32>
    %cst_38 = arith.constant dense<0.000000e+00> : vector<144x16xf32>
    %51 = tpu.matmul %50, %16, %cst_38 {dimension_numbers = #tpu.dot_dimension_numbers<[1], [1], [0], [0], [0, 0, 1, 0], [], []>, precision = #tpu.contract_precision<fp32>} : vector<144x384xf32>, vector<16x384xf32>, vector<144x16xf32> -> vector<144x16xf32>
    %cst_39 = arith.constant dense<0.000000e+00> : vector<144x32xf32>
    %52 = tpu.matmul %51, %2, %cst_39 {dimension_numbers = #tpu.dot_dimension_numbers<[1], [0], [0], [1], [0, 0, 1, 1], [], []>, precision = #tpu.contract_precision<fp32>} : vector<144x16xf32>, vector<16x32xf32>, vector<144x32xf32> -> vector<144x32xf32>
    %53 = arith.addf %48, %52 : vector<144x32xf32>
    %54 = arith.mulf %53, %4 : vector<144x32xf32>
    %55 = vector.extract_strided_slice %54 {offsets = [0, 0], sizes = [36, 32], strides = [1, 1]} : vector<144x32xf32> to vector<36x32xf32>
    %56 = vector.extract_strided_slice %54 {offsets = [36, 0], sizes = [36, 32], strides = [1, 1]} : vector<144x32xf32> to vector<36x32xf32>
    %57 = arith.addf %55, %56 : vector<36x32xf32>
    %58 = vector.extract_strided_slice %54 {offsets = [72, 0], sizes = [36, 32], strides = [1, 1]} : vector<144x32xf32> to vector<36x32xf32>
    %59 = arith.addf %57, %58 : vector<36x32xf32>
    %60 = vector.extract_strided_slice %54 {offsets = [108, 0], sizes = [36, 32], strides = [1, 1]} : vector<144x32xf32> to vector<36x32xf32>
    %61 = arith.addf %59, %60 : vector<36x32xf32>
    %cst_40 = arith.constant dense<0.000000e+00> : vector<36x32xf32>
    %62 = tpu.matmul %61, %0, %cst_40 {dimension_numbers = #tpu.dot_dimension_numbers<[1], [0], [0], [1], [0, 0, 1, 1], [], []>, precision = #tpu.contract_precision<fp32>} : vector<36x32xf32>, vector<32x32xf32>, vector<36x32xf32> -> vector<36x32xf32>
    %c272 = arith.constant 272 : index
    %c0_41 = arith.constant 0 : index
    %63 = vector.load %arg3[%c272, %c0_41] : memref<278x32xf32, #tpu.memory_space<vmem>>, vector<1x32xf32>
    %64 = vector.broadcast %63 : vector<1x32xf32> to vector<36x32xf32>
    %65 = arith.addf %62, %64 : vector<36x32xf32>
    %66 = arith.addf %14, %65 : vector<36x32xf32>
    %c274 = arith.constant 274 : index
    %c0_42 = arith.constant 0 : index
    %67 = vector.load %arg3[%c274, %c0_42] : memref<278x32xf32, #tpu.memory_space<vmem>>, vector<1x32xf32>
    %c275 = arith.constant 275 : index
    %c0_43 = arith.constant 0 : index
    %68 = vector.load %arg3[%c275, %c0_43] : memref<278x32xf32, #tpu.memory_space<vmem>>, vector<1x32xf32>
    %cst_44 = arith.constant dense<0.000000e+00> : vector<36xf32>
    %69 = vector.multi_reduction <add>, %66, %cst_44 [1] : vector<36x32xf32> to vector<36xf32>
    %70 = vector.shape_cast %69 : vector<36xf32> to vector<36x1xf32>
    %cst_45 = arith.constant 3.200000e+01 : f32
    %71 = vector.broadcast %cst_45 : f32 to vector<36x1xf32>
    %72 = arith.divf %70, %71 : vector<36x1xf32>
    %73 = vector.broadcast %72 : vector<36x1xf32> to vector<36x32xf32>
    %74 = arith.subf %66, %73 : vector<36x32xf32>
    %75 = arith.mulf %74, %74 : vector<36x32xf32>
    %cst_46 = arith.constant dense<0.000000e+00> : vector<36xf32>
    %76 = vector.multi_reduction <add>, %75, %cst_46 [1] : vector<36x32xf32> to vector<36xf32>
    %77 = vector.shape_cast %76 : vector<36xf32> to vector<36x1xf32>
    %cst_47 = arith.constant 3.200000e+01 : f32
    %78 = vector.broadcast %cst_47 : f32 to vector<36x1xf32>
    %79 = arith.divf %77, %78 : vector<36x1xf32>
    %80 = vector.broadcast %72 : vector<36x1xf32> to vector<36x32xf32>
    %81 = arith.subf %66, %80 : vector<36x32xf32>
    %cst_48 = arith.constant 9.99999974E-6 : f32
    %82 = vector.broadcast %cst_48 : f32 to vector<36x1xf32>
    %83 = arith.addf %79, %82 : vector<36x1xf32>
    %84 = math.rsqrt %83 : vector<36x1xf32>
    %85 = vector.broadcast %84 : vector<36x1xf32> to vector<36x32xf32>
    %86 = arith.mulf %81, %85 : vector<36x32xf32>
    %87 = vector.broadcast %67 : vector<1x32xf32> to vector<36x32xf32>
    %88 = arith.mulf %86, %87 : vector<36x32xf32>
    %89 = vector.broadcast %68 : vector<1x32xf32> to vector<36x32xf32>
    %90 = arith.addf %88, %89 : vector<36x32xf32>
    %cst_49 = arith.constant dense<0.000000e+00> : vector<36x64xf32>
    %91 = tpu.matmul %90, %11, %cst_49 {dimension_numbers = #tpu.dot_dimension_numbers<[1], [0], [0], [1], [0, 0, 1, 1], [], []>, precision = #tpu.contract_precision<fp32>} : vector<36x32xf32>, vector<32x64xf32>, vector<36x64xf32> -> vector<36x64xf32>
    %92 = vector.broadcast %12 : vector<1x64xf32> to vector<36x64xf32>
    %93 = arith.addf %91, %92 : vector<36x64xf32>
    %cst_50 = arith.constant 0.000000e+00 : f32
    %94 = vector.broadcast %cst_50 : f32 to vector<36x64xf32>
    %95 = arith.maximumf %93, %94 : vector<36x64xf32>
    %cst_51 = arith.constant dense<0.000000e+00> : vector<36x32xf32>
    %96 = tpu.matmul %95, %1, %cst_51 {dimension_numbers = #tpu.dot_dimension_numbers<[1], [0], [0], [1], [0, 0, 1, 1], [], []>, precision = #tpu.contract_precision<fp32>} : vector<36x64xf32>, vector<64x32xf32>, vector<36x32xf32> -> vector<36x32xf32>
    %c273 = arith.constant 273 : index
    %c0_52 = arith.constant 0 : index
    %97 = vector.load %arg3[%c273, %c0_52] : memref<278x32xf32, #tpu.memory_space<vmem>>, vector<1x32xf32>
    %98 = vector.broadcast %97 : vector<1x32xf32> to vector<36x32xf32>
    %99 = arith.addf %96, %98 : vector<36x32xf32>
    %100 = arith.addf %90, %99 : vector<36x32xf32>
    %c276 = arith.constant 276 : index
    %c0_53 = arith.constant 0 : index
    %101 = vector.load %arg3[%c276, %c0_53] : memref<278x32xf32, #tpu.memory_space<vmem>>, vector<1x32xf32>
    %c277 = arith.constant 277 : index
    %c0_54 = arith.constant 0 : index
    %102 = vector.load %arg3[%c277, %c0_54] : memref<278x32xf32, #tpu.memory_space<vmem>>, vector<1x32xf32>
    %cst_55 = arith.constant dense<0.000000e+00> : vector<36xf32>
    %103 = vector.multi_reduction <add>, %100, %cst_55 [1] : vector<36x32xf32> to vector<36xf32>
    %104 = vector.shape_cast %103 : vector<36xf32> to vector<36x1xf32>
    %cst_56 = arith.constant 3.200000e+01 : f32
    %105 = vector.broadcast %cst_56 : f32 to vector<36x1xf32>
    %106 = arith.divf %104, %105 : vector<36x1xf32>
    %107 = vector.broadcast %106 : vector<36x1xf32> to vector<36x32xf32>
    %108 = arith.subf %100, %107 : vector<36x32xf32>
    %109 = arith.mulf %108, %108 : vector<36x32xf32>
    %cst_57 = arith.constant dense<0.000000e+00> : vector<36xf32>
    %110 = vector.multi_reduction <add>, %109, %cst_57 [1] : vector<36x32xf32> to vector<36xf32>
    %111 = vector.shape_cast %110 : vector<36xf32> to vector<36x1xf32>
    %cst_58 = arith.constant 3.200000e+01 : f32
    %112 = vector.broadcast %cst_58 : f32 to vector<36x1xf32>
    %113 = arith.divf %111, %112 : vector<36x1xf32>
    %114 = vector.broadcast %106 : vector<36x1xf32> to vector<36x32xf32>
    %115 = arith.subf %100, %114 : vector<36x32xf32>
    %cst_59 = arith.constant 9.99999974E-6 : f32
    %116 = vector.broadcast %cst_59 : f32 to vector<36x1xf32>
    %117 = arith.addf %113, %116 : vector<36x1xf32>
    %118 = math.rsqrt %117 : vector<36x1xf32>
    %119 = vector.broadcast %118 : vector<36x1xf32> to vector<36x32xf32>
    %120 = arith.mulf %115, %119 : vector<36x32xf32>
    %121 = vector.broadcast %101 : vector<1x32xf32> to vector<36x32xf32>
    %122 = arith.mulf %120, %121 : vector<36x32xf32>
    %123 = vector.broadcast %102 : vector<1x32xf32> to vector<36x32xf32>
    %124 = arith.addf %122, %123 : vector<36x32xf32>
    %c0_60 = arith.constant 0 : index
    %c0_61 = arith.constant 0 : index
    %c0_62 = arith.constant 0 : index
    %125 = vector.load %arg8[%c0_60, %c0_61, %c0_62] : memref<1x36x32xf32, #tpu.memory_space<vmem>>, vector<1x36x32xf32>
    %126 = vector.shape_cast %125 : vector<1x36x32xf32> to vector<36x32xf32>
    %127 = vector.shape_cast %124 : vector<36x32xf32> to vector<1x36x32xf32>
    tpu.vector_store %arg8[%c0_60, %c0_61, %c0_62], %127 {strides = array<i32>} : memref<1x36x32xf32, #tpu.memory_space<vmem>>, vector<1x36x32xf32>,
    return
  }
  func.func @transform_0(%arg0: i32) -> (i32, i32, i32) {
    %c0_i32 = arith.constant 0 : i32
    %c0_i32_0 = arith.constant 0 : i32
    %c0_i32_1 = arith.constant 0 : i32
    return %arg0, %c0_i32, %c0_i32_0 : i32, i32, i32
  }
  func.func @transform_1(%arg0: i32) -> (i32, i32, i32) {
    %c0_i32 = arith.constant 0 : i32
    %c0_i32_0 = arith.constant 0 : i32
    %c0_i32_1 = arith.constant 0 : i32
    return %arg0, %c0_i32, %c0_i32_0 : i32, i32, i32
  }
  func.func @transform_2(%arg0: i32) -> (i32, i32) {
    %c0_i32 = arith.constant 0 : i32
    %c0_i32_0 = arith.constant 0 : i32
    %c0_i32_1 = arith.constant 0 : i32
    return %c0_i32, %c0_i32_0 : i32, i32
  }
  func.func @transform_3(%arg0: i32) -> (i32, i32) {
    %c0_i32 = arith.constant 0 : i32
    %c0_i32_0 = arith.constant 0 : i32
    %c0_i32_1 = arith.constant 0 : i32
    return %c0_i32, %c0_i32_0 : i32, i32
  }
  func.func @transform_4(%arg0: i32) -> (i32, i32) {
    %c0_i32 = arith.constant 0 : i32
    %c0_i32_0 = arith.constant 0 : i32
    %c0_i32_1 = arith.constant 0 : i32
    return %c0_i32, %c0_i32_0 : i32, i32
  }
  func.func @transform_5(%arg0: i32) -> (i32, i32) {
    %c0_i32 = arith.constant 0 : i32
    %c0_i32_0 = arith.constant 0 : i32
    %c0_i32_1 = arith.constant 0 : i32
    return %c0_i32, %c0_i32_0 : i32, i32
  }
  func.func @transform_6(%arg0: i32) -> (i32, i32) {
    %c0_i32 = arith.constant 0 : i32
    %c0_i32_0 = arith.constant 0 : i32
    %c0_i32_1 = arith.constant 0 : i32
    return %c0_i32, %c0_i32_0 : i32, i32
  }
  func.func @transform_7(%arg0: i32) -> (i32, i32, i32) {
    %c0_i32 = arith.constant 0 : i32
    %c0_i32_0 = arith.constant 0 : i32
    %c0_i32_1 = arith.constant 0 : i32
    return %arg0, %c0_i32, %c0_i32_0 : i32, i32, i32
  }
}

</mosaic_0001>

<bundles_post_ra>
// kernel: localised_spectrum_encoder.1
= control target key start
LH: loop header
LB: loop body
LE: loop exit
PB: predicated region body
PF: predicated region fallthrough
CT: control target
= control target key end

     0   :  { %s19635_s24 = smov 0   ;;  %s25007_s0 = inlined_call_operand.vmem [shape: f32[2,36,32], index: 0, kind: input, shape index: {}]   ;;  %s25008_s1 = inlined_call_operand.vmem [shape: f32[2,17,384], index: 1, kind: input, shape index: {}]   ;;  %s25009_s2 = inlined_call_operand.vmem [shape: f32[278,32], index: 2, kind: input, shape index: {}]   ;;  %s25010_s3 = inlined_call_operand.vmem [shape: f32[288,36], index: 3, kind: input, shape index: {}]   ;;  %s25011_s4 = inlined_call_operand.vmem [shape: f32[180,384], index: 4, kind: input, shape index: {}]   ;;  %s25012_s5 = inlined_call_operand.vmem [shape: f32[33,96], index: 5, kind: input, shape index: {}]   ;;  %s25013_s6 = inlined_call_operand.vmem [shape: f32[33,64], index: 6, kind: input, shape index: {}]   ;;  %s25014_s7 = inlined_call_operand.vmem [shape: f32[2,36,32], index: 7, kind: output, shape index: {}]  }
   0x1 LB: > { %s15044_s25 = sadd.s32 4294967295, %s19588_s24   ;;  %p15048_p0 = scmp.ge.s32.totalorder %s19588_s24, 1  ;;  %s19588_s24 = sphi %s19635_s24, %s17_s24  }
   0x2   : > { %p247_p1 = scmp.lt.s32.totalorder %s19588_s24, 3 }
   0x4   : > { %p248_p2 = pnand %p15048_p0, %p247_p1 }
   0x6   : > { %251 = sbr.rel (%p248_p2) target bundleno = 5377 (0x1501), region = 48 }
   0xd   : > { %v438_v0 = vld [vmem:[%s25012_s5] sm:$0xff]  ;;  %v439_v1 = vld [vmem:[%s25012_s5 + $0x8] sm:$0xff]  ;;  %v440_v2 = vld [vmem:[%s25012_s5 + $0x10] sm:$0xff]  ;;  %v25015_v3 = vmov 0.0|0.0   ;;  %vm19591_vm0 = vmmov 0   ;;  %v25021_v8 = vmov 0.0  }
   0xe   : > { %18084 = vmatprep.subr.bf16.mxu0 %v25015_v3  ;;  %v481_v4 = vand.u32 4294901760, %v438_v0  ;;  %v484_v5 = vand.u32 4294901760, %v439_v1  ;;  %v441_v6 = vld [vmem:[%s25012_s5 + $0x18] sm:$0xff]  ;;  %v487_v7 = vand.u32 4294901760, %v440_v2  ;;  %16193 = vmatprep.mubr.msk.f32.mxu0 %vm19591_vm0, %v25021_v8  ;;  %p284_p3 = scmp.lt.s32.totalorder %s15044_s25, 1  ;;  %vm464_vm1 = vcmask 261120  }
   0xf   : > { %v490_v9 = vand.u32 4294901760, %v441_v6  ;;  %vm1137_vm2 = vcmask 293888   ;;  %s19593_s21 = smov 96   ;;  %vm1192_vm3 = vcmask 1043456   ;;  %vm2619_vm4 = vcmask 130048   ;;  %s19594_s12 = smov 64  }
  0x10   : > { %v19658_v10 = vpack.c.bf16 %v484_v5, %v481_v4  ;;  %v19660_v11 = vsub.f32 %v438_v0, %v481_v4  ;;  %v19662_v12 = vsub.f32 %v439_v1, %v484_v5  ;;  %v19664_v13 = vsub.f32 %v440_v2, %v487_v7  ;;  %s26137_s25 = smov (!%p284_p3, %s15044_s25), 1 }
  0x11   : > { %v19668_v14 = vsub.f32 %v441_v6, %v490_v9  ;;  %v19671_v15 = vpack.c.bf16 %v490_v9, %v487_v7  ;;  %s19398_s11 = smul.u32 40, %s26137_s25  ;;  %v333_v6 = vld [vmem:[%s25010_s3] sm:$0xff]  ;;  %v335_v7 = vld [vmem:[%s25010_s3 + $0x10] sm:$0xff]  ;;  %vm13398_vm5 = vcmask 257024   ;;  %vm14157_vm6 = vcmask 523264  }
  0x12   : > { %18086 = vmatpush3.bf16.msra.mxu0 %v19658_v10  ;;  %v602_v16 = vand.u32 4294901760, %v19660_v11  ;;  %v609_v17 = vand.u32 4294901760, %v19662_v12  ;;  %v616_v18 = vand.u32 4294901760, %v19664_v13  ;;  %v18097_v4 = vpack.c.bf16 %v19662_v12, %v19660_v11  ;;  %16336 = vmatprep.mubr.msk.f32.mxu1 %vm1137_vm2, %v335_v7  ;;  %v15052_v9 = vld [vmem:[%s25012_s5 + $0x20] ss:$0 sm:$0xff]  ;;  %s19399_s18 = smul.u32 72, %s26137_s25 }
  0x13   : > { %18087 = vmatprep.subr.bf16.mxu0 %v25015_v3  ;;  %v623_v19 = vand.u32 4294901760, %v19668_v14  ;;  %s19684_s14 = scalar_lea.vmem %s25007_s0, %s19398_s11  ;;  %v18100_v5 = vpack.c.bf16 %v19668_v14, %v19664_v13 }
  0x14   : > { %v19686_v20 = vpack.c.bf16 %v609_v17, %v602_v16  ;;  %v448_v21 = vld [vmem:[%s19684_s14] sm:$0xff]  ;;  %v449_v22 = vld [vmem:[%s19684_s14 + $0x8] sm:$0xff]  ;;  %v450_v23 = vld [vmem:[%s19684_s14 + $0x10] sm:$0xff]  ;;  %v603_v27 = vsub.f32 %v19660_v11, %v602_v16  ;;  %v610_v28 = vsub.f32 %v19662_v12, %v609_v17  ;;  %v617_v35 = vsub.f32 %v19664_v13, %v616_v18 }
  0x15   : > { %v19691_v24 = vpack.c.bf16 %v623_v19, %v616_v18  ;;  %v466_v25 = vsel %vm464_vm1, %v448_v21, 0  ;;  %v469_v26 = vsel %vm464_vm1, %v449_v22, 0  ;;  %v451_v31 = vld [vmem:[%s19684_s14 + $0x18] sm:$0xff]  ;;  %v472_v32 = vsel %vm464_vm1, %v450_v23, 0  ;;  %v452_v34 = vld [vmem:[%s19684_s14 + $0x20] sm:$0xf] }
  0x16   : > { %18089 = vmatpush3.bf16.msra.mxu0 %v19671_v15  ;;  %v19698_v29 = vand.u32 4294901760, %v466_v25  ;;  %v19700_v30 = vand.u32 4294901760, %v469_v26  ;;  %v475_v33 = vsel %vm464_vm1, %v451_v31, 0  ;;  %v19714_v38 = vand.u32 4294901760, %v472_v32  ;;  %v314_v21 = vld [vmem:[%s25009_s2 + $0x78] sm:$0xff] }
  0x17   : > { %18090 = vmatprep.subr.bf16.mxu0 %v25015_v3  ;;  %v624_v39 = vsub.f32 %v19668_v14, %v623_v19  ;;  %v604_v40 = vand.u32 4294901760, %v603_v27  ;;  %v611_v41 = vand.u32 4294901760, %v610_v28  ;;  %v19717_v42 = vand.u32 4294901760, %v475_v33 }
  0x18   : > { %v19709_v36 = vsub.f32 %v466_v25, %v19698_v29  ;;  %v19712_v37 = vsub.f32 %v469_v26, %v19700_v30  ;;  %v478_v43 = vsel %vm464_vm1, %v452_v34, 0  ;;  %v19723_v46 = vsub.f32 %v472_v32, %v19714_v38  ;;  %v336_v34 = vld [vmem:[%s25010_s3 + $0x18] sm:$0xff] }
  0x19   : > { %v19725_v47 = vand.u32 4294901760, %v478_v43  ;;  %v19735_v51 = vsub.f32 %v475_v33, %v19717_v42  ;;  %v18091_v52 = vpack.c.bf16 %v611_v41, %v604_v40  ;;  %v618_v53 = vand.u32 4294901760, %v617_v35  ;;  %v334_v33 = vld [vmem:[%s25010_s3 + $0x8] sm:$0xff]  ;;  %v341_v40 = vld [vmem:[%s25010_s3 + $0x40] sm:$0xff] }
  0x1a   : > { %v551_v44 = vand.u32 4294901760, %v19709_v36  ;;  %v561_v45 = vand.u32 4294901760, %v19712_v37  ;;  %v571_v50 = vand.u32 4294901760, %v19723_v46  ;;  %v625_v54 = vand.u32 4294901760, %v624_v39  ;;  %v340_v39 = vld [vmem:[%s25010_s3 + $0x38] sm:$0xff]  ;;  %v342_v41 = vld [vmem:[%s25010_s3 + $0x48] sm:$0xff] }
  0x1b   : > { %v581_v58 = vand.u32 4294901760, %v19735_v51  ;;  %v19742_v59 = vsub.f32 %v478_v43, %v19725_v47  ;;  %v19887_v26 = vsel %vm464_vm1, %v314_v21, 0  ;;  %v344_v43 = vld [vmem:[%s25010_s3 + $0x58] sm:$0xff] }
  0x1c   : > { %v552_v48 = vsub.f32 %v19709_v36, %v551_v44  ;;  %v562_v49 = vsub.f32 %v19712_v37, %v561_v45  ;;  %v572_v57 = vsub.f32 %v19723_v46, %v571_v50  ;;  %v18094_v60 = vpack.c.bf16 %v625_v54, %v618_v53 }
  0x1d   : > { %v582_v62 = vsub.f32 %v19735_v51, %v581_v58  ;;  %v591_v63 = vand.u32 4294901760, %v19742_v59 }
  0x1e   : > { %v553_v55 = vand.u32 4294901760, %v552_v48  ;;  %v563_v56 = vand.u32 4294901760, %v562_v49  ;;  %v573_v61 = vand.u32 4294901760, %v572_v57  ;;  %v349_v48 = vld [vmem:[%s25010_s3 + $0x80] sm:$0xff]  ;;  %v350_v49 = vld [vmem:[%s25010_s3 + $0x88] sm:$0xff] }
  0x1f   : > { %v583_v0 = vand.u32 4294901760, %v582_v62  ;;  %v592_v1 = vsub.f32 %v19742_v59, %v591_v63 }
  0x20   : > { %16194 = vmatmul.mubr.f32.vlgmr.msra.gmra.mrb[0].mxu0 %v553_v55 }
  0x21   : > { %16196 = vmatprep.mubr.msk.f32.mxu0 %vm19591_vm0, %v25021_v8  ;;  %18092 = vmatpush3.bf16.msra.mxu0 %v18091_v52  ;;  %v593_v2 = vand.u32 4294901760, %v592_v1 }
  0x22   : > { %18093 = vmatprep.subr.bf16.mxu0 %v25015_v3 }
  0x24   : > { %16197 = vmatmul.mubr.f32.gmra.mrb[2].mxu0 %v563_v56 }
  0x25   : > { %16199 = vmatprep.mubr.msk.f32.mxu0 %vm19591_vm0, %v25021_v8  ;;  %18095 = vmatpush3.bf16.msra.mxu0 %v18094_v60 }
  0x26   : > { %18096 = vmatprep.subr.bf16.mxu0 %v25015_v3 }
  0x28   : > { %16200 = vmatmul.mubr.f32.gmra.mrb[4].mxu0 %v573_v61 }
  0x29   : > { %16202 = vmatprep.mubr.msk.f32.mxu0 %vm19591_vm0, %v25021_v8 }
  0x2c   : > { %16203 = vmatmul.mubr.f32.gmra.mrb[6].mxu0 %v583_v0 }
  0x2d   : > { %16205 = vmatprep.mubr.msk.f32.mxu0 %vm19591_vm0, %v25021_v8 }
  0x30   : > { %16206 = vmatmul.mubr.f32.gmra.mrb[8].mxu0 %v593_v2 }
  0x31   : > { %16216 = vmatprep.mubr.msk.f32.mxu0 %vm19591_vm0, %v25021_v8 }
  0x34   : > { %16217 = vmatmul.mubr.f32.vlgmr.msra.gmra.mrb[0].mxu0 %v19698_v29 }
  0x35   : > { %16219 = vmatprep.mubr.msk.f32.mxu0 %vm19591_vm0, %v25021_v8  ;;  %18098 = vmatpush3.bf16.msra.mxu0 %v18097_v4 }
  0x36   : > { %18099 = vmatprep.subr.bf16.mxu0 %v25015_v3 }
  0x38   : > { %16220 = vmatmul.mubr.f32.gmra.mrb[2].mxu0 %v19700_v30 }
  0x39   : > { %16222 = vmatprep.mubr.msk.f32.mxu0 %vm19591_vm0, %v25021_v8  ;;  %18101 = vmatpush3.bf16.msra.mxu0 %v18100_v5 }
  0x3a   : > { %18102 = vmatprep.subr.bf16.mxu0 %v25015_v3 }
  0x3c   : > { %16223 = vmatmul.mubr.f32.gmra.mrb[4].mxu0 %v19714_v38 }
  0x3d   : > { %16225 = vmatprep.mubr.msk.f32.mxu0 %vm19591_vm0, %v25021_v8 }
  0x40   : > { %16226 = vmatmul.mubr.f32.gmra.mrb[6].mxu0 %v19717_v42 }
  0x41   : > { %16228 = vmatprep.mubr.msk.f32.mxu0 %vm19591_vm0, %v25021_v8 }
  0x44   : > { %16229 = vmatmul.mubr.f32.gmra.mrb[8].mxu0 %v19725_v47 }
  0x45   : > { %16239 = vmatprep.mubr.msk.f32.mxu0 %vm19591_vm0, %v25021_v8 }
  0x48   : > { %16240 = vmatmul.mubr.f32.vlgmr.msra.gmra.mrb[0].mxu0 %v19709_v36  ;;  %v337_v36 = vld [vmem:[%s25010_s3 + $0x20] sm:$0xff] }
  0x49   : > { %16242 = vmatprep.mubr.msk.f32.mxu0 %vm19591_vm0, %v25021_v8  ;;  %18104 = vmatpush3.bf16.msra.mxu0 %v19658_v10 }
  0x4a   : > { %18105 = vmatprep.subr.bf16.mxu0 %v25015_v3 }
  0x4c   : > { %16243 = vmatmul.mubr.f32.gmra.mrb[2].mxu0 %v19712_v37  ;;  %v338_v37 = vld [vmem:[%s25010_s3 + $0x28] sm:$0xff] }
  0x4d   : > { %16245 = vmatprep.mubr.msk.f32.mxu0 %vm19591_vm0, %v25021_v8  ;;  %18107 = vmatpush3.bf16.msra.mxu0 %v19671_v15 }
  0x4e   : > { %18108 = vmatprep.subr.bf16.mxu0 %v25015_v3 }
  0x50   : > { %16246 = vmatmul.mubr.f32.gmra.mrb[4].mxu0 %v19723_v46  ;;  %v347_v46 = vld [vmem:[%s25010_s3 + $0x70] sm:$0xff] }
  0x51   : > { %16248 = vmatprep.mubr.msk.f32.mxu0 %vm19591_vm0, %v25021_v8 }
  0x54   : > { %16249 = vmatmul.mubr.f32.gmra.mrb[6].mxu0 %v19735_v51 }
  0x55   : > { %16251 = vmatprep.mubr.msk.f32.mxu0 %vm19591_vm0, %v25021_v8 }
  0x58   : > { %16252 = vmatmul.mubr.f32.gmra.mrb[8].mxu0 %v19742_v59 }
  0x59   : > { %16262 = vmatprep.mubr.msk.f32.mxu0 %vm19591_vm0, %v25021_v8 }
  0x5c   : > { %16263 = vmatmul.mubr.f32.vlgmr.msra.gmra.mrb[0].mxu0 %v551_v44  ;;  %v345_v44 = vld [vmem:[%s25010_s3 + $0x60] sm:$0xff] }
  0x5d   : > { %16265 = vmatprep.mubr.msk.f32.mxu0 %vm19591_vm0, %v25021_v8  ;;  %18110 = vmatpush3.bf16.msra.mxu0 %v19686_v20  ;;  %v313_v20 = vld [vmem:[%s25009_s2 + $0x70] sm:$0xff] }
  0x5e   : > { %18111 = vmatprep.subr.bf16.mxu0 %v25015_v3  ;;  %v19884_v25 = vsel %vm464_vm1, %v313_v20, 0 }
  0x60   : > { %16266 = vmatmul.mubr.f32.gmra.mrb[2].mxu0 %v561_v45  ;;  %v346_v45 = vld [vmem:[%s25010_s3 + $0x68] sm:$0xff] }
  0x61   : > { %16268 = vmatprep.mubr.msk.f32.mxu0 %vm19591_vm0, %v25021_v8  ;;  %18113 = vmatpush3.bf16.msra.mxu0 %v19691_v24 }
  0x62   : > { %18114 = vmatprep.subr.bf16.mxu0 %v25015_v3 }
  0x64   : > { %16269 = vmatmul.mubr.f32.gmra.mrb[4].mxu0 %v571_v50 }
  0x65   : > { %16271 = vmatprep.mubr.msk.f32.mxu0 %vm19591_vm0, %v25021_v8 }
  0x68   : > { %16272 = vmatmul.mubr.f32.gmra.mrb[6].mxu0 %v581_v58 }
  0x69   : > { %16274 = vmatprep.mubr.msk.f32.mxu0 %vm19591_vm0, %v25021_v8 }
  0x6c   : > { %16275 = vmatmul.mubr.f32.gmra.mrb[8].mxu0 %v591_v63 }
  0x6d   : > { %16285 = vmatprep.mubr.msk.f32.mxu0 %vm19591_vm0, %v25021_v8 }
  0x70   : > { %16286 = vmatmul.mubr.f32.vlgmr.msra.gmra.mrb[0].mxu0 %v19698_v29 }
  0x71   : > { %16288 = vmatprep.mubr.msk.f32.mxu0 %vm19591_vm0, %v25021_v8  ;;  %18116 = vmatpush3.bf16.msra.mxu0 %v19658_v10 }
  0x72   : > { %18117 = vmatprep.subr.bf16.mxu0 %v25015_v3 }
  0x74   : > { %16289 = vmatmul.mubr.f32.gmra.mrb[2].mxu0 %v19700_v30 }
  0x75   : > { %16291 = vmatprep.mubr.msk.f32.mxu0 %vm19591_vm0, %v25021_v8  ;;  %18119 = vmatpush3.bf16.msra.mxu0 %v19671_v15 }
  0x78   : > { %16292 = vmatmul.mubr.f32.gmra.mrb[4].mxu0 %v19714_v38 }
  0x79   : > { %16294 = vmatprep.mubr.msk.f32.mxu0 %vm19591_vm0, %v25021_v8 }
  0x7c   : > { %16295 = vmatmul.mubr.f32.gmra.mrb[6].mxu0 %v19717_v42 }
  0x7d   : > { %16297 = vmatprep.mubr.msk.f32.mxu0 %vm19591_vm0, %v25021_v8 }
  0x80   : > { %16298 = vmatmul.mubr.f32.gmra.mrb[8].mxu0 %v19725_v47 }
  0x81   : > { %16308 = vmatprep.mubr.msk.f32.mxu0 %vm19591_vm0, %v25021_v8 }
  0x84   : > { %16309 = vmatmul.mubr.f32.vlgmr.msra.gmra.mrb[0].mxu0 %v19698_v29  ;;  %v1430_v29 = vand.u32 4294901760, %v19884_v25 }
  0x85   : > { %16311 = vmatprep.mubr.msk.f32.mxu0 %vm19591_vm0, %v25021_v8 }
  0x86   : > { %v20006_v5 = vsub.f32 %v19884_v25, %v1430_v29 }
  0x88   : > { %16312 = vmatmul.mubr.f32.gmra.mrb[2].mxu0 %v19700_v30  ;;  %v1433_v30 = vand.u32 4294901760, %v19887_v26 }
  0x89   : > { %16314 = vmatprep.mubr.msk.f32.mxu0 %vm19591_vm0, %v25021_v8 }
  0x8a   : > { %v19913_v35 = vpack.c.bf16 %v1433_v30, %v1430_v29 }
  0x8c   : > { %16315 = vmatmul.mubr.f32.gmra.mrb[4].mxu0 %v19714_v38  ;;  %v339_v38 = vld [vmem:[%s25010_s3 + $0x30] sm:$0xff] }
  0x8d   : > { %16317 = vmatprep.mubr.msk.f32.mxu0 %vm19591_vm0, %v25021_v8 }
  0x90   : > { %16318 = vmatmul.mubr.f32.gmra.mrb[6].mxu0 %v19717_v42  ;;  %v343_v42 = vld [vmem:[%s25010_s3 + $0x50] sm:$0xff] }
  0x91   : > { %16320 = vmatprep.mubr.msk.f32.mxu0 %vm19591_vm0, %v25021_v8 }
  0x94   : > { %16321 = vmatmul.mubr.f32.gmra.mrb[8].mxu0 %v19725_v47  ;;  %v348_v47 = vld [vmem:[%s25010_s3 + $0x78] sm:$0xff] }
  0x95   : > { %16333 = vmatprep.mubr.msk.f32.mxu0 %vm1137_vm2, %v333_v6  ;;  %v20011_v6 = vsub.f32 %v19887_v26, %v1433_v30 }
 0x157   : > { %v1109_v10 = vpop.f32.mrb[0].mxu0 }
 0x158   : > { %v16310_v11 = vpop.f32.mrb[1].mxu0  ;;  %v19861_v12 = vadd.f32 %v15052_v9, %v1109_v10 }
 0x15a   : > { %25417 = vst [vmem:[#allocation2_spill] sm:$0xff] %v19861_v12  ;;  %5556 = vrot.lane.b32.xlu0 %v19861_v12, %s19593_s21 }
 0x15b   : > { %v1115_v13 = vpop.f32.mrb[2].mxu0 }
 0x15c   : > { %v16313_v14 = vpop.f32.mrb[3].mxu0  ;;  %v19865_v15 = vadd.f32 %v15052_v9, %v1115_v13  ;;  %v25024_v13 = vand.u32 4294901760, %v20006_v5 }
 0x15d   : > { %v25023_v14 = vand.u32 4294901760, %v20011_v6 }
 0x15e   : > { %25418 = vst [vmem:[#allocation3_spill] sm:$0xff] %v19865_v15  ;;  %5558 = vrot.lane.b32.xlu0 %v19865_v15, %s19593_s21  ;;  %v18120_v16 = vpack.c.bf16 %v19865_v15, %v19861_v12  ;;  %v1680_v21 = vsub.f32 %v20006_v5, %v25024_v13 }
 0x15f   : > { %v1121_v17 = vpop.f32.mrb[4].mxu0 }
 0x160   : > { %v16316_v18 = vpop.f32.mrb[5].mxu0  ;;  %18121 = vmatprep.subr.bf16.mxu0 %v18120_v16  ;;  %18544 = vmatprep.subr.bf16.mxu1 %v18120_v16  ;;  %v19871_v19 = vadd.f32 %v15052_v9, %v1121_v17  ;;  %v1681_v26 = vand.u32 4294901760, %v1680_v21  ;;  %v322_v21 = vld [vmem:[%s25009_s2 + $0xb8] sm:$0xff] }
 0x161   : > { %18123 = vmatpush3.bf16.msra.mxu0 %v18120_v16  ;;  %18547 = vmatpush3.bf16.msra.mxu1 %v18120_v16 }
 0x162   : > { %25419 = vst [vmem:[#allocation4_spill] sm:$0xff] %v19871_v19  ;;  %5560 = vrot.lane.b32.xlu1 %v19871_v19, %s19593_s21 }
 0x163   : > { %v1127_v22 = vpop.f32.mrb[6].mxu0 }
 0x164   : > { %v16319_v23 = vpop.f32.mrb[7].mxu0  ;;  %v19881_v24 = vadd.f32 %v15052_v9, %v1127_v22  ;;  %v1687_v22 = vsub.f32 %v20011_v6, %v25023_v14 }
 0x166   : > { %25420 = vst [vmem:[#allocation5_spill] sm:$0xff] %v19881_v24  ;;  %5562 = vrot.lane.b32.xlu1 %v19881_v24, %s19593_s21  ;;  %v18124_v27 = vpack.c.bf16 %v19881_v24, %v19871_v19 }
 0x167   : > { %v1133_v28 = vpop.f32.mrb[8].mxu0 }
 0x168   : > { %v19895_v31 = vadd.f32 %v15052_v9, %v1133_v28  ;;  %v16322_v32 = vpop.f32.mrb[9].mxu0  ;;  %18125 = vmatprep.subr.bf16.mxu0 %v18124_v27  ;;  %18545 = vmatprep.subr.bf16.mxu1 %v18124_v27  ;;  %v1688_v28 = vand.u32 4294901760, %v1687_v22 }
 0x169   : > { %18127 = vmatpush3.bf16.msra.mxu0 %v18124_v27  ;;  %18548 = vmatpush3.bf16.msra.mxu1 %v18124_v27 }
 0x16a   : > { %25421 = vst [vmem:[#allocation6_spill] sm:$0xff] %v19895_v31  ;;  %5564 = vrot.lane.b32.xlu0 %v19895_v31, %s19593_s21  ;;  %16331 = vmatprep.subr.msk.mxu0 %vm1192_vm3, %v19895_v31  ;;  %v20036_v32 = vpack.c.bf16 %v1688_v28, %v1681_v26  ;;  %v321_v28 = vld [vmem:[%s25009_s2 + $0xb0] sm:$0xff]  ;;  %s20414_s21 = scalar_lea.vmem %s25008_s1, %s19399_s18  ;;  %s298_s18 = scalar_lea.vmem %s25014_s7, %s19398_s11 }
 0x16b   : > { %18546 = vmatprep.subr.msk.mxu1 %vm1192_vm3, %v19895_v31 }
 0x16d   : > { %16332 = vmatpush3.msk.msra.mxu0 %vm1192_vm3, %v19895_v31  ;;  %18549 = vmatpush3.msk.msra.mxu1 %vm1192_vm3, %v19895_v31 }
 0x16e   : > { %16334 = vmatmul.mubr.msk.f32.vlgmr.msra.gmra.mrb[10].mxu0 %vm1137_vm2, %v334_v33  ;;  %16337 = vmatmul.mubr.msk.f32.vlgmr.msra.gmra.mrb[0].mxu1 %vm1137_vm2, %v336_v34 }
 0x16f   : > { %16339 = vmatprep.mubr.msk.f32.mxu1 %vm1137_vm2, %v337_v36  ;;  %18129 = vmatprep.subr.bf16.mxu1 %v19913_v35 }
 0x170   : > { %2742 = vmatprep.mubr.f32.mxu0 %v25021_v8  ;;  %v328_v8 = vld [vmem:[%s25009_s2 + $0xe8] sm:$0xff] }
 0x172   : > { %16340 = vmatmul.mubr.msk.f32.gmra.mrb[2].mxu1 %vm1137_vm2, %v338_v37  ;;  %v20043_v37 = vpack.c.bf16 %v20011_v6, %v20006_v5 }
 0x173   : > { %16342 = vmatprep.mubr.msk.f32.mxu1 %vm1137_vm2, %v339_v38  ;;  %v316_v38 = vld [vmem:[%s25009_s2 + $0x88] sm:$0xff] }
 0x174   : > { %18131 = vmatpush3.bf16.xpose.msra.mxu1 %v19913_v35 }
 0x175   : > { %18133 = vmatprep.subr.bf16.mxu1 %v20036_v32 }
 0x176   : > { %16343 = vmatmul.mubr.msk.f32.gmra.mrb[4].mxu1 %vm1137_vm2, %v340_v39  ;;  %v318_v39 = vld [vmem:[%s25009_s2 + $0x98] sm:$0xff] }
 0x177   : > { %16345 = vmatprep.mubr.msk.f32.mxu1 %vm1137_vm2, %v341_v40  ;;  %v315_v40 = vld [vmem:[%s25009_s2 + $0x80] sm:$0xff] }
 0x17a   : > { %16346 = vmatmul.mubr.msk.f32.gmra.mrb[6].mxu1 %vm1137_vm2, %v342_v41  ;;  %v317_v41 = vld [vmem:[%s25009_s2 + $0x90] sm:$0xff] }
 0x17b   : > { %16348 = vmatprep.mubr.msk.f32.mxu1 %vm1137_vm2, %v343_v42 }
 0x17e   : > { %16349 = vmatmul.mubr.msk.f32.gmra.mrb[8].mxu1 %vm1137_vm2, %v344_v43 }
 0x17f   : > { %16351 = vmatprep.mubr.msk.f32.mxu1 %vm1137_vm2, %v345_v44 }
 0x182   : > { %16352 = vmatmul.mubr.msk.f32.gmra.mrb[10].mxu1 %vm1137_vm2, %v346_v45 }
 0x183   : > { %16354 = vmatprep.mubr.msk.f32.mxu1 %vm1137_vm2, %v347_v46 }
 0x186   : > { %16355 = vmatmul.mubr.msk.f32.gmra.mrb[12].mxu1 %vm1137_vm2, %v348_v47 }
 0x187   : > { %16357 = vmatprep.mubr.msk.f32.mxu1 %vm1137_vm2, %v349_v48 }
 0x18a   : > { %16358 = vmatmul.mubr.msk.f32.gmra.mrb[14].mxu1 %vm1137_vm2, %v350_v49 }
 0x1cc   : > { %v5557_v50 = vpop.permute.xlu0 %5556 }
 0x1cd   : > { %v19981_v51 = vsel %vm464_vm1, %v5557_v50, 0  ;;  %v320_v50 = vld [vmem:[%s25009_s2 + $0xa8] sm:$0xff] }
 0x1ce   : > { %25422 = vst [vmem:[#allocation7_spill] sm:$0xff] %v19981_v51  ;;  %v25020_v52 = vand.u32 4294901760, %v19981_v51 }
 0x1d0   : > { %v5828_v53 = vsub.f32 %v19981_v51, %v25020_v52  ;;  %v5559_v54 = vpop.permute.xlu0 %5558 }
 0x1d1   : > { %v19988_v55 = vsel %vm464_vm1, %v5559_v54, 0 }
 0x1d2   : > { %25423 = vst [vmem:[#allocation8_spill] sm:$0xff] %v19988_v55  ;;  %v5829_v56 = vand.u32 4294901760, %v5828_v53  ;;  %v25019_v57 = vand.u32 4294901760, %v19988_v55 }
 0x1d4   : > { %v5830_v58 = vsub.f32 %v5828_v53, %v5829_v56  ;;  %v5835_v59 = vsub.f32 %v19988_v55, %v25019_v57  ;;  %v5561_v60 = vpop.permute.xlu1 %5560 }
 0x1d5   : > { %v19995_v61 = vsel %vm464_vm1, %v5561_v60, 0 }
 0x1d6   : > { %25424 = vst [vmem:[#allocation9_spill] sm:$0xff] %v19995_v61  ;;  %v5836_v62 = vand.u32 4294901760, %v5835_v59  ;;  %v25018_v63 = vand.u32 4294901760, %v19995_v61  ;;  %v19998_v0 = vpack.c.bf16 %v5835_v59, %v5828_v53  ;;  %v5831_v16 = vand.u32 4294901760, %v5830_v58 }
 0x1d8   : > { %25425 = vst [vmem:[#allocation10_spill] sm:$0xff] %v19998_v0  ;;  %v5837_v1 = vsub.f32 %v5835_v59, %v5836_v62  ;;  %v5842_v2 = vsub.f32 %v19995_v61, %v25018_v63  ;;  %v5563_v4 = vpop.permute.xlu1 %5562  ;;  %v20016_v9 = vpack.c.bf16 %v5836_v62, %v5829_v56  ;;  %v319_v56 = vld [vmem:[%s25009_s2 + $0xa0] sm:$0xff] }
 0x1d9   : > { %v20014_v7 = vsel %vm464_vm1, %v5563_v4, 0 }
 0x1da   : > { %25426 = vst [vmem:[#allocation11_spill] sm:$0xff] %v20014_v7  ;;  %25427 = vst [vmem:[#allocation12_spill] sm:$0xff] %v20016_v9  ;;  %v5843_v10 = vand.u32 4294901760, %v5842_v2  ;;  %v25017_v11 = vand.u32 4294901760, %v20014_v7  ;;  %v5838_v17 = vand.u32 4294901760, %v5837_v1 }
 0x1dc   : > { %v5844_v18 = vsub.f32 %v5842_v2, %v5843_v10  ;;  %v5849_v20 = vsub.f32 %v20014_v7, %v25017_v11  ;;  %v20030_v23 = vpack.c.bf16 %v5838_v17, %v5831_v16 }
 0x1de   : > { %25428 = vst [vmem:[#allocation13_spill] sm:$0xff] %v20030_v23  ;;  %v5850_v25 = vand.u32 4294901760, %v5849_v20  ;;  %v20032_v27 = vpack.c.bf16 %v5849_v20, %v5842_v2  ;;  %v5845_v33 = vand.u32 4294901760, %v5844_v18 }
 0x1e0   : > { %25429 = vst [vmem:[#allocation14_spill] sm:$0xff] %v20032_v27  ;;  %v5851_v29 = vsub.f32 %v5849_v20, %v5850_v25  ;;  %v20034_v30 = vpack.c.bf16 %v5850_v25, %v5843_v10 }
 0x1e2   : > { %25430 = vst [vmem:[#allocation15_spill] sm:$0xff] %v20034_v30  ;;  %v5852_v34 = vand.u32 4294901760, %v5851_v29 }
 0x1e4   : > { %v20039_v36 = vpack.c.bf16 %v5852_v34, %v5845_v33 }
 0x1e6   : > { %25431 = vst [vmem:[#allocation16_spill] sm:$0xff] %v20039_v36 }
 0x241   : > { %v16335_v42 = vpop.f32.mrb[10].mxu0  ;;  %v16338_v43 = vpop.f32.mrb[0].mxu1 }
 0x242   : > { %v1352_v44 = vmul.f32 %v16335_v42, %v316_v38  ;;  %v1262_v45 = vpop.f32.mrb[11].mxu0  ;;  %v1354_v46 = vmul.f32 %v16338_v43, %v318_v39  ;;  %v1272_v47 = vpop.f32.mrb[1].mxu1 }
 0x243   : > { %v1351_v48 = vmul.f32 %v1262_v45, %v315_v40  ;;  %v1353_v49 = vmul.f32 %v1272_v47, %v317_v41  ;;  %v324_v47 = vld [vmem:[%s25009_s2 + $0xc8] sm:$0xff] }
 0x244   : > { %v1373_v53 = vsel %vm464_vm1, %v1352_v44, 0  ;;  %v1379_v54 = vsel %vm464_vm1, %v1354_v46, 0 }
 0x245   : > { %v20065_v58 = vand.u32 4294901760, %v1373_v53  ;;  %v1370_v59 = vsel %vm464_vm1, %v1351_v48, 0  ;;  %v20068_v60 = vand.u32 4294901760, %v1379_v54  ;;  %v1376_v62 = vsel %vm464_vm1, %v1353_v49, 0  ;;  %v16341_v1 = vpop.f32.mrb[2].mxu1 }
 0x246   : > { %v20071_v2 = vand.u32 4294901760, %v1370_v59  ;;  %v20073_v4 = vand.u32 4294901760, %v1376_v62  ;;  %v1356_v10 = vmul.f32 %v16341_v1, %v320_v50  ;;  %v1282_v16 = vpop.f32.mrb[3].mxu1 }
 0x247   : > { %25432 = vst [vmem:[#allocation17_spill] sm:$0xff] %v20065_v58  ;;  %25433 = vst [vmem:[#allocation18_spill] sm:$0xff] %v20068_v60  ;;  %v20076_v17 = vsub.f32 %v1373_v53, %v20065_v58  ;;  %v20079_v18 = vsub.f32 %v1379_v54, %v20068_v60  ;;  %v1355_v20 = vmul.f32 %v1282_v16, %v319_v56  ;;  %v323_v54 = vld [vmem:[%s25009_s2 + $0xc0] sm:$0xff] }
 0x248   : > { %25434 = vst [vmem:[#allocation19_spill] sm:$0xff] %v20071_v2  ;;  %25435 = vst [vmem:[#allocation20_spill] sm:$0xff] %v20073_v4  ;;  %v20085_v22 = vsub.f32 %v1370_v59, %v20071_v2  ;;  %v20088_v25 = vsub.f32 %v1376_v62, %v20073_v4  ;;  %v1385_v26 = vsel %vm464_vm1, %v1356_v10, 0 }
 0x249   : > { %25436 = vst [vmem:[#allocation21_spill] sm:$0xff] %v20076_v17  ;;  %25437 = vst [vmem:[#allocation22_spill] sm:$0xff] %v20079_v18  ;;  %v20095_v29 = vand.u32 4294901760, %v20076_v17  ;;  %v20097_v33 = vand.u32 4294901760, %v1385_v26  ;;  %v1382_v34 = vsel %vm464_vm1, %v1355_v20, 0  ;;  %v16344_v38 = vpop.f32.mrb[4].mxu1 }
 0x24a   : > { %25438 = vst [vmem:[#allocation23_spill] sm:$0xff] %v20085_v22  ;;  %25439 = vst [vmem:[#allocation24_spill] sm:$0xff] %v20088_v25  ;;  %v20101_v39 = vand.u32 4294901760, %v20079_v18  ;;  %v20103_v40 = vand.u32 4294901760, %v1382_v34  ;;  %v1358_v41 = vmul.f32 %v16344_v38, %v322_v21  ;;  %v1292_v42 = vpop.f32.mrb[5].mxu1  ;;  %v20106_v43 = vand.u32 4294901760, %v20085_v22 }
 0x24b   : > { %25440 = vst [vmem:[#allocation25_spill] sm:$0xff] %v20095_v29  ;;  %25441 = vst [vmem:[#allocation26_spill] sm:$0xff] %v20097_v33  ;;  %v20109_v44 = vand.u32 4294901760, %v20088_v25  ;;  %v20112_v45 = vsub.f32 %v1385_v26, %v20097_v33  ;;  %v1357_v46 = vmul.f32 %v1292_v42, %v321_v28  ;;  %v1509_v48 = vsub.f32 %v20076_v17, %v20095_v29 }
 0x24c   : > { %25442 = vst [vmem:[#allocation27_spill] sm:$0xff] %v20101_v39  ;;  %25443 = vst [vmem:[#allocation28_spill] sm:$0xff] %v20103_v40  ;;  %v20120_v49 = vsub.f32 %v1382_v34, %v20103_v40  ;;  %v1391_v50 = vsel %vm464_vm1, %v1358_v41, 0  ;;  %v1499_v53 = vsub.f32 %v20085_v22, %v20106_v43  ;;  %v1529_v10 = vsub.f32 %v20079_v18, %v20101_v39  ;;  %v326_v41 = vld [vmem:[%s25009_s2 + $0xd8] sm:$0xff] }
 0x24d   : > { %25444 = vst [vmem:[#allocation29_spill] sm:$0xff] %v20106_v43  ;;  %25445 = vst [vmem:[#allocation30_spill] sm:$0xff] %v20109_v44  ;;  %v1519_v56 = vsub.f32 %v20088_v25, %v20109_v44  ;;  %v20130_v59 = vand.u32 4294901760, %v1391_v50  ;;  %v1388_v62 = vsel %vm464_vm1, %v1357_v46, 0  ;;  %v16347_v1 = vpop.f32.mrb[6].mxu1  ;;  %v20139_v26 = vand.u32 4294901760, %v1509_v48 }
 0x24e   : > { %25446 = vst [vmem:[#allocation31_spill] sm:$0xff] %v20112_v45  ;;  %25447 = vst [vmem:[#allocation32_spill] sm:$0xff] %v20120_v49  ;;  %v20135_v16 = vand.u32 4294901760, %v1388_v62  ;;  %v20137_v20 = vand.u32 4294901760, %v1499_v53  ;;  %v1360_v21 = vmul.f32 %v16347_v1, %v324_v47  ;;  %v1302_v28 = vpop.f32.mrb[7].mxu1  ;;  %v20148_v42 = vand.u32 4294901760, %v20120_v49 }
 0x24f   : > { %25448 = vst [vmem:[#allocation33_spill] sm:$0xff] %v20130_v59  ;;  %25451 = vst [vmem:[#allocation36_spill] sm:$0xff] %v20139_v26  ;;  %v20142_v34 = vsub.f32 %v1391_v50, %v20130_v59  ;;  %v1359_v38 = vmul.f32 %v1302_v28, %v323_v54  ;;  %v20151_v46 = vand.u32 4294901760, %v20112_v45  ;;  %v20158_v48 = vand.u32 4294901760, %v1519_v56  ;;  %v325_v50 = vld [vmem:[%s25009_s2 + $0xd0] sm:$0xff] }
 0x250   : > { %25449 = vst [vmem:[#allocation34_spill] sm:$0xff] %v20135_v16  ;;  %25450 = vst [vmem:[#allocation35_spill] sm:$0xff] %v20137_v20  ;;  %v20154_v53 = vsub.f32 %v1388_v62, %v20135_v16  ;;  %16364 = vmatprep.mubr.f32.mxu1 %v20137_v20  ;;  %v1397_v47 = vsel %vm464_vm1, %v1360_v21, 0  ;;  %v1539_v62 = vsub.f32 %v20120_v49, %v20148_v42  ;;  %v20181_v57 = vand.u32 4294901760, %v1529_v10  ;;  %v327_v10 = vld [vmem:[%s25009_s2 + $0xe0] sm:$0xff] }
 0x251   : > { %25452 = vst [vmem:[#allocation37_spill] sm:$0xff] %v20142_v34  ;;  %25453 = vst [vmem:[#allocation38_spill] sm:$0xff] %v20148_v42  ;;  %v20163_v54 = vand.u32 4294901760, %v1397_v47  ;;  %16365 = vmatmul.mubr.f32.vlgmr.msra.gmra.mrb[16].mxu1 %v20139_v26  ;;  %v1394_v1 = vsel %vm464_vm1, %v1359_v38, 0  ;;  %v16350_v28 = vpop.f32.mrb[8].mxu1  ;;  %v1549_v11 = vsub.f32 %v20112_v45, %v20151_v46  ;;  %v331_v26 = vld [vmem:[%s25009_s2 + $0x100] sm:$0xff] }
 0x252   : > { %25454 = vst [vmem:[#allocation39_spill] sm:$0xff] %v20151_v46  ;;  %25455 = vst [vmem:[#allocation40_spill] sm:$0xff] %v20154_v53  ;;  %v20169_v3 = vand.u32 4294901760, %v1394_v1  ;;  %16367 = vmatprep.mubr.f32.mxu1 %v20158_v48  ;;  %v1362_v56 = vmul.f32 %v16350_v28, %v326_v41  ;;  %v1312_v21 = vpop.f32.mrb[9].mxu1  ;;  %18135 = vmatpush3.bf16.xpose.msra.mxu1 %v20036_v32  ;;  %v20176_v63 = vand.u32 4294901760, %v20154_v53  ;;  %v20187_v41 = vand.u32 4294901760, %v20142_v34 }
 0x253   : > { %25456 = vst [vmem:[#allocation41_spill] sm:$0xff] %v20158_v48  ;;  %25457 = vst [vmem:[#allocation42_spill] sm:$0xff] %v20163_v54  ;;  %v20179_v38 = vsub.f32 %v1397_v47, %v20163_v54  ;;  %v1361_v52 = vmul.f32 %v1312_v21, %v325_v50  ;;  %18137 = vmatprep.subr.bf16.mxu1 %v20043_v37  ;;  %v20194_v14 = vand.u32 4294901760, %v1539_v62  ;;  %v20211_v24 = vand.u32 4294901760, %v1549_v11  ;;  %v332_v48 = vld [vmem:[%s25009_s2 + $0x108] sm:$0xff] }
 0x254   : > { %25458 = vst [vmem:[#allocation43_spill] sm:$0xff] %v20169_v3  ;;  %25459 = vst [vmem:[#allocation44_spill] sm:$0xff] %v20176_v63  ;;  %v20191_v32 = vsub.f32 %v1394_v1, %v20169_v3  ;;  %v1403_v28 = vsel %vm464_vm1, %v1362_v56, 0  ;;  %v1559_v47 = vsub.f32 %v20154_v53, %v20176_v63  ;;  %v1569_v15 = vsub.f32 %v20142_v34, %v20187_v41 }
 0x255   : > { %25460 = vst [vmem:[#allocation45_spill] sm:$0xff] %v20179_v38  ;;  %25461 = vst [vmem:[#allocation46_spill] sm:$0xff] %v20181_v57  ;;  %v20201_v50 = vand.u32 4294901760, %v1403_v28  ;;  %16368 = vmatmul.mubr.f32.gmra.mrb[18].mxu1 %v20181_v57  ;;  %v1400_v21 = vsel %vm464_vm1, %v1361_v52, 0  ;;  %v16353_v13 = vpop.f32.mrb[10].mxu1  ;;  %v20206_v1 = vand.u32 4294901760, %v20179_v38 }
 0x256   : > { %25462 = vst [vmem:[#allocation47_spill] sm:$0xff] %v20187_v41  ;;  %25463 = vst [vmem:[#allocation48_spill] sm:$0xff] %v20191_v32  ;;  %v20208_v56 = vand.u32 4294901760, %v1400_v21  ;;  %16370 = vmatprep.mubr.f32.mxu1 %v20194_v14  ;;  %v1364_v62 = vmul.f32 %v16353_v13, %v328_v8  ;;  %v1322_v31 = vpop.f32.mrb[11].mxu1  ;;  %v330_v52 = vld [vmem:[%s25009_s2 + $0xf8] sm:$0xff]  ;;  %v20222_v36 = vand.u32 4294901760, %v20191_v32 }
 0x257   : > { %25464 = vst [vmem:[#allocation49_spill] sm:$0xff] %v20194_v14  ;;  %25465 = vst [vmem:[#allocation50_spill] sm:$0xff] %v20201_v50  ;;  %v20214_v12 = vsub.f32 %v1403_v28, %v20201_v50  ;;  %v1363_v19 = vmul.f32 %v1322_v31, %v327_v10  ;;  %v20228_v11 = vand.u32 4294901760, %v1559_v47  ;;  %v329_v31 = vld [vmem:[%s25009_s2 + $0xf0] sm:$0xff]  ;;  %v20253_v57 = vand.u32 4294901760, %v1569_v15 }
 0x258   : > { %25466 = vst [vmem:[#allocation51_spill] sm:$0xff] %v20206_v1  ;;  %25467 = vst [vmem:[#allocation52_spill] sm:$0xff] %v20208_v56  ;;  %v20225_v23 = vsub.f32 %v1400_v21, %v20208_v56  ;;  %v1409_v8 = vsel %vm464_vm1, %v1364_v62, 0  ;;  %v1579_v30 = vsub.f32 %v20191_v32, %v20222_v36  ;;  %v1589_v21 = vsub.f32 %v20179_v38, %v20206_v1 }
 0x259   : > { %25468 = vst [vmem:[#allocation53_spill] sm:$0xff] %v20211_v24  ;;  %25469 = vst [vmem:[#allocation54_spill] sm:$0xff] %v20214_v12  ;;  %v20233_v13 = vand.u32 4294901760, %v1409_v8  ;;  %16371 = vmatmul.mubr.f32.gmra.mrb[20].mxu1 %v20211_v24  ;;  %v1406_v28 = vsel %vm464_vm1, %v1363_v19, 0  ;;  %v16356_v10 = vpop.f32.mrb[12].mxu1  ;;  %v20248_v24 = vand.u32 4294901760, %v20214_v12 }
 0x25a   : > { %25470 = vst [vmem:[#allocation55_spill] sm:$0xff] %v20222_v36  ;;  %25471 = vst [vmem:[#allocation56_spill] sm:$0xff] %v20225_v23  ;;  %v20241_v62 = vand.u32 4294901760, %v1406_v28  ;;  %16373 = vmatprep.mubr.f32.mxu1 %v20228_v11  ;;  %v1366_v47 = vmul.f32 %v16356_v10, %v330_v52  ;;  %v1332_v9 = vpop.f32.mrb[13].mxu1  ;;  %v20245_v14 = vand.u32 4294901760, %v20225_v23  ;;  %v20262_v10 = vand.u32 4294901760, %v1579_v30 }
 0x25b   : > { %25472 = vst [vmem:[#allocation57_spill] sm:$0xff] %v20228_v11  ;;  %25473 = vst [vmem:[#allocation58_spill] sm:$0xff] %v20233_v13  ;;  %v20251_v19 = vsub.f32 %v1409_v8, %v20233_v13  ;;  %v1365_v27 = vmul.f32 %v1332_v9, %v329_v31  ;;  %v1609_v0 = vsub.f32 %v20214_v12, %v20248_v24 }
 0x25c   : > { %25474 = vst [vmem:[#allocation59_spill] sm:$0xff] %v20241_v62  ;;  %25475 = vst [vmem:[#allocation60_spill] sm:$0xff] %v20245_v14  ;;  %v20259_v11 = vsub.f32 %v1406_v28, %v20241_v62  ;;  %v1415_v52 = vsel %vm464_vm1, %v1366_v47, 0  ;;  %v1599_v15 = vsub.f32 %v20225_v23, %v20245_v14  ;;  %v20276_v47 = vand.u32 4294901760, %v1589_v21 }
 0x25d   : > { %25476 = vst [vmem:[#allocation61_spill] sm:$0xff] %v20248_v24  ;;  %25477 = vst [vmem:[#allocation62_spill] sm:$0xff] %v20251_v19  ;;  %v20269_v8 = vand.u32 4294901760, %v1415_v52  ;;  %16374 = vmatmul.mubr.f32.gmra.mrb[22].mxu1 %v20253_v57  ;;  %v1412_v9 = vsel %vm464_vm1, %v1365_v27, 0  ;;  %v16359_v31 = vpop.f32.mrb[14].mxu1  ;;  %v20287_v27 = vand.u32 4294901760, %v20251_v19 }
 0x25e   : > { %25478 = vst [vmem:[#allocation63_spill] sm:$0xff] %v20253_v57  ;;  %25479 = vst [vmem:[#allocation64_spill] sm:$0xff] %v20259_v11  ;;  %v20273_v28 = vand.u32 4294901760, %v1412_v9  ;;  %16376 = vmatprep.mubr.f32.mxu1 %v20262_v10  ;;  %v1368_v30 = vmul.f32 %v16359_v31, %v332_v48  ;;  %v1342_v20 = vpop.f32.mrb[15].mxu1  ;;  %v20284_v57 = vand.u32 4294901760, %v20259_v11  ;;  %v20293_v21 = vand.u32 4294901760, %v1599_v15 }
 0x25f   : > { %25480 = vst [vmem:[#allocation65_spill] sm:$0xff] %v20262_v10  ;;  %25481 = vst [vmem:[#allocation66_spill] sm:$0xff] %v20269_v8  ;;  %v20281_v7 = vsub.f32 %v1415_v52, %v20269_v8  ;;  %v1367_v61 = vmul.f32 %v1342_v20, %v331_v26  ;;  %v20310_v15 = vand.u32 4294901760, %v1609_v0 }
 0x260   : > { %25482 = vst [vmem:[#allocation67_spill] sm:$0xff] %v20273_v28  ;;  %25483 = vst [vmem:[#allocation68_spill] sm:$0xff] %v20276_v47  ;;  %v20290_v55 = vsub.f32 %v1412_v9, %v20273_v28  ;;  %v1421_v48 = vsel %vm464_vm1, %v1368_v30, 0  ;;  %v1619_v20 = vsub.f32 %v20259_v11, %v20284_v57 }
 0x261   : > { %25484 = vst [vmem:[#allocation69_spill] sm:$0xff] %v20281_v7  ;;  %25485 = vst [vmem:[#allocation70_spill] sm:$0xff] %v20284_v57  ;;  %v20295_v31 = vand.u32 4294901760, %v1421_v48  ;;  %16377 = vmatmul.mubr.f32.gmra.mrb[24].mxu1 %v20276_v47  ;;  %v1418_v52 = vsel %vm464_vm1, %v1367_v61, 0  ;;  %v1629_v47 = vsub.f32 %v20251_v19, %v20287_v27  ;;  %v20315_v61 = vand.u32 4294901760, %v20281_v7 }
 0x262   : > { %25486 = vst [vmem:[#allocation71_spill] sm:$0xff] %v20287_v27  ;;  %25487 = vst [vmem:[#allocation72_spill] sm:$0xff] %v20290_v55  ;;  %v20301_v26 = vand.u32 4294901760, %v1418_v52  ;;  %16379 = vmatprep.mubr.f32.mxu1 %v20293_v21  ;;  %v20305_v9 = vand.u32 4294901760, %v20290_v55  ;;  %v20320_v51 = vand.u32 4294901760, %v1619_v20 }
 0x263   : > { %25488 = vst [vmem:[#allocation73_spill] sm:$0xff] %v20293_v21  ;;  %25489 = vst [vmem:[#allocation74_spill] sm:$0xff] %v20295_v31  ;;  %v20308_v30 = vsub.f32 %v1421_v48, %v20295_v31  ;;  %v20329_v48 = vand.u32 4294901760, %v1629_v47  ;;  %v1649_v27 = vsub.f32 %v20281_v7, %v20315_v61 }
 0x264   : > { %25490 = vst [vmem:[#allocation75_spill] sm:$0xff] %v20301_v26  ;;  %25491 = vst [vmem:[#allocation76_spill] sm:$0xff] %v20305_v9  ;;  %v20318_v10 = vsub.f32 %v1418_v52, %v20301_v26  ;;  %v1639_v21 = vsub.f32 %v20290_v55, %v20305_v9 }
 0x265   : > { %25492 = vst [vmem:[#allocation77_spill] sm:$0xff] %v20308_v30  ;;  %25493 = vst [vmem:[#allocation78_spill] sm:$0xff] %v20310_v15  ;;  %16380 = vmatmul.mubr.f32.gmra.mrb[26].mxu1 %v20310_v15  ;;  %v20334_v52 = vand.u32 4294901760, %v20308_v30 }
 0x266   : > { %25494 = vst [vmem:[#allocation79_spill] sm:$0xff] %v20315_v61  ;;  %25495 = vst [vmem:[#allocation80_spill] sm:$0xff] %v20318_v10  ;;  %16382 = vmatprep.mubr.f32.mxu1 %v20320_v51  ;;  %v20327_v0 = vand.u32 4294901760, %v20318_v10  ;;  %v20336_v20 = vand.u32 4294901760, %v1639_v21 }
 0x267   : > { %25496 = vst [vmem:[#allocation81_spill] sm:$0xff] %v20320_v51  ;;  %25498 = vst [vmem:[#allocation83_spill] sm:$0xff] %v20329_v48  ;;  %v20342_v51 = vand.u32 4294901760, %v1649_v27  ;;  %v1669_v47 = vsub.f32 %v20308_v30, %v20334_v52  ;;  %v25505_v27 = vand.u32 4294901760, %v20011_v6 }
 0x268   : > { %25497 = vst [vmem:[#allocation82_spill] sm:$0xff] %v20327_v0  ;;  %25499 = vst [vmem:[#allocation84_spill] sm:$0xff] %v20334_v52  ;;  %v1659_v9 = vsub.f32 %v20318_v10, %v20327_v0 }
 0x269   : > { %25500 = vst [vmem:[#allocation85_spill] sm:$0xff] %v20336_v20  ;;  %16383 = vmatmul.mubr.f32.gmra.mrb[28].mxu1 %v20329_v48  ;;  %25501 = vst [vmem:[#allocation86_spill] sm:$0xff] %v20342_v51  ;;  %v20350_v21 = vand.u32 4294901760, %v1669_v47  ;;  %v20419_v47 = vld [vmem:[%s20414_s21 + $0x10] sm:$0xff] }
 0x26a   : > { %16385 = vmatprep.mubr.f32.mxu1 %v20336_v20  ;;  %v20346_v15 = vand.u32 4294901760, %v1659_v9 }
 0x26b   : > { %25503 = vst [vmem:[#allocation88_spill] sm:$0xff] %v20350_v21  ;;  %v25507_v6 = vld [vmem:[#allocation76_spill] sm:$0xff] }
 0x26c   : > { %25502 = vst [vmem:[#allocation87_spill] sm:$0xff] %v20346_v15 }
 0x26d   : > { %16386 = vmatmul.mubr.f32.gmra.mrb[30].mxu1 %v20342_v51 }
 0x26e   : > { %16388 = vmatprep.mubr.f32.mxu1 %v20346_v15 }
 0x271   : > { %16389 = vmatmul.mubr.f32.gmra.mrb[32].mxu1 %v20350_v21 }
 0x272   : > { %16395 = vmatprep.mubr.f32.mxu1 %v20071_v2 }
 0x275   : > { %16396 = vmatmul.mubr.f32.vlgmr.msra.gmra.mrb[16].mxu1 %v20065_v58 }
 0x276   : > { %16398 = vmatprep.mubr.f32.mxu1 %v20073_v4  ;;  %18139 = vmatpush3.bf16.xpose.msra.mxu1 %v20043_v37  ;;  %v25504_v37 = vand.u32 4294901760, %v20006_v5  ;;  %v25506_v5 = vld [vmem:[#allocation71_spill] sm:$0xff] }
 0x277   : > { %18141 = vmatprep.subr.bf16.mxu1 %v19913_v35 }
 0x278   : > { %v18144_v9 = vpack.c.bf16 %v25505_v27, %v25504_v37  ;;  %v20422_v37 = vld [vmem:[%s20414_s21 + $0x28] sm:$0xff]  ;;  %v25058_v27 = vand.u32 4294901760, %v20419_v47 }
 0x279   : > { %16399 = vmatmul.mubr.f32.gmra.mrb[18].mxu1 %v20068_v60 }
 0x27a   : > { %16401 = vmatprep.mubr.f32.mxu1 %v20103_v40 }
 0x27d   : > { %16402 = vmatmul.mubr.f32.gmra.mrb[20].mxu1 %v20097_v33 }
 0x27e   : > { %16404 = vmatprep.mubr.f32.mxu1 %v20135_v16 }
 0x281   : > { %16405 = vmatmul.mubr.f32.gmra.mrb[22].mxu1 %v20130_v59 }
 0x282   : > { %16407 = vmatprep.mubr.f32.mxu1 %v20169_v3 }
 0x285   : > { %16408 = vmatmul.mubr.f32.gmra.mrb[24].mxu1 %v20163_v54 }
 0x286   : > { %16410 = vmatprep.mubr.f32.mxu1 %v20208_v56 }
 0x289   : > { %16411 = vmatmul.mubr.f32.gmra.mrb[26].mxu1 %v20201_v50 }
 0x28a   : > { %16413 = vmatprep.mubr.f32.mxu1 %v20241_v62 }
 0x28d   : > { %16414 = vmatmul.mubr.f32.gmra.mrb[28].mxu1 %v20233_v13 }
 0x28e   : > { %16416 = vmatprep.mubr.f32.mxu1 %v20273_v28 }
 0x291   : > { %16417 = vmatmul.mubr.f32.gmra.mrb[30].mxu1 %v20269_v8 }
 0x292   : > { %16419 = vmatprep.mubr.f32.mxu1 %v20301_v26 }
 0x295   : > { %16420 = vmatmul.mubr.f32.gmra.mrb[32].mxu1 %v20295_v31 }
 0x296   : > { %16426 = vmatprep.mubr.f32.mxu1 %v20085_v22 }
 0x299   : > { %16427 = vmatmul.mubr.f32.vlgmr.msra.gmra.mrb[16].mxu1 %v20076_v17 }
 0x29a   : > { %16429 = vmatprep.mubr.f32.mxu1 %v20088_v25  ;;  %18143 = vmatpush3.bf16.xpose.msra.mxu1 %v19913_v35 }
 0x29b   : > { %18145 = vmatprep.subr.bf16.mxu1 %v18144_v9 }
 0x29d   : > { %16430 = vmatmul.mubr.f32.gmra.mrb[18].mxu1 %v20079_v18 }
 0x29e   : > { %16432 = vmatprep.mubr.f32.mxu1 %v20120_v49 }
 0x2a1   : > { %16433 = vmatmul.mubr.f32.gmra.mrb[20].mxu1 %v20112_v45 }
 0x2a2   : > { %16435 = vmatprep.mubr.f32.mxu1 %v20154_v53 }
 0x2a5   : > { %16436 = vmatmul.mubr.f32.gmra.mrb[22].mxu1 %v20142_v34 }
 0x2a6   : > { %16438 = vmatprep.mubr.f32.mxu1 %v20191_v32 }
 0x2a9   : > { %16439 = vmatmul.mubr.f32.gmra.mrb[24].mxu1 %v20179_v38 }
 0x2aa   : > { %16441 = vmatprep.mubr.f32.mxu1 %v20225_v23 }
 0x2ad   : > { %16442 = vmatmul.mubr.f32.gmra.mrb[26].mxu1 %v20214_v12 }
 0x2ae   : > { %16444 = vmatprep.mubr.f32.mxu1 %v20259_v11 }
 0x2b1   : > { %16445 = vmatmul.mubr.f32.gmra.mrb[28].mxu1 %v20251_v19 }
 0x2b2   : > { %16447 = vmatprep.mubr.f32.mxu1 %v20290_v55 }
 0x2b5   : > { %16448 = vmatmul.mubr.f32.gmra.mrb[30].mxu1 %v20281_v7 }
 0x2b6   : > { %16450 = vmatprep.mubr.f32.mxu1 %v20318_v10 }
 0x2b9   : > { %16451 = vmatmul.mubr.f32.gmra.mrb[32].mxu1 %v20308_v30 }
 0x2ba   : > { %16457 = vmatprep.mubr.f32.mxu1 %v20106_v43 }
 0x2bd   : > { %16458 = vmatmul.mubr.f32.vlgmr.msra.gmra.mrb[16].mxu1 %v20095_v29 }
 0x2be   : > { %16460 = vmatprep.mubr.f32.mxu1 %v20109_v44  ;;  %18147 = vmatpush3.bf16.xpose.msra.mxu1 %v18144_v9  ;;  %v25057_v9 = vand.u32 4294901760, %v20422_v37 }
 0x2bf   : > { %18149 = vmatprep.subr.bf16.mxu1 %v19913_v35 }
 0x2c1   : > { %16461 = vmatmul.mubr.f32.gmra.mrb[18].mxu1 %v20101_v39 }
 0x2c2   : > { %16463 = vmatprep.mubr.f32.mxu1 %v20148_v42 }
 0x2c5   : > { %16464 = vmatmul.mubr.f32.gmra.mrb[20].mxu1 %v20151_v46 }
 0x2c6   : > { %16466 = vmatprep.mubr.f32.mxu1 %v20176_v63 }
 0x2c9   : > { %16467 = vmatmul.mubr.f32.gmra.mrb[22].mxu1 %v20187_v41 }
 0x2ca   : > { %16469 = vmatprep.mubr.f32.mxu1 %v20222_v36 }
 0x2cd   : > { %16470 = vmatmul.mubr.f32.gmra.mrb[24].mxu1 %v20206_v1 }
 0x2ce   : > { %16472 = vmatprep.mubr.f32.mxu1 %v20245_v14 }
 0x2d1   : > { %16473 = vmatmul.mubr.f32.gmra.mrb[26].mxu1 %v20248_v24 }
 0x2d2   : > { %16475 = vmatprep.mubr.f32.mxu1 %v20284_v57 }
 0x2d5   : > { %16476 = vmatmul.mubr.f32.gmra.mrb[28].mxu1 %v25506_v5 }
 0x2d6   : > { %16478 = vmatprep.mubr.f32.mxu1 %v25507_v6  ;;  %v20434_v6 = vpack.c.bf16 %v25057_v9, %v25058_v27  ;;  %v457_v9 = vld [vmem:[%s20414_s21 + $0x20] sm:$0xff] }
 0x2d8   : > { %25508 = vst [vmem:[#allocation89_spill] sm:$0xff] %v20434_v6 }
 0x2d9   : > { %16479 = vmatmul.mubr.f32.gmra.mrb[30].mxu1 %v20315_v61  ;;  %v456_v61 = vld [vmem:[%s20414_s21 + $0x18] sm:$0xff] }
 0x2da   : > { %16481 = vmatprep.mubr.f32.mxu1 %v20327_v0  ;;  %v453_v0 = vld [vmem:[%s20414_s21] sm:$0xff]  ;;  %v2680_v57 = vand.u32 4294901760, %v456_v61 }
 0x2db   : > { %v2676_v5 = vand.u32 4294901760, %v453_v0 }
 0x2dc   : > { %v20490_v63 = vsub.f32 %v456_v61, %v2680_v57 }
 0x2dd   : > { %16482 = vmatmul.mubr.f32.gmra.mrb[32].mxu1 %v20334_v52  ;;  %v2678_v52 = vand.u32 4294901760, %v457_v9  ;;  %v20480_v14 = vpack.c.bf16 %v2680_v57, %v2676_v5  ;;  %v20488_v41 = vsub.f32 %v453_v0, %v2676_v5  ;;  %v25514_v57 = vand.u32 4294901760, %v20419_v47 }
 0x2de   : > { %16488 = vmatprep.mubr.f32.mxu1 %v20071_v2  ;;  %v25515_v0 = vand.u32 4294901760, %v20422_v37 }
 0x2df   : > { %25510 = vst [vmem:[#allocation91_spill] sm:$0xff] %v20480_v14  ;;  %v20486_v36 = vsub.f32 %v457_v9, %v2678_v52  ;;  %v20506_v61 = vsub.f32 %v20419_v47, %v25514_v57  ;;  %v25086_v57 = vand.u32 4294901760, %v20488_v41 }
 0x2e0   : > { %v20511_v5 = vsub.f32 %v20422_v37, %v25515_v0  ;;  %v25089_v0 = vand.u32 4294901760, %v20490_v63 }
 0x2e1   : > { %16489 = vmatmul.mubr.f32.vlgmr.msra.gmra.mrb[16].mxu1 %v20065_v58  ;;  %25512 = vst [vmem:[#allocation93_spill] sm:$0xff] %v20486_v36  ;;  %v25073_v42 = vand.u32 4294901760, %v20486_v36  ;;  %v25075_v9 = vand.u32 4294901760, %v20506_v61 }
 0x2e2   : > { %16491 = vmatprep.mubr.f32.mxu1 %v20073_v4  ;;  %18151 = vmatpush3.bf16.xpose.msra.mxu1 %v19913_v35  ;;  %v454_v35 = vld [vmem:[%s20414_s21 + $0x8] sm:$0xff]  ;;  %v20526_v37 = vpack.c.bf16 %v20511_v5, %v20506_v61 }
 0x2e3   : > { %18177 = vmatprep.subr.bf16.mxu1 %v20434_v6  ;;  %v2674_v27 = vand.u32 4294901760, %v454_v35  ;;  %v2956_v44 = vsub.f32 %v20486_v36, %v25073_v42  ;;  %v25077_v42 = vand.u32 4294901760, %v20511_v5 }
 0x2e4   : > { %25517 = vst [vmem:[#allocation96_spill] sm:$0xff] %v20526_v37 }
 0x2e5   : > { %16492 = vmatmul.mubr.f32.gmra.mrb[18].mxu1 %v20068_v60  ;;  %v20478_v24 = vpack.c.bf16 %v2678_v52, %v2674_v27  ;;  %v20484_v1 = vsub.f32 %v454_v35, %v2674_v27  ;;  %v2957_v35 = vand.u32 4294901760, %v2956_v44  ;;  %v4256_v44 = vsub.f32 %v20511_v5, %v25077_v42 }
 0x2e6   : > { %16494 = vmatprep.mubr.f32.mxu1 %v20103_v40 }
 0x2e7   : > { %25509 = vst [vmem:[#allocation90_spill] sm:$0xff] %v20478_v24  ;;  %18153 = vmatprep.subr.bf16.mxu0 %v20478_v24  ;;  %25511 = vst [vmem:[#allocation92_spill] sm:$0xff] %v20484_v1  ;;  %v25074_v46 = vand.u32 4294901760, %v20484_v1  ;;  %v4257_v47 = vand.u32 4294901760, %v4256_v44 }
 0x2e8   : > { %18155 = vmatpush1.bf16.msra.mxu0 %v20480_v14 }
 0x2e9   : > { %16495 = vmatmul.mubr.f32.gmra.mrb[20].mxu1 %v20097_v33  ;;  %v2944_v39 = vsub.f32 %v20484_v1, %v25074_v46 }
 0x2ea   : > { %16497 = vmatprep.mubr.f32.mxu1 %v20135_v16 }
 0x2eb   : > { %v2945_v27 = vand.u32 4294901760, %v2944_v39  ;;  %v4249_v39 = vsub.f32 %v20506_v61, %v25075_v9 }
 0x2ed   : > { %16498 = vmatmul.mubr.f32.gmra.mrb[22].mxu1 %v20130_v59  ;;  %v20500_v52 = vpack.c.bf16 %v2957_v35, %v2945_v27  ;;  %v4250_v27 = vand.u32 4294901760, %v4249_v39 }
 0x2ee   : > { %16500 = vmatprep.mubr.f32.mxu1 %v20169_v3 }
 0x2ef   : > { %25513 = vst [vmem:[#allocation94_spill] sm:$0xff] %v20500_v52  ;;  %18157 = vmatprep.subr.bf16.mxu0 %v20500_v52  ;;  %v20521_v35 = vpack.c.bf16 %v4257_v47, %v4250_v27  ;;  %v2950_v27 = vsub.f32 %v20488_v41, %v25086_v57  ;;  %v2962_v47 = vsub.f32 %v20490_v63, %v25089_v0 }
 0x2f1   : > { %16501 = vmatmul.mubr.f32.gmra.mrb[24].mxu1 %v20163_v54  ;;  %25516 = vst [vmem:[#allocation95_spill] sm:$0xff] %v20521_v35 }
 0x2f2   : > { %16503 = vmatprep.mubr.f32.mxu1 %v20208_v56 }
 0x2f5   : > { %16504 = vmatmul.mubr.f32.gmra.mrb[26].mxu1 %v20201_v50 }
 0x2f6   : > { %16506 = vmatprep.mubr.f32.mxu1 %v20241_v62 }
 0x2f9   : > { %16507 = vmatmul.mubr.f32.gmra.mrb[28].mxu1 %v20233_v13 }
 0x2fa   : > { %16509 = vmatprep.mubr.f32.mxu1 %v20273_v28 }
 0x2fd   : > { %16510 = vmatmul.mubr.f32.gmra.mrb[30].mxu1 %v20269_v8 }
 0x2fe   : > { %16512 = vmatprep.mubr.f32.mxu1 %v20301_v26 }
 0x301   : > { %16513 = vmatmul.mubr.f32.gmra.mrb[32].mxu1 %v20295_v31 }
 0x302   : > { %16519 = vmatprep.mubr.f32.mxu1 %v20071_v2 }
 0x305   : > { %16520 = vmatmul.mubr.f32.vlgmr.msra.gmra.mrb[16].mxu1 %v20065_v58 }
 0x306   : > { %16522 = vmatprep.mubr.f32.mxu1 %v20073_v4  ;;  %18179 = vmatpush3.bf16.msra.mxu1 %v20434_v6  ;;  %v25521_v4 = vmov 0.0  }
 0x307   : > { %18181 = vmatprep.subr.bf16.mxu1 %v20521_v35 }
 0x309   : > { %16523 = vmatmul.mubr.f32.gmra.mrb[18].mxu1 %v20068_v60 }
 0x30a   : > { %16525 = vmatprep.mubr.f32.mxu1 %v20103_v40 }
 0x30d   : > { %16526 = vmatmul.mubr.f32.gmra.mrb[20].mxu1 %v20097_v33 }
 0x30e   : > { %16528 = vmatprep.mubr.f32.mxu1 %v20135_v16 }
 0x311   : > { %16529 = vmatmul.mubr.f32.gmra.mrb[22].mxu1 %v20130_v59 }
 0x312   : > { %16531 = vmatprep.mubr.f32.mxu1 %v20169_v3 }
 0x315   : > { %16532 = vmatmul.mubr.f32.gmra.mrb[24].mxu1 %v20163_v54 }
 0x316   : > { %16534 = vmatprep.mubr.f32.mxu1 %v20208_v56 }
 0x319   : > { %16535 = vmatmul.mubr.f32.gmra.mrb[26].mxu1 %v20201_v50 }
 0x31a   : > { %16537 = vmatprep.mubr.f32.mxu1 %v20241_v62 }
 0x31d   : > { %16538 = vmatmul.mubr.f32.gmra.mrb[28].mxu1 %v20233_v13  ;;  %v2963_v13 = vand.u32 4294901760, %v2962_v47 }
 0x31e   : > { %16540 = vmatprep.mubr.f32.mxu1 %v20273_v28 }
 0x321   : > { %16541 = vmatmul.mubr.f32.gmra.mrb[30].mxu1 %v20269_v8 }
 0x322   : > { %16543 = vmatprep.mubr.f32.mxu1 %v20301_v26 }
 0x325   : > { %16544 = vmatmul.mubr.f32.gmra.mrb[32].mxu1 %v20295_v31 }
 0x3d8   : > { %v16521_v46 = vpop.f32.mrb[16].mxu1 }
 0x3d9   : > { %v2624_v9 = vsel %vm2619_vm4, %v16521_v46, 0  ;;  %v2513_v52 = vpop.f32.mrb[17].mxu1 }
 0x3da   : > { %v20531_v42 = vand.u32 4294901760, %v2624_v9  ;;  %v2621_v39 = vsel %vm2619_vm4, %v2513_v52, 0 }
 0x3db   : > { %v20534_v44 = vand.u32 4294901760, %v2621_v39 }
 0x3dc   : > { %v20543_v29 = vsub.f32 %v2624_v9, %v20531_v42  ;;  %v16524_v43 = vpop.f32.mrb[18].mxu1  ;;  %v2951_v9 = vand.u32 4294901760, %v2950_v27 }
 0x3dd   : > { %v20546_v46 = vsub.f32 %v2621_v39, %v20534_v44  ;;  %v2525_v31 = vpop.f32.mrb[19].mxu1  ;;  %v2630_v52 = vsel %vm2619_vm4, %v16524_v43, 0 }
 0x3de   : > { %v20550_v26 = vand.u32 4294901760, %v20543_v29  ;;  %v2627_v8 = vsel %vm2619_vm4, %v2525_v31, 0  ;;  %v20553_v57 = vand.u32 4294901760, %v2630_v52  ;;  %v20580_v16 = vpack.c.bf16 %v2963_v13, %v2951_v9 }
 0x3df   : > { %v20556_v28 = vand.u32 4294901760, %v20546_v46  ;;  %v20558_v0 = vand.u32 4294901760, %v2627_v8 }
 0x3e0   : > { %v16527_v62 = vpop.f32.mrb[20].mxu1  ;;  %v2757_v39 = vsub.f32 %v20543_v29, %v20550_v26  ;;  %v20563_v43 = vsub.f32 %v2630_v52, %v20553_v57  ;;  %25519 = vst [vmem:[#allocation98_spill] sm:$0xff] %v20580_v16 }
 0x3e1   : > { %v2537_v50 = vpop.f32.mrb[21].mxu1  ;;  %v2746_v31 = vsub.f32 %v20546_v46, %v20556_v28  ;;  %v20568_v56 = vsub.f32 %v2627_v8, %v20558_v0  ;;  %v2636_v54 = vsel %vm2619_vm4, %v16527_v62, 0 }
 0x3e2   : > { %v20572_v3 = vand.u32 4294901760, %v20563_v43  ;;  %v2633_v27 = vsel %vm2619_vm4, %v2537_v50, 0  ;;  %v20575_v47 = vand.u32 4294901760, %v2636_v54  ;;  %v2758_v8 = vand.u32 4294901760, %v2757_v39 }
 0x3e3   : > { %v2747_v59 = vand.u32 4294901760, %v2746_v31  ;;  %v20578_v52 = vand.u32 4294901760, %v20568_v56  ;;  %v20582_v33 = vand.u32 4294901760, %v2633_v27  ;;  %v20591_v50 = vpack.c.bf16 %v20486_v36, %v20484_v1 }
 0x3e4   : > { %25518 = vst [vmem:[#allocation97_spill] sm:$0xff] %v20572_v3  ;;  %v16530_v40 = vpop.f32.mrb[22].mxu1  ;;  %v2779_v62 = vsub.f32 %v20563_v43, %v20572_v3  ;;  %v20587_v60 = vsub.f32 %v2636_v54, %v20575_v47 }
 0x3e5   : > { %25520 = vst [vmem:[#allocation99_spill] sm:$0xff] %v20591_v50  ;;  %v2549_v31 = vpop.f32.mrb[23].mxu1  ;;  %2748 = vmatmul.mubr.f32.vlgmr.msra.gmra.mrb[12].mxu0 %v2747_v59  ;;  %16550 = vmatprep.mubr.f32.mxu1 %v2747_v59  ;;  %v2768_v13 = vsub.f32 %v20568_v56, %v20578_v52  ;;  %v20596_v9 = vsub.f32 %v2633_v27, %v20582_v33  ;;  %v2642_v39 = vsel %vm2619_vm4, %v16530_v40, 0 }
 0x3e6   : > { %16551 = vmatmul.mubr.f32.vlgmr.msra.gmra.mrb[34].mxu1 %v2758_v8  ;;  %2753 = vmatprep.mubr.f32.mxu0 %v25521_v4  ;;  %v20601_v54 = vand.u32 4294901760, %v20587_v60  ;;  %v2639_v58 = vsel %vm2619_vm4, %v2549_v31, 0  ;;  %v20604_v2 = vand.u32 4294901760, %v2642_v39  ;;  %v2780_v10 = vand.u32 4294901760, %v2779_v62 }
 0x3e7   : > { %v2769_v30 = vand.u32 4294901760, %v2768_v13  ;;  %18159 = vmatpush1.bf16.msra.mxu0 %v20580_v16  ;;  %v20608_v59 = vand.u32 4294901760, %v20596_v9  ;;  %v20610_v27 = vand.u32 4294901760, %v2639_v58  ;;  %18183 = vmatpush3.bf16.msra.mxu1 %v20521_v35 }
 0x3e8   : > { %25522 = vst [vmem:[#allocation100_spill] sm:$0xff] %v20601_v54  ;;  %v16533_v40 = vpop.f32.mrb[24].mxu1  ;;  %v2801_v7 = vsub.f32 %v20587_v60, %v20601_v54  ;;  %v20616_v55 = vsub.f32 %v2642_v39, %v20604_v2  ;;  %18185 = vmatprep.subr.bf16.mxu1 %v20526_v37  ;;  %18161 = vmatprep.subr.bf16.mxu0 %v20591_v50 }
 0x3e9   : > { %25523 = vst [vmem:[#allocation101_spill] sm:$0xff] %v20608_v59  ;;  %v2561_v31 = vpop.f32.mrb[25].mxu1  ;;  %2759 = vmatmul.mubr.f32.gmra.mrb[14].mxu0 %v2758_v8  ;;  %16553 = vmatprep.mubr.f32.mxu1 %v2769_v30  ;;  %v2790_v13 = vsub.f32 %v20596_v9, %v20608_v59  ;;  %v20623_v16 = vsub.f32 %v2639_v58, %v20610_v27  ;;  %v2648_v62 = vsel %vm2619_vm4, %v16533_v40, 0 }
 0x3ea   : > { %16554 = vmatmul.mubr.f32.gmra.mrb[36].mxu1 %v2780_v10  ;;  %2764 = vmatprep.mubr.f32.mxu0 %v25521_v4  ;;  %v20628_v39 = vand.u32 4294901760, %v20616_v55  ;;  %v2645_v35 = vsel %vm2619_vm4, %v2561_v31, 0  ;;  %v20631_v50 = vand.u32 4294901760, %v2648_v62  ;;  %v2802_v12 = vand.u32 4294901760, %v2801_v7 }
 0x3eb   : > { %v2791_v8 = vand.u32 4294901760, %v2790_v13  ;;  %v20634_v19 = vand.u32 4294901760, %v20623_v16  ;;  %v20636_v11 = vand.u32 4294901760, %v2645_v35 }
 0x3ec   : > { %25524 = vst [vmem:[#allocation102_spill] sm:$0xff] %v20628_v39  ;;  %v16536_v58 = vpop.f32.mrb[26].mxu1  ;;  %v2823_v40 = vsub.f32 %v20616_v55, %v20628_v39  ;;  %v20641_v23 = vsub.f32 %v2648_v62, %v20631_v50 }
 0x3ed   : > { %25525 = vst [vmem:[#allocation103_spill] sm:$0xff] %v20634_v19  ;;  %v2573_v38 = vpop.f32.mrb[27].mxu1  ;;  %2770 = vmatmul.mubr.f32.gmra.mrb[16].mxu0 %v2769_v30  ;;  %16556 = vmatprep.mubr.f32.mxu1 %v2791_v8  ;;  %v2812_v31 = vsub.f32 %v20623_v16, %v20634_v19  ;;  %v20646_v13 = vsub.f32 %v2645_v35, %v20636_v11  ;;  %v2654_v32 = vsel %vm2619_vm4, %v16536_v58, 0 }
 0x3ee   : > { %16557 = vmatmul.mubr.f32.gmra.mrb[38].mxu1 %v2802_v12  ;;  %2775 = vmatprep.mubr.f32.mxu0 %v25521_v4  ;;  %v20651_v7 = vand.u32 4294901760, %v20641_v23  ;;  %v2651_v62 = vsel %vm2619_vm4, %v2573_v38, 0  ;;  %v20654_v34 = vand.u32 4294901760, %v2654_v32  ;;  %v20661_v49 = vand.u32 4294901760, %v2823_v40 }
 0x3ef   : > { %v2813_v30 = vand.u32 4294901760, %v2812_v31  ;;  %v20657_v53 = vand.u32 4294901760, %v20646_v13  ;;  %v20659_v45 = vand.u32 4294901760, %v2651_v62 }
 0x3f0   : > { %25526 = vst [vmem:[#allocation104_spill] sm:$0xff] %v20651_v7  ;;  %v16539_v35 = vpop.f32.mrb[28].mxu1  ;;  %v2845_v58 = vsub.f32 %v20641_v23, %v20651_v7  ;;  %v20666_v18 = vsub.f32 %v2654_v32, %v20654_v34 }
 0x3f1   : > { %25527 = vst [vmem:[#allocation105_spill] sm:$0xff] %v20657_v53  ;;  %v2660_v25 = vsel %vm2619_vm4, %v16539_v35, 0  ;;  %v2585_v38 = vpop.f32.mrb[29].mxu1  ;;  %2781 = vmatmul.mubr.f32.gmra.mrb[18].mxu0 %v2780_v10  ;;  %16559 = vmatprep.mubr.f32.mxu1 %v2813_v30  ;;  %v2834_v31 = vsub.f32 %v20646_v13, %v20657_v53  ;;  %v20672_v17 = vsub.f32 %v2651_v62, %v20659_v45 }
 0x3f2   : > { %v20674_v22 = vand.u32 4294901760, %v2660_v25  ;;  %v2657_v40 = vsel %vm2619_vm4, %v2585_v38, 0  ;;  %16560 = vmatmul.mubr.f32.gmra.mrb[40].mxu1 %v20661_v49  ;;  %2786 = vmatprep.mubr.f32.mxu0 %v25521_v4  ;;  %v20680_v32 = vand.u32 4294901760, %v20666_v18  ;;  %v2846_v51 = vand.u32 4294901760, %v2845_v58 }
 0x3f3   : > { %v20682_v35 = vand.u32 4294901760, %v2657_v40  ;;  %v2835_v10 = vand.u32 4294901760, %v2834_v31  ;;  %v20685_v21 = vand.u32 4294901760, %v20672_v17 }
 0x3f4   : > { %25528 = vst [vmem:[#allocation106_spill] sm:$0xff] %v20680_v32  ;;  %v20688_v62 = vsub.f32 %v2660_v25, %v20674_v22  ;;  %v16542_v15 = vpop.f32.mrb[30].mxu1  ;;  %v2867_v38 = vsub.f32 %v20666_v18, %v20680_v32 }
 0x3f5   : > { %25529 = vst [vmem:[#allocation107_spill] sm:$0xff] %v20685_v21  ;;  %v20693_v20 = vsub.f32 %v2657_v40, %v20682_v35  ;;  %v2666_v48 = vsel %vm2619_vm4, %v16542_v15, 0  ;;  %v2597_v14 = vpop.f32.mrb[31].mxu1  ;;  %2792 = vmatmul.mubr.f32.gmra.mrb[20].mxu0 %v2791_v8  ;;  %16562 = vmatprep.mubr.f32.mxu1 %v2835_v10  ;;  %v2856_v31 = vsub.f32 %v20672_v17, %v20685_v21 }
 0x3f6   : > { %v20698_v36 = vand.u32 4294901760, %v2666_v48  ;;  %v2663_v25 = vsel %vm2619_vm4, %v2597_v14, 0  ;;  %16563 = vmatmul.mubr.f32.gmra.mrb[42].mxu1 %v2846_v51  ;;  %2797 = vmatprep.mubr.f32.mxu0 %v25521_v4  ;;  %v20703_v58 = vand.u32 4294901760, %v20688_v62  ;;  %v2868_v21 = vand.u32 4294901760, %v2867_v38 }
 0x3f7   : > { %v20705_v40 = vand.u32 4294901760, %v2663_v25  ;;  %v2857_v1 = vand.u32 4294901760, %v2856_v31  ;;  %v20708_v15 = vand.u32 4294901760, %v20693_v20 }
 0x3f8   : > { %25530 = vst [vmem:[#allocation108_spill] sm:$0xff] %v20703_v58  ;;  %v20711_v8 = vsub.f32 %v2666_v48, %v20698_v36  ;;  %v16545_v32 = vpop.f32.mrb[32].mxu1  ;;  %v2889_v14 = vsub.f32 %v20688_v62, %v20703_v58 }
 0x3f9   : > { %25531 = vst [vmem:[#allocation109_spill] sm:$0xff] %v20708_v15  ;;  %v20716_v7 = vsub.f32 %v2663_v25, %v20705_v40  ;;  %v2672_v53 = vsel %vm2619_vm4, %v16545_v32, 0  ;;  %v2609_v39 = vpop.f32.mrb[33].mxu1  ;;  %2803 = vmatmul.mubr.f32.gmra.mrb[22].mxu0 %v2802_v12  ;;  %16565 = vmatprep.mubr.f32.mxu1 %v2857_v1  ;;  %v2878_v31 = vsub.f32 %v20693_v20, %v20708_v15 }
 0x3fa   : > { %v20721_v19 = vand.u32 4294901760, %v2672_v53  ;;  %v2669_v48 = vsel %vm2619_vm4, %v2609_v39, 0  ;;  %16566 = vmatmul.mubr.f32.gmra.mrb[44].mxu1 %v2868_v21  ;;  %2808 = vmatprep.mubr.f32.mxu0 %v25521_v4  ;;  %v20726_v38 = vand.u32 4294901760, %v20711_v8  ;;  %v2890_v15 = vand.u32 4294901760, %v2889_v14 }
 0x3fb   : > { %v20728_v25 = vand.u32 4294901760, %v2669_v48  ;;  %v2879_v58 = vand.u32 4294901760, %v2878_v31  ;;  %v20731_v32 = vand.u32 4294901760, %v20716_v7 }
 0x3fc   : > { %25532 = vst [vmem:[#allocation110_spill] sm:$0xff] %v20726_v38  ;;  %v20734_v12 = vsub.f32 %v2672_v53, %v20721_v19  ;;  %v2911_v54 = vsub.f32 %v20711_v8, %v20726_v38 }
 0x3fd   : > { %25533 = vst [vmem:[#allocation111_spill] sm:$0xff] %v20731_v32  ;;  %v20739_v39 = vsub.f32 %v2669_v48, %v20728_v25  ;;  %2814 = vmatmul.mubr.f32.gmra.mrb[24].mxu0 %v2813_v30  ;;  %16568 = vmatprep.mubr.f32.mxu1 %v2879_v58  ;;  %v2900_v59 = vsub.f32 %v20716_v7, %v20731_v32 }
 0x3fe   : > { %16569 = vmatmul.mubr.f32.gmra.mrb[46].mxu1 %v2890_v15  ;;  %2819 = vmatprep.mubr.f32.mxu0 %v25521_v4  ;;  %v20745_v31 = vand.u32 4294901760, %v20734_v12  ;;  %v2912_v3 = vand.u32 4294901760, %v2911_v54  ;;  %v25542_v54 = vld [vmem:[#allocation103_spill] sm:$0xff] }
 0x3ff   : > { %v2901_v53 = vand.u32 4294901760, %v2900_v59  ;;  %v20748_v14 = vand.u32 4294901760, %v20739_v39  ;;  %v25543_v59 = vld [vmem:[#allocation102_spill] sm:$0xff] }
 0x400   : > { %v2933_v48 = vsub.f32 %v20734_v12, %v20745_v31 }
 0x401   : > { %25534 = vst [vmem:[#allocation112_spill] sm:$0xff] %v20748_v14  ;;  %2825 = vmatmul.mubr.f32.gmra.mrb[26].mxu0 %v20661_v49  ;;  %16571 = vmatprep.mubr.f32.mxu1 %v2901_v53  ;;  %v2922_v30 = vsub.f32 %v20739_v39, %v20748_v14  ;;  %v25537_v49 = vand.u32 4294901760, %v20511_v5  ;;  %v25541_v5 = vld [vmem:[#allocation100_spill] sm:$0xff] }
 0x402   : > { %16572 = vmatmul.mubr.f32.gmra.mrb[48].mxu1 %v2912_v3  ;;  %2830 = vmatprep.mubr.f32.mxu0 %v25521_v4  ;;  %v2934_v32 = vand.u32 4294901760, %v2933_v48 }
 0x403   : > { %v2923_v38 = vand.u32 4294901760, %v2922_v30  ;;  %v25551_v30 = vld [vmem:[#allocation110_spill] sm:$0xff] }
 0x404   : > { %v25550_v48 = vld [vmem:[#allocation111_spill] sm:$0xff] }
 0x405   : > { %2836 = vmatmul.mubr.f32.gmra.mrb[28].mxu0 %v2835_v10  ;;  %16574 = vmatprep.mubr.f32.mxu1 %v2923_v38  ;;  %v25544_v10 = vld [vmem:[#allocation105_spill] sm:$0xff] }
 0x406   : > { %16575 = vmatmul.mubr.f32.gmra.mrb[50].mxu1 %v2934_v32  ;;  %2841 = vmatprep.mubr.f32.mxu0 %v25521_v4 }
 0x407   : > { %16581 = vmatprep.mubr.f32.mxu1 %v20534_v44 }
 0x409   : > { %2847 = vmatmul.mubr.f32.gmra.mrb[30].mxu0 %v2846_v51  ;;  %v25536_v51 = vand.u32 4294901760, %v20506_v61  ;;  %v25540_v61 = vld [vmem:[#allocation101_spill] sm:$0xff] }
 0x40a   : > { %16582 = vmatmul.mubr.f32.vlgmr.msra.gmra.mrb[34].mxu1 %v20531_v42  ;;  %2852 = vmatprep.mubr.f32.mxu0 %v25521_v4 }
 0x40b   : > { %16584 = vmatprep.mubr.f32.mxu1 %v20558_v0  ;;  %18187 = vmatpush3.bf16.msra.mxu1 %v20526_v37 }
 0x40c   : > { %18189 = vmatprep.subr.bf16.mxu1 %v20434_v6 }
 0x40d   : > { %2858 = vmatmul.mubr.f32.gmra.mrb[32].mxu0 %v2857_v1  ;;  %v20796_v1 = vpack.c.bf16 %v25537_v49, %v25536_v51  ;;  %v25552_v51 = vld [vmem:[#allocation92_spill] sm:$0xff] }
 0x40e   : > { %16585 = vmatmul.mubr.f32.gmra.mrb[36].mxu1 %v20553_v57  ;;  %2863 = vmatprep.mubr.f32.mxu0 %v25521_v4  ;;  %v25553_v49 = vand.u32 4294901760, %v25552_v51  ;;  %v25579_v51 = vld [vmem:[#allocation63_spill] sm:$0xff] }
 0x40f   : > { %16587 = vmatprep.mubr.f32.mxu1 %v20582_v33  ;;  %25538 = vst [vmem:[#allocation114_spill] sm:$0xff] %v20796_v1 }
 0x411   : > { %2869 = vmatmul.mubr.f32.gmra.mrb[34].mxu0 %v2868_v21  ;;  %v25539_v21 = vld [vmem:[#allocation97_spill] sm:$0xff] }
 0x412   : > { %16588 = vmatmul.mubr.f32.gmra.mrb[38].mxu1 %v20575_v47  ;;  %2874 = vmatprep.mubr.f32.mxu0 %v25521_v4 }
 0x413   : > { %16590 = vmatprep.mubr.f32.mxu1 %v20610_v27 }
 0x415   : > { %2880 = vmatmul.mubr.f32.gmra.mrb[36].mxu0 %v2879_v58  ;;  %v25545_v58 = vld [vmem:[#allocation104_spill] sm:$0xff] }
 0x416   : > { %16591 = vmatmul.mubr.f32.gmra.mrb[40].mxu1 %v20604_v2  ;;  %2885 = vmatprep.mubr.f32.mxu0 %v25521_v4 }
 0x417   : > { %16593 = vmatprep.mubr.f32.mxu1 %v20636_v11 }
 0x419   : > { %2891 = vmatmul.mubr.f32.gmra.mrb[38].mxu0 %v2890_v15  ;;  %v25546_v15 = vld [vmem:[#allocation107_spill] sm:$0xff] }
 0x41a   : > { %16594 = vmatmul.mubr.f32.gmra.mrb[42].mxu1 %v20631_v50  ;;  %2896 = vmatprep.mubr.f32.mxu0 %v25521_v4 }
 0x41b   : > { %16596 = vmatprep.mubr.f32.mxu1 %v20659_v45 }
 0x41d   : > { %2902 = vmatmul.mubr.f32.gmra.mrb[40].mxu0 %v2901_v53  ;;  %v25549_v53 = vld [vmem:[#allocation108_spill] sm:$0xff] }
 0x41e   : > { %16597 = vmatmul.mubr.f32.gmra.mrb[44].mxu1 %v20654_v34  ;;  %2907 = vmatprep.mubr.f32.mxu0 %v25521_v4 }
 0x41f   : > { %16599 = vmatprep.mubr.f32.mxu1 %v20682_v35 }
 0x421   : > { %2913 = vmatmul.mubr.f32.gmra.mrb[42].mxu0 %v2912_v3  ;;  %v20789_v3 = vpack.c.bf16 %v20490_v63, %v20488_v41 }
 0x422   : > { %16600 = vmatmul.mubr.f32.gmra.mrb[46].mxu1 %v20674_v22  ;;  %2918 = vmatprep.mubr.f32.mxu0 %v25521_v4 }
 0x423   : > { %16602 = vmatprep.mubr.f32.mxu1 %v20705_v40  ;;  %25535 = vst [vmem:[#allocation113_spill] sm:$0xff] %v20789_v3 }
 0x425   : > { %2924 = vmatmul.mubr.f32.gmra.mrb[44].mxu0 %v2923_v38  ;;  %v25547_v38 = vld [vmem:[#allocation106_spill] sm:$0xff] }
 0x426   : > { %16603 = vmatmul.mubr.f32.gmra.mrb[48].mxu1 %v20698_v36  ;;  %2929 = vmatprep.mubr.f32.mxu0 %v25521_v4 }
 0x427   : > { %16605 = vmatprep.mubr.f32.mxu1 %v20728_v25 }
 0x429   : > { %2935 = vmatmul.mubr.f32.gmra.mrb[46].mxu0 %v2934_v32  ;;  %v25548_v32 = vld [vmem:[#allocation109_spill] sm:$0xff] }
 0x42a   : > { %16606 = vmatmul.mubr.f32.gmra.mrb[50].mxu1 %v20721_v19  ;;  %3025 = vmatprep.mubr.f32.mxu0 %v25521_v4 }
 0x42b   : > { %16612 = vmatprep.mubr.f32.mxu1 %v20546_v46 }
 0x42d   : > { %3027 = vmatmul.mubr.f32.vlgmr.msra.gmra.mrb[12].mxu0 %v20534_v44 }
 0x42e   : > { %16613 = vmatmul.mubr.f32.vlgmr.msra.gmra.mrb[34].mxu1 %v20543_v29  ;;  %3032 = vmatprep.mubr.f32.mxu0 %v25521_v4 }
 0x42f   : > { %16615 = vmatprep.mubr.f32.mxu1 %v20568_v56  ;;  %18163 = vmatpush1.bf16.msra.mxu0 %v20789_v3 }
 0x430   : > { %18191 = vmatpush3.bf16.msra.mxu1 %v20434_v6  ;;  %18165 = vmatprep.subr.bf16.mxu0 %v20478_v24 }
 0x431   : > { %3034 = vmatmul.mubr.f32.gmra.mrb[14].mxu0 %v20531_v42  ;;  %18193 = vmatprep.subr.bf16.mxu1 %v20796_v1 }
 0x432   : > { %16616 = vmatmul.mubr.f32.gmra.mrb[36].mxu1 %v20563_v43  ;;  %3039 = vmatprep.mubr.f32.mxu0 %v25521_v4 }
 0x433   : > { %16618 = vmatprep.mubr.f32.mxu1 %v20596_v9 }
 0x435   : > { %3041 = vmatmul.mubr.f32.gmra.mrb[16].mxu0 %v20558_v0 }
 0x436   : > { %16619 = vmatmul.mubr.f32.gmra.mrb[38].mxu1 %v20587_v60  ;;  %3046 = vmatprep.mubr.f32.mxu0 %v25521_v4 }
 0x437   : > { %16621 = vmatprep.mubr.f32.mxu1 %v20623_v16 }
 0x439   : > { %3048 = vmatmul.mubr.f32.gmra.mrb[18].mxu0 %v20553_v57 }
 0x43a   : > { %16622 = vmatmul.mubr.f32.gmra.mrb[40].mxu1 %v20616_v55  ;;  %3053 = vmatprep.mubr.f32.mxu0 %v25521_v4 }
 0x43b   : > { %16624 = vmatprep.mubr.f32.mxu1 %v20646_v13 }
 0x43d   : > { %3055 = vmatmul.mubr.f32.gmra.mrb[20].mxu0 %v20582_v33 }
 0x43e   : > { %16625 = vmatmul.mubr.f32.gmra.mrb[42].mxu1 %v20641_v23  ;;  %3060 = vmatprep.mubr.f32.mxu0 %v25521_v4 }
 0x43f   : > { %16627 = vmatprep.mubr.f32.mxu1 %v20672_v17 }
 0x441   : > { %3062 = vmatmul.mubr.f32.gmra.mrb[22].mxu0 %v20575_v47 }
 0x442   : > { %16628 = vmatmul.mubr.f32.gmra.mrb[44].mxu1 %v20666_v18  ;;  %3067 = vmatprep.mubr.f32.mxu0 %v25521_v4 }
 0x443   : > { %16630 = vmatprep.mubr.f32.mxu1 %v20693_v20 }
 0x445   : > { %3069 = vmatmul.mubr.f32.gmra.mrb[24].mxu0 %v20610_v27 }
 0x446   : > { %16631 = vmatmul.mubr.f32.gmra.mrb[46].mxu1 %v20688_v62  ;;  %3074 = vmatprep.mubr.f32.mxu0 %v25521_v4 }
 0x447   : > { %16633 = vmatprep.mubr.f32.mxu1 %v20716_v7 }
 0x449   : > { %3076 = vmatmul.mubr.f32.gmra.mrb[26].mxu0 %v20604_v2 }
 0x44a   : > { %16634 = vmatmul.mubr.f32.gmra.mrb[48].mxu1 %v20711_v8  ;;  %3081 = vmatprep.mubr.f32.mxu0 %v25521_v4 }
 0x44b   : > { %16636 = vmatprep.mubr.f32.mxu1 %v20739_v39 }
 0x44d   : > { %3083 = vmatmul.mubr.f32.gmra.mrb[28].mxu0 %v20636_v11 }
 0x44e   : > { %16637 = vmatmul.mubr.f32.gmra.mrb[50].mxu1 %v20734_v12  ;;  %3088 = vmatprep.mubr.f32.mxu0 %v25521_v4 }
 0x44f   : > { %16643 = vmatprep.mubr.f32.mxu1 %v20556_v28 }
 0x451   : > { %3090 = vmatmul.mubr.f32.gmra.mrb[30].mxu0 %v20631_v50 }
 0x452   : > { %16644 = vmatmul.mubr.f32.vlgmr.msra.gmra.mrb[34].mxu1 %v20550_v26  ;;  %3095 = vmatprep.mubr.f32.mxu0 %v25521_v4 }
 0x453   : > { %16646 = vmatprep.mubr.f32.mxu1 %v20578_v52  ;;  %18195 = vmatpush3.bf16.msra.mxu1 %v20796_v1  ;;  %v25554_v1 = vld [vmem:[#allocation93_spill] sm:$0xff] }
 0x454   : > { %18197 = vmatprep.subr.bf16.mxu1 %v20434_v6  ;;  %v25555_v3 = vand.u32 4294901760, %v25554_v1 }
 0x455   : > { %3097 = vmatmul.mubr.f32.gmra.mrb[32].mxu0 %v20659_v45 }
 0x456   : > { %16647 = vmatmul.mubr.f32.gmra.mrb[36].mxu1 %v25539_v21  ;;  %3102 = vmatprep.mubr.f32.mxu0 %v25521_v4  ;;  %v20879_v37 = vpack.c.bf16 %v25555_v3, %v25553_v49  ;;  %v436_v49 = vld [vmem:[%s25011_s4 + $0x218] sm:$0xf] }
 0x457   : > { %16649 = vmatprep.mubr.f32.mxu1 %v25540_v61 }
 0x458   : > { %25556 = vst [vmem:[#allocation97_spill] sm:$0xff] %v20879_v37 }
 0x459   : > { %3104 = vmatmul.mubr.f32.gmra.mrb[34].mxu0 %v20654_v34 }
 0x45a   : > { %16650 = vmatmul.mubr.f32.gmra.mrb[38].mxu1 %v25541_v5  ;;  %3109 = vmatprep.mubr.f32.mxu0 %v25521_v4 }
 0x45b   : > { %16652 = vmatprep.mubr.f32.mxu1 %v25542_v54 }
 0x45d   : > { %3111 = vmatmul.mubr.f32.gmra.mrb[36].mxu0 %v20682_v35 }
 0x45e   : > { %16653 = vmatmul.mubr.f32.gmra.mrb[40].mxu1 %v25543_v59  ;;  %3116 = vmatprep.mubr.f32.mxu0 %v25521_v4 }
 0x45f   : > { %16655 = vmatprep.mubr.f32.mxu1 %v25544_v10 }
 0x461   : > { %3118 = vmatmul.mubr.f32.gmra.mrb[38].mxu0 %v20674_v22 }
 0x462   : > { %16656 = vmatmul.mubr.f32.gmra.mrb[42].mxu1 %v25545_v58  ;;  %3123 = vmatprep.mubr.f32.mxu0 %v25521_v4 }
 0x463   : > { %16658 = vmatprep.mubr.f32.mxu1 %v25546_v15 }
 0x465   : > { %3125 = vmatmul.mubr.f32.gmra.mrb[40].mxu0 %v20705_v40 }
 0x466   : > { %16659 = vmatmul.mubr.f32.gmra.mrb[44].mxu1 %v25547_v38  ;;  %3130 = vmatprep.mubr.f32.mxu0 %v25521_v4 }
 0x467   : > { %16661 = vmatprep.mubr.f32.mxu1 %v25548_v32 }
 0x469   : > { %3132 = vmatmul.mubr.f32.gmra.mrb[42].mxu0 %v20698_v36 }
 0x46a   : > { %16662 = vmatmul.mubr.f32.gmra.mrb[46].mxu1 %v25549_v53  ;;  %3137 = vmatprep.mubr.f32.mxu0 %v25521_v4 }
 0x46b   : > { %16664 = vmatprep.mubr.f32.mxu1 %v25550_v48 }
 0x46d   : > { %3139 = vmatmul.mubr.f32.gmra.mrb[44].mxu0 %v20728_v25 }
 0x46e   : > { %16665 = vmatmul.mubr.f32.gmra.mrb[48].mxu1 %v25551_v30  ;;  %3144 = vmatprep.mubr.f32.mxu0 %v25521_v4 }
 0x46f   : > { %16667 = vmatprep.mubr.f32.mxu1 %v20748_v14  ;;  %v25557_v14 = vld [vmem:[#allocation91_spill] sm:$0xff] }
 0x471   : > { %3146 = vmatmul.mubr.f32.gmra.mrb[46].mxu0 %v20721_v19 }
 0x472   : > { %16668 = vmatmul.mubr.f32.gmra.mrb[50].mxu1 %v20745_v31  ;;  %3224 = vmatprep.mubr.f32.mxu0 %v25521_v4 }
 0x473   : > { %16674 = vmatprep.mubr.f32.mxu1 %v20534_v44 }
 0x475   : > { %3227 = vmatmul.mubr.f32.vlgmr.msra.gmra.mrb[12].mxu0 %v20546_v46 }
 0x476   : > { %16675 = vmatmul.mubr.f32.vlgmr.msra.gmra.mrb[34].mxu1 %v20531_v42  ;;  %3232 = vmatprep.mubr.f32.mxu0 %v25521_v4 }
 0x477   : > { %16677 = vmatprep.mubr.f32.mxu1 %v20558_v0  ;;  %18167 = vmatpush1.bf16.msra.mxu0 %v25557_v14 }
 0x478   : > { %18199 = vmatpush3.bf16.msra.mxu1 %v20434_v6  ;;  %18169 = vmatprep.subr.bf16.mxu0 %v20879_v37 }
 0x479   : > { %3235 = vmatmul.mubr.f32.gmra.mrb[14].mxu0 %v20543_v29  ;;  %v25564_v29 = vld [vmem:[#allocation8_spill] sm:$0xff] }
 0x47a   : > { %16678 = vmatmul.mubr.f32.gmra.mrb[36].mxu1 %v20553_v57  ;;  %3240 = vmatprep.mubr.f32.mxu0 %v25521_v4 }
 0x47b   : > { %16680 = vmatprep.mubr.f32.mxu1 %v20582_v33 }
 0x47d   : > { %3243 = vmatmul.mubr.f32.gmra.mrb[16].mxu0 %v20568_v56  ;;  %v25566_v56 = vld [vmem:[#allocation9_spill] sm:$0xff] }
 0x47e   : > { %16681 = vmatmul.mubr.f32.gmra.mrb[38].mxu1 %v20575_v47  ;;  %3248 = vmatprep.mubr.f32.mxu0 %v25521_v4 }
 0x47f   : > { %16683 = vmatprep.mubr.f32.mxu1 %v20610_v27 }
 0x481   : > { %3251 = vmatmul.mubr.f32.gmra.mrb[18].mxu0 %v20563_v43  ;;  %v5565_v43 = vpop.permute.xlu0 %5564 }
 0x482   : > { %16684 = vmatmul.mubr.f32.gmra.mrb[40].mxu1 %v20604_v2  ;;  %3256 = vmatprep.mubr.f32.mxu0 %v25521_v4 }
 0x483   : > { %16686 = vmatprep.mubr.f32.mxu1 %v20636_v11 }
 0x485   : > { %3259 = vmatmul.mubr.f32.gmra.mrb[20].mxu0 %v20596_v9 }
 0x486   : > { %16687 = vmatmul.mubr.f32.gmra.mrb[42].mxu1 %v20631_v50  ;;  %3264 = vmatprep.mubr.f32.mxu0 %v25521_v4 }
 0x487   : > { %16689 = vmatprep.mubr.f32.mxu1 %v20659_v45 }
 0x489   : > { %3267 = vmatmul.mubr.f32.gmra.mrb[22].mxu0 %v20587_v60 }
 0x48a   : > { %16690 = vmatmul.mubr.f32.gmra.mrb[44].mxu1 %v20654_v34  ;;  %3272 = vmatprep.mubr.f32.mxu0 %v25521_v4 }
 0x48b   : > { %16692 = vmatprep.mubr.f32.mxu1 %v20682_v35 }
 0x48d   : > { %3275 = vmatmul.mubr.f32.gmra.mrb[24].mxu0 %v20623_v16  ;;  %v25565_v16 = vand.u32 4294901760, %v25564_v29  ;;  %v25581_v29 = vld [vmem:[#allocation68_spill] sm:$0xff] }
 0x48e   : > { %16693 = vmatmul.mubr.f32.gmra.mrb[46].mxu1 %v20674_v22  ;;  %3280 = vmatprep.mubr.f32.mxu0 %v25521_v4 }
 0x48f   : > { %16695 = vmatprep.mubr.f32.mxu1 %v20705_v40 }
 0x491   : > { %3283 = vmatmul.mubr.f32.gmra.mrb[26].mxu0 %v20616_v55  ;;  %v25558_v55 = vand.u32 4294901760, %v20488_v41 }
 0x492   : > { %16696 = vmatmul.mubr.f32.gmra.mrb[48].mxu1 %v20698_v36  ;;  %3288 = vmatprep.mubr.f32.mxu0 %v25521_v4 }
 0x493   : > { %16698 = vmatprep.mubr.f32.mxu1 %v20728_v25 }
 0x495   : > { %3291 = vmatmul.mubr.f32.gmra.mrb[28].mxu0 %v20646_v13  ;;  %v427_v13 = vld [vmem:[%s25011_s4 + $0x1d0] sm:$0xff] }
 0x496   : > { %16699 = vmatmul.mubr.f32.gmra.mrb[50].mxu1 %v20721_v19  ;;  %3296 = vmatprep.mubr.f32.mxu0 %v25521_v4 }
 0x497   : > { %16705 = vmatprep.mubr.f32.mxu1 %v20534_v44 }
 0x499   : > { %3299 = vmatmul.mubr.f32.gmra.mrb[30].mxu0 %v20641_v23  ;;  %v25559_v23 = vand.u32 4294901760, %v20490_v63  ;;  %v25561_v63 = vld [vmem:[#allocation112_spill] sm:$0xff] }
 0x49a   : > { %16706 = vmatmul.mubr.f32.vlgmr.msra.gmra.mrb[34].mxu1 %v20531_v42  ;;  %3304 = vmatprep.mubr.f32.mxu0 %v25521_v4 }
 0x49b   : > { %16708 = vmatprep.mubr.f32.mxu1 %v20558_v0  ;;  %v20959_v60 = vpack.c.bf16 %v25559_v23, %v25558_v55  ;;  %v25580_v55 = vld [vmem:[#allocation65_spill] sm:$0xff]  ;;  %v435_v23 = vld [vmem:[%s25011_s4 + $0x210] sm:$0xf] }
 0x49d   : > { %3307 = vmatmul.mubr.f32.gmra.mrb[32].mxu0 %v20672_v17  ;;  %25560 = vst [vmem:[#allocation101_spill] sm:$0xff] %v20959_v60  ;;  %v25562_v17 = vld [vmem:[#allocation7_spill] sm:$0xff] }
 0x49e   : > { %16709 = vmatmul.mubr.f32.gmra.mrb[36].mxu1 %v20553_v57  ;;  %3312 = vmatprep.mubr.f32.mxu0 %v25521_v4 }
 0x49f   : > { %16711 = vmatprep.mubr.f32.mxu1 %v20582_v33 }
 0x4a1   : > { %3315 = vmatmul.mubr.f32.gmra.mrb[34].mxu0 %v20666_v18  ;;  %v25563_v18 = vand.u32 4294901760, %v25562_v17  ;;  %v428_v17 = vld [vmem:[%s25011_s4 + $0x1d8] sm:$0xff] }
 0x4a2   : > { %16712 = vmatmul.mubr.f32.gmra.mrb[38].mxu1 %v20575_v47  ;;  %3320 = vmatprep.mubr.f32.mxu0 %v25521_v4 }
 0x4a3   : > { %16714 = vmatprep.mubr.f32.mxu1 %v20610_v27  ;;  %v21003_v41 = vpack.c.bf16 %v25565_v16, %v25563_v18  ;;  %v25582_v16 = vld [vmem:[#allocation73_spill] sm:$0xff] }
 0x4a5   : > { %3323 = vmatmul.mubr.f32.gmra.mrb[36].mxu0 %v20693_v20 }
 0x4a6   : > { %16715 = vmatmul.mubr.f32.gmra.mrb[40].mxu1 %v20604_v2  ;;  %3328 = vmatprep.mubr.f32.mxu0 %v25521_v4 }
 0x4a7   : > { %16717 = vmatprep.mubr.f32.mxu1 %v20636_v11 }
 0x4a9   : > { %3331 = vmatmul.mubr.f32.gmra.mrb[38].mxu0 %v20688_v62 }
 0x4aa   : > { %16718 = vmatmul.mubr.f32.gmra.mrb[42].mxu1 %v20631_v50  ;;  %3336 = vmatprep.mubr.f32.mxu0 %v25521_v4 }
 0x4ab   : > { %16720 = vmatprep.mubr.f32.mxu1 %v20659_v45 }
 0x4ad   : > { %3339 = vmatmul.mubr.f32.gmra.mrb[40].mxu0 %v20716_v7 }
 0x4ae   : > { %16721 = vmatmul.mubr.f32.gmra.mrb[44].mxu1 %v20654_v34  ;;  %3344 = vmatprep.mubr.f32.mxu0 %v25521_v4 }
 0x4af   : > { %16723 = vmatprep.mubr.f32.mxu1 %v20682_v35 }
 0x4b1   : > { %3347 = vmatmul.mubr.f32.gmra.mrb[42].mxu0 %v20711_v8  ;;  %v430_v8 = vld [vmem:[%s25011_s4 + $0x1e8] sm:$0xff] }
 0x4b2   : > { %16724 = vmatmul.mubr.f32.gmra.mrb[46].mxu1 %v20674_v22  ;;  %3352 = vmatprep.mubr.f32.mxu0 %v25521_v4 }
 0x4b3   : > { %16726 = vmatprep.mubr.f32.mxu1 %v20705_v40 }
 0x4b5   : > { %3355 = vmatmul.mubr.f32.gmra.mrb[44].mxu0 %v20739_v39 }
 0x4b6   : > { %16727 = vmatmul.mubr.f32.gmra.mrb[48].mxu1 %v20698_v36  ;;  %3360 = vmatprep.mubr.f32.mxu0 %v25521_v4 }
 0x4b7   : > { %16729 = vmatprep.mubr.f32.mxu1 %v20728_v25 }
 0x4b9   : > { %3363 = vmatmul.mubr.f32.gmra.mrb[46].mxu0 %v20734_v12  ;;  %v433_v12 = vld [vmem:[%s25011_s4 + $0x200] sm:$0xff] }
 0x4ba   : > { %16730 = vmatmul.mubr.f32.gmra.mrb[50].mxu1 %v20721_v19  ;;  %3437 = vmatprep.mubr.f32.mxu0 %v25521_v4 }
 0x4bd   : > { %3441 = vmatmul.mubr.f32.vlgmr.msra.gmra.mrb[12].mxu0 %v20556_v28  ;;  %v25567_v28 = vand.u32 4294901760, %v25566_v56  ;;  %v25583_v56 = vld [vmem:[#allocation12_spill] sm:$0xff] }
 0x4be   : > { %3446 = vmatprep.mubr.f32.mxu0 %v25521_v4  ;;  %18171 = vmatpush1.bf16.msra.mxu0 %v20959_v60 }
 0x4bf   : > { %18173 = vmatprep.subr.bf16.mxu0 %v20478_v24 }
 0x4c1   : > { %3450 = vmatmul.mubr.f32.gmra.mrb[14].mxu0 %v20550_v26  ;;  %v25568_v26 = vld [vmem:[#allocation11_spill] sm:$0xff] }
 0x4c2   : > { %3455 = vmatprep.mubr.f32.mxu0 %v25521_v4  ;;  %v25569_v20 = vand.u32 4294901760, %v25568_v26  ;;  %v25585_v26 = vld [vmem:[#allocation81_spill] sm:$0xff] }
 0x4c4   : > { %v21047_v46 = vpack.c.bf16 %v25569_v20, %v25567_v28  ;;  %v25584_v28 = vld [vmem:[#allocation78_spill] sm:$0xff]  ;;  %v25586_v20 = vld [vmem:[#allocation83_spill] sm:$0xff] }
 0x4c5   : > { %3459 = vmatmul.mubr.f32.gmra.mrb[16].mxu0 %v20578_v52  ;;  %v21055_v52 = vsel %vm464_vm1, %v5565_v43, 0  ;;  %v25587_v43 = vld [vmem:[#allocation85_spill] sm:$0xff] }
 0x4c6   : > { %3464 = vmatprep.mubr.f32.mxu0 %v25521_v4  ;;  %v21059_v9 = vand.u32 4294901760, %v21055_v52 }
 0x4c9   : > { %3468 = vmatmul.mubr.f32.gmra.mrb[18].mxu0 %v25539_v21  ;;  %v429_v21 = vld [vmem:[%s25011_s4 + $0x1e0] sm:$0xff] }
 0x4ca   : > { %3473 = vmatprep.mubr.f32.mxu0 %v25521_v4 }
 0x4cd   : > { %3477 = vmatmul.mubr.f32.gmra.mrb[20].mxu0 %v25540_v61  ;;  %v432_v61 = vld [vmem:[%s25011_s4 + $0x1f8] sm:$0xff] }
 0x4ce   : > { %3482 = vmatprep.mubr.f32.mxu0 %v25521_v4 }
 0x4d1   : > { %3486 = vmatmul.mubr.f32.gmra.mrb[22].mxu0 %v25541_v5  ;;  %v21149_v5 = vpack.c.bf16 %v432_v61, %v429_v21  ;;  %v25596_v21 = vld [vmem:[#allocation32_spill] sm:$0xff]  ;;  %v25597_v61 = vld [vmem:[#allocation31_spill] sm:$0xff] }
 0x4d2   : > { %3491 = vmatprep.mubr.f32.mxu0 %v25521_v4 }
 0x4d5   : > { %3495 = vmatmul.mubr.f32.gmra.mrb[24].mxu0 %v25542_v54 }
 0x4d6   : > { %3500 = vmatprep.mubr.f32.mxu0 %v25521_v4 }
 0x4d9   : > { %3504 = vmatmul.mubr.f32.gmra.mrb[26].mxu0 %v25543_v59 }
 0x4da   : > { %3509 = vmatprep.mubr.f32.mxu0 %v25521_v4 }
 0x4dd   : > { %3513 = vmatmul.mubr.f32.gmra.mrb[28].mxu0 %v25544_v10 }
 0x4de   : > { %3518 = vmatprep.mubr.f32.mxu0 %v25521_v4 }
 0x4e1   : > { %3522 = vmatmul.mubr.f32.gmra.mrb[30].mxu0 %v25545_v58 }
 0x4e2   : > { %3527 = vmatprep.mubr.f32.mxu0 %v25521_v4 }
 0x4e5   : > { %3531 = vmatmul.mubr.f32.gmra.mrb[32].mxu0 %v25546_v15  ;;  %v25571_v15 = vld [vmem:[#allocation35_spill] sm:$0xff] }
 0x4e6   : > { %3536 = vmatprep.mubr.f32.mxu0 %v25521_v4 }
 0x4e9   : > { %3540 = vmatmul.mubr.f32.gmra.mrb[34].mxu0 %v25547_v38  ;;  %v25573_v38 = vld [vmem:[#allocation41_spill] sm:$0xff] }
 0x4ea   : > { %3545 = vmatprep.mubr.f32.mxu0 %v25521_v4 }
 0x4ed   : > { %3549 = vmatmul.mubr.f32.gmra.mrb[36].mxu0 %v25548_v32  ;;  %v25574_v32 = vld [vmem:[#allocation14_spill] sm:$0xff] }
 0x4ee   : > { %3554 = vmatprep.mubr.f32.mxu0 %v25521_v4 }
 0x4f1   : > { %3558 = vmatmul.mubr.f32.gmra.mrb[38].mxu0 %v25549_v53  ;;  %v25575_v53 = vld [vmem:[#allocation46_spill] sm:$0xff] }
 0x4f2   : > { %3563 = vmatprep.mubr.f32.mxu0 %v25521_v4 }
 0x4f5   : > { %3567 = vmatmul.mubr.f32.gmra.mrb[40].mxu0 %v25550_v48  ;;  %v21177_v48 = vsub.f32 %v21055_v52, %v21059_v9  ;;  %v25588_v52 = vld [vmem:[#allocation86_spill] sm:$0xff] }
 0x4f6   : > { %3572 = vmatprep.mubr.f32.mxu0 %v25521_v4 }
 0x4f9   : > { %3576 = vmatmul.mubr.f32.gmra.mrb[42].mxu0 %v25551_v30  ;;  %v25577_v30 = vld [vmem:[#allocation53_spill] sm:$0xff] }
 0x4fa   : > { %3581 = vmatprep.mubr.f32.mxu0 %v25521_v4 }
 0x4fd   : > { %3585 = vmatmul.mubr.f32.gmra.mrb[44].mxu0 %v25561_v63  ;;  %v425_v63 = vld [vmem:[%s25011_s4 + $0x1c0] sm:$0xff] }
 0x4fe   : > { %3590 = vmatprep.mubr.f32.mxu0 %v25521_v4  ;;  %v21197_v18 = vpack.c.bf16 %v428_v17, %v425_v63  ;;  %v25607_v63 = vld [vmem:[#allocation69_spill] sm:$0xff]  ;;  %v25608_v17 = vld [vmem:[#allocation80_spill] sm:$0xff] }
 0x501   : > { %3594 = vmatmul.mubr.f32.gmra.mrb[46].mxu0 %v20745_v31  ;;  %v21129_v31 = vpack.c.bf16 %v433_v12, %v430_v8  ;;  %v25594_v8 = vld [vmem:[#allocation15_spill] sm:$0xff]  ;;  %v25595_v12 = vld [vmem:[#allocation22_spill] sm:$0xff] }
 0x502   : > { %3676 = vmatprep.mubr.f32.mxu0 %v25521_v4 }
 0x505   : > { %3678 = vmatmul.mubr.f32.vlgmr.msra.gmra.mrb[12].mxu0 %v20534_v44 }
 0x506   : > { %18175 = vmatpush1.bf16.msra.mxu0 %v25557_v14  ;;  %3683 = vmatprep.mubr.f32.mxu0 %v25521_v4 }
 0x507   : > { %18217 = vmatprep.subr.bf16.mxu0 %v21003_v41 }
 0x509   : > { %3685 = vmatmul.mubr.f32.gmra.mrb[14].mxu0 %v20531_v42 }
 0x50a   : > { %3690 = vmatprep.mubr.f32.mxu0 %v25521_v4 }
 0x50d   : > { %3692 = vmatmul.mubr.f32.gmra.mrb[16].mxu0 %v20558_v0 }
 0x50e   : > { %3697 = vmatprep.mubr.f32.mxu0 %v25521_v4 }
 0x511   : > { %3699 = vmatmul.mubr.f32.gmra.mrb[18].mxu0 %v20553_v57 }
 0x512   : > { %3704 = vmatprep.mubr.f32.mxu0 %v25521_v4 }
 0x515   : > { %3706 = vmatmul.mubr.f32.gmra.mrb[20].mxu0 %v20582_v33 }
 0x516   : > { %3711 = vmatprep.mubr.f32.mxu0 %v25521_v4 }
 0x519   : > { %3713 = vmatmul.mubr.f32.gmra.mrb[22].mxu0 %v20575_v47 }
 0x51a   : > { %3718 = vmatprep.mubr.f32.mxu0 %v25521_v4 }
 0x51d   : > { %3720 = vmatmul.mubr.f32.gmra.mrb[24].mxu0 %v20610_v27 }
 0x51e   : > { %3725 = vmatprep.mubr.f32.mxu0 %v25521_v4 }
 0x521   : > { %3727 = vmatmul.mubr.f32.gmra.mrb[26].mxu0 %v20604_v2 }
 0x522   : > { %3732 = vmatprep.mubr.f32.mxu0 %v25521_v4 }
 0x525   : > { %3734 = vmatmul.mubr.f32.gmra.mrb[28].mxu0 %v20636_v11 }
 0x526   : > { %3739 = vmatprep.mubr.f32.mxu0 %v25521_v4 }
 0x529   : > { %3741 = vmatmul.mubr.f32.gmra.mrb[30].mxu0 %v20631_v50 }
 0x52a   : > { %3746 = vmatprep.mubr.f32.mxu0 %v25521_v4 }
 0x52d   : > { %3748 = vmatmul.mubr.f32.gmra.mrb[32].mxu0 %v20659_v45 }
 0x52e   : > { %3753 = vmatprep.mubr.f32.mxu0 %v25521_v4 }
 0x531   : > { %3755 = vmatmul.mubr.f32.gmra.mrb[34].mxu0 %v20654_v34 }
 0x532   : > { %3760 = vmatprep.mubr.f32.mxu0 %v25521_v4 }
 0x535   : > { %3762 = vmatmul.mubr.f32.gmra.mrb[36].mxu0 %v20682_v35 }
 0x536   : > { %3767 = vmatprep.mubr.f32.mxu0 %v25521_v4 }
 0x539   : > { %3769 = vmatmul.mubr.f32.gmra.mrb[38].mxu0 %v20674_v22 }
 0x53a   : > { %3774 = vmatprep.mubr.f32.mxu0 %v25521_v4 }
 0x53d   : > { %3776 = vmatmul.mubr.f32.gmra.mrb[40].mxu0 %v20705_v40 }
 0x53e   : > { %3781 = vmatprep.mubr.f32.mxu0 %v25521_v4 }
 0x541   : > { %3783 = vmatmul.mubr.f32.gmra.mrb[42].mxu0 %v20698_v36 }
 0x542   : > { %3788 = vmatprep.mubr.f32.mxu0 %v25521_v4 }
 0x545   : > { %3790 = vmatmul.mubr.f32.gmra.mrb[44].mxu0 %v20728_v25 }
 0x546   : > { %3795 = vmatprep.mubr.f32.mxu0 %v25521_v4 }
 0x549   : > { %3797 = vmatmul.mubr.f32.gmra.mrb[46].mxu0 %v20721_v19 }
 0x54a   : > { %3871 = vmatprep.mubr.f32.mxu0 %v25521_v4 }
 0x54d   : > { %3873 = vmatmul.mubr.f32.vlgmr.msra.gmra.mrb[12].mxu0 %v20534_v44 }
 0x54e   : > { %18219 = vmatpush3.bf16.xpose.msra.mxu0 %v21003_v41  ;;  %3878 = vmatprep.mubr.f32.mxu0 %v25521_v4 }
 0x54f   : > { %18221 = vmatprep.subr.bf16.mxu0 %v21047_v46 }
 0x551   : > { %3880 = vmatmul.mubr.f32.gmra.mrb[14].mxu0 %v20531_v42  ;;  %v25570_v42 = vld [vmem:[#allocation10_spill] sm:$0xff] }
 0x552   : > { %3885 = vmatprep.mubr.f32.mxu0 %v25521_v4 }
 0x555   : > { %3887 = vmatmul.mubr.f32.gmra.mrb[16].mxu0 %v20558_v0 }
 0x556   : > { %18223 = vmatpush3.bf16.xpose.msra.mxu0 %v21047_v46  ;;  %3892 = vmatprep.mubr.f32.mxu0 %v25521_v4 }
 0x557   : > { %16777 = vmatprep.subr.mxu0 %v21059_v9 }
 0x559   : > { %3894 = vmatmul.mubr.f32.gmra.mrb[18].mxu0 %v20553_v57 }
 0x55a   : > { %3899 = vmatprep.mubr.f32.mxu0 %v25521_v4 }
 0x55d   : > { %3901 = vmatmul.mubr.f32.gmra.mrb[20].mxu0 %v20582_v33 }
 0x55e   : > { %16778 = vmatpush3.xpose.msra.mxu0 %v21059_v9  ;;  %3906 = vmatprep.mubr.f32.mxu0 %v25521_v4 }
 0x55f   : > { %18233 = vmatprep.subr.bf16.mxu0 %v25570_v42 }
 0x561   : > { %3908 = vmatmul.mubr.f32.gmra.mrb[22].mxu0 %v20575_v47 }
 0x562   : > { %3913 = vmatprep.mubr.f32.mxu0 %v25521_v4 }
 0x565   : > { %3915 = vmatmul.mubr.f32.gmra.mrb[24].mxu0 %v20610_v27 }
 0x566   : > { %3920 = vmatprep.mubr.f32.mxu0 %v25521_v4 }
 0x569   : > { %3922 = vmatmul.mubr.f32.gmra.mrb[26].mxu0 %v20604_v2 }
 0x56a   : > { %3927 = vmatprep.mubr.f32.mxu0 %v25521_v4 }
 0x56d   : > { %3929 = vmatmul.mubr.f32.gmra.mrb[28].mxu0 %v20636_v11  ;;  %v21078_v33 = vpop.f32.mrb[34].mxu1 }
 0x56e   : > { %v21080_v57 = vpop.f32.mrb[35].mxu1  ;;  %3934 = vmatprep.mubr.f32.mxu0 %v25521_v4 }
 0x571   : > { %3936 = vmatmul.mubr.f32.gmra.mrb[30].mxu0 %v20631_v50  ;;  %v21084_v0 = vpop.f32.mrb[36].mxu1 }
 0x572   : > { %v21086_v44 = vpop.f32.mrb[37].mxu1  ;;  %3941 = vmatprep.mubr.f32.mxu0 %v25521_v4 }
 0x575   : > { %3943 = vmatmul.mubr.f32.gmra.mrb[32].mxu0 %v20659_v45  ;;  %v21090_v2 = vpop.f32.mrb[38].mxu1  ;;  %v424_v45 = vld [vmem:[%s25011_s4 + $0x1b8] sm:$0xff] }
 0x576   : > { %v21092_v47 = vpop.f32.mrb[39].mxu1  ;;  %3948 = vmatprep.mubr.f32.mxu0 %v25521_v4  ;;  %v21116_v62 = vpack.c.bf16 %v427_v13, %v424_v45  ;;  %v25590_v45 = vld [vmem:[#allocation88_spill] sm:$0xff]  ;;  %v25591_v13 = vld [vmem:[#allocation23_spill] sm:$0xff] }
 0x578   : > { %18201 = vmatprep.subr.bf16.mxu1 %v21116_v62 }
 0x579   : > { %3950 = vmatmul.mubr.f32.gmra.mrb[34].mxu0 %v20654_v34  ;;  %v21096_v11 = vpop.f32.mrb[40].mxu1  ;;  %v423_v34 = vld [vmem:[%s25011_s4 + $0x1b0] sm:$0xff] }
 0x57a   : > { %v21098_v27 = vpop.f32.mrb[41].mxu1  ;;  %3955 = vmatprep.mubr.f32.mxu0 %v25521_v4 }
 0x57d   : > { %3957 = vmatmul.mubr.f32.gmra.mrb[36].mxu0 %v20682_v35  ;;  %v21102_v50 = vpop.f32.mrb[42].mxu1  ;;  %v426_v35 = vld [vmem:[%s25011_s4 + $0x1c8] sm:$0xff] }
 0x57e   : > { %v21113_v7 = vpop.f32.mrb[43].mxu1  ;;  %3962 = vmatprep.mubr.f32.mxu0 %v25521_v4  ;;  %v21127_v39 = vpack.c.bf16 %v426_v35, %v423_v34  ;;  %v25592_v34 = vld [vmem:[#allocation21_spill] sm:$0xff]  ;;  %v25593_v35 = vld [vmem:[#allocation24_spill] sm:$0xff] }
 0x580   : > { %18203 = vmatpush1.bf16.xpose.msra.mxu1 %v21127_v39 }
 0x581   : > { %3964 = vmatmul.mubr.f32.gmra.mrb[38].mxu0 %v20674_v22  ;;  %v21133_v3 = vpop.f32.mrb[44].mxu1  ;;  %18205 = vmatprep.subr.bf16.mxu1 %v21129_v31 }
 0x582   : > { %v21136_v1 = vpop.f32.mrb[45].mxu1  ;;  %3969 = vmatprep.mubr.f32.mxu0 %v25521_v4 }
 0x585   : > { %3971 = vmatmul.mubr.f32.gmra.mrb[40].mxu0 %v20705_v40  ;;  %v21147_v22 = vpop.f32.mrb[46].mxu1 }
 0x586   : > { %v21151_v54 = vpop.f32.mrb[47].mxu1  ;;  %3976 = vmatprep.mubr.f32.mxu0 %v25521_v4 }
 0x588   : > { %18207 = vmatpush1.bf16.xpose.msra.mxu1 %v21149_v5 }
 0x589   : > { %3978 = vmatmul.mubr.f32.gmra.mrb[42].mxu0 %v20698_v36  ;;  %v21155_v59 = vpop.f32.mrb[48].mxu1  ;;  %v25572_v36 = vld [vmem:[#allocation36_spill] sm:$0xff]  ;;  %5250 = vmatprep.subr.mxu1 %v436_v49 }
 0x58a   : > { %v21158_v10 = vpop.f32.mrb[49].mxu1  ;;  %3983 = vmatprep.mubr.f32.mxu0 %v25521_v4 }
 0x58d   : > { %3985 = vmatmul.mubr.f32.gmra.mrb[44].mxu0 %v20728_v25  ;;  %v21162_v40 = vpop.f32.mrb[50].mxu1  ;;  %v25576_v25 = vld [vmem:[#allocation49_spill] sm:$0xff] }
 0x58e   : > { %v21164_v58 = vpop.f32.mrb[51].mxu1  ;;  %3990 = vmatprep.mubr.f32.mxu0 %v25521_v4 }
 0x590   : > { %5251 = vmatpush1.xpose.msra.mxu1 %v435_v23 }
 0x591   : > { %3992 = vmatmul.mubr.f32.gmra.mrb[46].mxu0 %v20721_v19  ;;  %v25578_v19 = vld [vmem:[#allocation57_spill] sm:$0xff]  ;;  %18209 = vmatprep.subr.bf16.mxu1 %v21197_v18 }
 0x592   : > { %16779 = vmatprep.mubr.f32.mxu0 %v25571_v15  ;;  %v21220_v15 = vand.u32 4294901760, %v21177_v48 }
 0x595   : > { %16780 = vmatmul.mubr.f32.vlgmr.msra.gmra.mrb[48].mxu0 %v25572_v36  ;;  %v25598_v36 = vld [vmem:[#allocation40_spill] sm:$0xff] }
 0x596   : > { %18235 = vmatpush3.bf16.xpose.msra.mxu0 %v25570_v42  ;;  %16782 = vmatprep.mubr.f32.mxu0 %v25573_v38  ;;  %v25589_v42 = vld [vmem:[#allocation87_spill] sm:$0xff]  ;;  %v25599_v38 = vld [vmem:[#allocation37_spill] sm:$0xff] }
 0x597   : > { %18237 = vmatprep.subr.bf16.mxu0 %v25574_v32 }
 0x599   : > { %16783 = vmatmul.mubr.f32.gmra.mrb[50].mxu0 %v25575_v53  ;;  %v25601_v53 = vld [vmem:[#allocation45_spill] sm:$0xff] }
 0x59a   : > { %16785 = vmatprep.mubr.f32.mxu0 %v25576_v25  ;;  %v25602_v25 = vld [vmem:[#allocation56_spill] sm:$0xff] }
 0x59d   : > { %16786 = vmatmul.mubr.f32.gmra.mrb[52].mxu0 %v25577_v30  ;;  %v25603_v30 = vld [vmem:[#allocation54_spill] sm:$0xff] }
 0x59e   : > { %18239 = vmatpush3.bf16.xpose.msra.mxu0 %v25574_v32  ;;  %16788 = vmatprep.mubr.f32.mxu0 %v25578_v19  ;;  %v25600_v32 = vld [vmem:[#allocation48_spill] sm:$0xff] }
 0x59f   : > { %16851 = vmatprep.subr.mxu0 %v21177_v48  ;;  %v25604_v19 = vld [vmem:[#allocation64_spill] sm:$0xff] }
 0x5a1   : > { %16789 = vmatmul.mubr.f32.gmra.mrb[54].mxu0 %v25579_v51  ;;  %v25605_v51 = vld [vmem:[#allocation62_spill] sm:$0xff] }
 0x5a2   : > { %16791 = vmatprep.mubr.f32.mxu0 %v25580_v55  ;;  %v25606_v55 = vld [vmem:[#allocation72_spill] sm:$0xff] }
 0x5a5   : > { %16792 = vmatmul.mubr.f32.gmra.mrb[56].mxu0 %v25581_v29  ;;  %v25609_v29 = vld [vmem:[#allocation77_spill] sm:$0xff] }
 0x5a6   : > { %16852 = vmatpush3.xpose.msra.mxu0 %v21177_v48  ;;  %16794 = vmatprep.mubr.f32.mxu0 %v25582_v16  ;;  %v25610_v16 = vld [vmem:[#allocation19_spill] sm:$0xff] }
 0x5a7   : > { %18249 = vmatprep.subr.bf16.mxu0 %v25583_v56 }
 0x5a9   : > { %16795 = vmatmul.mubr.f32.gmra.mrb[58].mxu0 %v25584_v28  ;;  %v25612_v28 = vld [vmem:[#allocation20_spill] sm:$0xff] }
 0x5aa   : > { %16797 = vmatprep.mubr.f32.mxu0 %v25585_v26  ;;  %v25614_v26 = vld [vmem:[#allocation28_spill] sm:$0xff] }
 0x5ad   : > { %16798 = vmatmul.mubr.f32.gmra.mrb[60].mxu0 %v25586_v20  ;;  %v25615_v20 = vld [vmem:[#allocation26_spill] sm:$0xff] }
 0x5ae   : > { %16800 = vmatprep.mubr.f32.mxu0 %v25587_v43  ;;  %v25616_v43 = vld [vmem:[#allocation34_spill] sm:$0xff] }
 0x5b1   : > { %16801 = vmatmul.mubr.f32.gmra.mrb[62].mxu0 %v25588_v52  ;;  %v25617_v52 = vld [vmem:[#allocation33_spill] sm:$0xff] }
 0x5b2   : > { %16803 = vmatprep.mubr.f32.mxu0 %v25589_v42  ;;  %v25620_v42 = vld [vmem:[#allocation52_spill] sm:$0xff] }
 0x5b5   : > { %16804 = vmatmul.mubr.f32.gmra.mrb[64].mxu0 %v25590_v45  ;;  %v25621_v45 = vld [vmem:[#allocation50_spill] sm:$0xff] }
 0x5b6   : > { %16853 = vmatprep.mubr.f32.mxu0 %v25591_v13  ;;  %v25624_v13 = vld [vmem:[#allocation67_spill] sm:$0xff] }
 0x5b9   : > { %16854 = vmatmul.mubr.f32.vlgmr.msra.gmra.mrb[66].mxu0 %v25592_v34  ;;  %v25625_v34 = vld [vmem:[#allocation66_spill] sm:$0xff] }
 0x5ba   : > { %18251 = vmatpush3.bf16.xpose.msra.mxu0 %v25583_v56  ;;  %16856 = vmatprep.mubr.f32.mxu0 %v25593_v35  ;;  %v25611_v56 = vld [vmem:[#allocation17_spill] sm:$0xff]  ;;  %v25627_v35 = vld [vmem:[#allocation74_spill] sm:$0xff] }
 0x5bb   : > { %18253 = vmatprep.subr.bf16.mxu0 %v25594_v8 }
 0x5bd   : > { %16857 = vmatmul.mubr.f32.gmra.mrb[68].mxu0 %v25595_v12  ;;  %v369_v12 = vld [vmem:[%s25011_s4] sm:$0xff] }
 0x5be   : > { %16859 = vmatprep.mubr.f32.mxu0 %v25596_v21 }
 0x5c1   : > { %16860 = vmatmul.mubr.f32.gmra.mrb[70].mxu0 %v25597_v61  ;;  %v431_v61 = vld [vmem:[%s25011_s4 + $0x1f0] sm:$0xff] }
 0x5c2   : > { %18255 = vmatpush3.bf16.xpose.msra.mxu0 %v25594_v8  ;;  %16862 = vmatprep.mubr.f32.mxu0 %v25598_v36  ;;  %v370_v8 = vld [vmem:[%s25011_s4 + $0x8] sm:$0xff] }
 0x5c3   : > { %16925 = vmatprep.subr.mxu0 %v21220_v15  ;;  %v434_v36 = vld [vmem:[%s25011_s4 + $0x208] sm:$0xff] }
 0x5c5   : > { %16863 = vmatmul.mubr.f32.gmra.mrb[72].mxu0 %v25599_v38 }
 0x5c6   : > { %16865 = vmatprep.mubr.f32.mxu0 %v25600_v32 }
 0x5c9   : > { %16866 = vmatmul.mubr.f32.gmra.mrb[74].mxu0 %v25601_v53 }
 0x5ca   : > { %16926 = vmatpush3.xpose.msra.mxu0 %v21220_v15  ;;  %16868 = vmatprep.mubr.f32.mxu0 %v25602_v25  ;;  %v373_v25 = vld [vmem:[%s25011_s4 + $0x20] sm:$0xff] }
 0x5cb   : > { %18265 = vmatprep.subr.bf16.mxu0 %v21116_v62  ;;  %v25613_v62 = vld [vmem:[#allocation18_spill] sm:$0xff] }
 0x5cd   : > { %16869 = vmatmul.mubr.f32.gmra.mrb[76].mxu0 %v25603_v30  ;;  %v21278_v30 = vpack.c.bf16 %v434_v36, %v431_v61 }
 0x5ce   : > { %16871 = vmatprep.mubr.f32.mxu0 %v25604_v19  ;;  %v372_v19 = vld [vmem:[%s25011_s4 + $0x18] sm:$0xff] }
 0x5d1   : > { %16872 = vmatmul.mubr.f32.gmra.mrb[78].mxu0 %v25605_v51 }
 0x5d2   : > { %16874 = vmatprep.mubr.f32.mxu0 %v25606_v55 }
 0x5d5   : > { %16875 = vmatmul.mubr.f32.gmra.mrb[80].mxu0 %v25607_v63 }
 0x5d6   : > { %16877 = vmatprep.mubr.f32.mxu0 %v25608_v17 }
 0x5d9   : > { %16878 = vmatmul.mubr.f32.gmra.mrb[82].mxu0 %v25609_v29  ;;  %v376_v29 = vld [vmem:[%s25011_s4 + $0x38] sm:$0xff] }
 0x5da   : > { %16927 = vmatprep.mubr.f32.mxu0 %v25610_v16 }
 0x5dd   : > { %16928 = vmatmul.mubr.f32.vlgmr.msra.gmra.mrb[84].mxu0 %v25611_v56 }
 0x5de   : > { %16930 = vmatprep.mubr.f32.mxu0 %v25612_v28  ;;  %18267 = vmatpush1.bf16.msra.mxu0 %v21127_v39  ;;  %v25618_v39 = vld [vmem:[#allocation43_spill] sm:$0xff] }
 0x5df   : > { %18269 = vmatprep.subr.bf16.mxu0 %v21129_v31  ;;  %v25619_v31 = vld [vmem:[#allocation42_spill] sm:$0xff] }
 0x5e1   : > { %16931 = vmatmul.mubr.f32.gmra.mrb[86].mxu0 %v25613_v62 }
 0x5e2   : > { %16933 = vmatprep.mubr.f32.mxu0 %v25614_v26  ;;  %18271 = vmatpush1.bf16.msra.mxu0 %v21149_v5  ;;  %v25622_v5 = vld [vmem:[#allocation59_spill] sm:$0xff] }
 0x5e3   : > { %15072 = vmatprep.subr.msk.mxu0 %vm1192_vm3, %v436_v49  ;;  %v25623_v49 = vld [vmem:[#allocation58_spill] sm:$0xff] }
 0x5e5   : > { %16934 = vmatmul.mubr.f32.gmra.mrb[88].mxu0 %v25615_v20 }
 0x5e6   : > { %16936 = vmatprep.mubr.f32.mxu0 %v25616_v43  ;;  %15073 = vmatpush1.msk.msra.mxu0 %vm1192_vm3, %v435_v23  ;;  %v25626_v23 = vld [vmem:[#allocation75_spill] sm:$0xff] }
 0x5e7   : > { %18305 = vmatprep.subr.bf16.mxu0 %v20434_v6 }
 0x5e9   : > { %16937 = vmatmul.mubr.f32.gmra.mrb[90].mxu0 %v25617_v52 }
 0x5ea   : > { %16939 = vmatprep.mubr.f32.mxu0 %v25618_v39 }
 0x5ed   : > { %16940 = vmatmul.mubr.f32.gmra.mrb[92].mxu0 %v25619_v31 }
 0x5ee   : > { %16942 = vmatprep.mubr.f32.mxu0 %v25620_v42 }
 0x5f1   : > { %16943 = vmatmul.mubr.f32.gmra.mrb[94].mxu0 %v25621_v45 }
 0x5f2   : > { %16945 = vmatprep.mubr.f32.mxu0 %v25622_v5 }
 0x5f5   : > { %16946 = vmatmul.mubr.f32.gmra.mrb[96].mxu0 %v25623_v49 }
 0x5f6   : > { %16948 = vmatprep.mubr.f32.mxu0 %v25624_v13 }
 0x5f9   : > { %16949 = vmatmul.mubr.f32.gmra.mrb[98].mxu0 %v25625_v34 }
 0x5fa   : > { %16951 = vmatprep.mubr.f32.mxu0 %v25626_v23 }
 0x5fd   : > { %16952 = vmatmul.mubr.f32.gmra.mrb[100].mxu0 %v25627_v35 }
 0x5fe   : > { %7184 = vmatprep.mubr.f32.mxu0 %v25521_v4  ;;  %v25638_v4 = vld [vmem:[#allocation29_spill] sm:$0xff] }
 0x620   : > { %v3874_v21 = vpop.f32.mrb[12].mxu0 }
 0x621   : > { %v3876_v38 = vpop.f32.mrb[13].mxu0  ;;  %v5188_v53 = vmul.f32 %v3874_v21, %v369_v12 }
 0x622   : > { %v5189_v32 = vmul.f32 %v3876_v38, %v370_v8  ;;  %v375_v8 = vld [vmem:[%s25011_s4 + $0x30] sm:$0xff] }
 0x623   : > { %v379_v38 = vld [vmem:[%s25011_s4 + $0x50] sm:$0xff] }
 0x624   : > { %v3881_v51 = vpop.f32.mrb[14].mxu0  ;;  %5306 = vmatprep.mubr.f32.mxu1 %v5189_v32  ;;  %v378_v32 = vld [vmem:[%s25011_s4 + $0x48] sm:$0xff] }
 0x625   : > { %v3883_v55 = vpop.f32.mrb[15].mxu0  ;;  %5307 = vmatmul.mubr.f32.vlgmr.msra.gmra.mrb[52].mxu1 %v5188_v53  ;;  %v5191_v17 = vmul.f32 %v3881_v51, %v372_v19 }
 0x626   : > { %v5192_v63 = vmul.f32 %v3883_v55, %v373_v25  ;;  %18211 = vmatpush3.bf16.xpose.msra.mxu1 %v21197_v18  ;;  %v21300_v25 = vld [vmem:[%s25011_s4 + $0x220] sm:$0xf] }
 0x627   : > { %18213 = vmatprep.subr.bf16.mxu1 %v21278_v30 }
 0x628   : > { %v3888_v12 = vpop.f32.mrb[16].mxu0  ;;  %5311 = vmatprep.mubr.f32.mxu1 %v5192_v63  ;;  %v382_v63 = vld [vmem:[%s25011_s4 + $0x68] sm:$0xff] }
 0x629   : > { %v3890_v21 = vpop.f32.mrb[17].mxu0  ;;  %5312 = vmatmul.mubr.f32.gmra.mrb[54].mxu1 %v5191_v17  ;;  %v5194_v36 = vmul.f32 %v3888_v12, %v375_v8  ;;  %v381_v17 = vld [vmem:[%s25011_s4 + $0x60] sm:$0xff] }
 0x62a   : > { %v5195_v61 = vmul.f32 %v3890_v21, %v376_v29 }
 0x62c   : > { %v3895_v53 = vpop.f32.mrb[18].mxu0  ;;  %5316 = vmatprep.mubr.f32.mxu1 %v5195_v61  ;;  %v385_v61 = vld [vmem:[%s25011_s4 + $0x80] sm:$0xff] }
 0x62d   : > { %v3897_v19 = vpop.f32.mrb[19].mxu0  ;;  %5317 = vmatmul.mubr.f32.gmra.mrb[56].mxu1 %v5194_v36  ;;  %v5197_v55 = vmul.f32 %v3895_v53, %v378_v32  ;;  %v384_v36 = vld [vmem:[%s25011_s4 + $0x78] sm:$0xff] }
 0x62e   : > { %v5198_v51 = vmul.f32 %v3897_v19, %v379_v38  ;;  %18215 = vmatpush3.bf16.xpose.msra.mxu1 %v21278_v30 }
 0x62f   : > { %16740 = vmatprep.subr.mxu1 %v21300_v25 }
 0x630   : > { %v3902_v29 = vpop.f32.mrb[20].mxu0  ;;  %5321 = vmatprep.mubr.f32.mxu1 %v5198_v51  ;;  %v25628_v51 = vld [vmem:[#allocation13_spill] sm:$0xff] }
 0x631   : > { %v3904_v8 = vpop.f32.mrb[21].mxu0  ;;  %5322 = vmatmul.mubr.f32.gmra.mrb[58].mxu1 %v5197_v55  ;;  %v5200_v21 = vmul.f32 %v3902_v29, %v381_v17  ;;  %v388_v55 = vld [vmem:[%s25011_s4 + $0x98] sm:$0xff] }
 0x632   : > { %v5201_v12 = vmul.f32 %v3904_v8, %v382_v63  ;;  %v387_v63 = vld [vmem:[%s25011_s4 + $0x90] sm:$0xff] }
 0x634   : > { %v3909_v38 = vpop.f32.mrb[22].mxu0  ;;  %5326 = vmatprep.mubr.f32.mxu1 %v5201_v12 }
 0x635   : > { %v3911_v32 = vpop.f32.mrb[23].mxu0  ;;  %5327 = vmatmul.mubr.f32.gmra.mrb[60].mxu1 %v5200_v21  ;;  %v5203_v19 = vmul.f32 %v3909_v38, %v384_v36  ;;  %v391_v21 = vld [vmem:[%s25011_s4 + $0xb0] sm:$0xff] }
 0x636   : > { %v5204_v53 = vmul.f32 %v3911_v32, %v385_v61  ;;  %16741 = vmatpush3.xpose.msra.mxu1 %v21300_v25  ;;  %v390_v61 = vld [vmem:[%s25011_s4 + $0xa8] sm:$0xff] }
 0x637   : > { %18225 = vmatprep.subr.bf16.mxu1 %v25628_v51 }
 0x638   : > { %v3916_v17 = vpop.f32.mrb[24].mxu0  ;;  %5331 = vmatprep.mubr.f32.mxu1 %v5204_v53  ;;  %v394_v53 = vld [vmem:[%s25011_s4 + $0xc8] sm:$0xff] }
 0x639   : > { %v3918_v29 = vpop.f32.mrb[25].mxu0  ;;  %5332 = vmatmul.mubr.f32.gmra.mrb[62].mxu1 %v5203_v19  ;;  %v5206_v12 = vmul.f32 %v3916_v17, %v387_v63  ;;  %v393_v19 = vld [vmem:[%s25011_s4 + $0xc0] sm:$0xff] }
 0x63a   : > { %v5207_v8 = vmul.f32 %v3918_v29, %v388_v55 }
 0x63c   : > { %v3923_v36 = vpop.f32.mrb[26].mxu0  ;;  %5336 = vmatprep.mubr.f32.mxu1 %v5207_v8  ;;  %v397_v8 = vld [vmem:[%s25011_s4 + $0xe0] sm:$0xff] }
 0x63d   : > { %v3925_v38 = vpop.f32.mrb[27].mxu0  ;;  %5337 = vmatmul.mubr.f32.gmra.mrb[64].mxu1 %v5206_v12  ;;  %v5209_v60 = vmul.f32 %v3923_v36, %v390_v61  ;;  %v396_v12 = vld [vmem:[%s25011_s4 + $0xd8] sm:$0xff] }
 0x63e   : > { %v5210_v32 = vmul.f32 %v3925_v38, %v391_v21 }
 0x640   : > { %v3930_v55 = vpop.f32.mrb[28].mxu0  ;;  %5341 = vmatprep.mubr.f32.mxu1 %v5210_v32  ;;  %v399_v32 = vld [vmem:[%s25011_s4 + $0xf0] sm:$0xff] }
 0x641   : > { %v3932_v63 = vpop.f32.mrb[29].mxu0  ;;  %5342 = vmatmul.mubr.f32.gmra.mrb[66].mxu1 %v5209_v60  ;;  %v5212_v29 = vmul.f32 %v3930_v55, %v393_v19  ;;  %v400_v60 = vld [vmem:[%s25011_s4 + $0xf8] sm:$0xff] }
 0x642   : > { %v5213_v17 = vmul.f32 %v3932_v63, %v394_v53 }
 0x644   : > { %v3937_v21 = vpop.f32.mrb[30].mxu0  ;;  %5346 = vmatprep.mubr.f32.mxu1 %v5213_v17  ;;  %v403_v17 = vld [vmem:[%s25011_s4 + $0x110] sm:$0xff] }
 0x645   : > { %v3939_v61 = vpop.f32.mrb[31].mxu0  ;;  %5347 = vmatmul.mubr.f32.gmra.mrb[68].mxu1 %v5212_v29  ;;  %v5215_v38 = vmul.f32 %v3937_v21, %v396_v12  ;;  %v402_v29 = vld [vmem:[%s25011_s4 + $0x108] sm:$0xff] }
 0x646   : > { %v5216_v36 = vmul.f32 %v3939_v61, %v397_v8 }
 0x648   : > { %v3944_v53 = vpop.f32.mrb[32].mxu0  ;;  %5351 = vmatprep.mubr.f32.mxu1 %v5216_v36  ;;  %v406_v36 = vld [vmem:[%s25011_s4 + $0x128] sm:$0xff] }
 0x649   : > { %v3946_v19 = vpop.f32.mrb[33].mxu0  ;;  %5352 = vmatmul.mubr.f32.gmra.mrb[70].mxu1 %v5215_v38  ;;  %v5218_v63 = vmul.f32 %v3944_v53, %v399_v32  ;;  %v405_v38 = vld [vmem:[%s25011_s4 + $0x120] sm:$0xff] }
 0x64a   : > { %v5219_v55 = vmul.f32 %v3946_v19, %v400_v60 }
 0x64c   : > { %v3951_v8 = vpop.f32.mrb[34].mxu0  ;;  %5356 = vmatprep.mubr.f32.mxu1 %v5219_v55  ;;  %v409_v55 = vld [vmem:[%s25011_s4 + $0x140] sm:$0xff] }
 0x64d   : > { %v3953_v12 = vpop.f32.mrb[35].mxu0  ;;  %5357 = vmatmul.mubr.f32.gmra.mrb[72].mxu1 %v5218_v63  ;;  %v5221_v61 = vmul.f32 %v3951_v8, %v402_v29  ;;  %v408_v63 = vld [vmem:[%s25011_s4 + $0x138] sm:$0xff] }
 0x64e   : > { %v5222_v21 = vmul.f32 %v3953_v12, %v403_v17 }
 0x650   : > { %v3958_v60 = vpop.f32.mrb[36].mxu0  ;;  %5361 = vmatprep.mubr.f32.mxu1 %v5222_v21  ;;  %v412_v21 = vld [vmem:[%s25011_s4 + $0x158] sm:$0xff] }
 0x651   : > { %v3960_v32 = vpop.f32.mrb[37].mxu0  ;;  %5362 = vmatmul.mubr.f32.gmra.mrb[74].mxu1 %v5221_v61  ;;  %v5224_v19 = vmul.f32 %v3958_v60, %v405_v38  ;;  %v411_v61 = vld [vmem:[%s25011_s4 + $0x150] sm:$0xff] }
 0x652   : > { %v5225_v53 = vmul.f32 %v3960_v32, %v406_v36 }
 0x654   : > { %v3965_v17 = vpop.f32.mrb[38].mxu0  ;;  %5366 = vmatprep.mubr.f32.mxu1 %v5225_v53  ;;  %v415_v53 = vld [vmem:[%s25011_s4 + $0x170] sm:$0xff] }
 0x655   : > { %v3967_v29 = vpop.f32.mrb[39].mxu0  ;;  %5367 = vmatmul.mubr.f32.gmra.mrb[76].mxu1 %v5224_v19  ;;  %v5227_v12 = vmul.f32 %v3965_v17, %v408_v63  ;;  %v414_v19 = vld [vmem:[%s25011_s4 + $0x168] sm:$0xff] }
 0x656   : > { %v5228_v8 = vmul.f32 %v3967_v29, %v409_v55 }
 0x658   : > { %v3972_v36 = vpop.f32.mrb[40].mxu0  ;;  %5371 = vmatprep.mubr.f32.mxu1 %v5228_v8  ;;  %v418_v8 = vld [vmem:[%s25011_s4 + $0x188] sm:$0xff] }
 0x659   : > { %v3974_v38 = vpop.f32.mrb[41].mxu0  ;;  %5372 = vmatmul.mubr.f32.gmra.mrb[78].mxu1 %v5227_v12  ;;  %v5230_v32 = vmul.f32 %v3972_v36, %v411_v61  ;;  %v417_v12 = vld [vmem:[%s25011_s4 + $0x180] sm:$0xff] }
 0x65a   : > { %v5231_v60 = vmul.f32 %v3974_v38, %v412_v21 }
 0x65c   : > { %v3979_v55 = vpop.f32.mrb[42].mxu0  ;;  %5376 = vmatprep.mubr.f32.mxu1 %v5231_v60  ;;  %v421_v60 = vld [vmem:[%s25011_s4 + $0x1a0] sm:$0xff] }
 0x65d   : > { %v3981_v63 = vpop.f32.mrb[43].mxu0  ;;  %5377 = vmatmul.mubr.f32.gmra.mrb[80].mxu1 %v5230_v32  ;;  %v5233_v29 = vmul.f32 %v3979_v55, %v414_v19  ;;  %v420_v32 = vld [vmem:[%s25011_s4 + $0x198] sm:$0xff]  ;;  %v371_v19 = vld [vmem:[%s25011_s4 + $0x10] sm:$0xff] }
 0x65e   : > { %v5234_v17 = vmul.f32 %v3981_v63, %v415_v53 }
 0x660   : > { %v3986_v21 = vpop.f32.mrb[44].mxu0  ;;  %5381 = vmatprep.mubr.f32.mxu1 %v5234_v17 }
 0x661   : > { %v3988_v61 = vpop.f32.mrb[45].mxu0  ;;  %5382 = vmatmul.mubr.f32.gmra.mrb[82].mxu1 %v5233_v29  ;;  %v5236_v38 = vmul.f32 %v3986_v21, %v417_v12  ;;  %v374_v29 = vld [vmem:[%s25011_s4 + $0x28] sm:$0xff]  ;;  %v377_v21 = vld [vmem:[%s25011_s4 + $0x40] sm:$0xff] }
 0x662   : > { %v5237_v36 = vmul.f32 %v3988_v61, %v418_v8  ;;  %v5190_v8 = vmul.f32 %v21080_v57, %v371_v19  ;;  %v25629_v19 = vld [vmem:[#allocation16_spill] sm:$0xff] }
 0x664   : > { %v3993_v53 = vpop.f32.mrb[46].mxu0  ;;  %5386 = vmatprep.mubr.f32.mxu1 %v5237_v36  ;;  %v5193_v36 = vmul.f32 %v21078_v33, %v374_v29 }
 0x665   : > { %v3995_v55 = vpop.f32.mrb[47].mxu0  ;;  %5387 = vmatmul.mubr.f32.gmra.mrb[84].mxu1 %v5236_v38  ;;  %v5239_v17 = vmul.f32 %v3993_v53, %v420_v32  ;;  %v380_v38 = vld [vmem:[%s25011_s4 + $0x58] sm:$0xff]  ;;  %v383_v32 = vld [vmem:[%s25011_s4 + $0x70] sm:$0xff] }
 0x666   : > { %v5240_v63 = vmul.f32 %v3995_v55, %v421_v60  ;;  %v5196_v60 = vmul.f32 %v21086_v44, %v377_v21  ;;  %v5199_v33 = vmul.f32 %v21084_v0, %v380_v38  ;;  %v386_v44 = vld [vmem:[%s25011_s4 + $0x88] sm:$0xff]  ;;  %v5202_v55 = vmul.f32 %v21092_v47, %v383_v32  ;;  %v401_v32 = vld [vmem:[%s25011_s4 + $0x100] sm:$0xff] }
 0x667   : > { %v5858_v0 = vsub.f32 %v21177_v48, %v21220_v15 }
 0x668   : > { %5391 = vmatprep.mubr.f32.mxu1 %v5240_v63  ;;  %v21397_v12 = vpop.f32.mrb[48].mxu0 }
 0x669   : > { %5392 = vmatmul.mubr.f32.gmra.mrb[86].mxu1 %v5239_v17  ;;  %v21402_v61 = vpop.f32.mrb[49].mxu0  ;;  %v389_v17 = vld [vmem:[%s25011_s4 + $0xa0] sm:$0xff] }
 0x66a   : > { %16742 = vmatprep.mubr.f32.mxu1 %v5190_v8  ;;  %v392_v8 = vld [vmem:[%s25011_s4 + $0xb8] sm:$0xff]  ;;  %v5208_v47 = vmul.f32 %v21098_v27, %v389_v17  ;;  %v398_v27 = vld [vmem:[%s25011_s4 + $0xe8] sm:$0xff] }
 0x66c   : > { %v21409_v57 = vpop.f32.mrb[50].mxu0 }
 0x66d   : > { %16743 = vmatmul.mubr.f32.vlgmr.msra.gmra.mrb[88].mxu1 %v5193_v36  ;;  %v21414_v53 = vpop.f32.mrb[51].mxu0  ;;  %v395_v36 = vld [vmem:[%s25011_s4 + $0xd0] sm:$0xff] }
 0x66e   : > { %18227 = vmatpush3.bf16.xpose.msra.mxu1 %v25628_v51  ;;  %16745 = vmatprep.mubr.f32.mxu1 %v5196_v60  ;;  %v5205_v51 = vmul.f32 %v21090_v2, %v386_v44  ;;  %v5859_v60 = vand.u32 4294901760, %v5858_v0  ;;  %v5211_v2 = vmul.f32 %v21096_v11, %v392_v8  ;;  %v5214_v48 = vmul.f32 %v21113_v7, %v395_v36  ;;  %v404_v11 = vld [vmem:[%s25011_s4 + $0x118] sm:$0xff]  ;;  %v407_v7 = vld [vmem:[%s25011_s4 + $0x130] sm:$0xff]  ;;  %v413_v8 = vld [vmem:[%s25011_s4 + $0x160] sm:$0xff] }
 0x66f   : > { %18229 = vmatprep.subr.bf16.mxu1 %v25629_v19  ;;  %v5220_v44 = vmul.f32 %v21136_v1, %v401_v32  ;;  %v5223_v0 = vmul.f32 %v21133_v3, %v404_v11  ;;  %v5226_v1 = vmul.f32 %v21151_v54, %v407_v7  ;;  %v416_v36 = vld [vmem:[%s25011_s4 + $0x178] sm:$0xff]  ;;  %v419_v54 = vld [vmem:[%s25011_s4 + $0x190] sm:$0xff] }
 0x670   : > { %v21423_v63 = vpop.f32.mrb[52].mxu0  ;;  %v5238_v32 = vmul.f32 %v21164_v58, %v419_v54 }
 0x671   : > { %16746 = vmatmul.mubr.f32.gmra.mrb[90].mxu1 %v5199_v33  ;;  %v21428_v29 = vpop.f32.mrb[53].mxu0 }
 0x672   : > { %16748 = vmatprep.mubr.f32.mxu1 %v5202_v55 }
 0x674   : > { %v21437_v21 = vpop.f32.mrb[54].mxu0 }
 0x675   : > { %16749 = vmatmul.mubr.f32.gmra.mrb[92].mxu1 %v5205_v51  ;;  %v21442_v38 = vpop.f32.mrb[55].mxu0 }
 0x676   : > { %18231 = vmatpush3.bf16.xpose.msra.mxu1 %v25629_v19  ;;  %16751 = vmatprep.mubr.f32.mxu1 %v5208_v47  ;;  %v5217_v19 = vmul.f32 %v21102_v50, %v398_v27  ;;  %v410_v50 = vld [vmem:[%s25011_s4 + $0x148] sm:$0xff] }
 0x677   : > { %16814 = vmatprep.subr.mxu1 %v5859_v60  ;;  %v5229_v3 = vmul.f32 %v21147_v22, %v410_v50  ;;  %v422_v22 = vld [vmem:[%s25011_s4 + $0x1a8] sm:$0xff] }
 0x678   : > { %v21450_v15 = vpop.f32.mrb[56].mxu0  ;;  %v5241_v11 = vmul.f32 %v21162_v40, %v422_v22 }
 0x679   : > { %16752 = vmatmul.mubr.f32.gmra.mrb[94].mxu1 %v5211_v2  ;;  %v21455_v33 = vpop.f32.mrb[57].mxu0 }
 0x67a   : > { %16754 = vmatprep.mubr.f32.mxu1 %v5214_v48  ;;  %v5235_v48 = vmul.f32 %v21155_v59, %v416_v36 }
 0x67c   : > { %v21462_v55 = vpop.f32.mrb[58].mxu0 }
 0x67d   : > { %16755 = vmatmul.mubr.f32.gmra.mrb[96].mxu1 %v5217_v19  ;;  %v21467_v17 = vpop.f32.mrb[59].mxu0 }
 0x67e   : > { %16815 = vmatpush3.xpose.msra.mxu1 %v5859_v60  ;;  %16757 = vmatprep.mubr.f32.mxu1 %v5220_v44  ;;  %v5232_v60 = vmul.f32 %v21158_v10, %v413_v8 }
 0x67f   : > { %18241 = vmatprep.subr.bf16.mxu1 %v21003_v41 }
 0x680   : > { %v21475_v51 = vpop.f32.mrb[60].mxu0 }
 0x681   : > { %16758 = vmatmul.mubr.f32.gmra.mrb[98].mxu1 %v5223_v0  ;;  %v21480_v47 = vpop.f32.mrb[61].mxu0 }
 0x682   : > { %16760 = vmatprep.mubr.f32.mxu1 %v5226_v1 }
 0x684   : > { %v21487_v2 = vpop.f32.mrb[62].mxu0 }
 0x685   : > { %16761 = vmatmul.mubr.f32.gmra.mrb[100].mxu1 %v5229_v3  ;;  %v21492_v27 = vpop.f32.mrb[63].mxu0 }
 0x686   : > { %16763 = vmatprep.mubr.f32.mxu1 %v5232_v60 }
 0x688   : > { %v21499_v19 = vpop.f32.mrb[64].mxu0 }
 0x689   : > { %16764 = vmatmul.mubr.f32.gmra.mrb[102].mxu1 %v5235_v48  ;;  %v21501_v10 = vpop.f32.mrb[65].mxu0 }
 0x68a   : > { %16766 = vmatprep.mubr.f32.mxu1 %v5238_v32 }
 0x68c   : > { %v21504_v44 = vpop.f32.mrb[66].mxu0 }
 0x68d   : > { %16767 = vmatmul.mubr.f32.gmra.mrb[104].mxu1 %v5241_v11  ;;  %v21506_v7 = vpop.f32.mrb[67].mxu0 }
 0x68e   : > { %16816 = vmatprep.mubr.f32.mxu1 %v25610_v16 }
 0x690   : > { %v21509_v59 = vpop.f32.mrb[68].mxu0 }
 0x691   : > { %16817 = vmatmul.mubr.f32.vlgmr.msra.gmra.mrb[106].mxu1 %v25611_v56  ;;  %v21512_v58 = vpop.f32.mrb[69].mxu0 }
 0x692   : > { %18243 = vmatpush3.bf16.xpose.msra.mxu1 %v21003_v41  ;;  %16819 = vmatprep.mubr.f32.mxu1 %v25612_v28 }
 0x693   : > { %18245 = vmatprep.subr.bf16.mxu1 %v21047_v46 }
 0x694   : > { %v21517_v40 = vpop.f32.mrb[70].mxu0 }
 0x695   : > { %16820 = vmatmul.mubr.f32.gmra.mrb[108].mxu1 %v25613_v62  ;;  %v21520_v0 = vpop.f32.mrb[71].mxu0 }
 0x696   : > { %16822 = vmatprep.mubr.f32.mxu1 %v25614_v26 }
 0x698   : > { %v21523_v50 = vpop.f32.mrb[72].mxu0 }
 0x699   : > { %16823 = vmatmul.mubr.f32.gmra.mrb[110].mxu1 %v25615_v20  ;;  %v21526_v1 = vpop.f32.mrb[73].mxu0 }
 0x69a   : > { %18247 = vmatpush3.bf16.xpose.msra.mxu1 %v21047_v46  ;;  %16825 = vmatprep.mubr.f32.mxu1 %v25616_v43 }
 0x69b   : > { %16888 = vmatprep.subr.mxu1 %v21059_v9 }
 0x69c   : > { %v21531_v8 = vpop.f32.mrb[74].mxu0 }
 0x69d   : > { %16826 = vmatmul.mubr.f32.gmra.mrb[112].mxu1 %v25617_v52  ;;  %v21534_v3 = vpop.f32.mrb[75].mxu0 }
 0x69e   : > { %16828 = vmatprep.mubr.f32.mxu1 %v25618_v39 }
 0x6a0   : > { %v21537_v36 = vpop.f32.mrb[76].mxu0 }
 0x6a1   : > { %16829 = vmatmul.mubr.f32.gmra.mrb[114].mxu1 %v25619_v31  ;;  %v21540_v60 = vpop.f32.mrb[77].mxu0 }
 0x6a2   : > { %16889 = vmatpush3.xpose.msra.mxu1 %v21059_v9  ;;  %16831 = vmatprep.mubr.f32.mxu1 %v25620_v42 }
 0x6a3   : > { %18257 = vmatprep.subr.bf16.mxu1 %v21003_v41 }
 0x6a4   : > { %v21545_v54 = vpop.f32.mrb[78].mxu0 }
 0x6a5   : > { %25630 = vst [vmem:[#allocation100_spill] sm:$0xff] %v21545_v54  ;;  %16832 = vmatmul.mubr.f32.gmra.mrb[116].mxu1 %v25621_v45  ;;  %v21548_v48 = vpop.f32.mrb[79].mxu0 }
 0x6a6   : > { %25631 = vst [vmem:[#allocation103_spill] sm:$0xff] %v21548_v48  ;;  %16834 = vmatprep.mubr.f32.mxu1 %v25622_v5 }
 0x6a8   : > { %v21551_v22 = vpop.f32.mrb[80].mxu0 }
 0x6a9   : > { %25632 = vst [vmem:[#allocation102_spill] sm:$0xff] %v21551_v22  ;;  %16835 = vmatmul.mubr.f32.gmra.mrb[118].mxu1 %v25623_v49  ;;  %v21554_v32 = vpop.f32.mrb[81].mxu0 }
 0x6aa   : > { %25633 = vst [vmem:[#allocation105_spill] sm:$0xff] %v21554_v32  ;;  %16837 = vmatprep.mubr.f32.mxu1 %v25624_v13  ;;  %v25640_v32 = vld [vmem:[#allocation25_spill] sm:$0xff] }
 0x6ac   : > { %v21557_v11 = vpop.f32.mrb[82].mxu0 }
 0x6ad   : > { %25634 = vst [vmem:[#allocation104_spill] sm:$0xff] %v21557_v11  ;;  %16838 = vmatmul.mubr.f32.gmra.mrb[120].mxu1 %v25625_v34  ;;  %v21560_v37 = vpop.f32.mrb[83].mxu0  ;;  %v25642_v11 = vld [vmem:[#allocation30_spill] sm:$0xff] }
 0x6ae   : > { %25635 = vst [vmem:[#allocation107_spill] sm:$0xff] %v21560_v37  ;;  %16840 = vmatprep.mubr.f32.mxu1 %v25626_v23 }
 0x6b0   : > { %v21563_v6 = vpop.f32.mrb[84].mxu0 }
 0x6b1   : > { %25636 = vst [vmem:[#allocation106_spill] sm:$0xff] %v21563_v6  ;;  %16841 = vmatmul.mubr.f32.gmra.mrb[122].mxu1 %v25627_v35  ;;  %v21566_v14 = vpop.f32.mrb[85].mxu0  ;;  %v25644_v6 = vld [vmem:[#allocation27_spill] sm:$0xff] }
 0x6b2   : > { %25637 = vst [vmem:[#allocation109_spill] sm:$0xff] %v21566_v14  ;;  %16890 = vmatprep.mubr.f32.mxu1 %v25638_v4  ;;  %v25646_v14 = vld [vmem:[#allocation38_spill] sm:$0xff] }
 0x6b4   : > { %v21569_v22 = vpop.f32.mrb[86].mxu0 }
 0x6b5   : > { %25639 = vst [vmem:[#allocation108_spill] sm:$0xff] %v21569_v22  ;;  %16891 = vmatmul.mubr.f32.vlgmr.msra.gmra.mrb[124].mxu1 %v25640_v32  ;;  %v21572_v48 = vpop.f32.mrb[87].mxu0  ;;  %v25648_v22 = vld [vmem:[#allocation39_spill] sm:$0xff] }
 0x6b6   : > { %25641 = vst [vmem:[#allocation111_spill] sm:$0xff] %v21572_v48  ;;  %18259 = vmatpush3.bf16.xpose.msra.mxu1 %v21003_v41  ;;  %16893 = vmatprep.mubr.f32.mxu1 %v25642_v11  ;;  %v25650_v41 = vld [vmem:[#allocation44_spill] sm:$0xff] }
 0x6b7   : > { %18261 = vmatprep.subr.bf16.mxu1 %v21047_v46 }
 0x6b8   : > { %v21577_v37 = vpop.f32.mrb[88].mxu0 }
 0x6b9   : > { %25643 = vst [vmem:[#allocation110_spill] sm:$0xff] %v21577_v37  ;;  %16894 = vmatmul.mubr.f32.gmra.mrb[126].mxu1 %v25644_v6  ;;  %v21580_v54 = vpop.f32.mrb[89].mxu0  ;;  %v25652_v37 = vld [vmem:[#allocation47_spill] sm:$0xff] }
 0x6ba   : > { %25645 = vst [vmem:[#allocation92_spill] sm:$0xff] %v21580_v54  ;;  %16896 = vmatprep.mubr.f32.mxu1 %v25646_v14  ;;  %v25654_v54 = vld [vmem:[#allocation55_spill] sm:$0xff] }
 0x6bc   : > { %v21583_v4 = vpop.f32.mrb[90].mxu0 }
 0x6bd   : > { %25647 = vst [vmem:[#allocation93_spill] sm:$0xff] %v21583_v4  ;;  %16897 = vmatmul.mubr.f32.gmra.mrb[128].mxu1 %v25648_v22  ;;  %v21586_v32 = vpop.f32.mrb[91].mxu0  ;;  %v25656_v4 = vld [vmem:[#allocation51_spill] sm:$0xff] }
 0x6be   : > { %25649 = vst [vmem:[#allocation112_spill] sm:$0xff] %v21586_v32  ;;  %18263 = vmatpush3.bf16.xpose.msra.mxu1 %v21047_v46  ;;  %16899 = vmatprep.mubr.f32.mxu1 %v25650_v41  ;;  %v25658_v46 = vld [vmem:[#allocation60_spill] sm:$0xff] }
 0x6bf   : > { %16962 = vmatprep.subr.mxu1 %v21059_v9 }
 0x6c0   : > { %v21591_v11 = vpop.f32.mrb[92].mxu0 }
 0x6c1   : > { %25651 = vst [vmem:[#allocation7_spill] sm:$0xff] %v21591_v11  ;;  %16900 = vmatmul.mubr.f32.gmra.mrb[130].mxu1 %v25652_v37  ;;  %v21594_v6 = vpop.f32.mrb[93].mxu0  ;;  %v25660_v11 = vld [vmem:[#allocation61_spill] sm:$0xff] }
 0x6c2   : > { %25653 = vst [vmem:[#allocation8_spill] sm:$0xff] %v21594_v6  ;;  %16902 = vmatprep.mubr.f32.mxu1 %v25654_v54  ;;  %v25662_v6 = vld [vmem:[#allocation70_spill] sm:$0xff] }
 0x6c4   : > { %v21597_v14 = vpop.f32.mrb[94].mxu0 }
 0x6c5   : > { %25655 = vst [vmem:[#allocation9_spill] sm:$0xff] %v21597_v14  ;;  %16903 = vmatmul.mubr.f32.gmra.mrb[132].mxu1 %v25656_v4  ;;  %v21600_v22 = vpop.f32.mrb[95].mxu0  ;;  %v25664_v14 = vld [vmem:[#allocation71_spill] sm:$0xff] }
 0x6c6   : > { %25657 = vst [vmem:[#allocation11_spill] sm:$0xff] %v21600_v22  ;;  %16963 = vmatpush3.xpose.msra.mxu1 %v21059_v9  ;;  %16905 = vmatprep.mubr.f32.mxu1 %v25658_v46  ;;  %v25666_v22 = vld [vmem:[#allocation76_spill] sm:$0xff]  ;;  %v25668_v46 = vld [vmem:[#allocation79_spill] sm:$0xff] }
 0x6c7   : > { %18273 = vmatprep.subr.bf16.mxu1 %v21197_v18 }
 0x6c8   : > { %v21605_v41 = vpop.f32.mrb[96].mxu0 }
 0x6c9   : > { %25659 = vst [vmem:[#allocation10_spill] sm:$0xff] %v21605_v41  ;;  %16906 = vmatmul.mubr.f32.gmra.mrb[134].mxu1 %v25660_v11  ;;  %v21608_v37 = vpop.f32.mrb[97].mxu0  ;;  %v25670_v41 = vld [vmem:[#allocation82_spill] sm:$0xff]  ;;  %v25671_v11 = vld [vmem:[#allocation84_spill] sm:$0xff] }
 0x6ca   : > { %25661 = vst [vmem:[#allocation35_spill] sm:$0xff] %v21608_v37  ;;  %16908 = vmatprep.mubr.f32.mxu1 %v25662_v6 }
 0x6cc   : > { %v21611_v54 = vpop.f32.mrb[98].mxu0 }
 0x6cd   : > { %25663 = vst [vmem:[#allocation36_spill] sm:$0xff] %v21611_v54  ;;  %16909 = vmatmul.mubr.f32.gmra.mrb[136].mxu1 %v25664_v14  ;;  %v21614_v4 = vpop.f32.mrb[99].mxu0 }
 0x6ce   : > { %25665 = vst [vmem:[#allocation41_spill] sm:$0xff] %v21614_v4  ;;  %16911 = vmatprep.mubr.f32.mxu1 %v25666_v22 }
 0x6d0   : > { %v21617_v9 = vpop.f32.mrb[100].mxu0 }
 0x6d1   : > { %25667 = vst [vmem:[#allocation14_spill] sm:$0xff] %v21617_v9  ;;  %16912 = vmatmul.mubr.f32.gmra.mrb[138].mxu1 %v25668_v46  ;;  %v21620_v32 = vpop.f32.mrb[101].mxu0 }
 0x6d2   : > { %25669 = vst [vmem:[#allocation46_spill] sm:$0xff] %v21620_v32  ;;  %16914 = vmatprep.mubr.f32.mxu1 %v25670_v41 }
 0x6d5   : > { %16915 = vmatmul.mubr.f32.gmra.mrb[140].mxu1 %v25671_v11 }
 0x6d6   : > { %16964 = vmatprep.mubr.f32.mxu1 %v25610_v16 }
 0x6d9   : > { %16965 = vmatmul.mubr.f32.vlgmr.msra.gmra.mrb[142].mxu1 %v25611_v56 }
 0x6da   : > { %16967 = vmatprep.mubr.f32.mxu1 %v25612_v28  ;;  %18275 = vmatpush3.bf16.msra.mxu1 %v21197_v18 }
 0x6db   : > { %18277 = vmatprep.subr.bf16.mxu1 %v21278_v30 }
 0x6dd   : > { %16968 = vmatmul.mubr.f32.gmra.mrb[144].mxu1 %v25613_v62 }
 0x6de   : > { %16970 = vmatprep.mubr.f32.mxu1 %v25614_v26  ;;  %18279 = vmatpush3.bf16.msra.mxu1 %v21278_v30 }
 0x6df   : > { %16999 = vmatprep.subr.msk.mxu1 %vm1192_vm3, %v21300_v25 }
 0x6e1   : > { %16971 = vmatmul.mubr.f32.gmra.mrb[146].mxu1 %v25615_v20 }
 0x6e2   : > { %16973 = vmatprep.mubr.f32.mxu1 %v25616_v43  ;;  %17000 = vmatpush3.msk.msra.mxu1 %vm1192_vm3, %v21300_v25 }
 0x6e3   : > { %18281 = vmatprep.subr.bf16.mxu1 %v20478_v24 }
 0x6e5   : > { %16974 = vmatmul.mubr.f32.gmra.mrb[148].mxu1 %v25617_v52 }
 0x6e6   : > { %16976 = vmatprep.mubr.f32.mxu1 %v25618_v39 }
 0x6e9   : > { %16977 = vmatmul.mubr.f32.gmra.mrb[150].mxu1 %v25619_v31 }
 0x6ea   : > { %16979 = vmatprep.mubr.f32.mxu1 %v25620_v42 }
 0x6ed   : > { %16980 = vmatmul.mubr.f32.gmra.mrb[152].mxu1 %v25621_v45 }
 0x6ee   : > { %16982 = vmatprep.mubr.f32.mxu1 %v25622_v5 }
 0x6f1   : > { %16983 = vmatmul.mubr.f32.gmra.mrb[154].mxu1 %v25623_v49 }
 0x6f2   : > { %16985 = vmatprep.mubr.f32.mxu1 %v25624_v13 }
 0x6f5   : > { %16986 = vmatmul.mubr.f32.gmra.mrb[156].mxu1 %v25625_v34 }
 0x6f6   : > { %16988 = vmatprep.mubr.f32.mxu1 %v25626_v23 }
 0x6f8   : > { %v5308_v18 = vpop.f32.mrb[52].mxu1 }
 0x6f9   : > { %v5310_v16 = vpop.f32.mrb[53].mxu1  ;;  %16989 = vmatmul.mubr.f32.gmra.mrb[158].mxu1 %v25627_v35 }
 0x6fc   : > { %v5313_v56 = vpop.f32.mrb[54].mxu1 }
 0x6fd   : > { %v5315_v28 = vpop.f32.mrb[55].mxu1 }
 0x700   : > { %v5318_v62 = vpop.f32.mrb[56].mxu1 }
 0x701   : > { %v5320_v26 = vpop.f32.mrb[57].mxu1 }
 0x704   : > { %v5323_v20 = vpop.f32.mrb[58].mxu1 }
 0x705   : > { %v5325_v43 = vpop.f32.mrb[59].mxu1 }
 0x708   : > { %v5328_v52 = vpop.f32.mrb[60].mxu1 }
 0x709   : > { %v5330_v39 = vpop.f32.mrb[61].mxu1 }
 0x70c   : > { %v5333_v31 = vpop.f32.mrb[62].mxu1 }
 0x70d   : > { %v5335_v42 = vpop.f32.mrb[63].mxu1 }
 0x710   : > { %v5338_v45 = vpop.f32.mrb[64].mxu1 }
 0x711   : > { %v5340_v5 = vpop.f32.mrb[65].mxu1 }
 0x714   : > { %v5343_v49 = vpop.f32.mrb[66].mxu1 }
 0x715   : > { %v5345_v13 = vpop.f32.mrb[67].mxu1 }
 0x718   : > { %v5348_v34 = vpop.f32.mrb[68].mxu1 }
 0x719   : > { %v5350_v23 = vpop.f32.mrb[69].mxu1 }
 0x71c   : > { %v5353_v30 = vpop.f32.mrb[70].mxu1 }
 0x71d   : > { %v5355_v25 = vpop.f32.mrb[71].mxu1 }
 0x720   : > { %v5358_v6 = vpop.f32.mrb[72].mxu1 }
 0x721   : > { %v5360_v35 = vpop.f32.mrb[73].mxu1 }
 0x724   : > { %v5363_v14 = vpop.f32.mrb[74].mxu1 }
 0x725   : > { %v5365_v22 = vpop.f32.mrb[75].mxu1 }
 0x728   : > { %v5368_v41 = vpop.f32.mrb[76].mxu1 }
 0x729   : > { %v5370_v46 = vpop.f32.mrb[77].mxu1 }
 0x72c   : > { %v5373_v11 = vpop.f32.mrb[78].mxu1 }
 0x72d   : > { %v5375_v16 = vpop.f32.mrb[79].mxu1 }
 0x730   : > { %v5378_v28 = vpop.f32.mrb[80].mxu1 }
 0x731   : > { %v5380_v26 = vpop.f32.mrb[81].mxu1 }
 0x734   : > { %v5383_v43 = vpop.f32.mrb[82].mxu1 }
 0x735   : > { %v5385_v39 = vpop.f32.mrb[83].mxu1 }
 0x738   : > { %v5388_v42 = vpop.f32.mrb[84].mxu1 }
 0x739   : > { %v5390_v5 = vpop.f32.mrb[85].mxu1 }
 0x73c   : > { %v5393_v24 = vpop.f32.mrb[86].mxu1 }
 0x73d   : > { %v5395_v13 = vpop.f32.mrb[87].mxu1 }
 0x740   : > { %v16744_v32 = vpop.f32.mrb[88].mxu1 }
 0x741   : > { %v5469_v23 = vadd.f32 %v16744_v32, %v5313_v56  ;;  %v5463_v9 = vpop.f32.mrb[89].mxu1 }
 0x742   : > { %v5464_v25 = vadd.f32 %v5463_v9, %v5308_v18 }
 0x743   : > { %v5663_v35 = vadd.f32 %v21397_v12, %v5469_v23 }
 0x744   : > { %v16747_v4 = vpop.f32.mrb[90].mxu1  ;;  %v5653_v22 = vadd.f32 %v21402_v61, %v5464_v25 }
 0x745   : > { %v5479_v46 = vadd.f32 %v16747_v4, %v5323_v20  ;;  %v5473_v54 = vpop.f32.mrb[91].mxu1 }
 0x746   : > { %v5474_v16 = vadd.f32 %v5473_v54, %v5318_v62 }
 0x747   : > { %v5683_v26 = vadd.f32 %v21409_v57, %v5479_v46 }
 0x748   : > { %v16750_v37 = vpop.f32.mrb[92].mxu1  ;;  %v5673_v39 = vadd.f32 %v21414_v53, %v5474_v16 }
 0x749   : > { %v5489_v5 = vadd.f32 %v16750_v37, %v5333_v31  ;;  %v5483_v48 = vpop.f32.mrb[93].mxu1 }
 0x74a   : > { %v5484_v13 = vadd.f32 %v5483_v48, %v5328_v52 }
 0x74b   : > { %v5703_v32 = vadd.f32 %v21423_v63, %v5489_v5 }
 0x74c   : > { %v16753_v56 = vpop.f32.mrb[94].mxu1  ;;  %v5693_v9 = vadd.f32 %v21428_v29, %v5484_v13 }
 0x74d   : > { %v5499_v12 = vadd.f32 %v16753_v56, %v5343_v49  ;;  %v5493_v18 = vpop.f32.mrb[95].mxu1 }
 0x74e   : > { %v5494_v23 = vadd.f32 %v5493_v18, %v5338_v45 }
 0x74f   : > { %v5723_v61 = vadd.f32 %v21437_v21, %v5499_v12 }
 0x750   : > { %v16756_v4 = vpop.f32.mrb[96].mxu1  ;;  %v5713_v54 = vadd.f32 %v21442_v38, %v5494_v23 }
 0x751   : > { %v5509_v57 = vadd.f32 %v16756_v4, %v5353_v30  ;;  %v5503_v62 = vpop.f32.mrb[97].mxu1 }
 0x752   : > { %v5504_v20 = vadd.f32 %v5503_v62, %v5348_v34 }
 0x753   : > { %v5743_v53 = vadd.f32 %v21450_v15, %v5509_v57 }
 0x754   : > { %v16759_v37 = vpop.f32.mrb[98].mxu1  ;;  %v5733_v48 = vadd.f32 %v21455_v33, %v5504_v20 }
 0x755   : > { %v5519_v63 = vadd.f32 %v16759_v37, %v5363_v14  ;;  %v5513_v52 = vpop.f32.mrb[99].mxu1 }
 0x756   : > { %v5514_v31 = vadd.f32 %v5513_v52, %v5358_v6 }
 0x757   : > { %v5763_v29 = vadd.f32 %v21462_v55, %v5519_v63 }
 0x758   : > { %v16762_v49 = vpop.f32.mrb[100].mxu1  ;;  %v5753_v45 = vadd.f32 %v21467_v17, %v5514_v31 }
 0x759   : > { %v5529_v21 = vadd.f32 %v16762_v49, %v5373_v11  ;;  %v5523_v25 = vpop.f32.mrb[101].mxu1 }
 0x75a   : > { %v5524_v46 = vadd.f32 %v5523_v25, %v5368_v41 }
 0x75b   : > { %v5783_v38 = vadd.f32 %v21475_v51, %v5529_v21 }
 0x75c   : > { %v16765_v30 = vpop.f32.mrb[102].mxu1  ;;  %v5773_v34 = vadd.f32 %v21480_v47, %v5524_v46 }
 0x75d   : > { %v5539_v15 = vadd.f32 %v16765_v30, %v5383_v43  ;;  %v5533_v16 = vpop.f32.mrb[103].mxu1 }
 0x75e   : > { %v5534_v5 = vadd.f32 %v5533_v16, %v5378_v28 }
 0x75f   : > { %v5803_v33 = vadd.f32 %v21487_v2, %v5539_v15 }
 0x760   : > { %v16768_v14 = vpop.f32.mrb[104].mxu1  ;;  %v5793_v6 = vadd.f32 %v21492_v27, %v5534_v5 }
 0x761   : > { %v5549_v55 = vadd.f32 %v16768_v14, %v5393_v24  ;;  %v5543_v13 = vpop.f32.mrb[105].mxu1 }
 0x762   : > { %v5544_v56 = vadd.f32 %v5543_v13, %v5388_v42 }
 0x763   : > { %v5823_v17 = vadd.f32 %v21499_v19, %v5549_v55 }
 0x764   : > { %v16818_v11 = vpop.f32.mrb[106].mxu1  ;;  %v5813_v41 = vadd.f32 %v21501_v10, %v5544_v56 }
 0x765   : > { %v5925_v51 = vadd.f32 %v16818_v11, %v5663_v35  ;;  %v5918_v12 = vpop.f32.mrb[107].mxu1 }
 0x766   : > { %v5919_v18 = vadd.f32 %v5918_v12, %v5653_v22 }
 0x767   : > { %v6110_v47 = vadd.f32 %v21504_v44, %v5925_v51 }
 0x768   : > { %v16821_v43 = vpop.f32.mrb[108].mxu1  ;;  %v6103_v28 = vadd.f32 %v21506_v7, %v5919_v18 }
 0x769   : > { %v5937_v2 = vadd.f32 %v16821_v43, %v5683_v26  ;;  %v5930_v23 = vpop.f32.mrb[109].mxu1  ;;  %v25678_v43 = vld [vmem:[#allocation106_spill] sm:$0xff] }
 0x76a   : > { %v5931_v4 = vadd.f32 %v5930_v23, %v5673_v39 }
 0x76b   : > { %v6124_v24 = vadd.f32 %v21509_v59, %v5937_v2 }
 0x76c   : > { %v16824_v27 = vpop.f32.mrb[110].mxu1  ;;  %v6117_v42 = vadd.f32 %v21512_v58, %v5931_v4 }
 0x76d   : > { %v5949_v19 = vadd.f32 %v16824_v27, %v5703_v32  ;;  %v5942_v57 = vpop.f32.mrb[111].mxu1 }
 0x76e   : > { %v5943_v62 = vadd.f32 %v5942_v57, %v5693_v9  ;;  %v25680_v57 = vld [vmem:[#allocation108_spill] sm:$0xff] }
 0x76f   : > { %v6138_v10 = vadd.f32 %v21517_v40, %v5949_v19 }
 0x770   : > { %v16827_v35 = vpop.f32.mrb[112].mxu1  ;;  %v6131_v22 = vadd.f32 %v21520_v0, %v5943_v62 }
 0x771   : > { %v5961_v44 = vadd.f32 %v16827_v35, %v5723_v61  ;;  %v5954_v20 = vpop.f32.mrb[113].mxu1 }
 0x772   : > { %v5955_v37 = vadd.f32 %v5954_v20, %v5713_v54 }
 0x773   : > { %v6152_v7 = vadd.f32 %v21523_v50, %v5961_v44 }
 0x774   : > { %v16830_v26 = vpop.f32.mrb[114].mxu1  ;;  %v6145_v39 = vadd.f32 %v21526_v1, %v5955_v37  ;;  %v25672_v1 = vld [vmem:[#allocation100_spill] sm:$0xff] }
 0x775   : > { %v5973_v59 = vadd.f32 %v16830_v26, %v5743_v53  ;;  %v5966_v63 = vpop.f32.mrb[115].mxu1  ;;  %v25682_v26 = vld [vmem:[#allocation110_spill] sm:$0xff] }
 0x776   : > { %v5967_v52 = vadd.f32 %v5966_v63, %v5733_v48  ;;  %v25673_v48 = vld [vmem:[#allocation103_spill] sm:$0xff] }
 0x777   : > { %v6166_v58 = vadd.f32 %v21531_v8, %v5973_v59 }
 0x778   : > { %v16833_v32 = vpop.f32.mrb[116].mxu1  ;;  %v6159_v9 = vadd.f32 %v21534_v3, %v5967_v52  ;;  %v25674_v3 = vld [vmem:[#allocation102_spill] sm:$0xff] }
 0x779   : > { %v5985_v40 = vadd.f32 %v16833_v32, %v5763_v29  ;;  %v5978_v31 = vpop.f32.mrb[117].mxu1 }
 0x77a   : > { %v5979_v49 = vadd.f32 %v5978_v31, %v5753_v45  ;;  %v25675_v45 = vld [vmem:[#allocation105_spill] sm:$0xff] }
 0x77b   : > { %v6180_v0 = vadd.f32 %v21537_v36, %v5985_v40 }
 0x77c   : > { %v16836_v61 = vpop.f32.mrb[118].mxu1  ;;  %v6173_v54 = vadd.f32 %v21540_v60, %v5979_v49  ;;  %v25676_v60 = vld [vmem:[#allocation104_spill] sm:$0xff] }
 0x77d   : > { %v5997_v50 = vadd.f32 %v16836_v61, %v5783_v38  ;;  %v5990_v21 = vpop.f32.mrb[119].mxu1  ;;  %v25685_v49 = vld [vmem:[#allocation112_spill] sm:$0xff] }
 0x77e   : > { %v5991_v25 = vadd.f32 %v5990_v21, %v5773_v34  ;;  %v25677_v34 = vld [vmem:[#allocation107_spill] sm:$0xff] }
 0x77f   : > { %v6194_v53 = vadd.f32 %v25672_v1, %v5997_v50 }
 0x780   : > { %v16839_v46 = vpop.f32.mrb[120].mxu1  ;;  %v6187_v30 = vadd.f32 %v25673_v48, %v5991_v25 }
 0x781   : > { %v6009_v8 = vadd.f32 %v16839_v46, %v5803_v33  ;;  %v6002_v15 = vpop.f32.mrb[121].mxu1  ;;  %v25687_v46 = vld [vmem:[#allocation8_spill] sm:$0xff] }
 0x782   : > { %v6003_v16 = vadd.f32 %v6002_v15, %v5793_v6  ;;  %v25679_v6 = vld [vmem:[#allocation109_spill] sm:$0xff] }
 0x783   : > { %v6208_v29 = vadd.f32 %v25674_v3, %v6009_v8  ;;  %v25688_v15 = vld [vmem:[#allocation9_spill] sm:$0xff] }
 0x784   : > { %v16842_v5 = vpop.f32.mrb[122].mxu1  ;;  %v6201_v14 = vadd.f32 %v25675_v45, %v6003_v16 }
 0x785   : > { %v6021_v36 = vadd.f32 %v16842_v5, %v5823_v17  ;;  %v6014_v55 = vpop.f32.mrb[123].mxu1  ;;  %v25689_v5 = vld [vmem:[#allocation11_spill] sm:$0xff] }
 0x786   : > { %v6015_v13 = vadd.f32 %v6014_v55, %v5813_v41  ;;  %v25681_v41 = vld [vmem:[#allocation111_spill] sm:$0xff]  ;;  %v25690_v55 = vld [vmem:[#allocation10_spill] sm:$0xff] }
 0x787   : > { %v6222_v38 = vadd.f32 %v25676_v60, %v6021_v36 }
 0x788   : > { %v16892_v56 = vpop.f32.mrb[124].mxu1  ;;  %v6215_v11 = vadd.f32 %v25677_v34, %v6015_v13 }
 0x789   : > { %v6308_v51 = vadd.f32 %v16892_v56, %v6110_v47  ;;  %v6299_v12 = vpop.f32.mrb[125].mxu1  ;;  %v25691_v56 = vld [vmem:[#allocation35_spill] sm:$0xff] }
 0x78a   : > { %v6300_v18 = vadd.f32 %v6299_v12, %v6103_v28  ;;  %v25683_v28 = vld [vmem:[#allocation92_spill] sm:$0xff] }
 0x78b   : > { %v6528_v33 = vadd.f32 %v25678_v43, %v6308_v51  ;;  %v25692_v12 = vld [vmem:[#allocation36_spill] sm:$0xff] }
 0x78c   : > { %v16895_v2 = vpop.f32.mrb[126].mxu1  ;;  %v6522_v23 = vadd.f32 %v25679_v6, %v6300_v18 }
 0x78d   : > { %v6324_v4 = vadd.f32 %v16895_v2, %v6124_v24  ;;  %v6315_v27 = vpop.f32.mrb[127].mxu1  ;;  %v25684_v24 = vld [vmem:[#allocation93_spill] sm:$0xff] }
 0x78e   : > { %v6316_v19 = vadd.f32 %v6315_v27, %v6117_v42  ;;  %v25693_v2 = vld [vmem:[#allocation41_spill] sm:$0xff]  ;;  %v25694_v27 = vld [vmem:[#allocation14_spill] sm:$0xff] }
 0x78f   : > { %v6540_v17 = vadd.f32 %v25680_v57, %v6324_v4 }
 0x790   : > { %v16898_v62 = vpop.f32.mrb[128].mxu1  ;;  %v6534_v35 = vadd.f32 %v25681_v41, %v6316_v19 }
 0x791   : > { %v6340_v44 = vadd.f32 %v16898_v62, %v6138_v10  ;;  %v6331_v20 = vpop.f32.mrb[129].mxu1  ;;  %v25695_v62 = vld [vmem:[#allocation46_spill] sm:$0xff] }
 0x792   : > { %v6332_v37 = vadd.f32 %v6331_v20, %v6131_v22  ;;  %v25686_v22 = vld [vmem:[#allocation7_spill] sm:$0xff] }
 0x793   : > { %v6552_v47 = vadd.f32 %v25682_v26, %v6340_v44 }
 0x794   : > { %v16901_v59 = vpop.f32.mrb[130].mxu1  ;;  %v21692_v63 = vadd.f32 %v25683_v28, %v6332_v37 }
 0x795   : > { %v6356_v52 = vadd.f32 %v16901_v59, %v6152_v7  ;;  %v6347_v32 = vpop.f32.mrb[131].mxu1 }
 0x796   : > { %v6348_v40 = vadd.f32 %v6347_v32, %v6145_v39  ;;  %v351_v32 = vld [vmem:[%s25010_s3 + $0x90] sm:$0xff] }
 0x797   : > { %v21695_v31 = vadd.f32 %v25684_v24, %v6356_v52 }
 0x798   : > { %v16904_v42 = vpop.f32.mrb[132].mxu1  ;;  %v21698_v61 = vadd.f32 %v25685_v49, %v6348_v40 }
 0x799   : > { %v6372_v50 = vadd.f32 %v16904_v42, %v6166_v58  ;;  %v6363_v10 = vpop.f32.mrb[133].mxu1 }
 0x79a   : > { %v6364_v21 = vadd.f32 %v6363_v10, %v6159_v9  ;;  %v354_v10 = vld [vmem:[%s25010_s3 + $0xa8] sm:$0xff] }
 0x79b   : > { %v21701_v25 = vadd.f32 %v25686_v22, %v6372_v50 }
 0x79c   : > { %v16907_v1 = vpop.f32.mrb[134].mxu1  ;;  %v21704_v48 = vadd.f32 %v25687_v46, %v6364_v21 }
 0x79d   : > { %v6388_v7 = vadd.f32 %v16907_v1, %v6180_v0  ;;  %v6379_v8 = vpop.f32.mrb[135].mxu1 }
 0x79e   : > { %v6380_v39 = vadd.f32 %v6379_v8, %v6173_v54 }
 0x79f   : > { %v21707_v16 = vadd.f32 %v25688_v15, %v6388_v7 }
 0x7a0   : > { %v16910_v3 = vpop.f32.mrb[136].mxu1  ;;  %v21710_v45 = vadd.f32 %v25689_v5, %v6380_v39 }
 0x7a1   : > { %v6404_v58 = vadd.f32 %v16910_v3, %v6194_v53  ;;  %v6395_v36 = vpop.f32.mrb[137].mxu1 }
 0x7a2   : > { %v6396_v9 = vadd.f32 %v6395_v36, %v6187_v30 }
 0x7a3   : > { %v21713_v13 = vadd.f32 %v25690_v55, %v6404_v58  ;;  %v356_v58 = vld [vmem:[%s25010_s3 + $0xb8] sm:$0xff] }
 0x7a4   : > { %v16913_v60 = vpop.f32.mrb[138].mxu1  ;;  %v21716_v34 = vadd.f32 %v25691_v56, %v6396_v9 }
 0x7a5   : > { %v6420_v0 = vadd.f32 %v16913_v60, %v6208_v29  ;;  %v6411_v54 = vpop.f32.mrb[139].mxu1  ;;  %v355_v60 = vld [vmem:[%s25010_s3 + $0xb0] sm:$0xff] }
 0x7a6   : > { %v6412_v51 = vadd.f32 %v6411_v54, %v6201_v14  ;;  %v21731_v14 = vld [vmem:[%s20414_s21 + $0x30] ss:$0 sm:$0xff] }
 0x7a7   : > { %v21719_v18 = vadd.f32 %v25692_v12, %v6420_v0 }
 0x7a8   : > { %v16916_v43 = vpop.f32.mrb[140].mxu1  ;;  %v21722_v6 = vadd.f32 %v25693_v2, %v6412_v51 }
 0x7a9   : > { %v6436_v53 = vadd.f32 %v16916_v43, %v6222_v38  ;;  %v6427_v30 = vpop.f32.mrb[141].mxu1  ;;  %v352_v38 = vld [vmem:[%s25010_s3 + $0x98] sm:$0xff] }
 0x7aa   : > { %v6428_v4 = vadd.f32 %v6427_v30, %v6215_v11 }
 0x7ab   : > { %v21725_v19 = vadd.f32 %v25694_v27, %v6436_v53  ;;  %v358_v53 = vld [vmem:[%s25010_s3 + $0xc8] sm:$0xff] }
 0x7ac   : > { %v16966_v57 = vpop.f32.mrb[142].mxu1  ;;  %v21728_v41 = vadd.f32 %v25695_v62, %v6428_v4 }
 0x7ad   : > { %v6706_v29 = vadd.f32 %v16966_v57, %v6528_v33  ;;  %v6699_v44 = vpop.f32.mrb[143].mxu1  ;;  %v357_v57 = vld [vmem:[%s25010_s3 + $0xc0] sm:$0xff] }
 0x7ae   : > { %v6700_v20 = vadd.f32 %v6699_v44, %v6522_v23 }
 0x7af   : > { %v6806_v37 = vmul.f32 0.35355338, %v6706_v29 }
 0x7b0   : > { %v6805_v26 = vmul.f32 0.35355338, %v6700_v20  ;;  %v16969_v59 = vpop.f32.mrb[144].mxu1 }
 0x7b1   : > { %v6824_v11 = vadd.f32 %v6806_v37, %v21731_v14  ;;  %v6718_v28 = vadd.f32 %v16969_v59, %v6540_v17  ;;  %v6711_v52 = vpop.f32.mrb[145].mxu1 }
 0x7b2   : > { %v6823_v33 = vadd.f32 %v6805_v26, %v21731_v14  ;;  %v6712_v40 = vadd.f32 %v6711_v52, %v6534_v35  ;;  %v353_v35 = vld [vmem:[%s25010_s3 + $0xa0] sm:$0xff] }
 0x7b3   : > { %v6808_v24 = vmul.f32 0.35355338, %v6718_v28  ;;  %v21741_v23 = vadd.f32 %v6824_v11, %v352_v38  ;;  %v360_v38 = vld [vmem:[%s25010_s3 + $0xd8] sm:$0xff] }
 0x7b4   : > { %v6807_v42 = vmul.f32 0.35355338, %v6712_v40  ;;  %v16972_v49 = vpop.f32.mrb[146].mxu1  ;;  %v21743_v50 = vadd.f32 %v6823_v33, %v351_v32  ;;  %v359_v32 = vld [vmem:[%s25010_s3 + $0xd0] sm:$0xff] }
 0x7b5   : > { %v6826_v17 = vadd.f32 %v6808_v24, %v21731_v14  ;;  %v6730_v21 = vadd.f32 %v16972_v49, %v6552_v47  ;;  %v6723_v22 = vpop.f32.mrb[147].mxu1  ;;  %v6862_v1 = vsel %vm1137_vm2, %v21741_v23, -inf }
 0x7b6   : > { %v6825_v46 = vadd.f32 %v6807_v42, %v21731_v14  ;;  %v6724_v7 = vadd.f32 %v6723_v22, %v21692_v63  ;;  %6863 = vmax.xlane.f32.xlu0 %v6862_v1  ;;  %v6859_v8 = vsel %vm1137_vm2, %v21743_v50, -inf }
 0x7b7   : > { %v6810_v39 = vmul.f32 0.35355338, %v6730_v21  ;;  %6860 = vmax.xlane.f32.xlu1 %v6859_v8  ;;  %v21758_v15 = vadd.f32 %v6826_v17, %v354_v10  ;;  %v362_v21 = vld [vmem:[%s25010_s3 + $0xe8] sm:$0xff] }
 0x7b8   : > { %v6809_v47 = vmul.f32 0.35355338, %v6724_v7  ;;  %v16975_v3 = vpop.f32.mrb[148].mxu1  ;;  %v21760_v5 = vadd.f32 %v6825_v46, %v353_v35  ;;  %v361_v46 = vld [vmem:[%s25010_s3 + $0xe0] sm:$0xff] }
 0x7b9   : > { %v6828_v36 = vadd.f32 %v6810_v39, %v21731_v14  ;;  %v6742_v63 = vadd.f32 %v16975_v3, %v21695_v31  ;;  %v6735_v9 = vpop.f32.mrb[149].mxu1  ;;  %v6868_v55 = vsel %vm1137_vm2, %v21758_v15, -inf }
 0x7ba   : > { %v6827_v56 = vadd.f32 %v6809_v47, %v21731_v14  ;;  %v6736_v0 = vadd.f32 %v6735_v9, %v21698_v61  ;;  %v6865_v54 = vsel %vm1137_vm2, %v21760_v5, -inf }
 0x7bb   : > { %v6812_v51 = vmul.f32 0.35355338, %v6742_v63  ;;  %6866 = vmax.xlane.f32.xlu0 %v6865_v54  ;;  %6869 = vmax.xlane.f32.xlu1 %v6868_v55  ;;  %v21776_v12 = vadd.f32 %v6828_v36, %v356_v58  ;;  %v364_v63 = vld [vmem:[%s25010_s3 + $0xf8] sm:$0xff] }
 0x7bc   : > { %v6811_v31 = vmul.f32 0.35355338, %v6736_v0  ;;  %v16978_v43 = vpop.f32.mrb[150].mxu1  ;;  %v21778_v2 = vadd.f32 %v6827_v56, %v355_v60  ;;  %v363_v56 = vld [vmem:[%s25010_s3 + $0xf0] sm:$0xff] }
 0x7bd   : > { %v6830_v30 = vadd.f32 %v6812_v51, %v21731_v14  ;;  %v6754_v61 = vadd.f32 %v16978_v43, %v21701_v25  ;;  %v6747_v4 = vpop.f32.mrb[151].mxu1  ;;  %v6874_v27 = vsel %vm1137_vm2, %v21776_v12, -inf }
 0x7be   : > { %v6829_v62 = vadd.f32 %v6811_v31, %v21731_v14  ;;  %v6748_v29 = vadd.f32 %v6747_v4, %v21704_v48  ;;  %v6871_v44 = vsel %vm1137_vm2, %v21778_v2, -inf }
 0x7bf   : > { %v6814_v20 = vmul.f32 0.35355338, %v6754_v61  ;;  %6872 = vmax.xlane.f32.xlu0 %v6871_v44  ;;  %6875 = vmax.xlane.f32.xlu1 %v6874_v27  ;;  %v21794_v37 = vadd.f32 %v6830_v30, %v358_v53  ;;  %v366_v61 = vld [vmem:[%s25010_s3 + $0x108] sm:$0xff] }
 0x7c0   : > { %v6813_v25 = vmul.f32 0.35355338, %v6748_v29  ;;  %v16981_v26 = vpop.f32.mrb[152].mxu1  ;;  %v21796_v59 = vadd.f32 %v6829_v62, %v357_v57  ;;  %v365_v62 = vld [vmem:[%s25010_s3 + $0x100] sm:$0xff] }
 0x7c1   : > { %v6832_v11 = vadd.f32 %v6814_v20, %v21731_v14  ;;  %v6766_v48 = vadd.f32 %v16981_v26, %v21707_v16  ;;  %v6759_v28 = vpop.f32.mrb[153].mxu1  ;;  %v6880_v52 = vsel %vm1137_vm2, %v21794_v37, -inf }
 0x7c2   : > { %v6831_v33 = vadd.f32 %v6813_v25, %v21731_v14  ;;  %v6760_v40 = vadd.f32 %v6759_v28, %v21710_v45  ;;  %v6877_v24 = vsel %vm1137_vm2, %v21796_v59, -inf  ;;  %v367_v28 = vld [vmem:[%s25010_s3 + $0x110] sm:$0xff] }
 0x7c3   : > { %v6816_v42 = vmul.f32 0.35355338, %v6766_v48  ;;  %6878 = vmax.xlane.f32.xlu0 %v6877_v24  ;;  %6881 = vmax.xlane.f32.xlu1 %v6880_v52  ;;  %v21812_v49 = vadd.f32 %v6832_v11, %v360_v38  ;;  %v368_v11 = vld [vmem:[%s25010_s3 + $0x118] sm:$0xff] }
 0x7c4   : > { %v6815_v16 = vmul.f32 0.35355338, %v6760_v40  ;;  %v16984_v10 = vpop.f32.mrb[154].mxu1  ;;  %v21814_v17 = vadd.f32 %v6831_v33, %v359_v32 }
 0x7c5   : > { %v6834_v22 = vadd.f32 %v6816_v42, %v21731_v14  ;;  %v6778_v45 = vadd.f32 %v16984_v10, %v21713_v13  ;;  %v6771_v1 = vpop.f32.mrb[155].mxu1  ;;  %v6886_v35 = vsel %vm1137_vm2, %v21812_v49, -inf }
 0x7c6   : > { %v6833_v7 = vadd.f32 %v6815_v16, %v21731_v14  ;;  %v6772_v8 = vadd.f32 %v6771_v1, %v21716_v34  ;;  %v6883_v39 = vsel %vm1137_vm2, %v21814_v17, -inf }
 0x7c7   : > { %v6818_v47 = vmul.f32 0.35355338, %v6778_v45  ;;  %6884 = vmax.xlane.f32.xlu0 %v6883_v39  ;;  %6887 = vmax.xlane.f32.xlu1 %v6886_v35  ;;  %v21830_v3 = vadd.f32 %v6834_v22, %v362_v21 }
 0x7c8   : > { %v6817_v13 = vmul.f32 0.35355338, %v6772_v8  ;;  %v16987_v58 = vpop.f32.mrb[156].mxu1  ;;  %v21832_v36 = vadd.f32 %v6833_v7, %v361_v46 }
 0x7c9   : > { %v6836_v9 = vadd.f32 %v6818_v47, %v21731_v14  ;;  %v6790_v34 = vadd.f32 %v16987_v58, %v21719_v18  ;;  %v6783_v55 = vpop.f32.mrb[157].mxu1  ;;  %v6892_v60 = vsel %vm1137_vm2, %v21830_v3, -inf }
 0x7ca   : > { %v6835_v0 = vadd.f32 %v6817_v13, %v21731_v14  ;;  %v6784_v54 = vadd.f32 %v6783_v55, %v21722_v6  ;;  %v6889_v51 = vsel %vm1137_vm2, %v21832_v36, -inf }
 0x7cb   : > { %v6820_v31 = vmul.f32 0.35355338, %v6790_v34  ;;  %6890 = vmax.xlane.f32.xlu0 %v6889_v51  ;;  %6893 = vmax.xlane.f32.xlu1 %v6892_v60  ;;  %v21848_v43 = vadd.f32 %v6836_v9, %v364_v63 }
 0x7cc   : > { %v6819_v18 = vmul.f32 0.35355338, %v6784_v54  ;;  %v16990_v53 = vpop.f32.mrb[158].mxu1  ;;  %v21850_v30 = vadd.f32 %v6835_v0, %v363_v56 }
 0x7cd   : > { %v6838_v4 = vadd.f32 %v6820_v31, %v21731_v14  ;;  %v6802_v6 = vadd.f32 %v16990_v53, %v21725_v19  ;;  %v6795_v27 = vpop.f32.mrb[159].mxu1  ;;  %v6898_v57 = vsel %vm1137_vm2, %v21848_v43, -inf }
 0x7ce   : > { %v6837_v29 = vadd.f32 %v6819_v18, %v21731_v14  ;;  %v6796_v44 = vadd.f32 %v6795_v27, %v21728_v41  ;;  %v6895_v20 = vsel %vm1137_vm2, %v21850_v30, -inf }
 0x7cf   : > { %v6822_v25 = vmul.f32 0.35355338, %v6802_v6  ;;  %6896 = vmax.xlane.f32.xlu0 %v6895_v20  ;;  %6899 = vmax.xlane.f32.xlu1 %v6898_v57  ;;  %v21866_v26 = vadd.f32 %v6838_v4, %v366_v61 }
 0x7d0   : > { %v6821_v19 = vmul.f32 0.35355338, %v6796_v44  ;;  %v21868_v38 = vadd.f32 %v6837_v29, %v365_v62 }
 0x7d1   : > { %v6840_v48 = vadd.f32 %v6822_v25, %v21731_v14  ;;  %v6904_v41 = vsel %vm1137_vm2, %v21866_v26, -inf }
 0x7d2   : > { %v6839_v52 = vadd.f32 %v6821_v19, %v21731_v14  ;;  %v6901_v32 = vsel %vm1137_vm2, %v21868_v38, -inf }
 0x7d3   : > { %6902 = vmax.xlane.f32.xlu0 %v6901_v32  ;;  %6905 = vmax.xlane.f32.xlu1 %v6904_v41  ;;  %v21882_v33 = vadd.f32 %v6840_v48, %v368_v11 }
 0x7d4   : > { %v21884_v40 = vadd.f32 %v6839_v52, %v367_v28 }
 0x7d5   : > { %v6910_v24 = vsel %vm1137_vm2, %v21882_v33, -inf }
 0x7d6   : > { %v6907_v42 = vsel %vm1137_vm2, %v21884_v40, -inf }
 0x7d7   : > { %6908 = vmax.xlane.f32.xlu0 %v6907_v42  ;;  %6911 = vmax.xlane.f32.xlu1 %v6910_v24 }
 0x843   : > { %v6864_v16 = vpop.xlane.xlu0 %6863 }
 0x844   : > { %v6914_v14 = vsub.f32 %v21741_v23, %v6864_v16  ;;  %v6861_v10 = vpop.xlane.xlu1 %6860 }
 0x845   : > { %v6913_v21 = vsub.f32 %v21743_v50, %v6861_v10 }
 0x846   : > { %v6933_v22 = vmul.f32 1.442695, %v6914_v14 }
 0x847   : > { %v6931_v45 = vmul.f32 1.442695, %v6913_v21 }
 0x848   : > { %19413 = vpow2.f32 %v6933_v22  ;;  %v6867_v1 = vpop.xlane.xlu0 %6866  ;;  %v6870_v35 = vpop.xlane.xlu1 %6869 }
 0x849   : > { %19415 = vpow2.f32 %v6931_v45  ;;  %v6915_v46 = vsub.f32 %v21760_v5, %v6867_v1  ;;  %v6916_v7 = vsub.f32 %v21758_v15, %v6870_v35 }
 0x84b   : > { %v6935_v8 = vmul.f32 1.442695, %v6915_v46  ;;  %v6937_v39 = vmul.f32 1.442695, %v6916_v7 }
 0x84c   : > { %v6873_v47 = vpop.xlane.xlu0 %6872  ;;  %v6876_v13 = vpop.xlane.xlu1 %6875 }
 0x84d   : > { %19417 = vpow2.f32 %v6935_v8  ;;  %v6917_v23 = vsub.f32 %v21778_v2, %v6873_v47  ;;  %v6918_v58 = vsub.f32 %v21776_v12, %v6876_v13 }
 0x84e   : > { %19419 = vpow2.f32 %v6937_v39 }
 0x84f   : > { %v6939_v50 = vmul.f32 1.442695, %v6917_v23  ;;  %v6941_v63 = vmul.f32 1.442695, %v6918_v58 }
 0x850   : > { %v6879_v9 = vpop.xlane.xlu0 %6878  ;;  %v6882_v34 = vpop.xlane.xlu1 %6881 }
 0x851   : > { %19421 = vpow2.f32 %v6939_v50  ;;  %v6919_v55 = vsub.f32 %v21796_v59, %v6879_v9  ;;  %v6920_v5 = vsub.f32 %v21794_v37, %v6882_v34 }
 0x852   : > { %v21898_v15 = vpop.eup %19413  ;;  %19423 = vpow2.f32 %v6941_v63 }
 0x853   : > { %v21900_v60 = vpop.eup %19415  ;;  %v6943_v56 = vmul.f32 1.442695, %v6919_v55  ;;  %v6945_v0 = vmul.f32 1.442695, %v6920_v5  ;;  %v6970_v12 = vsel %vm1137_vm2, %v21898_v15, 0.0 }
 0x854   : > { %v6885_v2 = vpop.xlane.xlu0 %6884  ;;  %6971 = vadd.xlane.f32.xlu1 %v6970_v12  ;;  %v6888_v54 = vpop.xlane.xlu1 %6887  ;;  %v6967_v51 = vsel %vm1137_vm2, %v21900_v60, 0.0 }
 0x855   : > { %19425 = vpow2.f32 %v6943_v56  ;;  %v6921_v59 = vsub.f32 %v21814_v17, %v6885_v2  ;;  %v6922_v37 = vsub.f32 %v21812_v49, %v6888_v54  ;;  %6968 = vadd.xlane.f32.xlu0 %v6967_v51  ;;  %v25696_v54 = vld [vmem:[#allocation3_spill] sm:$0xff]  ;;  %v25697_v51 = vld [vmem:[#allocation4_spill] sm:$0xff] }
 0x856   : > { %19427 = vpow2.f32 %v6945_v0 }
 0x857   : > { %v21908_v31 = vpop.eup %19417  ;;  %v6947_v18 = vmul.f32 1.442695, %v6921_v59  ;;  %v6949_v53 = vmul.f32 1.442695, %v6922_v37  ;;  %v25698_v59 = vld [vmem:[#allocation2_spill] sm:$0xff] }
 0x858   : > { %v21910_v61 = vpop.eup %19419  ;;  %v6891_v4 = vpop.xlane.xlu0 %6890  ;;  %v6973_v27 = vsel %vm1137_vm2, %v21908_v31, 0.0  ;;  %v25699_v37 = vld [vmem:[#allocation6_spill] sm:$0xff] }
 0x859   : > { %v6894_v6 = vpop.xlane.xlu1 %6893  ;;  %19429 = vpow2.f32 %v6947_v18  ;;  %v6923_v57 = vsub.f32 %v21832_v36, %v6891_v4  ;;  %6974 = vadd.xlane.f32.xlu0 %v6973_v27  ;;  %v6976_v49 = vsel %vm1137_vm2, %v21910_v61, 0.0  ;;  %v25700_v18 = vld [vmem:[#allocation5_spill] sm:$0xff] }
 0x85a   : > { %v6924_v17 = vsub.f32 %v21830_v3, %v6894_v6  ;;  %19431 = vpow2.f32 %v6949_v53  ;;  %6977 = vadd.xlane.f32.xlu1 %v6976_v49 }
 0x85b   : > { %v21918_v62 = vpop.eup %19421  ;;  %v6951_v29 = vmul.f32 1.442695, %v6923_v57 }
 0x85c   : > { %v6953_v44 = vmul.f32 1.442695, %v6924_v17  ;;  %v21920_v20 = vpop.eup %19423  ;;  %v6897_v25 = vpop.xlane.xlu0 %6896  ;;  %v6979_v11 = vsel %vm1137_vm2, %v21918_v62, 0.0 }
 0x85d   : > { %v6900_v19 = vpop.xlane.xlu1 %6899  ;;  %19433 = vpow2.f32 %v6951_v29  ;;  %v6925_v3 = vsub.f32 %v21850_v30, %v6897_v25  ;;  %6980 = vadd.xlane.f32.xlu0 %v6979_v11  ;;  %v6982_v48 = vsel %vm1137_vm2, %v21920_v20, 0.0 }
 0x85e   : > { %v6926_v36 = vsub.f32 %v21848_v43, %v6900_v19  ;;  %19435 = vpow2.f32 %v6953_v44  ;;  %6983 = vadd.xlane.f32.xlu1 %v6982_v48 }
 0x85f   : > { %v21928_v41 = vpop.eup %19425  ;;  %v6955_v28 = vmul.f32 1.442695, %v6925_v3 }
 0x860   : > { %v6957_v52 = vmul.f32 1.442695, %v6926_v36  ;;  %v21930_v32 = vpop.eup %19427  ;;  %v6903_v24 = vpop.xlane.xlu0 %6902  ;;  %v6985_v16 = vsel %vm1137_vm2, %v21928_v41, 0.0  ;;  %v25703_v36 = vmov 0.0  }
 0x861   : > { %v6906_v42 = vpop.xlane.xlu1 %6905  ;;  %19437 = vpow2.f32 %v6955_v28  ;;  %v6927_v43 = vsub.f32 %v21868_v38, %v6903_v24  ;;  %6986 = vadd.xlane.f32.xlu0 %v6985_v16  ;;  %v6988_v14 = vsel %vm1137_vm2, %v21930_v32, 0.0  ;;  %v25705_v28 = vld [vmem:[#allocation91_spill] sm:$0xff]  ;;  %v25708_v16 = vld [vmem:[#allocation94_spill] sm:$0xff] }
 0x862   : > { %v6928_v30 = vsub.f32 %v21866_v26, %v6906_v42  ;;  %19439 = vpow2.f32 %v6957_v52  ;;  %6989 = vadd.xlane.f32.xlu1 %v6988_v14  ;;  %v25706_v52 = vld [vmem:[#allocation89_spill] sm:$0xff] }
 0x863   : > { %v21938_v10 = vpop.eup %19429  ;;  %v6959_v21 = vmul.f32 1.442695, %v6927_v43  ;;  %v25709_v43 = vld [vmem:[#allocation95_spill] sm:$0xff] }
 0x864   : > { %v6961_v22 = vmul.f32 1.442695, %v6928_v30  ;;  %v21940_v45 = vpop.eup %19431  ;;  %v6909_v1 = vpop.xlane.xlu0 %6908  ;;  %v6991_v46 = vsel %vm1137_vm2, %v21938_v10, 0.0 }
 0x865   : > { %v6912_v35 = vpop.xlane.xlu1 %6911  ;;  %19441 = vpow2.f32 %v6959_v21  ;;  %v6929_v26 = vsub.f32 %v21884_v40, %v6909_v1  ;;  %6992 = vadd.xlane.f32.xlu0 %v6991_v46  ;;  %v6994_v7 = vsel %vm1137_vm2, %v21940_v45, 0.0 }
 0x866   : > { %v6930_v38 = vsub.f32 %v21882_v33, %v6912_v35  ;;  %19443 = vpow2.f32 %v6961_v22  ;;  %6995 = vadd.xlane.f32.xlu1 %v6994_v7 }
 0x867   : > { %v21948_v8 = vpop.eup %19433  ;;  %v6963_v39 = vmul.f32 1.442695, %v6929_v26 }
 0x868   : > { %v6965_v47 = vmul.f32 1.442695, %v6930_v38  ;;  %v21950_v13 = vpop.eup %19435  ;;  %v6997_v23 = vsel %vm1137_vm2, %v21948_v8, 0.0 }
 0x869   : > { %19445 = vpow2.f32 %v6963_v39  ;;  %6998 = vadd.xlane.f32.xlu0 %v6997_v23  ;;  %v7000_v33 = vsel %vm1137_vm2, %v21950_v13, 0.0 }
 0x86a   : > { %19447 = vpow2.f32 %v6965_v47  ;;  %7001 = vadd.xlane.f32.xlu1 %v7000_v33 }
 0x86b   : > { %v21956_v40 = vpop.eup %19437 }
 0x86c   : > { %v21958_v58 = vpop.eup %19439  ;;  %v7003_v50 = vsel %vm1137_vm2, %v21956_v40, 0.0 }
 0x86d   : > { %7004 = vadd.xlane.f32.xlu0 %v7003_v50  ;;  %v7006_v63 = vsel %vm1137_vm2, %v21958_v58, 0.0 }
 0x86e   : > { %7007 = vadd.xlane.f32.xlu1 %v7006_v63 }
 0x86f   : > { %v21964_v9 = vpop.eup %19441 }
 0x870   : > { %v21966_v34 = vpop.eup %19443  ;;  %v7009_v55 = vsel %vm1137_vm2, %v21964_v9, 0.0 }
 0x871   : > { %7010 = vadd.xlane.f32.xlu0 %v7009_v55  ;;  %v7012_v5 = vsel %vm1137_vm2, %v21966_v34, 0.0 }
 0x872   : > { %7013 = vadd.xlane.f32.xlu1 %v7012_v5 }
 0x873   : > { %v21972_v56 = vpop.eup %19445 }
 0x874   : > { %v21974_v0 = vpop.eup %19447  ;;  %v7015_v12 = vsel %vm1137_vm2, %v21972_v56, 0.0 }
 0x875   : > { %7016 = vadd.xlane.f32.xlu0 %v7015_v12  ;;  %v7018_v2 = vsel %vm1137_vm2, %v21974_v0, 0.0 }
 0x876   : > { %7019 = vadd.xlane.f32.xlu1 %v7018_v2 }
 0x887   : > { %11388 = vrot.lane.b32.xlu1 %v25696_v54, %s19594_s12 }
 0x88b   : > { %11390 = vrot.lane.b32.xlu1 %v25697_v51, %s19594_s12  ;;  %11386 = vrot.lane.b32.xlu0 %v25698_v59, %s19594_s12 }
 0x88f   : > { %11394 = vrot.lane.b32.xlu1 %v25699_v37, %s19594_s12  ;;  %11392 = vrot.lane.b32.xlu0 %v25700_v18, %s19594_s12 }
 0x8e1   : > { %v6972_v53 = vpop.xlane.xlu1 %6971 }
 0x8e2   : > { %19449 = vrcp.f32 %v6972_v53  ;;  %v6969_v4 = vpop.xlane.xlu0 %6968 }
 0x8e3   : > { %19451 = vrcp.f32 %v6969_v4 }
 0x8e6   : > { %v6975_v6 = vpop.xlane.xlu0 %6974 }
 0x8e7   : > { %19453 = vrcp.f32 %v6975_v6  ;;  %v6978_v27 = vpop.xlane.xlu1 %6977 }
 0x8e8   : > { %19455 = vrcp.f32 %v6978_v27 }
 0x8ea   : > { %v6981_v57 = vpop.xlane.xlu0 %6980 }
 0x8eb   : > { %19457 = vrcp.f32 %v6981_v57  ;;  %v6984_v17 = vpop.xlane.xlu1 %6983 }
 0x8ec   : > { %v19450_v49 = vpop.eup %19449  ;;  %19459 = vrcp.f32 %v6984_v17 }
 0x8ed   : > { %v19452_v29 = vpop.eup %19451  ;;  %v21989_v19 = vmul.f32 %v19450_v49, %v21898_v15 }
 0x8ee   : > { %v21986_v44 = vmul.f32 %v19452_v29, %v21900_v60  ;;  %v6987_v25 = vpop.xlane.xlu0 %6986 }
 0x8ef   : > { %25702 = vst [vmem:[#allocation53_spill] sm:$0xff] %v21989_v19  ;;  %19461 = vrcp.f32 %v6987_v25  ;;  %v6990_v11 = vpop.xlane.xlu1 %6989 }
 0x8f0   : > { %25701 = vst [vmem:[#allocation49_spill] sm:$0xff] %v21986_v44  ;;  %19463 = vrcp.f32 %v6990_v11  ;;  %15074 = vmatmul.mubr.msk.f32.vlgmr.msra.gmra.mrb[102].mxu0 %vm1137_vm2, %v21986_v44  ;;  %17001 = vmatprep.mubr.msk.f32.mxu1 %vm1137_vm2, %v21986_v44 }
 0x8f1   : > { %v19454_v3 = vpop.eup %19453  ;;  %17002 = vmatmul.mubr.msk.f32.vlgmr.msra.gmra.mrb[160].mxu1 %vm1137_vm2, %v21989_v19  ;;  %7190 = vmatprep.mubr.f32.mxu0 %v25703_v36 }
 0x8f2   : > { %v19456_v60 = vpop.eup %19455  ;;  %v6993_v48 = vpop.xlane.xlu0 %6992  ;;  %v21999_v15 = vmul.f32 %v19454_v3, %v21908_v31  ;;  %18283 = vmatpush1.bf16.xpose.msra.mxu1 %v25705_v28  ;;  %18307 = vmatpush3.bf16.xpose.msra.mxu0 %v25706_v52 }
 0x8f3   : > { %19465 = vrcp.f32 %v6993_v48  ;;  %v6996_v24 = vpop.xlane.xlu1 %6995  ;;  %v22004_v42 = vmul.f32 %v19456_v60, %v21910_v61  ;;  %18285 = vmatprep.subr.bf16.mxu1 %v25708_v16  ;;  %18309 = vmatprep.subr.bf16.mxu0 %v25709_v43  ;;  %v19505_v16 = vld [vmem:[%s25011_s4] sm:$0xff] }
 0x8f4   : > { %25704 = vst [vmem:[#allocation57_spill] sm:$0xff] %v21999_v15  ;;  %19467 = vrcp.f32 %v6996_v24  ;;  %15075 = vmatmul.mubr.msk.f32.gmra.mrb[104].mxu0 %vm1137_vm2, %v21989_v19  ;;  %17004 = vmatprep.mubr.msk.f32.mxu1 %vm1137_vm2, %v21999_v15 }
 0x8f5   : > { %25707 = vst [vmem:[#allocation63_spill] sm:$0xff] %v22004_v42  ;;  %v19458_v31 = vpop.eup %19457  ;;  %17005 = vmatmul.mubr.msk.f32.gmra.mrb[162].mxu1 %vm1137_vm2, %v22004_v42  ;;  %7196 = vmatprep.mubr.f32.mxu0 %v25703_v36 }
 0x8f6   : > { %v19460_v30 = vpop.eup %19459  ;;  %v6999_v61 = vpop.xlane.xlu0 %6998  ;;  %v22016_v14 = vmul.f32 %v19458_v31, %v21918_v62 }
 0x8f7   : > { %19469 = vrcp.f32 %v6999_v61  ;;  %v7002_v21 = vpop.xlane.xlu1 %7001  ;;  %v22019_v22 = vmul.f32 %v19460_v30, %v21920_v20 }
 0x8f8   : > { %25710 = vst [vmem:[#allocation65_spill] sm:$0xff] %v22016_v14  ;;  %19471 = vrcp.f32 %v7002_v21  ;;  %15076 = vmatmul.mubr.msk.f32.gmra.mrb[106].mxu0 %vm1137_vm2, %v21999_v15  ;;  %17007 = vmatprep.mubr.msk.f32.mxu1 %vm1137_vm2, %v22016_v14  ;;  %v19506_v21 = vld [vmem:[%s25011_s4 + $0x8] sm:$0xff] }
 0x8f9   : > { %25711 = vst [vmem:[#allocation68_spill] sm:$0xff] %v22019_v22  ;;  %v19462_v1 = vpop.eup %19461  ;;  %17008 = vmatmul.mubr.msk.f32.gmra.mrb[164].mxu1 %vm1137_vm2, %v22019_v22  ;;  %7202 = vmatprep.mubr.f32.mxu0 %v25703_v36 }
 0x8fa   : > { %v19464_v62 = vpop.eup %19463  ;;  %v7005_v35 = vpop.xlane.xlu0 %7004  ;;  %v22029_v46 = vmul.f32 %v19462_v1, %v21928_v41 }
 0x8fb   : > { %19473 = vrcp.f32 %v7005_v35  ;;  %v7008_v20 = vpop.xlane.xlu1 %7007  ;;  %v22032_v26 = vmul.f32 %v19464_v62, %v21930_v32  ;;  %v19507_v62 = vld [vmem:[%s25011_s4 + $0x28] sm:$0xff] }
 0x8fc   : > { %25712 = vst [vmem:[#allocation73_spill] sm:$0xff] %v22029_v46  ;;  %19475 = vrcp.f32 %v7008_v20  ;;  %15077 = vmatmul.mubr.msk.f32.gmra.mrb[108].mxu0 %vm1137_vm2, %v22004_v42  ;;  %17010 = vmatprep.mubr.msk.f32.mxu1 %vm1137_vm2, %v22029_v46 }
 0x8fd   : > { %25713 = vst [vmem:[#allocation12_spill] sm:$0xff] %v22032_v26  ;;  %v19466_v38 = vpop.eup %19465  ;;  %17011 = vmatmul.mubr.msk.f32.gmra.mrb[166].mxu1 %vm1137_vm2, %v22032_v26  ;;  %7208 = vmatprep.mubr.f32.mxu0 %v25703_v36 }
 0x8fe   : > { %v19468_v41 = vpop.eup %19467  ;;  %v7011_v7 = vpop.xlane.xlu0 %7010  ;;  %v22042_v39 = vmul.f32 %v19466_v38, %v21938_v10 }
 0x8ff   : > { %19477 = vrcp.f32 %v7011_v7  ;;  %v7014_v32 = vpop.xlane.xlu1 %7013  ;;  %v22045_v47 = vmul.f32 %v19468_v41, %v21940_v45  ;;  %v19508_v41 = vld [vmem:[%s25011_s4 + $0x10] sm:$0xff] }
 0x900   : > { %25714 = vst [vmem:[#allocation78_spill] sm:$0xff] %v22042_v39  ;;  %19479 = vrcp.f32 %v7014_v32  ;;  %15078 = vmatmul.mubr.msk.f32.gmra.mrb[110].mxu0 %vm1137_vm2, %v22016_v14  ;;  %17013 = vmatprep.mubr.msk.f32.mxu1 %vm1137_vm2, %v22042_v39 }
 0x901   : > { %25715 = vst [vmem:[#allocation81_spill] sm:$0xff] %v22045_v47  ;;  %v19470_v23 = vpop.eup %19469  ;;  %17014 = vmatmul.mubr.msk.f32.gmra.mrb[168].mxu1 %vm1137_vm2, %v22045_v47  ;;  %7214 = vmatprep.mubr.f32.mxu0 %v25703_v36 }
 0x902   : > { %v19472_v10 = vpop.eup %19471  ;;  %v7017_v33 = vpop.xlane.xlu0 %7016  ;;  %v22055_v50 = vmul.f32 %v19470_v23, %v21948_v8 }
 0x903   : > { %19481 = vrcp.f32 %v7017_v33  ;;  %v7020_v45 = vpop.xlane.xlu1 %7019  ;;  %v22058_v63 = vmul.f32 %v19472_v10, %v21950_v13 }
 0x904   : > { %25716 = vst [vmem:[#allocation83_spill] sm:$0xff] %v22055_v50  ;;  %19483 = vrcp.f32 %v7020_v45  ;;  %15079 = vmatmul.mubr.msk.f32.gmra.mrb[112].mxu0 %vm1137_vm2, %v22019_v22  ;;  %17016 = vmatprep.mubr.msk.f32.mxu1 %vm1137_vm2, %v22055_v50 }
 0x905   : > { %25717 = vst [vmem:[#allocation85_spill] sm:$0xff] %v22058_v63  ;;  %v19474_v55 = vpop.eup %19473  ;;  %17017 = vmatmul.mubr.msk.f32.gmra.mrb[170].mxu1 %vm1137_vm2, %v22058_v63  ;;  %7220 = vmatprep.mubr.f32.mxu0 %v25703_v36 }
 0x906   : > { %v19476_v8 = vpop.eup %19475  ;;  %v22067_v5 = vpop.permute.xlu0 %11386  ;;  %v22070_v12 = vmul.f32 %v19474_v55, %v21956_v40  ;;  %v19509_v55 = vld [vmem:[%s25011_s4 + $0x18] sm:$0xff] }
 0x907   : > { %25718 = vst [vmem:[#allocation86_spill] sm:$0xff] %v22067_v5  ;;  %v22072_v13 = vpop.permute.xlu1 %11388  ;;  %v22075_v2 = vmul.f32 %v19476_v8, %v21958_v58  ;;  %v25196_v53 = vand.u32 4294901760, %v22067_v5 }
 0x908   : > { %25719 = vst [vmem:[#allocation87_spill] sm:$0xff] %v22070_v12  ;;  %25720 = vst [vmem:[#allocation88_spill] sm:$0xff] %v22072_v13  ;;  %15080 = vmatmul.mubr.msk.f32.gmra.mrb[114].mxu0 %vm1137_vm2, %v22029_v46  ;;  %17019 = vmatprep.mubr.msk.f32.mxu1 %vm1137_vm2, %v22070_v12  ;;  %v25195_v4 = vand.u32 4294901760, %v22072_v13 }
 0x909   : > { %25721 = vst [vmem:[#allocation23_spill] sm:$0xff] %v22075_v2  ;;  %v19478_v54 = vpop.eup %19477  ;;  %17020 = vmatmul.mubr.msk.f32.gmra.mrb[172].mxu1 %vm1137_vm2, %v22075_v2  ;;  %7226 = vmatprep.mubr.f32.mxu0 %v25703_v36  ;;  %v22116_v17 = vsub.f32 %v22067_v5, %v25196_v53 }
 0x90a   : > { %v19480_v51 = vpop.eup %19479  ;;  %v22085_v40 = vmul.f32 %v19478_v54, %v21964_v9  ;;  %v22087_v59 = vpop.permute.xlu0 %11392  ;;  %v22121_v49 = vsub.f32 %v22072_v13, %v25195_v4 }
 0x90b   : > { %25723 = vst [vmem:[#allocation24_spill] sm:$0xff] %v22087_v59  ;;  %v22089_v58 = vpop.permute.xlu1 %11390  ;;  %v22092_v37 = vmul.f32 %v19480_v51, %v21966_v34  ;;  %v25191_v34 = vand.u32 4294901760, %v22087_v59  ;;  %25728 = vst [vmem:[#allocation40_spill] sm:$0xff] %v22116_v17  ;;  %v25194_v29 = vand.u32 4294901760, %v22116_v17 }
 0x90c   : > { %25722 = vst [vmem:[#allocation21_spill] sm:$0xff] %v22085_v40  ;;  %25724 = vst [vmem:[#allocation15_spill] sm:$0xff] %v22089_v58  ;;  %15081 = vmatmul.mubr.msk.f32.gmra.mrb[116].mxu0 %vm1137_vm2, %v22032_v26  ;;  %17022 = vmatprep.mubr.msk.f32.mxu1 %vm1137_vm2, %v22085_v40  ;;  %v25192_v6 = vand.u32 4294901760, %v22089_v58  ;;  %v25193_v25 = vand.u32 4294901760, %v22121_v49 }
 0x90d   : > { %25725 = vst [vmem:[#allocation22_spill] sm:$0xff] %v22092_v37  ;;  %v19482_v18 = vpop.eup %19481  ;;  %17023 = vmatmul.mubr.msk.f32.gmra.mrb[174].mxu1 %vm1137_vm2, %v22092_v37  ;;  %7232 = vmatprep.mubr.f32.mxu0 %v25703_v36  ;;  %25729 = vst [vmem:[#allocation37_spill] sm:$0xff] %v22121_v49 }
 0x90e   : > { %v19484_v9 = vpop.eup %19483  ;;  %v22106_v27 = vmul.f32 %v19482_v18, %v21972_v56  ;;  %v22129_v56 = vsub.f32 %v22087_v59, %v25191_v34  ;;  %v22152_v60 = vpack.c.bf16 %v25193_v25, %v25194_v29  ;;  %v19514_v25 = vld [vmem:[%s25011_s4 + $0x38] sm:$0xff] }
 0x90f   : > { %v22109_v57 = vmul.f32 %v19484_v9, %v21974_v0  ;;  %v22134_v0 = vsub.f32 %v22089_v58, %v25192_v6 }
 0x910   : > { %25726 = vst [vmem:[#allocation32_spill] sm:$0xff] %v22106_v27  ;;  %15082 = vmatmul.mubr.msk.f32.gmra.mrb[118].mxu0 %vm1137_vm2, %v22042_v39  ;;  %17025 = vmatprep.mubr.msk.f32.mxu1 %vm1137_vm2, %v22106_v27  ;;  %25730 = vst [vmem:[#allocation48_spill] sm:$0xff] %v22129_v56  ;;  %v25190_v11 = vand.u32 4294901760, %v22129_v56 }
 0x911   : > { %25727 = vst [vmem:[#allocation31_spill] sm:$0xff] %v22109_v57  ;;  %7238 = vmatprep.mubr.f32.mxu0 %v25703_v36  ;;  %25731 = vst [vmem:[#allocation45_spill] sm:$0xff] %v22134_v0  ;;  %17026 = vmatmul.mubr.msk.f32.gmra.mrb[176].mxu1 %vm1137_vm2, %v22109_v57  ;;  %v25189_v3 = vand.u32 4294901760, %v22134_v0 }
 0x912   : > { %25732 = vst [vmem:[#allocation56_spill] sm:$0xff] %v22152_v60 }
 0x913   : > { %v22158_v48 = vpack.c.bf16 %v25190_v11, %v25189_v3 }
 0x914   : > { %15083 = vmatmul.mubr.msk.f32.gmra.mrb[120].mxu0 %vm1137_vm2, %v22045_v47 }
 0x915   : > { %7244 = vmatprep.mubr.f32.mxu0 %v25703_v36  ;;  %25733 = vst [vmem:[#allocation54_spill] sm:$0xff] %v22158_v48 }
 0x918   : > { %15084 = vmatmul.mubr.msk.f32.gmra.mrb[122].mxu0 %vm1137_vm2, %v22055_v50 }
 0x919   : > { %7250 = vmatprep.mubr.f32.mxu0 %v25703_v36 }
 0x91c   : > { %15085 = vmatmul.mubr.msk.f32.gmra.mrb[124].mxu0 %vm1137_vm2, %v22058_v63 }
 0x91d   : > { %7256 = vmatprep.mubr.f32.mxu0 %v25703_v36 }
 0x920   : > { %15086 = vmatmul.mubr.msk.f32.gmra.mrb[126].mxu0 %vm1137_vm2, %v22070_v12 }
 0x921   : > { %7262 = vmatprep.mubr.f32.mxu0 %v25703_v36 }
 0x924   : > { %15087 = vmatmul.mubr.msk.f32.gmra.mrb[128].mxu0 %vm1137_vm2, %v22075_v2 }
 0x925   : > { %7268 = vmatprep.mubr.f32.mxu0 %v25703_v36 }
 0x928   : > { %15088 = vmatmul.mubr.msk.f32.gmra.mrb[130].mxu0 %vm1137_vm2, %v22085_v40 }
 0x929   : > { %7274 = vmatprep.mubr.f32.mxu0 %v25703_v36 }
 0x92c   : > { %15089 = vmatmul.mubr.msk.f32.gmra.mrb[132].mxu0 %vm1137_vm2, %v22092_v37  ;;  %v19519_v37 = vld [vmem:[%s25011_s4 + $0xb8] sm:$0xff] }
 0x92d   : > { %7280 = vmatprep.mubr.f32.mxu0 %v25703_v36 }
 0x930   : > { %15090 = vmatmul.mubr.msk.f32.gmra.mrb[134].mxu0 %vm1137_vm2, %v22106_v27 }
 0x931   : > { %7286 = vmatprep.mubr.f32.mxu0 %v25703_v36 }
 0x934   : > { %15091 = vmatmul.mubr.msk.f32.gmra.mrb[136].mxu0 %vm1137_vm2, %v22109_v57 }
 0x9c3   : > { %v7186_v24 = vpop.f32.mrb[102].mxu0 }
 0x9c4   : > { %v7448_v31 = vmul.f32 %v19505_v16, %v7186_v24  ;;  %v7188_v30 = vpop.f32.mrb[103].mxu0  ;;  %v17003_v61 = vpop.f32.mrb[160].mxu1  ;;  %v19510_v24 = vld [vmem:[%s25011_s4 + $0x20] sm:$0xff] }
 0x9c5   : > { %v7449_v1 = vmul.f32 %v19506_v21, %v7188_v30  ;;  %v7453_v35 = vmul.f32 %v19507_v62, %v17003_v61  ;;  %v7359_v20 = vpop.f32.mrb[161].mxu1 }
 0x9c6   : > { %v22189_v38 = vand.u32 4294901760, %v7448_v31  ;;  %v7450_v7 = vmul.f32 %v19508_v41, %v7359_v20 }
 0x9c7   : > { %v22194_v32 = vand.u32 4294901760, %v7449_v1  ;;  %v22196_v23 = vand.u32 4294901760, %v7453_v35  ;;  %v7192_v10 = vpop.f32.mrb[104].mxu0 }
 0x9c8   : > { %25734 = vst [vmem:[#allocation64_spill] sm:$0xff] %v22189_v38  ;;  %v22199_v33 = vsub.f32 %v7448_v31, %v22189_v38  ;;  %v22201_v45 = vand.u32 4294901760, %v7450_v7  ;;  %v7451_v8 = vmul.f32 %v19509_v55, %v7192_v10  ;;  %v7194_v54 = vpop.f32.mrb[105].mxu0  ;;  %v17006_v51 = vpop.f32.mrb[162].mxu1  ;;  %v19511_v31 = vld [vmem:[%s25011_s4 + $0x58] sm:$0xff] }
 0x9c9   : > { %25735 = vst [vmem:[#allocation62_spill] sm:$0xff] %v22194_v32  ;;  %v22207_v18 = vsub.f32 %v7449_v1, %v22194_v32  ;;  %v22210_v9 = vsub.f32 %v7453_v35, %v22196_v23  ;;  %v7452_v16 = vmul.f32 %v19510_v24, %v7194_v54  ;;  %v7459_v30 = vmul.f32 %v19511_v31, %v17006_v51  ;;  %v7369_v61 = vpop.f32.mrb[163].mxu1  ;;  %v19512_v1 = vld [vmem:[%s25011_s4 + $0x40] sm:$0xff] }
 0x9ca   : > { %25736 = vst [vmem:[#allocation72_spill] sm:$0xff] %v22199_v33  ;;  %25737 = vst [vmem:[#allocation69_spill] sm:$0xff] %v22201_v45  ;;  %v25197_v21 = vand.u32 4294901760, %v22199_v33  ;;  %v22219_v62 = vand.u32 4294901760, %v7451_v8  ;;  %v7456_v35 = vmul.f32 %v19512_v1, %v7369_v61  ;;  %v22234_v24 = vsub.f32 %v7450_v7, %v22201_v45  ;;  %v19513_v61 = vld [vmem:[%s25011_s4 + $0x30] sm:$0xff] }
 0x9cb   : > { %25738 = vst [vmem:[#allocation80_spill] sm:$0xff] %v22207_v18  ;;  %v25198_v20 = vand.u32 4294901760, %v22210_v9  ;;  %v22225_v41 = vand.u32 4294901760, %v7452_v16  ;;  %v22227_v10 = vand.u32 4294901760, %v7459_v30  ;;  %v7198_v55 = vpop.f32.mrb[106].mxu0  ;;  %v25203_v54 = vand.u32 4294901760, %v22207_v18 }
 0x9cc   : > { %25739 = vst [vmem:[#allocation77_spill] sm:$0xff] %v22219_v62  ;;  %v7579_v51 = vsub.f32 %v22199_v33, %v25197_v21  ;;  %v22236_v31 = vand.u32 4294901760, %v7456_v35  ;;  %v7454_v1 = vmul.f32 %v19513_v61, %v7198_v55  ;;  %v7200_v3 = vpop.f32.mrb[107].mxu0  ;;  %v17009_v11 = vpop.f32.mrb[164].mxu1  ;;  %v22247_v6 = vsub.f32 %v7451_v8, %v22219_v62  ;;  %v19515_v8 = vld [vmem:[%s25011_s4 + $0x88] sm:$0xff] }
 0x9cd   : > { %25740 = vst [vmem:[#allocation19_spill] sm:$0xff] %v22225_v41  ;;  %v22244_v34 = vsub.f32 %v22210_v9, %v25198_v20  ;;  %v22250_v7 = vsub.f32 %v7452_v16, %v22225_v41  ;;  %v7455_v29 = vmul.f32 %v19514_v25, %v7200_v3  ;;  %v7379_v4 = vpop.f32.mrb[165].mxu1  ;;  %v22256_v61 = vsub.f32 %v7459_v30, %v22227_v10  ;;  %v19516_v25 = vld [vmem:[%s25011_s4 + $0x70] sm:$0xff] }
 0x9ce   : > { %25741 = vst [vmem:[#allocation17_spill] sm:$0xff] %v22247_v6  ;;  %v7580_v55 = vand.u32 4294901760, %v7579_v51  ;;  %v22258_v53 = vand.u32 4294901760, %v7454_v1  ;;  %v7465_v21 = vmul.f32 %v19515_v8, %v17009_v11  ;;  %v22264_v16 = vsub.f32 %v7456_v35, %v22236_v31  ;;  %v19517_v11 = vld [vmem:[%s25011_s4 + $0x48] sm:$0xff] }
 0x9cf   : > { %25742 = vst [vmem:[#allocation20_spill] sm:$0xff] %v22250_v7  ;;  %25743 = vst [vmem:[#allocation18_spill] sm:$0xff] %v22256_v61  ;;  %v22266_v20 = vand.u32 4294901760, %v7455_v29  ;;  %v7462_v3 = vmul.f32 %v19516_v25, %v7379_v4  ;;  %v7204_v51 = vpop.f32.mrb[108].mxu0  ;;  %v7573_v30 = vsub.f32 %v22207_v18, %v25203_v54  ;;  %v9033_v48 = vand.u32 4294901760, %v22244_v34  ;;  %v19518_v34 = vld [vmem:[%s25011_s4 + $0x50] sm:$0xff] }
 0x9d0   : > { %25744 = vst [vmem:[#allocation28_spill] sm:$0xff] %v22258_v53  ;;  %v22275_v60 = vand.u32 4294901760, %v7465_v21  ;;  %v7457_v35 = vmul.f32 %v19517_v11, %v7204_v51  ;;  %v7206_v8 = vpop.f32.mrb[109].mxu0  ;;  %v17012_v57 = vpop.f32.mrb[166].mxu1  ;;  %v22282_v4 = vsub.f32 %v7454_v1, %v22258_v53  ;;  %v19520_v1 = vld [vmem:[%s25011_s4 + $0xa0] sm:$0xff] }
 0x9d1   : > { %25745 = vst [vmem:[#allocation26_spill] sm:$0xff] %v22266_v20  ;;  %v22284_v25 = vand.u32 4294901760, %v7462_v3  ;;  %v7458_v54 = vmul.f32 %v19518_v34, %v7206_v8  ;;  %v7471_v40 = vmul.f32 %v19519_v37, %v17012_v57  ;;  %v7389_v51 = vpop.f32.mrb[167].mxu1  ;;  %v22293_v11 = vsub.f32 %v7455_v29, %v22266_v20 }
 0x9d2   : > { %25746 = vst [vmem:[#allocation34_spill] sm:$0xff] %v22282_v4  ;;  %v22295_v27 = vand.u32 4294901760, %v7457_v35  ;;  %v7468_v2 = vmul.f32 %v19520_v1, %v7389_v51  ;;  %v7574_v12 = vand.u32 4294901760, %v7573_v30  ;;  %v22301_v63 = vsub.f32 %v7465_v21, %v22275_v60  ;;  %v19521_v21 = vld [vmem:[%s25011_s4 + $0x60] sm:$0xff] }
 0x9d3   : > { %25747 = vst [vmem:[#allocation33_spill] sm:$0xff] %v22293_v11  ;;  %v22303_v8 = vand.u32 4294901760, %v7458_v54  ;;  %v22305_v34 = vand.u32 4294901760, %v7471_v40  ;;  %v25751_v37 = vand.u32 4294901760, %v22234_v24  ;;  %v7210_v29 = vpop.f32.mrb[110].mxu0  ;;  %v22311_v50 = vsub.f32 %v7462_v3, %v22284_v25 }
 0x9d4   : > { %25748 = vst [vmem:[#allocation43_spill] sm:$0xff] %v22295_v27  ;;  %25749 = vst [vmem:[#allocation42_spill] sm:$0xff] %v22301_v63  ;;  %v22313_v47 = vand.u32 4294901760, %v7468_v2  ;;  %7575 = vmatprep.mubr.f32.mxu1 %v7574_v12  ;;  %v7460_v30 = vmul.f32 %v19521_v21, %v7210_v29  ;;  %v7212_v51 = vpop.f32.mrb[111].mxu0  ;;  %v17015_v1 = vpop.f32.mrb[168].mxu1  ;;  %v22320_v56 = vsub.f32 %v7457_v35, %v22295_v27  ;;  %v19522_v12 = vld [vmem:[%s25011_s4 + $0x68] sm:$0xff] }
 0x9d5   : > { %25750 = vst [vmem:[#allocation52_spill] sm:$0xff] %v22303_v8  ;;  %v9022_v57 = vsub.f32 %v22234_v24, %v25751_v37  ;;  %25752 = vst [vmem:[#allocation50_spill] sm:$0xff] %v22311_v50  ;;  %v22323_v37 = vsub.f32 %v7458_v54, %v22303_v8  ;;  %7581 = vmatmul.mubr.f32.vlgmr.msra.gmra.mrb[178].mxu1 %v7580_v55  ;;  %v7461_v39 = vmul.f32 %v19522_v12, %v7212_v51  ;;  %v7399_v26 = vpop.f32.mrb[169].mxu1  ;;  %v19523_v35 = vld [vmem:[%s25011_s4 + $0xe8] sm:$0xff]  ;;  %v19524_v54 = vld [vmem:[%s25011_s4 + $0xd0] sm:$0xff] }
 0x9d6   : > { %25753 = vst [vmem:[#allocation59_spill] sm:$0xff] %v22320_v56  ;;  %v22329_v29 = vsub.f32 %v7471_v40, %v22305_v34  ;;  %v22331_v21 = vand.u32 4294901760, %v7460_v30  ;;  %v7477_v0 = vmul.f32 %v19523_v35, %v17015_v1  ;;  %v7474_v55 = vmul.f32 %v19524_v54, %v7399_v26  ;;  %v25760_v1 = vld [vmem:[#allocation99_spill] sm:$0xff]  ;;  %v19525_v54 = vld [vmem:[%s25011_s4 + $0x78] sm:$0xff] }
 0x9d7   : > { %25754 = vst [vmem:[#allocation58_spill] sm:$0xff] %v22323_v37  ;;  %v9023_v3 = vand.u32 4294901760, %v9022_v57  ;;  %v25757_v57 = vld [vmem:[#allocation98_spill] sm:$0xff]  ;;  %v22340_v51 = vand.u32 4294901760, %v7461_v39  ;;  %v25759_v40 = vand.u32 4294901760, %v22250_v7  ;;  %v7216_v14 = vpop.f32.mrb[112].mxu0  ;;  %v22349_v35 = vsub.f32 %v7468_v2, %v22313_v47 }
 0x9d8   : > { %25755 = vst [vmem:[#allocation67_spill] sm:$0xff] %v22329_v29  ;;  %25756 = vst [vmem:[#allocation66_spill] sm:$0xff] %v22331_v21  ;;  %18287 = vmatpush1.bf16.xpose.msra.mxu1 %v25757_v57  ;;  %v22351_v26 = vand.u32 4294901760, %v7477_v0  ;;  %v7463_v57 = vmul.f32 %v19525_v54, %v7216_v14  ;;  %v17018_v46 = vpop.f32.mrb[170].mxu1  ;;  %v22359_v22 = vsub.f32 %v7460_v30, %v22331_v21  ;;  %v25768_v54 = vld [vmem:[#allocation96_spill] sm:$0xff]  ;;  %v25773_v13 = vand.u32 4294901760, %v22282_v4 }
 0x9d9   : > { %17032 = vmatprep.mubr.f32.mxu0 %v9023_v3  ;;  %25758 = vst [vmem:[#allocation75_spill] sm:$0xff] %v22340_v51  ;;  %v7588_v12 = vsub.f32 %v22250_v7, %v25759_v40  ;;  %18289 = vmatprep.subr.bf16.mxu1 %v25760_v1  ;;  %25761 = vst [vmem:[#allocation74_spill] sm:$0xff] %v22349_v35  ;;  %v22353_v3 = vand.u32 4294901760, %v7474_v55  ;;  %v7218_v40 = vpop.f32.mrb[113].mxu0  ;;  %v25763_v1 = vand.u32 4294901760, %v22247_v6  ;;  %v7409_v19 = vpop.f32.mrb[171].mxu1 }
 0x9da   : > { %17033 = vmatmul.mubr.f32.vlgmr.msra.gmra.mrb[138].mxu0 %v9033_v48  ;;  %25762 = vst [vmem:[#allocation13_spill] sm:$0xff] %v22359_v22  ;;  %v25764_v48 = vand.u32 4294901760, %v22264_v16  ;;  %v22369_v44 = vsub.f32 %v7461_v39, %v22340_v51  ;;  %v22372_v14 = vsub.f32 %v7477_v0, %v22351_v26  ;;  %v22374_v30 = vand.u32 4294901760, %v7463_v57  ;;  %v19527_v39 = vld [vmem:[%s25011_s4 + $0x118] sm:$0xff] }
 0x9db   : > { %v7589_v42 = vand.u32 4294901760, %v7588_v12  ;;  %v7594_v2 = vsub.f32 %v22247_v6, %v25763_v1  ;;  %18311 = vmatpush3.bf16.xpose.msra.mxu0 %v25709_v43  ;;  %v25231_v12 = vand.u32 4294901760, %v22256_v61  ;;  %v7483_v0 = vmul.f32 %v19527_v39, %v17018_v46  ;;  %v7222_v58 = vpop.f32.mrb[114].mxu0 }
 0x9dc   : > { %v9042_v15 = vsub.f32 %v22264_v16, %v25764_v48  ;;  %25765 = vst [vmem:[#allocation16_spill] sm:$0xff] %v22369_v44  ;;  %25766 = vst [vmem:[#allocation29_spill] sm:$0xff] %v22372_v14  ;;  %18313 = vmatprep.subr.bf16.mxu0 %v25768_v54  ;;  %v19526_v48 = vld [vmem:[%s25011_s4 + $0x80] sm:$0xff]  ;;  %v22385_v49 = vsub.f32 %v7474_v55, %v22353_v3  ;;  %v17021_v17 = vpop.f32.mrb[172].mxu1  ;;  %v25774_v6 = vand.u32 4294901760, %v22311_v50  ;;  %v25782_v51 = vand.u32 4294901760, %v22349_v35 }
 0x9dd   : > { %25767 = vst [vmem:[#allocation25_spill] sm:$0xff] %v22374_v30  ;;  %7590 = vmatprep.mubr.f32.mxu1 %v7589_v42  ;;  %v7595_v1 = vand.u32 4294901760, %v7594_v2  ;;  %v7464_v43 = vmul.f32 %v19526_v48, %v7218_v40  ;;  %v9052_v42 = vsub.f32 %v22256_v61, %v25231_v12  ;;  %v25236_v40 = vand.u32 4294901760, %v22293_v11  ;;  %v7224_v48 = vpop.f32.mrb[115].mxu0  ;;  %v7419_v12 = vpop.f32.mrb[173].mxu1 }
 0x9de   : > { %v9043_v59 = vand.u32 4294901760, %v9042_v15  ;;  %25769 = vst [vmem:[#allocation30_spill] sm:$0xff] %v22385_v49  ;;  %v19528_v15 = vld [vmem:[%s25011_s4 + $0x100] sm:$0xff]  ;;  %v22396_v39 = vand.u32 4294901760, %v7483_v0  ;;  %v9062_v28 = vsub.f32 %v22311_v50, %v25774_v6 }
 0x9df   : > { %v7480_v2 = vmul.f32 %v19528_v15, %v7409_v19  ;;  %7596 = vmatmul.mubr.f32.gmra.mrb[180].mxu1 %v7595_v1  ;;  %v22394_v46 = vand.u32 4294901760, %v7464_v43  ;;  %v9053_v5 = vand.u32 4294901760, %v9052_v42  ;;  %v7603_v19 = vsub.f32 %v22293_v11, %v25236_v40  ;;  %v7228_v40 = vpop.f32.mrb[116].mxu0 }
 0x9e0   : > { %17035 = vmatprep.mubr.f32.mxu0 %v9043_v59  ;;  %v19529_v59 = vld [vmem:[%s25011_s4 + $0x90] sm:$0xff]  ;;  %v22409_v15 = vsub.f32 %v7463_v57, %v22374_v30  ;;  %v7609_v42 = vsub.f32 %v22282_v4, %v25773_v13  ;;  %v22421_v11 = vsub.f32 %v7483_v0, %v22396_v39  ;;  %v25251_v57 = vand.u32 4294901760, %v22301_v63  ;;  %v17024_v7 = vpop.f32.mrb[174].mxu1  ;;  %v19530_v13 = vld [vmem:[%s25011_s4 + $0x98] sm:$0xff] }
 0x9e1   : > { %25770 = vst [vmem:[#allocation27_spill] sm:$0xff] %v22394_v46  ;;  %v22400_v36 = vand.u32 4294901760, %v7480_v2  ;;  %v7466_v1 = vmul.f32 %v19529_v59, %v7222_v58  ;;  %v22412_v55 = vsub.f32 %v7464_v43, %v22394_v46  ;;  %17036 = vmatmul.mubr.f32.gmra.mrb[140].mxu0 %v9053_v5  ;;  %v7604_v58 = vand.u32 4294901760, %v7603_v19  ;;  %v7230_v43 = vpop.f32.mrb[117].mxu0  ;;  %v19531_v5 = vld [vmem:[%s25011_s4 + $0x148] sm:$0xff]  ;;  %v7429_v0 = vpop.f32.mrb[175].mxu1 }
 0x9e2   : > { %25771 = vst [vmem:[#allocation38_spill] sm:$0xff] %v22409_v15  ;;  %25775 = vst [vmem:[#allocation44_spill] sm:$0xff] %v22421_v11  ;;  %v7610_v33 = vand.u32 4294901760, %v7609_v42  ;;  %v9063_v18 = vand.u32 4294901760, %v9062_v28  ;;  %v7467_v4 = vmul.f32 %v19530_v13, %v7224_v48  ;;  %v7489_v6 = vmul.f32 %v19531_v5, %v17021_v17  ;;  %v19532_v28 = vld [vmem:[%s25011_s4 + $0x130] sm:$0xff] }
 0x9e3   : > { %25772 = vst [vmem:[#allocation39_spill] sm:$0xff] %v22412_v55  ;;  %v22423_v59 = vand.u32 4294901760, %v7466_v1  ;;  %v22433_v19 = vsub.f32 %v7480_v2, %v22400_v36  ;;  %7605 = vmatprep.mubr.f32.mxu1 %v7604_v58  ;;  %v9072_v42 = vsub.f32 %v22301_v63, %v25251_v57  ;;  %v7486_v30 = vmul.f32 %v19532_v28, %v7419_v12  ;;  %v7234_v5 = vpop.f32.mrb[118].mxu0 }
 0x9e4   : > { %v25256_v48 = vand.u32 4294901760, %v22323_v37  ;;  %7611 = vmatmul.mubr.f32.gmra.mrb[182].mxu1 %v7610_v33  ;;  %17038 = vmatprep.mubr.f32.mxu0 %v9063_v18  ;;  %v22442_v13 = vand.u32 4294901760, %v7467_v4  ;;  %v22444_v17 = vand.u32 4294901760, %v7489_v6  ;;  %v19533_v33 = vld [vmem:[%s25011_s4 + $0xa8] sm:$0xff]  ;;  %v7236_v28 = vpop.f32.mrb[119].mxu0 }
 0x9e5   : > { %25776 = vst [vmem:[#allocation47_spill] sm:$0xff] %v22423_v59  ;;  %25777 = vst [vmem:[#allocation55_spill] sm:$0xff] %v22433_v19  ;;  %v9073_v46 = vand.u32 4294901760, %v9072_v42  ;;  %v22448_v57 = vand.u32 4294901760, %v7486_v30  ;;  %v7469_v18 = vmul.f32 %v19533_v33, %v7228_v40  ;;  %v22457_v21 = vsub.f32 %v7466_v1, %v22423_v59 }
 0x9e6   : > { %25778 = vst [vmem:[#allocation51_spill] sm:$0xff] %v22442_v13  ;;  %v7618_v12 = vsub.f32 %v22323_v37, %v25256_v48  ;;  %v22460_v2 = vsub.f32 %v7467_v4, %v22442_v13  ;;  %v25781_v42 = vand.u32 4294901760, %v22320_v56  ;;  %v9082_v48 = vsub.f32 %v22349_v35, %v25782_v51  ;;  %v17027_v37 = vpop.f32.mrb[176].mxu1  ;;  %v19535_v51 = vld [vmem:[%s25011_s4 + $0x178] sm:$0xff] }
 0x9e7   : > { %25779 = vst [vmem:[#allocation60_spill] sm:$0xff] %v22457_v21  ;;  %17039 = vmatmul.mubr.f32.gmra.mrb[142].mxu0 %v9073_v46  ;;  %v22469_v27 = vsub.f32 %v7489_v6, %v22444_v17  ;;  %v22471_v33 = vand.u32 4294901760, %v7469_v18  ;;  %v25271_v1 = vand.u32 4294901760, %v22329_v29  ;;  %v7439_v4 = vpop.f32.mrb[177].mxu1  ;;  %v7495_v46 = vmul.f32 %v19535_v51, %v17024_v7  ;;  %v7240_v6 = vpop.f32.mrb[120].mxu0 }
 0x9e8   : > { %25780 = vst [vmem:[#allocation61_spill] sm:$0xff] %v22460_v2  ;;  %v7624_v58 = vsub.f32 %v22320_v56, %v25781_v42  ;;  %v7619_v40 = vand.u32 4294901760, %v7618_v12  ;;  %v9083_v13 = vand.u32 4294901760, %v9082_v48  ;;  %v19534_v42 = vld [vmem:[%s25011_s4 + $0xb0] sm:$0xff]  ;;  %v22481_v12 = vsub.f32 %v7486_v30, %v22448_v57  ;;  %v19536_v48 = vld [vmem:[%s25011_s4 + $0x160] sm:$0xff] }
 0x9e9   : > { %25783 = vst [vmem:[#allocation70_spill] sm:$0xff] %v22471_v33  ;;  %v7470_v56 = vmul.f32 %v19534_v42, %v7230_v43  ;;  %v7492_v35 = vmul.f32 %v19536_v48, %v7429_v0  ;;  %v25276_v43 = vand.u32 4294901760, %v22369_v44  ;;  %v7242_v42 = vpop.f32.mrb[121].mxu0  ;;  %v22492_v51 = vand.u32 4294901760, %v7495_v46 }
 0x9ea   : > { %v7625_v59 = vand.u32 4294901760, %v7624_v58  ;;  %25784 = vst [vmem:[#allocation71_spill] sm:$0xff] %v22481_v12  ;;  %7620 = vmatprep.mubr.f32.mxu1 %v7619_v40  ;;  %v9092_v58 = vsub.f32 %v22329_v29, %v25271_v1  ;;  %17041 = vmatprep.mubr.f32.mxu0 %v9083_v13  ;;  %v25283_v30 = vand.u32 4294901760, %v22359_v22  ;;  %v25286_v40 = vand.u32 4294901760, %v22385_v49 }
 0x9eb   : > { %v22490_v7 = vand.u32 4294901760, %v7470_v56  ;;  %v22496_v1 = vand.u32 4294901760, %v7492_v35  ;;  %v7633_v0 = vsub.f32 %v22369_v44, %v25276_v43  ;;  %v22505_v48 = vsub.f32 %v7469_v18, %v22471_v33  ;;  %v7246_v43 = vpop.f32.mrb[122].mxu0 }
 0x9ec   : > { %7626 = vmatmul.mubr.f32.gmra.mrb[184].mxu1 %v7625_v59  ;;  %v9093_v63 = vand.u32 4294901760, %v9092_v58  ;;  %v19537_v59 = vld [vmem:[%s25011_s4 + $0xc0] sm:$0xff]  ;;  %v7639_v58 = vsub.f32 %v22359_v22, %v25283_v30  ;;  %v9102_v8 = vsub.f32 %v22385_v49, %v25286_v40  ;;  %v22517_v44 = vsub.f32 %v7495_v46, %v22492_v51  ;;  %v19538_v30 = vld [vmem:[%s25011_s4 + $0xc8] sm:$0xff] }
 0x9ed   : > { %25785 = vst [vmem:[#allocation76_spill] sm:$0xff] %v22490_v7  ;;  %v7472_v13 = vmul.f32 %v19537_v59, %v7234_v5  ;;  %25786 = vst [vmem:[#allocation79_spill] sm:$0xff] %v22505_v48  ;;  %v22508_v29 = vsub.f32 %v7470_v56, %v22490_v7  ;;  %v7634_v5 = vand.u32 4294901760, %v7633_v0  ;;  %v25289_v18 = vand.u32 4294901760, %v22372_v14  ;;  %v7248_v56 = vpop.f32.mrb[123].mxu0 }
 0x9ee   : > { %17042 = vmatmul.mubr.f32.gmra.mrb[144].mxu0 %v9093_v63  ;;  %v7640_v33 = vand.u32 4294901760, %v7639_v58  ;;  %v9103_v7 = vand.u32 4294901760, %v9102_v8  ;;  %v7473_v22 = vmul.f32 %v19538_v30, %v7236_v28  ;;  %v19539_v63 = vld [vmem:[%s25011_s4 + $0x1a8] sm:$0xff]  ;;  %v22529_v46 = vsub.f32 %v7492_v35, %v22496_v1  ;;  %v19540_v8 = vld [vmem:[%s25011_s4 + $0x190] sm:$0xff] }
 0x9ef   : > { %25787 = vst [vmem:[#allocation82_spill] sm:$0xff] %v22508_v29  ;;  %v22519_v59 = vand.u32 4294901760, %v7472_v13  ;;  %v7501_v40 = vmul.f32 %v19539_v63, %v17027_v37  ;;  %7635 = vmatprep.mubr.f32.mxu1 %v7634_v5  ;;  %v9112_v0 = vsub.f32 %v22372_v14, %v25289_v18  ;;  %v7498_v58 = vmul.f32 %v19540_v8, %v7439_v4  ;;  %v7252_v63 = vpop.f32.mrb[124].mxu0 }
 0x9f0   : > { %v25294_v28 = vand.u32 4294901760, %v22412_v55  ;;  %7641 = vmatmul.mubr.f32.gmra.mrb[186].mxu1 %v7640_v33  ;;  %17044 = vmatprep.mubr.f32.mxu0 %v9103_v7  ;;  %v22538_v30 = vand.u32 4294901760, %v7473_v22  ;;  %v19541_v33 = vld [vmem:[%s25011_s4 + $0xd8] sm:$0xff]  ;;  %v7254_v8 = vpop.f32.mrb[125].mxu0  ;;  %v25793_v53 = vand.u32 4294901760, %v22433_v19 }
 0x9f1   : > { %25788 = vst [vmem:[#allocation84_spill] sm:$0xff] %v22519_v59  ;;  %v22540_v37 = vand.u32 4294901760, %v7501_v40  ;;  %v9113_v49 = vand.u32 4294901760, %v9112_v0  ;;  %v22544_v18 = vand.u32 4294901760, %v7498_v58  ;;  %v7475_v7 = vmul.f32 %v19541_v33, %v7240_v6 }
 0x9f2   : > { %25789 = vst [vmem:[#allocation100_spill] sm:$0xff] %v22538_v30  ;;  %v7648_v4 = vsub.f32 %v22412_v55, %v25294_v28  ;;  %v22553_v14 = vsub.f32 %v7472_v13, %v22519_v59  ;;  %v22556_v35 = vsub.f32 %v7473_v22, %v22538_v30  ;;  %v25792_v0 = vand.u32 4294901760, %v22409_v15  ;;  %v19542_v30 = vld [vmem:[%s25011_s4 + $0xe0] sm:$0xff] }
 0x9f3   : > { %v9122_v28 = vsub.f32 %v22433_v19, %v25793_v53  ;;  %17045 = vmatmul.mubr.f32.gmra.mrb[146].mxu0 %v9113_v49  ;;  %v22565_v55 = vsub.f32 %v7501_v40, %v22540_v37  ;;  %v22567_v33 = vand.u32 4294901760, %v7475_v7  ;;  %v25305_v13 = vand.u32 4294901760, %v22421_v11  ;;  %v22574_v50 = vpop.f32.mrb[126].mxu0 }
 0x9f4   : > { %25790 = vst [vmem:[#allocation103_spill] sm:$0xff] %v22553_v14  ;;  %25791 = vst [vmem:[#allocation102_spill] sm:$0xff] %v22556_v35  ;;  %v7654_v5 = vsub.f32 %v22409_v15, %v25792_v0  ;;  %v7649_v6 = vand.u32 4294901760, %v7648_v4  ;;  %v7476_v0 = vmul.f32 %v19542_v30, %v7242_v42  ;;  %v25306_v15 = vand.u32 4294901760, %v22460_v2  ;;  %v19543_v30 = vld [vmem:[%s25011_s4 + $0xf0] sm:$0xff] }
 0x9f5   : > { %25794 = vst [vmem:[#allocation105_spill] sm:$0xff] %v22565_v55  ;;  %25795 = vst [vmem:[#allocation104_spill] sm:$0xff] %v22567_v33  ;;  %v9123_v22 = vand.u32 4294901760, %v9122_v28  ;;  %v22577_v53 = vsub.f32 %v7498_v58, %v22544_v18  ;;  %v9132_v49 = vsub.f32 %v22421_v11, %v25305_v13  ;;  %v25311_v40 = vand.u32 4294901760, %v22457_v21 }
 0x9f6   : > { %v7655_v59 = vand.u32 4294901760, %v7654_v5  ;;  %7650 = vmatprep.mubr.f32.mxu1 %v7649_v6  ;;  %v22584_v5 = vpop.f32.mrb[127].mxu0  ;;  %v22586_v42 = vand.u32 4294901760, %v7476_v0  ;;  %v7663_v58 = vsub.f32 %v22460_v2, %v25306_v15  ;;  %v7478_v4 = vmul.f32 %v19543_v30, %v7246_v43  ;;  %v19544_v15 = vld [vmem:[%s25011_s4 + $0xf8] sm:$0xff] }
 0x9f7   : > { %17047 = vmatprep.mubr.f32.mxu0 %v9123_v22  ;;  %v25321_v6 = vand.u32 4294901760, %v22469_v27  ;;  %v9133_v13 = vand.u32 4294901760, %v9132_v49  ;;  %v7669_v28 = vsub.f32 %v22457_v21, %v25311_v40  ;;  %v7479_v2 = vmul.f32 %v19544_v15, %v7248_v56  ;;  %v7264_v40 = vpop.f32.mrb[128].mxu0 }
 0x9f8   : > { %7656 = vmatmul.mubr.f32.gmra.mrb[188].mxu1 %v7655_v59  ;;  %25796 = vst [vmem:[#allocation107_spill] sm:$0xff] %v22586_v42  ;;  %v25797_v59 = vand.u32 4294901760, %v22481_v12  ;;  %v22605_v11 = vsub.f32 %v7475_v7, %v22567_v33  ;;  %v7664_v43 = vand.u32 4294901760, %v7663_v58  ;;  %v22607_v30 = vand.u32 4294901760, %v7478_v4  ;;  %v7266_v61 = vpop.f32.mrb[129].mxu0 }
 0x9f9   : > { %v9152_v49 = vsub.f32 %v22469_v27, %v25321_v6  ;;  %17048 = vmatmul.mubr.f32.gmra.mrb[148].mxu0 %v9133_v13  ;;  %v7670_v21 = vand.u32 4294901760, %v7669_v28  ;;  %v22616_v15 = vsub.f32 %v7476_v0, %v22586_v42  ;;  %v25322_v7 = vand.u32 4294901760, %v22505_v48  ;;  %v19545_v0 = vld [vmem:[%s25011_s4 + $0x108] sm:$0xff] }
 0x9fa   : > { %v9142_v22 = vsub.f32 %v22481_v12, %v25797_v59  ;;  %25798 = vst [vmem:[#allocation106_spill] sm:$0xff] %v22605_v11  ;;  %25799 = vst [vmem:[#allocation109_spill] sm:$0xff] %v22607_v30  ;;  %v22612_v59 = vand.u32 4294901760, %v7479_v2  ;;  %v25320_v12 = vand.u32 4294901760, %v22508_v29  ;;  %7665 = vmatprep.mubr.f32.mxu1 %v7664_v43  ;;  %v22619_v56 = vsub.f32 %v7478_v4, %v22607_v30 }
 0x9fb   : > { %25801 = vst [vmem:[#allocation111_spill] sm:$0xff] %v22616_v15  ;;  %v25325_v58 = vand.u32 4294901760, %v22529_v46  ;;  %v9153_v13 = vand.u32 4294901760, %v9152_v49  ;;  %v25333_v43 = vand.u32 4294901760, %v22517_v44  ;;  %v7684_v4 = vsub.f32 %v22505_v48, %v25322_v7  ;;  %v7270_v6 = vpop.f32.mrb[130].mxu0 }
 0x9fc   : > { %v9143_v19 = vand.u32 4294901760, %v9142_v22  ;;  %25800 = vst [vmem:[#allocation108_spill] sm:$0xff] %v22612_v59  ;;  %25802 = vst [vmem:[#allocation110_spill] sm:$0xff] %v22619_v56  ;;  %7671 = vmatmul.mubr.f32.gmra.mrb[190].mxu1 %v7670_v21  ;;  %v7678_v28 = vsub.f32 %v22508_v29, %v25320_v12  ;;  %v7481_v22 = vmul.f32 %v19545_v0, %v7252_v63  ;;  %v25332_v12 = vand.u32 4294901760, %v22556_v35 }
 0x9fd   : > { %v9162_v21 = vsub.f32 %v22529_v46, %v25325_v58  ;;  %v22641_v63 = vsub.f32 %v7479_v2, %v22612_v59  ;;  %v9172_v7 = vsub.f32 %v22517_v44, %v25333_v43  ;;  %v25336_v48 = vand.u32 4294901760, %v22553_v14  ;;  %v7272_v58 = vpop.f32.mrb[131].mxu0 }
 0x9fe   : > { %17050 = vmatprep.mubr.f32.mxu0 %v9143_v19  ;;  %v19546_v19 = vld [vmem:[%s25011_s4 + $0x110] sm:$0xff]  ;;  %v7679_v0 = vand.u32 4294901760, %v7678_v28  ;;  %v7685_v29 = vand.u32 4294901760, %v7684_v4 }
 0x9ff   : > { %v7482_v49 = vmul.f32 %v19546_v19, %v7254_v8  ;;  %17051 = vmatmul.mubr.f32.gmra.mrb[150].mxu0 %v9153_v13  ;;  %25803 = vst [vmem:[#allocation92_spill] sm:$0xff] %v22641_v63  ;;  %v9163_v30 = vand.u32 4294901760, %v9162_v21  ;;  %v7693_v8 = vsub.f32 %v22556_v35, %v25332_v12  ;;  %v22652_v13 = vand.u32 4294901760, %v7481_v22  ;;  %v19547_v12 = vld [vmem:[%s25011_s4 + $0x120] sm:$0xff]  ;;  %v7276_v43 = vpop.f32.mrb[132].mxu0 }
 0xa00   : > { %7680 = vmatprep.mubr.f32.mxu1 %v7679_v0  ;;  %v9173_v2 = vand.u32 4294901760, %v9172_v7  ;;  %v7699_v28 = vsub.f32 %v22553_v14, %v25336_v48  ;;  %v25337_v19 = vand.u32 4294901760, %v22577_v53  ;;  %v7484_v0 = vmul.f32 %v19547_v12, %v22574_v50  ;;  %v7278_v48 = vpop.f32.mrb[133].mxu0 }
 0xa01   : > { %v22647_v33 = vand.u32 4294901760, %v7482_v49  ;;  %7686 = vmatmul.mubr.f32.gmra.mrb[192].mxu1 %v7685_v29  ;;  %17053 = vmatprep.mubr.f32.mxu0 %v9163_v30  ;;  %v7694_v21 = vand.u32 4294901760, %v7693_v8  ;;  %v25342_v7 = vand.u32 4294901760, %v22565_v55  ;;  %v19548_v30 = vld [vmem:[%s25011_s4 + $0x128] sm:$0xff]  ;;  %v25345_v8 = vand.u32 4294901760, %v22616_v15 }
 0xa02   : > { %v7700_v35 = vand.u32 4294901760, %v7699_v28  ;;  %v9182_v29 = vsub.f32 %v22577_v53, %v25337_v19  ;;  %v22674_v50 = vand.u32 4294901760, %v7484_v0  ;;  %v19549_v28 = vld [vmem:[%s25011_s4 + $0x138] sm:$0xff] }
 0xa03   : > { %25804 = vst [vmem:[#allocation93_spill] sm:$0xff] %v22647_v33  ;;  %v22659_v4 = vsub.f32 %v7482_v49, %v22647_v33  ;;  %17054 = vmatmul.mubr.f32.gmra.mrb[152].mxu0 %v9173_v2  ;;  %v7485_v49 = vmul.f32 %v19548_v30, %v22584_v5  ;;  %7695 = vmatprep.mubr.f32.mxu1 %v7694_v21  ;;  %v19550_v21 = vld [vmem:[%s25011_s4 + $0x140] sm:$0xff]  ;;  %v7282_v59 = vpop.f32.mrb[134].mxu0 }
 0xa04   : > { %v9192_v12 = vsub.f32 %v22565_v55, %v25342_v7  ;;  %v7487_v19 = vmul.f32 %v19549_v28, %v7264_v40  ;;  %v9183_v14 = vand.u32 4294901760, %v9182_v29  ;;  %v7708_v5 = vsub.f32 %v22616_v15, %v25345_v8 }
 0xa05   : > { %25805 = vst [vmem:[#allocation112_spill] sm:$0xff] %v22659_v4  ;;  %v22683_v33 = vand.u32 4294901760, %v7485_v49  ;;  %v7488_v30 = vmul.f32 %v19550_v21, %v7266_v61  ;;  %v22692_v7 = vsub.f32 %v7481_v22, %v22652_v13  ;;  %7701 = vmatmul.mubr.f32.gmra.mrb[194].mxu1 %v7700_v35  ;;  %v22695_v2 = vsub.f32 %v7484_v0, %v22674_v50  ;;  %v7284_v22 = vpop.f32.mrb[135].mxu0  ;;  %v19551_v21 = vld [vmem:[%s25011_s4 + $0x150] sm:$0xff] }
 0xa06   : > { %v9193_v40 = vand.u32 4294901760, %v9192_v12  ;;  %v25808_v29 = vand.u32 4294901760, %v22605_v11  ;;  %17056 = vmatprep.mubr.f32.mxu0 %v9183_v14  ;;  %v7709_v8 = vand.u32 4294901760, %v7708_v5  ;;  %v22700_v15 = vand.u32 4294901760, %v7487_v19 }
 0xa07   : > { %25806 = vst [vmem:[#allocation7_spill] sm:$0xff] %v22692_v7  ;;  %25807 = vst [vmem:[#allocation8_spill] sm:$0xff] %v22695_v2  ;;  %v22702_v55 = vand.u32 4294901760, %v7488_v30  ;;  %v25350_v61 = vand.u32 4294901760, %v22641_v63  ;;  %v22706_v35 = vsub.f32 %v7485_v49, %v22683_v33  ;;  %v25357_v12 = vand.u32 4294901760, %v22619_v56  ;;  %v19552_v49 = vld [vmem:[%s25011_s4 + $0x158] sm:$0xff] }
 0xa08   : > { %v7714_v28 = vsub.f32 %v22605_v11, %v25808_v29  ;;  %17057 = vmatmul.mubr.f32.gmra.mrb[154].mxu0 %v9193_v40  ;;  %v7490_v14 = vmul.f32 %v19551_v21, %v7270_v6  ;;  %7710 = vmatprep.mubr.f32.mxu1 %v7709_v8  ;;  %v7491_v29 = vmul.f32 %v19552_v49, %v7272_v58  ;;  %v19553_v21 = vld [vmem:[%s25011_s4 + $0x168] sm:$0xff] }
 0xa09   : > { %25809 = vst [vmem:[#allocation9_spill] sm:$0xff] %v22706_v35  ;;  %17063 = vmatprep.mubr.f32.mxu0 %v22201_v45  ;;  %v22714_v5 = vsub.f32 %v7488_v30, %v22702_v55  ;;  %v7723_v40 = vsub.f32 %v22641_v63, %v25350_v61  ;;  %v7729_v6 = vsub.f32 %v22619_v56, %v25357_v12  ;;  %v7288_v63 = vpop.f32.mrb[136].mxu0  ;;  %v25363_v56 = vand.u32 4294901760, %v22706_v35 }
 0xa0a   : > { %v7715_v0 = vand.u32 4294901760, %v7714_v28  ;;  %v25358_v28 = vand.u32 4294901760, %v22659_v4  ;;  %v22726_v8 = vand.u32 4294901760, %v7490_v14  ;;  %v7493_v61 = vmul.f32 %v19553_v21, %v7276_v43  ;;  %v7290_v12 = vpop.f32.mrb[137].mxu0 }
 0xa0b   : > { %25810 = vst [vmem:[#allocation11_spill] sm:$0xff] %v22714_v5  ;;  %v7724_v11 = vand.u32 4294901760, %v7723_v40  ;;  %v22732_v45 = vand.u32 4294901760, %v7491_v29  ;;  %v22741_v30 = vsub.f32 %v7487_v19, %v22700_v15  ;;  %v7730_v43 = vand.u32 4294901760, %v7729_v6 }
 0xa0c   : > { %7716 = vmatmul.mubr.f32.gmra.mrb[196].mxu1 %v7715_v0  ;;  %v7738_v58 = vsub.f32 %v22659_v4, %v25358_v28  ;;  %v19554_v0 = vld [vmem:[%s25011_s4 + $0x170] sm:$0xff]  ;;  %17064 = vmatmul.mubr.f32.vlgmr.msra.gmra.mrb[156].mxu0 %v22196_v23  ;;  %v25812_v40 = vand.u32 4294901760, %v22692_v7  ;;  %v22754_v19 = vand.u32 4294901760, %v7493_v61  ;;  %v25368_v6 = vand.u32 4294901760, %v22714_v5 }
 0xa0d   : > { %v7494_v49 = vmul.f32 %v19554_v0, %v7278_v48  ;;  %25811 = vst [vmem:[#allocation10_spill] sm:$0xff] %v22741_v30  ;;  %17066 = vmatprep.mubr.f32.mxu0 %v22236_v31  ;;  %7725 = vmatprep.mubr.f32.mxu1 %v7724_v11  ;;  %v22752_v48 = vsub.f32 %v7490_v14, %v22726_v8  ;;  %v19555_v0 = vld [vmem:[%s25011_s4 + $0x180] sm:$0xff] }
 0xa0e   : > { %v7744_v21 = vsub.f32 %v22692_v7, %v25812_v40  ;;  %v7739_v28 = vand.u32 4294901760, %v7738_v58  ;;  %v7496_v40 = vmul.f32 %v19555_v0, %v7282_v59  ;;  %18315 = vmatpush3.bf16.xpose.msra.mxu0 %v25768_v54  ;;  %v22762_v11 = vsub.f32 %v7491_v29, %v22732_v45  ;;  %v19556_v58 = vld [vmem:[%s25011_s4 + $0x188] sm:$0xff] }
 0xa0f   : > { %v22748_v4 = vand.u32 4294901760, %v7494_v49  ;;  %v7753_v14 = vsub.f32 %v22706_v35, %v25363_v56  ;;  %18317 = vmatprep.subr.bf16.mxu0 %v25706_v52  ;;  %v25813_v29 = vand.u32 4294901760, %v22695_v2  ;;  %v22790_v35 = vsub.f32 %v7493_v61, %v22754_v19 }
 0xa10   : > { %7731 = vmatmul.mubr.f32.gmra.mrb[198].mxu1 %v7730_v43  ;;  %v7497_v43 = vmul.f32 %v19556_v58, %v7284_v22  ;;  %17067 = vmatmul.mubr.f32.gmra.mrb[158].mxu0 %v22227_v10  ;;  %v7745_v54 = vand.u32 4294901760, %v7744_v21  ;;  %v7768_v58 = vsub.f32 %v22714_v5, %v25368_v6 }
 0xa11   : > { %7740 = vmatprep.mubr.f32.mxu1 %v7739_v28  ;;  %v22774_v59 = vsub.f32 %v7494_v49, %v22748_v4  ;;  %v7759_v28 = vsub.f32 %v22695_v2, %v25813_v29  ;;  %17069 = vmatprep.mubr.f32.mxu0 %v22284_v25  ;;  %v7754_v56 = vand.u32 4294901760, %v7753_v14  ;;  %v19557_v49 = vld [vmem:[%s25011_s4 + $0x1a0] sm:$0xff]  ;;  %v22792_v29 = vand.u32 4294901760, %v7496_v40  ;;  %v19558_v14 = vld [vmem:[%s25011_s4 + $0x198] sm:$0xff] }
 0xa12   : > { %v22781_v22 = vand.u32 4294901760, %v7497_v43  ;;  %v7500_v21 = vmul.f32 %v19557_v49, %v7290_v12  ;;  %v7499_v0 = vmul.f32 %v19558_v14, %v7288_v63  ;;  %v7769_v6 = vand.u32 4294901760, %v7768_v58 }
 0xa13   : > { %25815 = vst [vmem:[#allocation36_spill] sm:$0xff] %v22792_v29  ;;  %v25376_v12 = vand.u32 4294901760, %v22762_v11  ;;  %v7760_v61 = vand.u32 4294901760, %v7759_v28  ;;  %v25375_v63 = vand.u32 4294901760, %v22774_v59 }
 0xa14   : > { %25814 = vst [vmem:[#allocation35_spill] sm:$0xff] %v22781_v22  ;;  %7746 = vmatmul.mubr.f32.gmra.mrb[200].mxu1 %v7745_v54  ;;  %v22798_v2 = vsub.f32 %v7497_v43, %v22781_v22  ;;  %v22800_v5 = vand.u32 4294901760, %v7500_v21  ;;  %17070 = vmatmul.mubr.f32.gmra.mrb[160].mxu0 %v22275_v60  ;;  %v25817_v54 = vand.u32 4294901760, %v22741_v30  ;;  %v22814_v43 = vsub.f32 %v7496_v40, %v22792_v29 }
 0xa15   : > { %7755 = vmatprep.mubr.f32.mxu1 %v7754_v56  ;;  %17072 = vmatprep.mubr.f32.mxu0 %v22313_v47  ;;  %v7783_v56 = vsub.f32 %v22762_v11, %v25376_v12  ;;  %v7798_v14 = vsub.f32 %v22774_v59, %v25375_v63 }
 0xa16   : > { %25816 = vst [vmem:[#allocation41_spill] sm:$0xff] %v22800_v5  ;;  %v7774_v49 = vsub.f32 %v22741_v30, %v25817_v54  ;;  %v22817_v28 = vsub.f32 %v7500_v21, %v22800_v5  ;;  %v25377_v54 = vand.u32 4294901760, %v22798_v2  ;;  %v22824_v30 = vand.u32 4294901760, %v7499_v0 }
 0xa17   : > { %v7784_v58 = vand.u32 4294901760, %v7783_v56  ;;  %v7799_v21 = vand.u32 4294901760, %v7798_v14 }
 0xa18   : > { %7761 = vmatmul.mubr.f32.gmra.mrb[202].mxu1 %v7760_v61  ;;  %17073 = vmatmul.mubr.f32.gmra.mrb[162].mxu0 %v22305_v34  ;;  %v7775_v7 = vand.u32 4294901760, %v7774_v49  ;;  %25818 = vst [vmem:[#allocation14_spill] sm:$0xff] %v22824_v30  ;;  %v25819_v61 = vand.u32 4294901760, %v22752_v48  ;;  %v7813_v56 = vsub.f32 %v22798_v2, %v25377_v54  ;;  %v25379_v63 = vand.u32 4294901760, %v22817_v28 }
 0xa19   : > { %7770 = vmatprep.mubr.f32.mxu1 %v7769_v6  ;;  %v25381_v6 = vand.u32 4294901760, %v22790_v35  ;;  %17075 = vmatprep.mubr.f32.mxu0 %v22353_v3  ;;  %v22836_v49 = vsub.f32 %v7499_v0, %v22824_v30 }
 0xa1a   : > { %v7789_v40 = vsub.f32 %v22752_v48, %v25819_v61  ;;  %v7828_v14 = vsub.f32 %v22817_v28, %v25379_v63  ;;  %v25831_v63 = vld [vmem:[#allocation75_spill] sm:$0xff] }
 0xa1b   : > { %25820 = vst [vmem:[#allocation46_spill] sm:$0xff] %v22836_v49  ;;  %v7804_v61 = vsub.f32 %v22790_v35, %v25381_v6  ;;  %v25378_v54 = vand.u32 4294901760, %v22836_v49  ;;  %v25833_v6 = vld [vmem:[#allocation30_spill] sm:$0xff] }
 0xa1c   : > { %7776 = vmatmul.mubr.f32.gmra.mrb[204].mxu1 %v7775_v7  ;;  %17076 = vmatmul.mubr.f32.gmra.mrb[164].mxu0 %v22351_v26  ;;  %v7790_v12 = vand.u32 4294901760, %v7789_v40  ;;  %v25380_v7 = vand.u32 4294901760, %v22814_v43 }
 0xa1d   : > { %7785 = vmatprep.mubr.f32.mxu1 %v7784_v58  ;;  %17078 = vmatprep.mubr.f32.mxu0 %v22400_v36  ;;  %v7814_v58 = vand.u32 4294901760, %v7813_v56  ;;  %v7805_v0 = vand.u32 4294901760, %v7804_v61  ;;  %v7834_v56 = vsub.f32 %v22836_v49, %v25378_v54  ;;  %v25830_v54 = vld [vmem:[#allocation43_spill] sm:$0xff]  ;;  %v25850_v49 = vld [vmem:[#allocation108_spill] sm:$0xff] }
 0xa1e   : > { %v7819_v40 = vsub.f32 %v22814_v43, %v25380_v7  ;;  %v25832_v7 = vld [vmem:[#allocation67_spill] sm:$0xff] }
 0xa1f   : > { %v7835_v61 = vand.u32 4294901760, %v7834_v56  ;;  %v25827_v56 = vld [vmem:[#allocation52_spill] sm:$0xff] }
 0xa20   : > { %7791 = vmatmul.mubr.f32.gmra.mrb[206].mxu1 %v7790_v12  ;;  %17079 = vmatmul.mubr.f32.gmra.mrb[166].mxu0 %v22396_v39  ;;  %v7829_v12 = vand.u32 4294901760, %v7828_v14  ;;  %v25822_v14 = vld [vmem:[#allocation90_spill] sm:$0xff] }
 0xa21   : > { %7800 = vmatprep.mubr.f32.mxu1 %v7799_v21  ;;  %17081 = vmatprep.mubr.f32.mxu0 %v22448_v57  ;;  %v7820_v21 = vand.u32 4294901760, %v7819_v40  ;;  %v25824_v40 = vld [vmem:[#allocation18_spill] sm:$0xff] }
 0xa24   : > { %7806 = vmatmul.mubr.f32.gmra.mrb[208].mxu1 %v7805_v0  ;;  %17082 = vmatmul.mubr.f32.gmra.mrb[168].mxu0 %v22444_v17  ;;  %v25823_v0 = vld [vmem:[#allocation114_spill] sm:$0xff] }
 0xa25   : > { %7815 = vmatprep.mubr.f32.mxu1 %v7814_v58  ;;  %17084 = vmatprep.mubr.f32.mxu0 %v22496_v1  ;;  %v25821_v58 = vld [vmem:[#allocation113_spill] sm:$0xff] }
 0xa28   : > { %7821 = vmatmul.mubr.f32.gmra.mrb[210].mxu1 %v7820_v21  ;;  %17085 = vmatmul.mubr.f32.gmra.mrb[170].mxu0 %v22492_v51  ;;  %v25826_v21 = vld [vmem:[#allocation28_spill] sm:$0xff] }
 0xa29   : > { %7830 = vmatprep.mubr.f32.mxu1 %v7829_v12  ;;  %17087 = vmatprep.mubr.f32.mxu0 %v22544_v18  ;;  %v25825_v12 = vld [vmem:[#allocation50_spill] sm:$0xff] }
 0xa2c   : > { %7836 = vmatmul.mubr.f32.gmra.mrb[212].mxu1 %v7835_v61  ;;  %17088 = vmatmul.mubr.f32.gmra.mrb[172].mxu0 %v22540_v37  ;;  %v25828_v61 = vld [vmem:[#allocation42_spill] sm:$0xff] }
 0xa2d   : > { %7926 = vmatprep.mubr.f32.mxu1 %v22194_v32  ;;  %17094 = vmatprep.mubr.f32.mxu0 %v22234_v24  ;;  %v25840_v32 = vld [vmem:[#allocation44_spill] sm:$0xff] }
 0xa30   : > { %7928 = vmatmul.mubr.f32.vlgmr.msra.gmra.mrb[178].mxu1 %v22189_v38  ;;  %17095 = vmatmul.mubr.f32.vlgmr.msra.gmra.mrb[174].mxu0 %v22210_v9  ;;  %v25839_v38 = vld [vmem:[#allocation51_spill] sm:$0xff] }
 0xa31   : > { %7933 = vmatprep.mubr.f32.mxu1 %v22225_v41  ;;  %18291 = vmatpush1.bf16.xpose.msra.mxu1 %v25821_v58  ;;  %v25829_v58 = vld [vmem:[#allocation74_spill] sm:$0xff]  ;;  %v25836_v41 = vld [vmem:[#allocation29_spill] sm:$0xff] }
 0xa32   : > { %18293 = vmatprep.subr.bf16.mxu1 %v25822_v14  ;;  %17097 = vmatprep.mubr.f32.mxu0 %v22264_v16  ;;  %v25843_v14 = vld [vmem:[#allocation76_spill] sm:$0xff] }
 0xa33   : > { %18319 = vmatpush3.bf16.xpose.msra.mxu0 %v25706_v52 }
 0xa34   : > { %7935 = vmatmul.mubr.f32.gmra.mrb[180].mxu1 %v22219_v62  ;;  %18321 = vmatprep.subr.bf16.mxu0 %v25823_v0  ;;  %v25835_v62 = vld [vmem:[#allocation27_spill] sm:$0xff] }
 0xa35   : > { %7940 = vmatprep.mubr.f32.mxu1 %v22266_v20  ;;  %17098 = vmatmul.mubr.f32.gmra.mrb[176].mxu0 %v25824_v40  ;;  %v25834_v20 = vld [vmem:[#allocation66_spill] sm:$0xff] }
 0xa36   : > { %17100 = vmatprep.mubr.f32.mxu0 %v25825_v12 }
 0xa38   : > { %7942 = vmatmul.mubr.f32.gmra.mrb[182].mxu1 %v25826_v21  ;;  %v25837_v21 = vld [vmem:[#allocation55_spill] sm:$0xff] }
 0xa39   : > { %7947 = vmatprep.mubr.f32.mxu1 %v25827_v56  ;;  %17101 = vmatmul.mubr.f32.gmra.mrb[178].mxu0 %v25828_v61  ;;  %v25838_v56 = vld [vmem:[#allocation25_spill] sm:$0xff] }
 0xa3a   : > { %17103 = vmatprep.mubr.f32.mxu0 %v25829_v58 }
 0xa3c   : > { %7949 = vmatmul.mubr.f32.gmra.mrb[184].mxu1 %v25830_v54  ;;  %v25841_v54 = vld [vmem:[#allocation71_spill] sm:$0xff] }
 0xa3d   : > { %7954 = vmatprep.mubr.f32.mxu1 %v25831_v63  ;;  %17104 = vmatmul.mubr.f32.gmra.mrb[180].mxu0 %v25832_v7  ;;  %v25842_v63 = vld [vmem:[#allocation47_spill] sm:$0xff] }
 0xa3e   : > { %17106 = vmatprep.mubr.f32.mxu0 %v25833_v6 }
 0xa40   : > { %7956 = vmatmul.mubr.f32.gmra.mrb[186].mxu1 %v25834_v20  ;;  %v25845_v20 = vld [vmem:[#allocation100_spill] sm:$0xff] }
 0xa41   : > { %7961 = vmatprep.mubr.f32.mxu1 %v25835_v62  ;;  %17107 = vmatmul.mubr.f32.gmra.mrb[182].mxu0 %v25836_v41  ;;  %v25844_v62 = vld [vmem:[#allocation70_spill] sm:$0xff] }
 0xa42   : > { %17109 = vmatprep.mubr.f32.mxu0 %v25837_v21 }
 0xa44   : > { %7963 = vmatmul.mubr.f32.gmra.mrb[188].mxu1 %v25838_v56  ;;  %v25847_v56 = vld [vmem:[#allocation105_spill] sm:$0xff] }
 0xa45   : > { %7968 = vmatprep.mubr.f32.mxu1 %v25839_v38  ;;  %17110 = vmatmul.mubr.f32.gmra.mrb[184].mxu0 %v25840_v32  ;;  %v25846_v38 = vld [vmem:[#allocation84_spill] sm:$0xff] }
 0xa46   : > { %17112 = vmatprep.mubr.f32.mxu0 %v25841_v54 }
 0xa48   : > { %7970 = vmatmul.mubr.f32.gmra.mrb[190].mxu1 %v25842_v63  ;;  %v25849_v63 = vld [vmem:[#allocation104_spill] sm:$0xff] }
 0xa49   : > { %7975 = vmatprep.mubr.f32.mxu1 %v25843_v14  ;;  %17113 = vmatmul.mubr.f32.gmra.mrb[186].mxu0 %v22469_v27  ;;  %v25848_v14 = vand.u32 4294901760, %v22234_v24  ;;  %v25855_v24 = vand.u32 4294901760, %v25824_v40  ;;  %v25862_v40 = vand.u32 4294901760, %v25837_v21  ;;  %v25869_v21 = vld [vmem:[#allocation80_spill] sm:$0xff] }
 0xa4a   : > { %17115 = vmatprep.mubr.f32.mxu0 %v22529_v46 }
 0xa4c   : > { %7977 = vmatmul.mubr.f32.gmra.mrb[192].mxu1 %v25844_v62  ;;  %v25851_v62 = vand.u32 4294901760, %v22210_v9  ;;  %v25857_v9 = vand.u32 4294901760, %v25828_v61  ;;  %v25871_v61 = vld [vmem:[#allocation69_spill] sm:$0xff] }
 0xa4d   : > { %7982 = vmatprep.mubr.f32.mxu1 %v25845_v20  ;;  %17116 = vmatmul.mubr.f32.gmra.mrb[188].mxu0 %v22517_v44  ;;  %v25852_v20 = vand.u32 4294901760, %v22264_v16  ;;  %v25860_v16 = vand.u32 4294901760, %v25833_v6  ;;  %v25864_v6 = vand.u32 4294901760, %v25841_v54  ;;  %v25868_v54 = vand.u32 4294901760, %v22577_v53 }
 0xa4e   : > { %17118 = vmatprep.mubr.f32.mxu0 %v22577_v53  ;;  %v25876_v53 = vld [vmem:[#allocation17_spill] sm:$0xff] }
 0xa50   : > { %7984 = vmatmul.mubr.f32.gmra.mrb[194].mxu1 %v25846_v38  ;;  %v25853_v38 = vld [vmem:[#allocation109_spill] sm:$0xff] }
 0xa51   : > { %7989 = vmatprep.mubr.f32.mxu1 %v22586_v42  ;;  %17119 = vmatmul.mubr.f32.gmra.mrb[190].mxu0 %v25847_v56  ;;  %v25854_v42 = vld [vmem:[#allocation93_spill] sm:$0xff] }
 0xa52   : > { %17125 = vmatprep.mubr.f32.mxu0 %v25848_v14  ;;  %v25856_v14 = vand.u32 4294901760, %v25825_v12  ;;  %v25866_v12 = vand.u32 4294901760, %v22529_v46  ;;  %v25872_v46 = vld [vmem:[#allocation72_spill] sm:$0xff] }
 0xa54   : > { %7991 = vmatmul.mubr.f32.gmra.mrb[196].mxu1 %v25849_v63 }
 0xa55   : > { %7996 = vmatprep.mubr.f32.mxu1 %v25850_v49  ;;  %17126 = vmatmul.mubr.f32.vlgmr.msra.gmra.mrb[192].mxu0 %v25851_v62  ;;  %v25858_v62 = vand.u32 4294901760, %v25829_v58  ;;  %v25873_v58 = vld [vmem:[#allocation20_spill] sm:$0xff] }
 0xa56   : > { %17128 = vmatprep.mubr.f32.mxu0 %v25852_v20  ;;  %18323 = vmatpush3.bf16.xpose.msra.mxu0 %v25823_v0  ;;  %v25859_v20 = vand.u32 4294901760, %v25832_v7  ;;  %v25861_v0 = vand.u32 4294901760, %v25836_v41  ;;  %v25863_v7 = vand.u32 4294901760, %v25840_v32  ;;  %v25865_v41 = vand.u32 4294901760, %v22469_v27 }
 0xa57   : > { %18325 = vmatprep.subr.bf16.mxu0 %v25706_v52  ;;  %v25867_v32 = vand.u32 4294901760, %v22517_v44  ;;  %v25870_v27 = vand.u32 4294901760, %v25847_v56  ;;  %v25875_v44 = vld [vmem:[#allocation97_spill] sm:$0xff] }
 0xa58   : > { %7998 = vmatmul.mubr.f32.gmra.mrb[198].mxu1 %v25853_v38  ;;  %v25877_v56 = vld [vmem:[#allocation33_spill] sm:$0xff] }
 0xa59   : > { %8003 = vmatprep.mubr.f32.mxu1 %v25854_v42  ;;  %17129 = vmatmul.mubr.f32.gmra.mrb[194].mxu0 %v25855_v24  ;;  %v25874_v24 = vld [vmem:[#allocation91_spill] sm:$0xff] }
 0xa5a   : > { %17131 = vmatprep.mubr.f32.mxu0 %v25856_v14  ;;  %v25878_v14 = vld [vmem:[#allocation34_spill] sm:$0xff] }
 0xa5c   : > { %8005 = vmatmul.mubr.f32.gmra.mrb[200].mxu1 %v22652_v13 }
 0xa5d   : > { %8010 = vmatprep.mubr.f32.mxu1 %v22683_v33  ;;  %17132 = vmatmul.mubr.f32.gmra.mrb[196].mxu0 %v25857_v9  ;;  %v25879_v9 = vld [vmem:[#allocation58_spill] sm:$0xff] }
 0xa5e   : > { %17134 = vmatprep.mubr.f32.mxu0 %v25858_v62  ;;  %v25880_v62 = vld [vmem:[#allocation59_spill] sm:$0xff] }
 0xa60   : > { %8012 = vmatmul.mubr.f32.gmra.mrb[202].mxu1 %v22674_v50 }
 0xa61   : > { %8017 = vmatprep.mubr.f32.mxu1 %v22702_v55  ;;  %17135 = vmatmul.mubr.f32.gmra.mrb[198].mxu0 %v25859_v20  ;;  %v25881_v20 = vld [vmem:[#allocation16_spill] sm:$0xff] }
 0xa62   : > { %17137 = vmatprep.mubr.f32.mxu0 %v25860_v16  ;;  %v25883_v16 = vld [vmem:[#allocation39_spill] sm:$0xff] }
 0xa64   : > { %8019 = vmatmul.mubr.f32.gmra.mrb[204].mxu1 %v22700_v15 }
 0xa65   : > { %8024 = vmatprep.mubr.f32.mxu1 %v22732_v45  ;;  %17138 = vmatmul.mubr.f32.gmra.mrb[200].mxu0 %v25861_v0  ;;  %v25884_v0 = vld [vmem:[#allocation38_spill] sm:$0xff] }
 0xa66   : > { %17140 = vmatprep.mubr.f32.mxu0 %v25862_v40  ;;  %v25885_v40 = vld [vmem:[#allocation61_spill] sm:$0xff] }
 0xa68   : > { %8026 = vmatmul.mubr.f32.gmra.mrb[206].mxu1 %v22726_v8 }
 0xa69   : > { %8031 = vmatprep.mubr.f32.mxu1 %v22748_v4  ;;  %17141 = vmatmul.mubr.f32.gmra.mrb[202].mxu0 %v25863_v7  ;;  %v25886_v7 = vld [vmem:[#allocation60_spill] sm:$0xff] }
 0xa6a   : > { %17143 = vmatprep.mubr.f32.mxu0 %v25864_v6  ;;  %v25887_v6 = vld [vmem:[#allocation82_spill] sm:$0xff] }
 0xa6c   : > { %8033 = vmatmul.mubr.f32.gmra.mrb[208].mxu1 %v22754_v19 }
 0xa6d   : > { %8038 = vmatprep.mubr.f32.mxu1 %v22781_v22  ;;  %17144 = vmatmul.mubr.f32.gmra.mrb[204].mxu0 %v25865_v41  ;;  %v25888_v41 = vld [vmem:[#allocation79_spill] sm:$0xff]  ;;  %v25897_v22 = vld [vmem:[#allocation9_spill] sm:$0xff] }
 0xa6e   : > { %17146 = vmatprep.mubr.f32.mxu0 %v25866_v12  ;;  %v25889_v12 = vld [vmem:[#allocation102_spill] sm:$0xff] }
 0xa70   : > { %8040 = vmatmul.mubr.f32.gmra.mrb[210].mxu1 %v22792_v29  ;;  %v25896_v29 = vld [vmem:[#allocation7_spill] sm:$0xff] }
 0xa71   : > { %8045 = vmatprep.mubr.f32.mxu1 %v22800_v5  ;;  %17147 = vmatmul.mubr.f32.gmra.mrb[206].mxu0 %v25867_v32  ;;  %v25890_v32 = vld [vmem:[#allocation103_spill] sm:$0xff]  ;;  %v25895_v5 = vld [vmem:[#allocation112_spill] sm:$0xff] }
 0xa72   : > { %17149 = vmatprep.mubr.f32.mxu0 %v25868_v54  ;;  %v25891_v54 = vld [vmem:[#allocation111_spill] sm:$0xff] }
 0xa74   : > { %8047 = vmatmul.mubr.f32.gmra.mrb[212].mxu1 %v22824_v30  ;;  %v25894_v30 = vld [vmem:[#allocation110_spill] sm:$0xff] }
 0xa75   : > { %8126 = vmatprep.mubr.f32.mxu1 %v25869_v21  ;;  %17150 = vmatmul.mubr.f32.gmra.mrb[208].mxu0 %v25870_v27  ;;  %v25892_v27 = vld [vmem:[#allocation106_spill] sm:$0xff] }
 0xa76   : > { %17156 = vmatprep.mubr.f32.mxu0 %v25871_v61 }
 0xa78   : > { %8129 = vmatmul.mubr.f32.vlgmr.msra.gmra.mrb[178].mxu1 %v25872_v46 }
 0xa79   : > { %8135 = vmatprep.mubr.f32.mxu1 %v25873_v58  ;;  %18295 = vmatpush1.bf16.xpose.msra.mxu1 %v25874_v24 }
 0xa7a   : > { %17157 = vmatmul.mubr.f32.vlgmr.msra.gmra.mrb[210].mxu0 %v22196_v23  ;;  %18297 = vmatprep.subr.bf16.mxu1 %v25875_v44  ;;  %v25893_v44 = vld [vmem:[#allocation92_spill] sm:$0xff] }
 0xa7b   : > { %17159 = vmatprep.mubr.f32.mxu0 %v22236_v31  ;;  %18327 = vmatpush3.bf16.xpose.msra.mxu0 %v25706_v52  ;;  %v25882_v52 = vld [vmem:[#allocation13_spill] sm:$0xff] }
 0xa7c   : > { %8138 = vmatmul.mubr.f32.gmra.mrb[180].mxu1 %v25876_v53 }
 0xa7d   : > { %8144 = vmatprep.mubr.f32.mxu1 %v25877_v56 }
 0xa7e   : > { %17160 = vmatmul.mubr.f32.gmra.mrb[212].mxu0 %v22227_v10 }
 0xa7f   : > { %17162 = vmatprep.mubr.f32.mxu0 %v22284_v25 }
 0xa80   : > { %8147 = vmatmul.mubr.f32.gmra.mrb[182].mxu1 %v25878_v14 }
 0xa81   : > { %8153 = vmatprep.mubr.f32.mxu1 %v25879_v9 }
 0xa82   : > { %17163 = vmatmul.mubr.f32.gmra.mrb[214].mxu0 %v22275_v60 }
 0xa83   : > { %17165 = vmatprep.mubr.f32.mxu0 %v22313_v47 }
 0xa84   : > { %8156 = vmatmul.mubr.f32.gmra.mrb[184].mxu1 %v25880_v62 }
 0xa85   : > { %8162 = vmatprep.mubr.f32.mxu1 %v25881_v20 }
 0xa86   : > { %17166 = vmatmul.mubr.f32.gmra.mrb[216].mxu0 %v22305_v34 }
 0xa87   : > { %17168 = vmatprep.mubr.f32.mxu0 %v22353_v3 }
 0xa88   : > { %8165 = vmatmul.mubr.f32.gmra.mrb[186].mxu1 %v25882_v52 }
 0xa89   : > { %8171 = vmatprep.mubr.f32.mxu1 %v25883_v16 }
 0xa8a   : > { %17169 = vmatmul.mubr.f32.gmra.mrb[218].mxu0 %v22351_v26 }
 0xa8b   : > { %17171 = vmatprep.mubr.f32.mxu0 %v22400_v36 }
 0xa8c   : > { %8174 = vmatmul.mubr.f32.gmra.mrb[188].mxu1 %v25884_v0 }
 0xa8d   : > { %8180 = vmatprep.mubr.f32.mxu1 %v25885_v40 }
 0xa8e   : > { %17172 = vmatmul.mubr.f32.gmra.mrb[220].mxu0 %v22396_v39 }
 0xa8f   : > { %17174 = vmatprep.mubr.f32.mxu0 %v22448_v57 }
 0xa90   : > { %8183 = vmatmul.mubr.f32.gmra.mrb[190].mxu1 %v25886_v7 }
 0xa91   : > { %8189 = vmatprep.mubr.f32.mxu1 %v25887_v6 }
 0xa92   : > { %17175 = vmatmul.mubr.f32.gmra.mrb[222].mxu0 %v22444_v17 }
 0xa93   : > { %17177 = vmatprep.mubr.f32.mxu0 %v22496_v1 }
 0xa94   : > { %8192 = vmatmul.mubr.f32.gmra.mrb[192].mxu1 %v25888_v41 }
 0xa95   : > { %8198 = vmatprep.mubr.f32.mxu1 %v25889_v12 }
 0xa96   : > { %17178 = vmatmul.mubr.f32.gmra.mrb[224].mxu0 %v22492_v51 }
 0xa97   : > { %17180 = vmatprep.mubr.f32.mxu0 %v22544_v18 }
 0xa98   : > { %8201 = vmatmul.mubr.f32.gmra.mrb[194].mxu1 %v25890_v32 }
 0xa99   : > { %8207 = vmatprep.mubr.f32.mxu1 %v25891_v54 }
 0xa9a   : > { %17181 = vmatmul.mubr.f32.gmra.mrb[226].mxu0 %v22540_v37 }
 0xa9b   : > { %17187 = vmatprep.mubr.f32.mxu0 %v25871_v61  ;;  %v25898_v61 = vld [vmem:[#allocation8_spill] sm:$0xff] }
 0xa9c   : > { %8210 = vmatmul.mubr.f32.gmra.mrb[196].mxu1 %v25892_v27 }
 0xa9d   : > { %8216 = vmatprep.mubr.f32.mxu1 %v25893_v44 }
 0xa9e   : > { %17188 = vmatmul.mubr.f32.vlgmr.msra.gmra.mrb[228].mxu0 %v22196_v23  ;;  %v25899_v23 = vld [vmem:[#allocation11_spill] sm:$0xff] }
 0xa9f   : > { %17190 = vmatprep.mubr.f32.mxu0 %v22236_v31  ;;  %v25900_v31 = vld [vmem:[#allocation10_spill] sm:$0xff] }
 0xaa0   : > { %8219 = vmatmul.mubr.f32.gmra.mrb[198].mxu1 %v25894_v30 }
 0xaa1   : > { %8225 = vmatprep.mubr.f32.mxu1 %v25895_v5 }
 0xaa2   : > { %17191 = vmatmul.mubr.f32.gmra.mrb[230].mxu0 %v22227_v10 }
 0xaa3   : > { %17193 = vmatprep.mubr.f32.mxu0 %v22284_v25  ;;  %v25901_v25 = vld [vmem:[#allocation46_spill] sm:$0xff] }
 0xaa4   : > { %8228 = vmatmul.mubr.f32.gmra.mrb[200].mxu1 %v25896_v29 }
 0xaa5   : > { %8234 = vmatprep.mubr.f32.mxu1 %v25897_v22 }
 0xaa6   : > { %17194 = vmatmul.mubr.f32.gmra.mrb[232].mxu0 %v22275_v60 }
 0xaa7   : > { %17196 = vmatprep.mubr.f32.mxu0 %v22313_v47 }
 0xaa8   : > { %8237 = vmatmul.mubr.f32.gmra.mrb[202].mxu1 %v25898_v61 }
 0xaa9   : > { %8243 = vmatprep.mubr.f32.mxu1 %v25899_v23 }
 0xaaa   : > { %17197 = vmatmul.mubr.f32.gmra.mrb[234].mxu0 %v22305_v34  ;;  %v25902_v34 = vand.u32 4294901760, %v25869_v21 }
 0xaab   : > { %17199 = vmatprep.mubr.f32.mxu0 %v22353_v3 }
 0xaac   : > { %8246 = vmatmul.mubr.f32.gmra.mrb[204].mxu1 %v25900_v31 }
 0xaad   : > { %8252 = vmatprep.mubr.f32.mxu1 %v22762_v11  ;;  %v23019_v60 = vpop.f32.mrb[138].mxu0 }
 0xaae   : > { %17200 = vmatmul.mubr.f32.gmra.mrb[236].mxu0 %v22351_v26  ;;  %v23022_v47 = vpop.f32.mrb[139].mxu0 }
 0xaaf   : > { %17202 = vmatprep.mubr.f32.mxu0 %v22400_v36 }
 0xab0   : > { %8255 = vmatmul.mubr.f32.gmra.mrb[206].mxu1 %v22752_v48 }
 0xab1   : > { %8261 = vmatprep.mubr.f32.mxu1 %v22774_v59 }
 0xab2   : > { %17203 = vmatmul.mubr.f32.gmra.mrb[238].mxu0 %v22396_v39  ;;  %v25903_v39 = vand.u32 4294901760, %v25872_v46  ;;  %v25911_v46 = vand.u32 4294901760, %v25878_v14  ;;  %v25919_v14 = vand.u32 4294901760, %v25883_v16  ;;  %v25927_v16 = vand.u32 4294901760, %v25887_v6 }
 0xab3   : > { %17205 = vmatprep.mubr.f32.mxu0 %v22448_v57  ;;  %v25904_v57 = vand.u32 4294901760, %v25873_v58  ;;  %v25912_v58 = vand.u32 4294901760, %v25879_v9  ;;  %v25934_v6 = vand.u32 4294901760, %v25891_v54  ;;  %v25938_v54 = vand.u32 4294901760, %v25895_v5 }
 0xab4   : > { %8264 = vmatmul.mubr.f32.gmra.mrb[208].mxu1 %v22790_v35  ;;  %v23031_v36 = vpop.f32.mrb[140].mxu0  ;;  %v25945_v5 = vand.u32 4294901760, %v25899_v23  ;;  %v25953_v23 = vand.u32 4294901760, %v22774_v59  ;;  %v25961_v59 = vand.u32 4294901760, %v22817_v28 }
 0xab5   : > { %8270 = vmatprep.mubr.f32.mxu1 %v22798_v2  ;;  %v23034_v10 = vpop.f32.mrb[141].mxu0 }
 0xab6   : > { %17206 = vmatmul.mubr.f32.gmra.mrb[240].mxu0 %v22444_v17  ;;  %v25905_v17 = vld [vmem:[#allocation101_spill] sm:$0xff] }
 0xab7   : > { %17208 = vmatprep.mubr.f32.mxu0 %v22496_v1  ;;  %v25906_v1 = vld [vmem:[#allocation90_spill] sm:$0xff] }
 0xab8   : > { %8273 = vmatmul.mubr.f32.gmra.mrb[210].mxu1 %v22814_v43 }
 0xab9   : > { %8279 = vmatprep.mubr.f32.mxu1 %v22817_v28 }
 0xaba   : > { %17209 = vmatmul.mubr.f32.gmra.mrb[242].mxu0 %v22492_v51  ;;  %v23042_v26 = vpop.f32.mrb[142].mxu0  ;;  %v25907_v51 = vand.u32 4294901760, %v25876_v53  ;;  %v25915_v53 = vand.u32 4294901760, %v25880_v62  ;;  %v25923_v62 = vand.u32 4294901760, %v25885_v40  ;;  %v25931_v40 = vand.u32 4294901760, %v25889_v12 }
 0xabb   : > { %17211 = vmatprep.mubr.f32.mxu0 %v22544_v18  ;;  %v23044_v3 = vpop.f32.mrb[143].mxu0  ;;  %v25936_v12 = vand.u32 4294901760, %v25893_v44  ;;  %v25941_v44 = vand.u32 4294901760, %v25897_v22  ;;  %v25949_v22 = vand.u32 4294901760, %v22762_v11  ;;  %v25957_v11 = vand.u32 4294901760, %v22798_v2 }
 0xabc   : > { %8282 = vmatmul.mubr.f32.gmra.mrb[212].mxu1 %v25901_v25 }
 0xabd   : > { %8358 = vmatprep.mubr.f32.mxu1 %v25902_v34 }
 0xabe   : > { %17212 = vmatmul.mubr.f32.gmra.mrb[244].mxu0 %v22540_v37  ;;  %v25909_v37 = vand.u32 4294901760, %v25877_v56  ;;  %v25917_v56 = vand.u32 4294901760, %v25882_v52  ;;  %v25925_v52 = vand.u32 4294901760, %v25886_v7  ;;  %v25933_v7 = vand.u32 4294901760, %v25890_v32 }
 0xabf   : > { %v25937_v32 = vand.u32 4294901760, %v25894_v30  ;;  %v25943_v30 = vand.u32 4294901760, %v25898_v61  ;;  %v25951_v61 = vand.u32 4294901760, %v22752_v48  ;;  %v25959_v48 = vand.u32 4294901760, %v22814_v43 }
 0xac0   : > { %8362 = vmatmul.mubr.f32.vlgmr.msra.gmra.mrb[178].mxu1 %v25903_v39 }
 0xac1   : > { %8369 = vmatprep.mubr.f32.mxu1 %v25904_v57  ;;  %18299 = vmatpush1.bf16.xpose.msra.mxu1 %v25905_v17  ;;  %v23054_v18 = vpop.f32.mrb[144].mxu0  ;;  %v25916_v57 = vand.u32 4294901760, %v25881_v20 }
 0xac2   : > { %18301 = vmatprep.subr.bf16.mxu1 %v25906_v1  ;;  %25908 = vst [vmem:[#allocation3_spill] sm:$0xff] %v23054_v18  ;;  %v23058_v21 = vpop.f32.mrb[145].mxu0  ;;  %v25921_v1 = vand.u32 4294901760, %v25884_v0  ;;  %v25929_v0 = vand.u32 4294901760, %v25888_v41  ;;  %v25935_v41 = vand.u32 4294901760, %v25892_v27  ;;  %v25939_v27 = vand.u32 4294901760, %v25896_v29 }
 0xac3   : > { %25910 = vst [vmem:[#allocation4_spill] sm:$0xff] %v23058_v21  ;;  %v25947_v29 = vand.u32 4294901760, %v25900_v31  ;;  %v25955_v31 = vand.u32 4294901760, %v22790_v35  ;;  %v25963_v35 = vand.u32 4294901760, %v25901_v25  ;;  %v25968_v25 = vld [vmem:[#allocation77_spill] sm:$0xff] }
 0xac4   : > { %8373 = vmatmul.mubr.f32.gmra.mrb[180].mxu1 %v25907_v51 }
 0xac5   : > { %8380 = vmatprep.mubr.f32.mxu1 %v25909_v37 }
 0xac6   : > { %v23064_v34 = vpop.f32.mrb[146].mxu0 }
 0xac7   : > { %25913 = vst [vmem:[#allocation2_spill] sm:$0xff] %v23064_v34  ;;  %v23066_v39 = vpop.f32.mrb[147].mxu0 }
 0xac8   : > { %8384 = vmatmul.mubr.f32.gmra.mrb[182].mxu1 %v25911_v46  ;;  %25914 = vst [vmem:[#allocation6_spill] sm:$0xff] %v23066_v39 }
 0xac9   : > { %8391 = vmatprep.mubr.f32.mxu1 %v25912_v58 }
 0xacc   : > { %8395 = vmatmul.mubr.f32.gmra.mrb[184].mxu1 %v25915_v53  ;;  %v23074_v17 = vpop.f32.mrb[148].mxu0 }
 0xacd   : > { %8402 = vmatprep.mubr.f32.mxu1 %v25916_v57  ;;  %25918 = vst [vmem:[#allocation5_spill] sm:$0xff] %v23074_v17  ;;  %v23078_v9 = vpop.f32.mrb[149].mxu0 }
 0xace   : > { %25920 = vst [vmem:[#allocation89_spill] sm:$0xff] %v23078_v9 }
 0xad0   : > { %8406 = vmatmul.mubr.f32.gmra.mrb[186].mxu1 %v25917_v56 }
 0xad1   : > { %8413 = vmatprep.mubr.f32.mxu1 %v25919_v14 }
 0xad2   : > { %v23082_v51 = vpop.f32.mrb[150].mxu0 }
 0xad3   : > { %25922 = vst [vmem:[#allocation94_spill] sm:$0xff] %v23082_v51  ;;  %v23086_v20 = vpop.f32.mrb[151].mxu0 }
 0xad4   : > { %8417 = vmatmul.mubr.f32.gmra.mrb[188].mxu1 %v25921_v1  ;;  %25924 = vst [vmem:[#allocation95_spill] sm:$0xff] %v23086_v20 }
 0xad5   : > { %8424 = vmatprep.mubr.f32.mxu1 %v25923_v62 }
 0xad6   : > { %v23090_v37 = vpop.f32.mrb[152].mxu0 }
 0xad7   : > { %25926 = vst [vmem:[#allocation98_spill] sm:$0xff] %v23090_v37  ;;  %v23094_v46 = vpop.f32.mrb[153].mxu0 }
 0xad8   : > { %8428 = vmatmul.mubr.f32.gmra.mrb[190].mxu1 %v25925_v52  ;;  %25928 = vst [vmem:[#allocation99_spill] sm:$0xff] %v23094_v46 }
 0xad9   : > { %8435 = vmatprep.mubr.f32.mxu1 %v25927_v16 }
 0xadb   : > { %v23098_v58 = vpop.f32.mrb[154].mxu0 }
 0xadc   : > { %8439 = vmatmul.mubr.f32.gmra.mrb[192].mxu1 %v25929_v0  ;;  %25930 = vst [vmem:[#allocation96_spill] sm:$0xff] %v23098_v58  ;;  %v23102_v53 = vpop.f32.mrb[155].mxu0 }
 0xadd   : > { %8446 = vmatprep.mubr.f32.mxu1 %v25931_v40  ;;  %25932 = vst [vmem:[#allocation113_spill] sm:$0xff] %v23102_v53 }
 0xadf   : > { %v23106_v57 = vpop.f32.mrb[156].mxu0 }
 0xae0   : > { %8450 = vmatmul.mubr.f32.gmra.mrb[194].mxu1 %v25933_v7  ;;  %v23110_v56 = vpop.f32.mrb[157].mxu0 }
 0xae1   : > { %8457 = vmatprep.mubr.f32.mxu1 %v25934_v6 }
 0xae3   : > { %v23114_v14 = vpop.f32.mrb[158].mxu0 }
 0xae4   : > { %8461 = vmatmul.mubr.f32.gmra.mrb[196].mxu1 %v25935_v41  ;;  %v23118_v1 = vpop.f32.mrb[159].mxu0 }
 0xae5   : > { %8468 = vmatprep.mubr.f32.mxu1 %v25936_v12 }
 0xae7   : > { %v23122_v62 = vpop.f32.mrb[160].mxu0 }
 0xae8   : > { %8472 = vmatmul.mubr.f32.gmra.mrb[198].mxu1 %v25937_v32  ;;  %v23126_v52 = vpop.f32.mrb[161].mxu0 }
 0xae9   : > { %8479 = vmatprep.mubr.f32.mxu1 %v25938_v54 }
 0xaeb   : > { %v23130_v16 = vpop.f32.mrb[162].mxu0 }
 0xaec   : > { %8483 = vmatmul.mubr.f32.gmra.mrb[200].mxu1 %v25939_v27  ;;  %25940 = vst [vmem:[#allocation114_spill] sm:$0xff] %v23130_v16  ;;  %v23134_v0 = vpop.f32.mrb[163].mxu0 }
 0xaed   : > { %8490 = vmatprep.mubr.f32.mxu1 %v25941_v44  ;;  %25942 = vst [vmem:[#allocation18_spill] sm:$0xff] %v23134_v0 }
 0xaef   : > { %v23138_v40 = vpop.f32.mrb[164].mxu0 }
 0xaf0   : > { %8494 = vmatmul.mubr.f32.gmra.mrb[202].mxu1 %v25943_v30  ;;  %25944 = vst [vmem:[#allocation50_spill] sm:$0xff] %v23138_v40  ;;  %v23142_v7 = vpop.f32.mrb[165].mxu0 }
 0xaf1   : > { %8501 = vmatprep.mubr.f32.mxu1 %v25945_v5  ;;  %25946 = vst [vmem:[#allocation42_spill] sm:$0xff] %v23142_v7 }
 0xaf3   : > { %v23146_v6 = vpop.f32.mrb[166].mxu0 }
 0xaf4   : > { %8505 = vmatmul.mubr.f32.gmra.mrb[204].mxu1 %v25947_v29  ;;  %25948 = vst [vmem:[#allocation74_spill] sm:$0xff] %v23146_v6  ;;  %v23150_v41 = vpop.f32.mrb[167].mxu0  ;;  %v25964_v29 = vld [vmem:[#allocation62_spill] sm:$0xff]  ;;  %v25987_v6 = vld [vmem:[#allocation47_spill] sm:$0xff] }
 0xaf5   : > { %8512 = vmatprep.mubr.f32.mxu1 %v25949_v22  ;;  %25950 = vst [vmem:[#allocation67_spill] sm:$0xff] %v23150_v41  ;;  %v25965_v22 = vld [vmem:[#allocation64_spill] sm:$0xff] }
 0xaf6   : > { %v25989_v41 = vld [vmem:[#allocation76_spill] sm:$0xff] }
 0xaf7   : > { %v23154_v12 = vpop.f32.mrb[168].mxu0 }
 0xaf8   : > { %8516 = vmatmul.mubr.f32.gmra.mrb[206].mxu1 %v25951_v61  ;;  %25952 = vst [vmem:[#allocation30_spill] sm:$0xff] %v23154_v12  ;;  %v23158_v32 = vpop.f32.mrb[169].mxu0  ;;  %v25966_v61 = vld [vmem:[#allocation19_spill] sm:$0xff]  ;;  %v25983_v12 = vld [vmem:[#allocation25_spill] sm:$0xff] }
 0xaf9   : > { %8523 = vmatprep.mubr.f32.mxu1 %v25953_v23  ;;  %25954 = vst [vmem:[#allocation29_spill] sm:$0xff] %v23158_v32  ;;  %v25967_v23 = vmov 0.0|0.0   ;;  %v25985_v32 = vld [vmem:[#allocation51_spill] sm:$0xff] }
 0xafb   : > { %v23162_v54 = vpop.f32.mrb[170].mxu0 }
 0xafc   : > { %8527 = vmatmul.mubr.f32.gmra.mrb[208].mxu1 %v25955_v31  ;;  %25956 = vst [vmem:[#allocation55_spill] sm:$0xff] %v23162_v54  ;;  %v23166_v27 = vpop.f32.mrb[171].mxu0  ;;  %v25979_v54 = vld [vmem:[#allocation66_spill] sm:$0xff] }
 0xafd   : > { %8534 = vmatprep.mubr.f32.mxu1 %v25957_v11  ;;  %25958 = vst [vmem:[#allocation44_spill] sm:$0xff] %v23166_v27  ;;  %v25970_v11 = vld [vmem:[#allocation26_spill] sm:$0xff]  ;;  %v25981_v27 = vld [vmem:[#allocation27_spill] sm:$0xff] }
 0xaff   : > { %v23170_v44 = vpop.f32.mrb[172].mxu0 }
 0xb00   : > { %8538 = vmatmul.mubr.f32.gmra.mrb[210].mxu1 %v25959_v48  ;;  %25960 = vst [vmem:[#allocation71_spill] sm:$0xff] %v23170_v44  ;;  %v23174_v30 = vpop.f32.mrb[173].mxu0  ;;  %v25973_v44 = vld [vmem:[#allocation52_spill] sm:$0xff] }
 0xb01   : > { %8545 = vmatprep.mubr.f32.mxu1 %v25961_v59  ;;  %25962 = vst [vmem:[#allocation105_spill] sm:$0xff] %v23174_v30  ;;  %v25971_v59 = vld [vmem:[#allocation28_spill] sm:$0xff] }
 0xb03   : > { %v23178_v5 = vpop.f32.mrb[174].mxu0 }
 0xb04   : > { %8549 = vmatmul.mubr.f32.gmra.mrb[212].mxu1 %v25963_v35  ;;  %v23181_v2 = vpop.f32.mrb[175].mxu0 }
 0xb05   : > { %8631 = vmatprep.mubr.f32.mxu1 %v25964_v29 }
 0xb08   : > { %8633 = vmatmul.mubr.f32.vlgmr.msra.gmra.mrb[178].mxu1 %v25965_v22  ;;  %v23184_v43 = vpop.f32.mrb[176].mxu0 }
 0xb09   : > { %8638 = vmatprep.mubr.f32.mxu1 %v25966_v61  ;;  %18303 = vmatpush1.bf16.xpose.msra.mxu1 %v25874_v24  ;;  %v23188_v28 = vpop.f32.mrb[177].mxu0  ;;  %v25975_v24 = vld [vmem:[#allocation43_spill] sm:$0xff] }
 0xb0a   : > { %18400 = vmatprep.subr.bf16.mxu1 %v25967_v23  ;;  %v25977_v23 = vld [vmem:[#allocation75_spill] sm:$0xff] }
 0xb0c   : > { %8640 = vmatmul.mubr.f32.gmra.mrb[180].mxu1 %v25968_v25  ;;  %v23192_v31 = vpop.f32.mrb[178].mxu0 }
 0xb0d   : > { %25969 = vst [vmem:[#allocation104_spill] sm:$0xff] %v23192_v31  ;;  %8645 = vmatprep.mubr.f32.mxu1 %v25970_v11  ;;  %v23195_v48 = vpop.f32.mrb[179].mxu0 }
 0xb10   : > { %8647 = vmatmul.mubr.f32.gmra.mrb[182].mxu1 %v25971_v59  ;;  %v23198_v35 = vpop.f32.mrb[180].mxu0 }
 0xb11   : > { %25972 = vst [vmem:[#allocation108_spill] sm:$0xff] %v23198_v35  ;;  %8652 = vmatprep.mubr.f32.mxu1 %v25973_v44  ;;  %v23201_v58 = vpop.f32.mrb[181].mxu0 }
 0xb12   : > { %25974 = vst [vmem:[#allocation109_spill] sm:$0xff] %v23201_v58 }
 0xb14   : > { %8654 = vmatmul.mubr.f32.gmra.mrb[184].mxu1 %v25975_v24  ;;  %v23204_v30 = vpop.f32.mrb[182].mxu0 }
 0xb15   : > { %25976 = vst [vmem:[#allocation93_spill] sm:$0xff] %v23204_v30  ;;  %8659 = vmatprep.mubr.f32.mxu1 %v25977_v23  ;;  %v23207_v53 = vpop.f32.mrb[183].mxu0 }
 0xb16   : > { %25978 = vst [vmem:[#allocation80_spill] sm:$0xff] %v23207_v53 }
 0xb18   : > { %8661 = vmatmul.mubr.f32.gmra.mrb[186].mxu1 %v25979_v54  ;;  %v23210_v37 = vpop.f32.mrb[184].mxu0 }
 0xb19   : > { %25980 = vst [vmem:[#allocation69_spill] sm:$0xff] %v23210_v37  ;;  %8666 = vmatprep.mubr.f32.mxu1 %v25981_v27  ;;  %v23213_v46 = vpop.f32.mrb[185].mxu0  ;;  %v25991_v37 = vld [vmem:[#allocation70_spill] sm:$0xff] }
 0xb1a   : > { %25982 = vst [vmem:[#allocation72_spill] sm:$0xff] %v23213_v46  ;;  %v25993_v46 = vld [vmem:[#allocation100_spill] sm:$0xff] }
 0xb1c   : > { %8668 = vmatmul.mubr.f32.gmra.mrb[188].mxu1 %v25983_v12  ;;  %v23216_v51 = vpop.f32.mrb[186].mxu0 }
 0xb1d   : > { %25984 = vst [vmem:[#allocation20_spill] sm:$0xff] %v23216_v51  ;;  %8673 = vmatprep.mubr.f32.mxu1 %v25985_v32  ;;  %v23219_v20 = vpop.f32.mrb[187].mxu0  ;;  %v25995_v51 = vld [vmem:[#allocation84_spill] sm:$0xff] }
 0xb1e   : > { %25986 = vst [vmem:[#allocation91_spill] sm:$0xff] %v23219_v20  ;;  %v25996_v20 = vld [vmem:[#allocation107_spill] sm:$0xff] }
 0xb20   : > { %8675 = vmatmul.mubr.f32.gmra.mrb[190].mxu1 %v25987_v6  ;;  %v23222_v17 = vpop.f32.mrb[188].mxu0 }
 0xb21   : > { %25988 = vst [vmem:[#allocation97_spill] sm:$0xff] %v23222_v17  ;;  %8680 = vmatprep.mubr.f32.mxu1 %v25989_v41  ;;  %v23225_v9 = vpop.f32.mrb[189].mxu0 }
 0xb22   : > { %25990 = vst [vmem:[#allocation17_spill] sm:$0xff] %v23225_v9 }
 0xb24   : > { %8682 = vmatmul.mubr.f32.gmra.mrb[192].mxu1 %v25991_v37  ;;  %v23228_v30 = vpop.f32.mrb[190].mxu0 }
 0xb25   : > { %25992 = vst [vmem:[#allocation33_spill] sm:$0xff] %v23228_v30  ;;  %8687 = vmatprep.mubr.f32.mxu1 %v25993_v46  ;;  %v23231_v40 = vpop.f32.mrb[191].mxu0 }
 0xb26   : > { %25994 = vst [vmem:[#allocation34_spill] sm:$0xff] %v23231_v40 }
 0xb28   : > { %8689 = vmatmul.mubr.f32.gmra.mrb[194].mxu1 %v25995_v51  ;;  %v23234_v34 = vpop.f32.mrb[192].mxu0 }
 0xb29   : > { %8694 = vmatprep.mubr.f32.mxu1 %v25996_v20  ;;  %v23237_v53 = vpop.f32.mrb[193].mxu0 }
 0xb2c   : > { %8696 = vmatmul.mubr.f32.gmra.mrb[196].mxu1 %v25849_v63  ;;  %v23240_v17 = vpop.f32.mrb[194].mxu0 }
 0xb2d   : > { %8701 = vmatprep.mubr.f32.mxu1 %v25850_v49  ;;  %v23243_v9 = vpop.f32.mrb[195].mxu0 }
 0xb30   : > { %8703 = vmatmul.mubr.f32.gmra.mrb[198].mxu1 %v25853_v38  ;;  %v23246_v30 = vpop.f32.mrb[196].mxu0 }
 0xb31   : > { %25997 = vst [vmem:[#allocation58_spill] sm:$0xff] %v23246_v30  ;;  %8708 = vmatprep.mubr.f32.mxu1 %v25854_v42  ;;  %v23249_v40 = vpop.f32.mrb[197].mxu0 }
 0xb34   : > { %8710 = vmatmul.mubr.f32.gmra.mrb[200].mxu1 %v22652_v13  ;;  %v23252_v7 = vpop.f32.mrb[198].mxu0 }
 0xb35   : > { %25998 = vst [vmem:[#allocation59_spill] sm:$0xff] %v23252_v7  ;;  %8715 = vmatprep.mubr.f32.mxu1 %v22683_v33  ;;  %v23255_v39 = vpop.f32.mrb[199].mxu0 }
 0xb36   : > { %25999 = vst [vmem:[#allocation16_spill] sm:$0xff] %v23255_v39 }
 0xb38   : > { %8717 = vmatmul.mubr.f32.gmra.mrb[202].mxu1 %v22674_v50  ;;  %v23258_v35 = vpop.f32.mrb[200].mxu0 }
 0xb39   : > { %26000 = vst [vmem:[#allocation13_spill] sm:$0xff] %v23258_v35  ;;  %8722 = vmatprep.mubr.f32.mxu1 %v22702_v55  ;;  %v23261_v16 = vpop.f32.mrb[201].mxu0 }
 0xb3a   : > { %26001 = vst [vmem:[#allocation39_spill] sm:$0xff] %v23261_v16  ;;  %v26007_v16 = vld [vmem:[#allocation35_spill] sm:$0xff] }
 0xb3c   : > { %8724 = vmatmul.mubr.f32.gmra.mrb[204].mxu1 %v22700_v15  ;;  %v23264_v18 = vpop.f32.mrb[202].mxu0 }
 0xb3d   : > { %26002 = vst [vmem:[#allocation38_spill] sm:$0xff] %v23264_v18  ;;  %8729 = vmatprep.mubr.f32.mxu1 %v22732_v45  ;;  %v23267_v58 = vpop.f32.mrb[203].mxu0  ;;  %v26009_v18 = vld [vmem:[#allocation36_spill] sm:$0xff] }
 0xb3e   : > { %26003 = vst [vmem:[#allocation61_spill] sm:$0xff] %v23267_v58  ;;  %v26011_v58 = vld [vmem:[#allocation41_spill] sm:$0xff] }
 0xb40   : > { %8731 = vmatmul.mubr.f32.gmra.mrb[206].mxu1 %v22726_v8  ;;  %v23270_v7 = vpop.f32.mrb[204].mxu0 }
 0xb41   : > { %26004 = vst [vmem:[#allocation60_spill] sm:$0xff] %v23270_v7  ;;  %8736 = vmatprep.mubr.f32.mxu1 %v22748_v4  ;;  %v23273_v39 = vpop.f32.mrb[205].mxu0  ;;  %v26013_v7 = vld [vmem:[#allocation14_spill] sm:$0xff] }
 0xb42   : > { %26005 = vst [vmem:[#allocation82_spill] sm:$0xff] %v23273_v39 }
 0xb44   : > { %8738 = vmatmul.mubr.f32.gmra.mrb[208].mxu1 %v22754_v19  ;;  %v23276_v35 = vpop.f32.mrb[206].mxu0 }
 0xb45   : > { %26006 = vst [vmem:[#allocation79_spill] sm:$0xff] %v23276_v35  ;;  %8743 = vmatprep.mubr.f32.mxu1 %v26007_v16  ;;  %v23279_v0 = vpop.f32.mrb[207].mxu0 }
 0xb46   : > { %26008 = vst [vmem:[#allocation102_spill] sm:$0xff] %v23279_v0 }
 0xb48   : > { %8745 = vmatmul.mubr.f32.gmra.mrb[210].mxu1 %v26009_v18  ;;  %v23282_v30 = vpop.f32.mrb[208].mxu0 }
 0xb49   : > { %26010 = vst [vmem:[#allocation103_spill] sm:$0xff] %v23282_v30  ;;  %8750 = vmatprep.mubr.f32.mxu1 %v26011_v58  ;;  %v23285_v21 = vpop.f32.mrb[209].mxu0 }
 0xb4a   : > { %26012 = vst [vmem:[#allocation111_spill] sm:$0xff] %v23285_v21 }
 0xb4c   : > { %8752 = vmatmul.mubr.f32.gmra.mrb[212].mxu1 %v26013_v7 }
 0xb4d   : > { %v23288_v31 = vpop.f32.mrb[210].mxu0  ;;  %8826 = vmatprep.mubr.f32.mxu1 %v25964_v29 }
 0xb4e   : > { %v23291_v39 = vpop.f32.mrb[211].mxu0 }
 0xb50   : > { %8828 = vmatmul.mubr.f32.vlgmr.msra.gmra.mrb[178].mxu1 %v25965_v22 }
 0xb51   : > { %v23294_v35 = vpop.f32.mrb[212].mxu0  ;;  %8833 = vmatprep.mubr.f32.mxu1 %v25966_v61 }
 0xb52   : > { %v23297_v0 = vpop.f32.mrb[213].mxu0 }
 0xb54   : > { %8835 = vmatmul.mubr.f32.gmra.mrb[180].mxu1 %v25968_v25 }
 0xb55   : > { %v23300_v30 = vpop.f32.mrb[214].mxu0  ;;  %8840 = vmatprep.mubr.f32.mxu1 %v25970_v11 }
 0xb56   : > { %v23303_v21 = vpop.f32.mrb[215].mxu0 }
 0xb58   : > { %8842 = vmatmul.mubr.f32.gmra.mrb[182].mxu1 %v25971_v59 }
 0xb59   : > { %v23306_v29 = vpop.f32.mrb[216].mxu0  ;;  %8847 = vmatprep.mubr.f32.mxu1 %v25973_v44 }
 0xb5a   : > { %v23309_v22 = vpop.f32.mrb[217].mxu0 }
 0xb5c   : > { %8849 = vmatmul.mubr.f32.gmra.mrb[184].mxu1 %v25975_v24 }
 0xb5d   : > { %v23312_v61 = vpop.f32.mrb[218].mxu0  ;;  %8854 = vmatprep.mubr.f32.mxu1 %v25977_v23 }
 0xb5e   : > { %v23315_v25 = vpop.f32.mrb[219].mxu0 }
 0xb60   : > { %8856 = vmatmul.mubr.f32.gmra.mrb[186].mxu1 %v25979_v54 }
 0xb61   : > { %v23318_v11 = vpop.f32.mrb[220].mxu0  ;;  %8861 = vmatprep.mubr.f32.mxu1 %v25981_v27 }
 0xb62   : > { %v23321_v59 = vpop.f32.mrb[221].mxu0 }
 0xb64   : > { %8863 = vmatmul.mubr.f32.gmra.mrb[188].mxu1 %v25983_v12 }
 0xb65   : > { %v23324_v44 = vpop.f32.mrb[222].mxu0  ;;  %8868 = vmatprep.mubr.f32.mxu1 %v25985_v32 }
 0xb66   : > { %v23327_v24 = vpop.f32.mrb[223].mxu0 }
 0xb68   : > { %8870 = vmatmul.mubr.f32.gmra.mrb[190].mxu1 %v25987_v6 }
 0xb69   : > { %v23330_v23 = vpop.f32.mrb[224].mxu0  ;;  %8875 = vmatprep.mubr.f32.mxu1 %v25989_v41 }
 0xb6a   : > { %26014 = vst [vmem:[#allocation106_spill] sm:$0xff] %v23330_v23  ;;  %v23333_v54 = vpop.f32.mrb[225].mxu0 }
 0xb6b   : > { %26015 = vst [vmem:[#allocation92_spill] sm:$0xff] %v23333_v54 }
 0xb6c   : > { %8877 = vmatmul.mubr.f32.gmra.mrb[192].mxu1 %v25991_v37 }
 0xb6d   : > { %v23336_v27 = vpop.f32.mrb[226].mxu0  ;;  %8882 = vmatprep.mubr.f32.mxu1 %v25993_v46 }
 0xb6e   : > { %26016 = vst [vmem:[#allocation110_spill] sm:$0xff] %v23336_v27  ;;  %v23339_v12 = vpop.f32.mrb[227].mxu0 }
 0xb6f   : > { %26017 = vst [vmem:[#allocation112_spill] sm:$0xff] %v23339_v12 }
 0xb70   : > { %8884 = vmatmul.mubr.f32.gmra.mrb[194].mxu1 %v25995_v51 }
 0xb71   : > { %v23342_v32 = vpop.f32.mrb[228].mxu0  ;;  %8889 = vmatprep.mubr.f32.mxu1 %v25996_v20 }
 0xb72   : > { %v23345_v6 = vpop.f32.mrb[229].mxu0 }
 0xb74   : > { %8891 = vmatmul.mubr.f32.gmra.mrb[196].mxu1 %v25849_v63 }
 0xb75   : > { %v23348_v41 = vpop.f32.mrb[230].mxu0  ;;  %8896 = vmatprep.mubr.f32.mxu1 %v25850_v49 }
 0xb76   : > { %v23351_v37 = vpop.f32.mrb[231].mxu0 }
 0xb78   : > { %8898 = vmatmul.mubr.f32.gmra.mrb[198].mxu1 %v25853_v38 }
 0xb79   : > { %v23354_v46 = vpop.f32.mrb[232].mxu0  ;;  %8903 = vmatprep.mubr.f32.mxu1 %v25854_v42 }
 0xb7a   : > { %v23357_v51 = vpop.f32.mrb[233].mxu0 }
 0xb7c   : > { %8905 = vmatmul.mubr.f32.gmra.mrb[200].mxu1 %v22652_v13 }
 0xb7d   : > { %v23360_v20 = vpop.f32.mrb[234].mxu0  ;;  %8910 = vmatprep.mubr.f32.mxu1 %v22683_v33 }
 0xb7e   : > { %v23363_v63 = vpop.f32.mrb[235].mxu0 }
 0xb80   : > { %8912 = vmatmul.mubr.f32.gmra.mrb[202].mxu1 %v22674_v50 }
 0xb81   : > { %v23366_v49 = vpop.f32.mrb[236].mxu0  ;;  %8917 = vmatprep.mubr.f32.mxu1 %v22702_v55 }
 0xb82   : > { %v23369_v38 = vpop.f32.mrb[237].mxu0 }
 0xb84   : > { %8919 = vmatmul.mubr.f32.gmra.mrb[204].mxu1 %v22700_v15 }
 0xb85   : > { %v23372_v42 = vpop.f32.mrb[238].mxu0  ;;  %8924 = vmatprep.mubr.f32.mxu1 %v22732_v45 }
 0xb86   : > { %v23375_v13 = vpop.f32.mrb[239].mxu0 }
 0xb88   : > { %8926 = vmatmul.mubr.f32.gmra.mrb[206].mxu1 %v22726_v8 }
 0xb89   : > { %v23378_v33 = vpop.f32.mrb[240].mxu0  ;;  %8931 = vmatprep.mubr.f32.mxu1 %v22748_v4  ;;  %v26023_v4 = vmov 0.0  }
 0xb8a   : > { %26018 = vst [vmem:[#allocation7_spill] sm:$0xff] %v23378_v33  ;;  %v23381_v50 = vpop.f32.mrb[241].mxu0 }
 0xb8c   : > { %8933 = vmatmul.mubr.f32.gmra.mrb[208].mxu1 %v22754_v19  ;;  %v311_v19 = vld [vmem:[%s25009_s2 + $0x60] sm:$0xff] }
 0xb8d   : > { %v23384_v55 = vpop.f32.mrb[242].mxu0  ;;  %8938 = vmatprep.mubr.f32.mxu1 %v26007_v16  ;;  %v312_v16 = vld [vmem:[%s25009_s2 + $0x68] sm:$0xff] }
 0xb8e   : > { %26019 = vst [vmem:[#allocation9_spill] sm:$0xff] %v23384_v55  ;;  %v23387_v15 = vpop.f32.mrb[243].mxu0  ;;  %v10200_v27 = vand.u32 4294901760, %v312_v16 }
 0xb8f   : > { %26020 = vst [vmem:[#allocation8_spill] sm:$0xff] %v23387_v15 }
 0xb90   : > { %8940 = vmatmul.mubr.f32.gmra.mrb[210].mxu1 %v26009_v18  ;;  %v10197_v18 = vand.u32 4294901760, %v311_v19 }
 0xb91   : > { %v23390_v45 = vpop.f32.mrb[244].mxu0  ;;  %8945 = vmatprep.mubr.f32.mxu1 %v26011_v58 }
 0xb92   : > { %26021 = vst [vmem:[#allocation11_spill] sm:$0xff] %v23390_v45  ;;  %v23393_v8 = vpop.f32.mrb[245].mxu0  ;;  %v23404_v45 = vpack.c.bf16 %v10200_v27, %v10197_v18  ;;  %v23408_v58 = vsub.f32 %v311_v19, %v10197_v18 }
 0xb93   : > { %26022 = vst [vmem:[#allocation10_spill] sm:$0xff] %v23393_v8 }
 0xb94   : > { %8947 = vmatmul.mubr.f32.gmra.mrb[212].mxu1 %v26013_v7  ;;  %26024 = vst [vmem:[#allocation46_spill] sm:$0xff] %v23404_v45  ;;  %18329 = vmatprep.subr.bf16.mxu0 %v23404_v45  ;;  %26025 = vst [vmem:[#allocation101_spill] sm:$0xff] %v23408_v58  ;;  %v23410_v7 = vsub.f32 %v312_v16, %v10200_v27 }
 0xb95   : > { %17630 = vmatprep.mubr.msk.f32.mxu1 %vm19591_vm0, %v26023_v4  ;;  %18331 = vmatpush3.bf16.msra.mxu0 %v23404_v45  ;;  %v25404_v4 = vand.u32 4294901760, %v23408_v58 }
 0xb96   : > { %26026 = vst [vmem:[#allocation90_spill] sm:$0xff] %v23410_v7  ;;  %v25407_v8 = vand.u32 4294901760, %v23410_v7  ;;  %v23425_v27 = vpack.c.bf16 %v23410_v7, %v23408_v58 }
 0xb97   : > { %v10447_v12 = vsub.f32 %v23408_v58, %v25404_v4 }
 0xb98   : > { %v10454_v55 = vsub.f32 %v23410_v7, %v25407_v8 }
 0xb99   : > { %v10448_v23 = vand.u32 4294901760, %v10447_v12 }
 0xb9a   : > { %v10455_v15 = vand.u32 4294901760, %v10454_v55 }
 0xb9c   : > { %v23420_v54 = vpack.c.bf16 %v10455_v15, %v10448_v23 }
 0xb9e   : > { %18333 = vmatprep.subr.bf16.mxu0 %v23420_v54 }
 0xc23   : > { %v8829_v19 = vpop.f32.mrb[178].mxu1 }
 0xc24   : > { %v9026_v16 = vadd.f32 %v23022_v47, %v8829_v19  ;;  %v8831_v18 = vpop.f32.mrb[179].mxu1 }
 0xc26   : > { %v9277_v4 = vadd.f32 %v23110_v56, %v9026_v16 }
 0xc27   : > { %v8836_v45 = vpop.f32.mrb[180].mxu1 }
 0xc28   : > { %v9455_v33 = vadd.f32 %v23181_v2, %v9277_v4  ;;  %v9036_v12 = vadd.f32 %v23019_v60, %v8836_v45  ;;  %v8838_v55 = vpop.f32.mrb[181].mxu1 }
 0xc2a   : > { %v9649_v23 = vadd.f32 %v23237_v53, %v9455_v33  ;;  %v9283_v15 = vadd.f32 %v23106_v57, %v9036_v12 }
 0xc2b   : > { %v8843_v8 = vpop.f32.mrb[182].mxu1 }
 0xc2c   : > { %v9862_v7 = vadd.f32 %v23291_v39, %v9649_v23  ;;  %v9462_v58 = vadd.f32 %v23178_v5, %v9283_v15  ;;  %v9046_v47 = vadd.f32 %v23034_v10, %v8843_v8  ;;  %v8845_v19 = vpop.f32.mrb[183].mxu1 }
 0xc2e   : > { %v10037_v56 = vadd.f32 %v23345_v6, %v9862_v7  ;;  %v9657_v16 = vadd.f32 %v23234_v34, %v9462_v58  ;;  %v9289_v2 = vadd.f32 %v23118_v1, %v9046_v47 }
 0xc2f   : > { %v8850_v60 = vpop.f32.mrb[184].mxu1 }
 0xc30   : > { %v9868_v45 = vadd.f32 %v23288_v31, %v9657_v16  ;;  %v9469_v53 = vadd.f32 %v23188_v28, %v9289_v2  ;;  %v9056_v57 = vadd.f32 %v23031_v36, %v8850_v60  ;;  %v8852_v33 = vpop.f32.mrb[185].mxu1  ;;  %v10143_v39 = vsel %vm2619_vm4, %v10037_v56, 0  ;;  %v26027_v60 = vld [vmem:[#allocation104_spill] sm:$0xff] }
 0xc31   : > { %v23443_v5 = vand.u32 4294901760, %v10143_v39 }
 0xc32   : > { %v10043_v10 = vadd.f32 %v23342_v32, %v9868_v45  ;;  %v9665_v6 = vadd.f32 %v23243_v9, %v9469_v53  ;;  %v9295_v34 = vadd.f32 %v23114_v14, %v9056_v57  ;;  %v26028_v53 = vld [vmem:[#allocation4_spill] sm:$0xff] }
 0xc33   : > { %v8857_v8 = vpop.f32.mrb[186].mxu1  ;;  %v23449_v1 = vsub.f32 %v10143_v39, %v23443_v5 }
 0xc34   : > { %v10146_v31 = vsel %vm2619_vm4, %v10043_v10, 0  ;;  %v9874_v28 = vadd.f32 %v23297_v0, %v9665_v6  ;;  %v9476_v36 = vadd.f32 %v23184_v43, %v9295_v34  ;;  %v9066_v4 = vadd.f32 %v23044_v3, %v8857_v8  ;;  %v8859_v58 = vpop.f32.mrb[187].mxu1  ;;  %v26029_v6 = vld [vmem:[#allocation58_spill] sm:$0xff] }
 0xc35   : > { %v23455_v7 = vand.u32 4294901760, %v10146_v31  ;;  %v10265_v32 = vand.u32 4294901760, %v23449_v1  ;;  %v26030_v8 = vld [vmem:[#allocation18_spill] sm:$0xff]  ;;  %v26031_v58 = vld [vmem:[#allocation109_spill] sm:$0xff] }
 0xc36   : > { %v10049_v9 = vadd.f32 %v23351_v37, %v9874_v28  ;;  %v9673_v14 = vadd.f32 %v23240_v17, %v9476_v36  ;;  %v9301_v18 = vadd.f32 %v23126_v52, %v9066_v4 }
 0xc37   : > { %v23462_v12 = vsub.f32 %v10146_v31, %v23455_v7  ;;  %v8864_v55 = vpop.f32.mrb[188].mxu1  ;;  %v10266_v0 = vsub.f32 %v23449_v1, %v10265_v32 }
 0xc38   : > { %v9880_v3 = vadd.f32 %v23294_v35, %v9673_v14  ;;  %v9483_v43 = vadd.f32 %v23195_v48, %v9301_v18  ;;  %v9076_v23 = vadd.f32 %v23042_v26, %v8864_v55  ;;  %v8866_v15 = vpop.f32.mrb[189].mxu1  ;;  %v10149_v37 = vsel %vm2619_vm4, %v10049_v9, 0  ;;  %v26032_v14 = vld [vmem:[#allocation3_spill] sm:$0xff] }
 0xc39   : > { %v10267_v17 = vand.u32 4294901760, %v10266_v0  ;;  %v10275_v52 = vand.u32 4294901760, %v23462_v12  ;;  %v23472_v47 = vand.u32 4294901760, %v10149_v37  ;;  %v26033_v15 = vld [vmem:[#allocation16_spill] sm:$0xff] }
 0xc3a   : > { %v10055_v19 = vadd.f32 %v23348_v41, %v9880_v3  ;;  %v9681_v56 = vadd.f32 %v23249_v40, %v9483_v43  ;;  %v9307_v16 = vadd.f32 %v23122_v62, %v9076_v23 }
 0xc3b   : > { %v8871_v2 = vpop.f32.mrb[190].mxu1  ;;  %17218 = vmatprep.mubr.f32.mxu0 %v10267_v17  ;;  %v10276_v26 = vsub.f32 %v23462_v12, %v10275_v52  ;;  %v23481_v48 = vsub.f32 %v10149_v37, %v23472_v47  ;;  %v26034_v37 = vld [vmem:[#allocation114_spill] sm:$0xff] }
 0xc3c   : > { %v9886_v35 = vadd.f32 %v23303_v21, %v9681_v56  ;;  %v9490_v45 = vadd.f32 %v26027_v60, %v9307_v16  ;;  %v9086_v57 = vadd.f32 %v26028_v53, %v8871_v2  ;;  %v8873_v41 = vpop.f32.mrb[191].mxu1  ;;  %v10152_v40 = vsel %vm2619_vm4, %v10055_v19, 0  ;;  %v26035_v2 = vld [vmem:[#allocation108_spill] sm:$0xff] }
 0xc3d   : > { %v10277_v33 = vand.u32 4294901760, %v10276_v26  ;;  %v10285_v62 = vand.u32 4294901760, %v23481_v48  ;;  %v23488_v39 = vand.u32 4294901760, %v10152_v40 }
 0xc3e   : > { %v10061_v10 = vadd.f32 %v23357_v51, %v9886_v35  ;;  %v9689_v34 = vadd.f32 %v26029_v6, %v9490_v45  ;;  %v9313_v31 = vadd.f32 %v26030_v8, %v9086_v57  ;;  %v26036_v35 = vld [vmem:[#allocation6_spill] sm:$0xff] }
 0xc3f   : > { %v8878_v28 = vpop.f32.mrb[192].mxu1  ;;  %17219 = vmatmul.mubr.f32.vlgmr.msra.gmra.mrb[246].mxu0 %v10277_v33  ;;  %v10286_v21 = vsub.f32 %v23481_v48, %v10285_v62  ;;  %v23497_v36 = vsub.f32 %v10152_v40, %v23488_v39  ;;  %v26037_v33 = vld [vmem:[#allocation59_spill] sm:$0xff]  ;;  %v26038_v6 = vld [vmem:[#allocation42_spill] sm:$0xff] }
 0xc40   : > { %v9892_v4 = vadd.f32 %v23300_v30, %v9689_v34  ;;  %v9497_v9 = vadd.f32 %v26031_v58, %v9313_v31  ;;  %v9096_v18 = vadd.f32 %v26032_v14, %v8878_v28  ;;  %v8880_v51 = vpop.f32.mrb[193].mxu1  ;;  %v10155_v55 = vsel %vm2619_vm4, %v10061_v10, 0  ;;  %18335 = vmatpush3.bf16.msra.mxu0 %v23420_v54  ;;  %v26040_v58 = vld [vmem:[#allocation2_spill] sm:$0xff] }
 0xc41   : > { %v10287_v0 = vand.u32 4294901760, %v10286_v21  ;;  %v10295_v3 = vand.u32 4294901760, %v23497_v36  ;;  %v23505_v43 = vand.u32 4294901760, %v10155_v55  ;;  %18337 = vmatprep.subr.bf16.mxu0 %v23425_v27  ;;  %v26039_v21 = vld [vmem:[#allocation80_spill] sm:$0xff] }
 0xc42   : > { %v10067_v23 = vadd.f32 %v23354_v46, %v9892_v4  ;;  %v9697_v30 = vadd.f32 %v26033_v15, %v9497_v9  ;;  %v9319_v17 = vadd.f32 %v26034_v37, %v9096_v18 }
 0xc43   : > { %v8885_v19 = vpop.f32.mrb[194].mxu1  ;;  %17221 = vmatprep.mubr.f32.mxu0 %v10287_v0  ;;  %v10296_v56 = vsub.f32 %v23497_v36, %v10295_v3  ;;  %v23515_v54 = vsub.f32 %v10155_v55, %v23505_v43 }
 0xc44   : > { %v9898_v16 = vadd.f32 %v23309_v22, %v9697_v30  ;;  %v9504_v26 = vadd.f32 %v26035_v2, %v9319_v17  ;;  %v9106_v60 = vadd.f32 %v26036_v35, %v8885_v19  ;;  %v8887_v46 = vpop.f32.mrb[195].mxu1  ;;  %v10158_v45 = vsel %vm2619_vm4, %v10067_v23, 0  ;;  %v26041_v23 = vld [vmem:[#allocation39_spill] sm:$0xff]  ;;  %v26042_v30 = vld [vmem:[#allocation50_spill] sm:$0xff] }
 0xc45   : > { %v10297_v53 = vand.u32 4294901760, %v10296_v56  ;;  %v10305_v57 = vand.u32 4294901760, %v23515_v54  ;;  %v23522_v41 = vand.u32 4294901760, %v10158_v45 }
 0xc46   : > { %v10073_v40 = vadd.f32 %v23363_v63, %v9898_v16  ;;  %v9705_v10 = vadd.f32 %v26037_v33, %v9504_v26  ;;  %v9325_v34 = vadd.f32 %v26038_v6, %v9106_v60  ;;  %v26043_v16 = vld [vmem:[#allocation93_spill] sm:$0xff]  ;;  %v26046_v6 = vld [vmem:[#allocation67_spill] sm:$0xff] }
 0xc47   : > { %v8892_v8 = vpop.f32.mrb[196].mxu1  ;;  %17222 = vmatmul.mubr.f32.gmra.mrb[248].mxu0 %v10297_v53  ;;  %v10306_v22 = vsub.f32 %v23515_v54, %v10305_v57  ;;  %v23531_v31 = vsub.f32 %v10158_v45, %v23522_v41  ;;  %v26044_v26 = vld [vmem:[#allocation89_spill] sm:$0xff] }
 0xc48   : > { %v9904_v28 = vadd.f32 %v23306_v29, %v9705_v10  ;;  %v9511_v4 = vadd.f32 %v26039_v21, %v9325_v34  ;;  %v9116_v9 = vadd.f32 %v26040_v58, %v8892_v8  ;;  %v8894_v63 = vpop.f32.mrb[197].mxu1  ;;  %v10161_v14 = vsel %vm2619_vm4, %v10073_v40, 0  ;;  %v26045_v33 = vld [vmem:[#allocation13_spill] sm:$0xff]  ;;  %v26047_v21 = vld [vmem:[#allocation72_spill] sm:$0xff] }
 0xc49   : > { %v10307_v18 = vand.u32 4294901760, %v10306_v22  ;;  %v10315_v51 = vand.u32 4294901760, %v23531_v31  ;;  %v23538_v55 = vand.u32 4294901760, %v10161_v14  ;;  %v26048_v58 = vld [vmem:[#allocation5_spill] sm:$0xff] }
 0xc4a   : > { %v10079_v0 = vadd.f32 %v23360_v20, %v9904_v28  ;;  %v9713_v15 = vadd.f32 %v26041_v23, %v9511_v4  ;;  %v9331_v37 = vadd.f32 %v26042_v30, %v9116_v9 }
 0xc4b   : > { %v8899_v17 = vpop.f32.mrb[198].mxu1  ;;  %17224 = vmatprep.mubr.f32.mxu0 %v10307_v18  ;;  %v10316_v29 = vsub.f32 %v23531_v31, %v10315_v51  ;;  %v23547_v19 = vsub.f32 %v10161_v14, %v23538_v55 }
 0xc4c   : > { %v9910_v56 = vadd.f32 %v23315_v25, %v9713_v15  ;;  %v9518_v2 = vadd.f32 %v26043_v16, %v9331_v37  ;;  %v9126_v35 = vadd.f32 %v26044_v26, %v8899_v17  ;;  %v8901_v20 = vpop.f32.mrb[199].mxu1  ;;  %v10164_v60 = vsel %vm2619_vm4, %v10079_v0, 0  ;;  %v26049_v15 = vld [vmem:[#allocation61_spill] sm:$0xff]  ;;  %v26050_v37 = vld [vmem:[#allocation74_spill] sm:$0xff] }
 0xc4d   : > { %v10317_v46 = vand.u32 4294901760, %v10316_v29  ;;  %v10325_v45 = vand.u32 4294901760, %v23547_v19  ;;  %v23554_v53 = vand.u32 4294901760, %v10164_v60 }
 0xc4e   : > { %v10085_v40 = vadd.f32 %v23369_v38, %v9910_v56  ;;  %v9721_v10 = vadd.f32 %v26045_v33, %v9518_v2  ;;  %v9337_v34 = vadd.f32 %v26046_v6, %v9126_v35  ;;  %v26051_v2 = vld [vmem:[#allocation69_spill] sm:$0xff]  ;;  %v26052_v35 = vld [vmem:[#allocation95_spill] sm:$0xff]  ;;  %v26053_v6 = vld [vmem:[#allocation38_spill] sm:$0xff] }
 0xc4f   : > { %v8906_v8 = vpop.f32.mrb[200].mxu1  ;;  %17225 = vmatmul.mubr.f32.gmra.mrb[250].mxu0 %v10317_v46  ;;  %v10326_v25 = vsub.f32 %v23547_v19, %v10325_v45  ;;  %v23563_v22 = vsub.f32 %v10164_v60, %v23554_v53 }
 0xc50   : > { %v9916_v28 = vadd.f32 %v23312_v61, %v9721_v10  ;;  %v9525_v4 = vadd.f32 %v26047_v21, %v9337_v34  ;;  %v9136_v9 = vadd.f32 %v26048_v58, %v8906_v8  ;;  %v8908_v38 = vpop.f32.mrb[201].mxu1  ;;  %v10167_v63 = vsel %vm2619_vm4, %v10085_v40, 0  ;;  %v26054_v8 = vld [vmem:[#allocation29_spill] sm:$0xff]  ;;  %v26055_v58 = vld [vmem:[#allocation91_spill] sm:$0xff] }
 0xc51   : > { %v10327_v14 = vand.u32 4294901760, %v10326_v25  ;;  %v10335_v18 = vand.u32 4294901760, %v23563_v22  ;;  %v23570_v0 = vand.u32 4294901760, %v10167_v63  ;;  %v26056_v38 = vld [vmem:[#allocation94_spill] sm:$0xff] }
 0xc52   : > { %v10091_v23 = vadd.f32 %v23366_v49, %v9916_v28  ;;  %v9729_v30 = vadd.f32 %v26049_v15, %v9525_v4  ;;  %v9343_v17 = vadd.f32 %v26050_v37, %v9136_v9 }
 0xc53   : > { %v8913_v29 = vpop.f32.mrb[202].mxu1  ;;  %17227 = vmatprep.mubr.f32.mxu0 %v10327_v14  ;;  %v10336_v61 = vsub.f32 %v23563_v22, %v10335_v18  ;;  %v23579_v56 = vsub.f32 %v10167_v63, %v23570_v0 }
 0xc54   : > { %v9922_v16 = vadd.f32 %v23321_v59, %v9729_v30  ;;  %v9532_v26 = vadd.f32 %v26051_v2, %v9343_v17  ;;  %v9146_v20 = vadd.f32 %v26052_v35, %v8913_v29  ;;  %v8915_v49 = vpop.f32.mrb[203].mxu1  ;;  %v10170_v60 = vsel %vm2619_vm4, %v10091_v23, 0  ;;  %v26057_v17 = vld [vmem:[#allocation82_spill] sm:$0xff] }
 0xc55   : > { %v10337_v46 = vand.u32 4294901760, %v10336_v61  ;;  %v10345_v40 = vand.u32 4294901760, %v23579_v56  ;;  %v23586_v33 = vand.u32 4294901760, %v10170_v60  ;;  %v26058_v61 = vld [vmem:[#allocation30_spill] sm:$0xff]  ;;  %v26059_v49 = vld [vmem:[#allocation20_spill] sm:$0xff] }
 0xc56   : > { %v10097_v10 = vadd.f32 %v23375_v13, %v9922_v16  ;;  %v9737_v34 = vadd.f32 %v26053_v6, %v9532_v26  ;;  %v9349_v25 = vadd.f32 %v26054_v8, %v9146_v20 }
 0xc57   : > { %v8920_v28 = vpop.f32.mrb[204].mxu1  ;;  %17228 = vmatmul.mubr.f32.gmra.mrb[252].mxu0 %v10337_v46  ;;  %v10346_v59 = vsub.f32 %v23579_v56, %v10345_v40  ;;  %v23595_v21 = vsub.f32 %v10170_v60, %v23586_v33 }
 0xc58   : > { %v9928_v4 = vadd.f32 %v23318_v11, %v9737_v34  ;;  %v9539_v9 = vadd.f32 %v26055_v58, %v9349_v25  ;;  %v9156_v63 = vadd.f32 %v26056_v38, %v8920_v28  ;;  %v8922_v13 = vpop.f32.mrb[205].mxu1  ;;  %v10173_v14 = vsel %vm2619_vm4, %v10097_v10, 0  ;;  %v26061_v28 = vld [vmem:[#allocation60_spill] sm:$0xff] }
 0xc59   : > { %v10347_v23 = vand.u32 4294901760, %v10346_v59  ;;  %v10355_v15 = vand.u32 4294901760, %v23595_v21  ;;  %v23602_v30 = vand.u32 4294901760, %v10173_v14  ;;  %v26063_v13 = vld [vmem:[#allocation17_spill] sm:$0xff] }
 0xc5a   : > { %v10103_v37 = vadd.f32 %v23372_v42, %v9928_v4  ;;  %v9745_v29 = vadd.f32 %v26057_v17, %v9539_v9  ;;  %v9355_v16 = vadd.f32 %v26058_v61, %v9156_v63  ;;  %v26060_v42 = vld [vmem:[#allocation99_spill] sm:$0xff]  ;;  %v26062_v4 = vld [vmem:[#allocation44_spill] sm:$0xff] }
 0xc5b   : > { %v8927_v2 = vpop.f32.mrb[206].mxu1  ;;  %17230 = vmatprep.mubr.f32.mxu0 %v10347_v23  ;;  %v10356_v11 = vsub.f32 %v23595_v21, %v10355_v15  ;;  %v23611_v26 = vsub.f32 %v10173_v14, %v23602_v30  ;;  %v26064_v23 = vld [vmem:[#allocation98_spill] sm:$0xff] }
 0xc5c   : > { %v10176_v35 = vsel %vm2619_vm4, %v10103_v37, 0  ;;  %v9934_v20 = vadd.f32 %v23327_v24, %v9745_v29  ;;  %v9546_v60 = vadd.f32 %v26059_v49, %v9355_v16  ;;  %v9166_v46 = vadd.f32 %v26060_v42, %v8927_v2  ;;  %v8929_v10 = vpop.f32.mrb[207].mxu1  ;;  %v26065_v2 = vld [vmem:[#allocation7_spill] sm:$0xff] }
 0xc5d   : > { %v23617_v6 = vand.u32 4294901760, %v10176_v35  ;;  %v10357_v34 = vand.u32 4294901760, %v10356_v11  ;;  %v10365_v8 = vand.u32 4294901760, %v23611_v26  ;;  %v26067_v49 = vld [vmem:[#allocation55_spill] sm:$0xff] }
 0xc5e   : > { %v10109_v25 = vadd.f32 %v23381_v50, %v9934_v20  ;;  %v9753_v59 = vadd.f32 %v26061_v28, %v9546_v60  ;;  %v9361_v58 = vadd.f32 %v26062_v4, %v9166_v46  ;;  %v26069_v28 = vld [vmem:[#allocation97_spill] sm:$0xff] }
 0xc5f   : > { %v23624_v9 = vsub.f32 %v10176_v35, %v23617_v6  ;;  %v8934_v24 = vpop.f32.mrb[208].mxu1  ;;  %17231 = vmatmul.mubr.f32.gmra.mrb[254].mxu0 %v10357_v34  ;;  %v10366_v38 = vsub.f32 %v23611_v26, %v10365_v8  ;;  %v26066_v35 = vld [vmem:[#allocation102_spill] sm:$0xff]  ;;  %v26068_v34 = vld [vmem:[#allocation92_spill] sm:$0xff]  ;;  %v26070_v4 = vld [vmem:[#allocation113_spill] sm:$0xff] }
 0xc60   : > { %v9940_v63 = vadd.f32 %v23324_v44, %v9753_v59  ;;  %v9553_v14 = vadd.f32 %v26063_v13, %v9361_v58  ;;  %v9176_v37 = vadd.f32 %v26064_v23, %v8934_v24  ;;  %v8936_v50 = vpop.f32.mrb[209].mxu1  ;;  %v10179_v17 = vsel %vm2619_vm4, %v10109_v25, 0 }
 0xc61   : > { %v10367_v29 = vand.u32 4294901760, %v10366_v38  ;;  %v10375_v61 = vand.u32 4294901760, %v23624_v9  ;;  %v23634_v16 = vand.u32 4294901760, %v10179_v17 }
 0xc62   : > { %v10115_v11 = vadd.f32 %v26065_v2, %v9940_v63  ;;  %v9761_v20 = vadd.f32 %v26066_v35, %v9553_v14  ;;  %v9367_v60 = vadd.f32 %v26067_v49, %v9176_v37  ;;  %v26071_v14 = vld [vmem:[#allocation8_spill] sm:$0xff]  ;;  %v26072_v37 = vld [vmem:[#allocation79_spill] sm:$0xff] }
 0xc63   : > { %v8941_v42 = vpop.f32.mrb[210].mxu1  ;;  %17233 = vmatprep.mubr.f32.mxu0 %v10367_v29  ;;  %v10376_v44 = vsub.f32 %v23624_v9, %v10375_v61  ;;  %v23643_v46 = vsub.f32 %v10179_v17, %v23634_v16  ;;  %v26073_v17 = vld [vmem:[#allocation105_spill] sm:$0xff] }
 0xc64   : > { %v10182_v10 = vsel %vm2619_vm4, %v10115_v11, 0  ;;  %v9946_v25 = vadd.f32 %v26068_v34, %v9761_v20  ;;  %v9560_v59 = vadd.f32 %v26069_v28, %v9367_v60  ;;  %v9186_v58 = vadd.f32 %v26070_v4, %v8941_v42  ;;  %v8943_v24 = vpop.f32.mrb[211].mxu1  ;;  %v26074_v20 = vld [vmem:[#allocation106_spill] sm:$0xff] }
 0xc65   : > { %v23649_v38 = vand.u32 4294901760, %v10182_v10  ;;  %v10377_v63 = vand.u32 4294901760, %v10376_v44  ;;  %v10385_v13 = vand.u32 4294901760, %v23643_v46  ;;  %v26075_v60 = vld [vmem:[#allocation34_spill] sm:$0xff]  ;;  %v26076_v44 = vld [vmem:[#allocation96_spill] sm:$0xff] }
 0xc66   : > { %v10121_v23 = vadd.f32 %v26071_v14, %v9946_v25  ;;  %v9769_v50 = vadd.f32 %v26072_v37, %v9560_v59  ;;  %v9373_v29 = vadd.f32 %v26073_v17, %v9186_v58  ;;  %v26077_v58 = vld [vmem:[#allocation9_spill] sm:$0xff]  ;;  %v26079_v37 = vld [vmem:[#allocation71_spill] sm:$0xff] }
 0xc67   : > { %v23656_v2 = vsub.f32 %v10182_v10, %v23649_v38  ;;  %v8948_v11 = vpop.f32.mrb[212].mxu1  ;;  %17234 = vmatmul.mubr.f32.gmra.mrb[0].mxu0 %v10377_v63  ;;  %v10386_v35 = vsub.f32 %v23643_v46, %v10385_v13  ;;  %v26078_v63 = vld [vmem:[#allocation111_spill] sm:$0xff] }
 0xc68   : > { %v9952_v49 = vadd.f32 %v26074_v20, %v9769_v50  ;;  %v9567_v42 = vadd.f32 %v26075_v60, %v9373_v29  ;;  %v9196_v34 = vadd.f32 %v26076_v44, %v8948_v11  ;;  %v8950_v25 = vpop.f32.mrb[213].mxu1  ;;  %v10185_v28 = vsel %vm2619_vm4, %v10121_v23, 0  ;;  %v26080_v11 = vld [vmem:[#allocation112_spill] sm:$0xff]  ;;  %v26081_v20 = vld [vmem:[#allocation33_spill] sm:$0xff] }
 0xc69   : > { %v10387_v59 = vand.u32 4294901760, %v10386_v35  ;;  %v10395_v4 = vand.u32 4294901760, %v23656_v2  ;;  %v23666_v10 = vand.u32 4294901760, %v10185_v28 }
 0xc6a   : > { %v10127_v24 = vadd.f32 %v26077_v58, %v9952_v49  ;;  %v9777_v14 = vadd.f32 %v26078_v63, %v9567_v42  ;;  %v9379_v17 = vadd.f32 %v26079_v37, %v9196_v34  ;;  %v26082_v34 = vld [vmem:[#allocation10_spill] sm:$0xff] }
 0xc6b   : > { %17236 = vmatprep.mubr.f32.mxu0 %v10387_v59  ;;  %v10396_v50 = vsub.f32 %v23656_v2, %v10395_v4  ;;  %v23675_v29 = vsub.f32 %v10185_v28, %v23666_v10  ;;  %v26083_v59 = vld [vmem:[#allocation103_spill] sm:$0xff] }
 0xc6c   : > { %v10188_v23 = vsel %vm2619_vm4, %v10127_v24, 0  ;;  %v9958_v35 = vadd.f32 %v26080_v11, %v9777_v14  ;;  %v9574_v60 = vadd.f32 %v26081_v20, %v9379_v17  ;;  %v26084_v24 = vld [vmem:[#allocation110_spill] sm:$0xff] }
 0xc6d   : > { %v23680_v44 = vand.u32 4294901760, %v10188_v23  ;;  %v10397_v49 = vand.u32 4294901760, %v10396_v50  ;;  %v10405_v42 = vand.u32 4294901760, %v23675_v29 }
 0xc6e   : > { %v10133_v25 = vadd.f32 %v26082_v34, %v9958_v35  ;;  %v9785_v58 = vadd.f32 %v26083_v59, %v9574_v60  ;;  %v26085_v35 = vld [vmem:[#allocation11_spill] sm:$0xff] }
 0xc6f   : > { %v23686_v63 = vsub.f32 %v10188_v23, %v23680_v44  ;;  %17237 = vmatmul.mubr.f32.gmra.mrb[2].mxu0 %v10397_v49  ;;  %v10406_v28 = vsub.f32 %v23675_v29, %v10405_v42 }
 0xc70   : > { %v9964_v14 = vadd.f32 %v26084_v24, %v9785_v58  ;;  %v10191_v37 = vsel %vm2619_vm4, %v10133_v25, 0 }
 0xc71   : > { %v10407_v17 = vand.u32 4294901760, %v10406_v28  ;;  %v10415_v50 = vand.u32 4294901760, %v23686_v63  ;;  %v23694_v11 = vand.u32 4294901760, %v10191_v37 }
 0xc72   : > { %v10139_v20 = vadd.f32 %v26085_v35, %v9964_v14  ;;  %v26086_v35 = vld [vmem:[#allocation46_spill] sm:$0xff] }
 0xc73   : > { %17239 = vmatprep.mubr.f32.mxu0 %v10407_v17  ;;  %v10416_v23 = vsub.f32 %v23686_v63, %v10415_v50  ;;  %v23701_v60 = vsub.f32 %v10191_v37, %v23694_v11 }
 0xc74   : > { %v10194_v49 = vsel %vm2619_vm4, %v10139_v20, 0 }
 0xc75   : > { %v23704_v34 = vand.u32 4294901760, %v10194_v49  ;;  %v10417_v25 = vand.u32 4294901760, %v10416_v23  ;;  %v10425_v59 = vand.u32 4294901760, %v23701_v60  ;;  %v26089_v23 = vld [vmem:[#allocation90_spill] sm:$0xff] }
 0xc77   : > { %v23708_v58 = vsub.f32 %v10194_v49, %v23704_v34  ;;  %17240 = vmatmul.mubr.f32.gmra.mrb[4].mxu0 %v10417_v25  ;;  %v10426_v28 = vsub.f32 %v23701_v60, %v10425_v59  ;;  %v26090_v49 = vand.u32 4294901760, %v26089_v23 }
 0xc79   : > { %v10427_v24 = vand.u32 4294901760, %v10426_v28  ;;  %v10435_v14 = vand.u32 4294901760, %v23708_v58 }
 0xc7b   : > { %17242 = vmatprep.mubr.f32.mxu0 %v10427_v24  ;;  %v10436_v37 = vsub.f32 %v23708_v58, %v10435_v14  ;;  %v26110_v24 = vld [vmem:[#allocation12_spill] sm:$0xff] }
 0xc7d   : > { %v10437_v17 = vand.u32 4294901760, %v10436_v37 }
 0xc7f   : > { %17243 = vmatmul.mubr.f32.gmra.mrb[6].mxu0 %v10437_v17 }
 0xc80   : > { %17249 = vmatprep.mubr.f32.mxu0 %v23443_v5 }
 0xc83   : > { %17250 = vmatmul.mubr.f32.vlgmr.msra.gmra.mrb[246].mxu0 %v23455_v7 }
 0xc84   : > { %17252 = vmatprep.mubr.f32.mxu0 %v23472_v47  ;;  %18339 = vmatpush3.bf16.msra.mxu0 %v23425_v27  ;;  %v26087_v27 = vld [vmem:[#allocation101_spill] sm:$0xff] }
 0xc85   : > { %18341 = vmatprep.subr.bf16.mxu0 %v26086_v35  ;;  %v26088_v20 = vand.u32 4294901760, %v26087_v27  ;;  %v26112_v27 = vld [vmem:[#allocation48_spill] sm:$0xff] }
 0xc87   : > { %17253 = vmatmul.mubr.f32.gmra.mrb[248].mxu0 %v23488_v39  ;;  %v18344_v25 = vpack.c.bf16 %v26090_v49, %v26088_v20  ;;  %v26113_v20 = vand.u32 4294901760, %v26112_v27  ;;  %v26114_v49 = vld [vmem:[#allocation45_spill] sm:$0xff] }
 0xc88   : > { %17255 = vmatprep.mubr.f32.mxu0 %v23505_v43 }
 0xc89   : > { %v11677_v23 = vsub.f32 %v26112_v27, %v26113_v20 }
 0xc8b   : > { %17256 = vmatmul.mubr.f32.gmra.mrb[250].mxu0 %v23522_v41 }
 0xc8c   : > { %17258 = vmatprep.mubr.f32.mxu0 %v23538_v55 }
 0xc8f   : > { %17259 = vmatmul.mubr.f32.gmra.mrb[252].mxu0 %v23554_v53 }
 0xc90   : > { %17261 = vmatprep.mubr.f32.mxu0 %v23570_v0 }
 0xc93   : > { %17262 = vmatmul.mubr.f32.gmra.mrb[254].mxu0 %v23586_v33 }
 0xc94   : > { %17264 = vmatprep.mubr.f32.mxu0 %v23602_v30 }
 0xc97   : > { %17265 = vmatmul.mubr.f32.gmra.mrb[0].mxu0 %v23617_v6 }
 0xc98   : > { %17267 = vmatprep.mubr.f32.mxu0 %v23634_v16 }
 0xc9b   : > { %17268 = vmatmul.mubr.f32.gmra.mrb[2].mxu0 %v23649_v38 }
 0xc9c   : > { %17270 = vmatprep.mubr.f32.mxu0 %v23666_v10 }
 0xc9f   : > { %17271 = vmatmul.mubr.f32.gmra.mrb[4].mxu0 %v23680_v44 }
 0xca0   : > { %17273 = vmatprep.mubr.f32.mxu0 %v23694_v11 }
 0xca3   : > { %17274 = vmatmul.mubr.f32.gmra.mrb[6].mxu0 %v23704_v34 }
 0xca4   : > { %17280 = vmatprep.mubr.f32.mxu0 %v23449_v1  ;;  %v26091_v1 = vld [vmem:[#allocation86_spill] sm:$0xff] }
 0xca7   : > { %17281 = vmatmul.mubr.f32.vlgmr.msra.gmra.mrb[246].mxu0 %v23462_v12  ;;  %v26093_v12 = vld [vmem:[#allocation88_spill] sm:$0xff] }
 0xca8   : > { %17283 = vmatprep.mubr.f32.mxu0 %v23481_v48  ;;  %18343 = vmatpush3.bf16.msra.mxu0 %v26086_v35 }
 0xca9   : > { %18345 = vmatprep.subr.bf16.mxu0 %v18344_v25 }
 0xcab   : > { %17284 = vmatmul.mubr.f32.gmra.mrb[248].mxu0 %v23497_v36  ;;  %v26095_v36 = vld [vmem:[#allocation40_spill] sm:$0xff] }
 0xcac   : > { %17286 = vmatprep.mubr.f32.mxu0 %v23515_v54 }
 0xcaf   : > { %17287 = vmatmul.mubr.f32.gmra.mrb[250].mxu0 %v23531_v31 }
 0xcb0   : > { %17289 = vmatprep.mubr.f32.mxu0 %v23547_v19  ;;  %v26099_v19 = vld [vmem:[#allocation15_spill] sm:$0xff] }
 0xcb3   : > { %17290 = vmatmul.mubr.f32.gmra.mrb[252].mxu0 %v23563_v22  ;;  %v26101_v22 = vld [vmem:[#allocation24_spill] sm:$0xff] }
 0xcb4   : > { %17292 = vmatprep.mubr.f32.mxu0 %v23579_v56 }
 0xcb7   : > { %17293 = vmatmul.mubr.f32.gmra.mrb[254].mxu0 %v23595_v21 }
 0xcb8   : > { %17295 = vmatprep.mubr.f32.mxu0 %v23611_v26  ;;  %v26104_v26 = vld [vmem:[#allocation53_spill] sm:$0xff] }
 0xcbb   : > { %17296 = vmatmul.mubr.f32.gmra.mrb[0].mxu0 %v23624_v9 }
 0xcbc   : > { %17298 = vmatprep.mubr.f32.mxu0 %v23643_v46 }
 0xcbf   : > { %17299 = vmatmul.mubr.f32.gmra.mrb[2].mxu0 %v23656_v2 }
 0xcc0   : > { %17301 = vmatprep.mubr.f32.mxu0 %v23675_v29 }
 0xcc3   : > { %17302 = vmatmul.mubr.f32.gmra.mrb[4].mxu0 %v23686_v63  ;;  %v26108_v63 = vld [vmem:[#allocation68_spill] sm:$0xff] }
 0xcc4   : > { %17304 = vmatprep.mubr.f32.mxu0 %v23701_v60 }
 0xcc7   : > { %17305 = vmatmul.mubr.f32.gmra.mrb[6].mxu0 %v23708_v58 }
 0xcc8   : > { %17311 = vmatprep.mubr.f32.mxu0 %v10265_v32  ;;  %v26092_v32 = vand.u32 4294901760, %v26091_v1 }
 0xccb   : > { %17312 = vmatmul.mubr.f32.vlgmr.msra.gmra.mrb[246].mxu0 %v10275_v52  ;;  %v26094_v52 = vand.u32 4294901760, %v26093_v12 }
 0xccc   : > { %17314 = vmatprep.mubr.f32.mxu0 %v10285_v62  ;;  %18347 = vmatpush3.bf16.msra.mxu0 %v18344_v25  ;;  %v11395_v62 = vpop.permute.xlu1 %11394  ;;  %v26115_v25 = vand.u32 4294901760, %v26114_v49 }
 0xccd   : > { %18349 = vmatprep.subr.bf16.mxu0 %v26086_v35  ;;  %v23802_v48 = vpack.c.bf16 %v26094_v52, %v26092_v32 }
 0xcce   : > { %v11670_v1 = vsub.f32 %v26114_v49, %v26115_v25 }
 0xccf   : > { %17315 = vmatmul.mubr.f32.gmra.mrb[248].mxu0 %v10295_v3  ;;  %v26096_v3 = vand.u32 4294901760, %v26095_v36 }
 0xcd0   : > { %17317 = vmatprep.mubr.f32.mxu0 %v10305_v57  ;;  %v26097_v57 = vld [vmem:[#allocation37_spill] sm:$0xff] }
 0xcd1   : > { %v11656_v54 = vsub.f32 %v26095_v36, %v26096_v3  ;;  %v26098_v31 = vand.u32 4294901760, %v26097_v57 }
 0xcd3   : > { %17318 = vmatmul.mubr.f32.gmra.mrb[250].mxu0 %v10315_v51  ;;  %v11663_v51 = vsub.f32 %v26097_v57, %v26098_v31  ;;  %v11657_v21 = vand.u32 4294901760, %v11656_v54 }
 0xcd4   : > { %17320 = vmatprep.mubr.f32.mxu0 %v10325_v45  ;;  %v26100_v45 = vand.u32 4294901760, %v26099_v19 }
 0xcd7   : > { %17321 = vmatmul.mubr.f32.gmra.mrb[252].mxu0 %v10335_v18  ;;  %v26102_v18 = vand.u32 4294901760, %v26101_v22  ;;  %v26117_v22 = vld [vmem:[#allocation83_spill] sm:$0xff] }
 0xcd8   : > { %17323 = vmatprep.mubr.f32.mxu0 %v10345_v40  ;;  %v11400_v40 = vsel %vm1192_vm3, %v11395_v62, 0 }
 0xcd9   : > { %v23834_v56 = vpack.c.bf16 %v26102_v18, %v26100_v45  ;;  %v7088_v18 = vsel %vm1137_vm2, %v26117_v22, 0 }
 0xcdb   : > { %17324 = vmatmul.mubr.f32.gmra.mrb[254].mxu0 %v10355_v15  ;;  %v11664_v15 = vand.u32 4294901760, %v11663_v51  ;;  %v26116_v51 = vld [vmem:[#allocation81_spill] sm:$0xff] }
 0xcdc   : > { %17326 = vmatprep.mubr.f32.mxu0 %v10365_v8  ;;  %v26105_v8 = vld [vmem:[#allocation57_spill] sm:$0xff]  ;;  %v7085_v19 = vsel %vm1137_vm2, %v26116_v51, 0 }
 0xcdd   : > { %v7064_v9 = vsel %vm1137_vm2, %v26105_v8, 0 }
 0xcdf   : > { %17327 = vmatmul.mubr.f32.gmra.mrb[0].mxu0 %v10375_v61 }
 0xce0   : > { %17329 = vmatprep.mubr.f32.mxu0 %v10385_v13  ;;  %v26107_v13 = vld [vmem:[#allocation65_spill] sm:$0xff] }
 0xce3   : > { %17330 = vmatmul.mubr.f32.gmra.mrb[2].mxu0 %v10395_v4 }
 0xce4   : > { %17332 = vmatprep.mubr.f32.mxu0 %v10405_v42 }
 0xce7   : > { %17333 = vmatmul.mubr.f32.gmra.mrb[4].mxu0 %v10415_v50  ;;  %v26109_v50 = vld [vmem:[#allocation73_spill] sm:$0xff] }
 0xce8   : > { %17335 = vmatprep.mubr.f32.mxu0 %v10425_v59 }
 0xceb   : > { %17336 = vmatmul.mubr.f32.gmra.mrb[6].mxu0 %v10435_v14  ;;  %v7079_v14 = vsel %vm1137_vm2, %v26110_v24, 0 }
 0xcec   : > { %17342 = vmatprep.mubr.f32.mxu0 %v23443_v5  ;;  %v23928_v52 = vand.u32 4294901760, %v7079_v14 }
 0xcef   : > { %17343 = vmatmul.mubr.f32.vlgmr.msra.gmra.mrb[246].mxu0 %v23455_v7 }
 0xcf0   : > { %18351 = vmatpush3.bf16.msra.mxu0 %v26086_v35  ;;  %17345 = vmatprep.mubr.f32.mxu0 %v23472_v47 }
 0xcf1   : > { %18353 = vmatprep.subr.bf16.mxu0 %v23802_v48 }
 0xcf3   : > { %17346 = vmatmul.mubr.f32.gmra.mrb[248].mxu0 %v23488_v39 }
 0xcf4   : > { %17348 = vmatprep.mubr.f32.mxu0 %v23505_v43 }
 0xcf7   : > { %17349 = vmatmul.mubr.f32.gmra.mrb[250].mxu0 %v23522_v41 }
 0xcf8   : > { %17351 = vmatprep.mubr.f32.mxu0 %v23538_v55 }
 0xcfb   : > { %17352 = vmatmul.mubr.f32.gmra.mrb[252].mxu0 %v23554_v53 }
 0xcfc   : > { %17354 = vmatprep.mubr.f32.mxu0 %v23570_v0 }
 0xcff   : > { %17355 = vmatmul.mubr.f32.gmra.mrb[254].mxu0 %v23586_v33 }
 0xd00   : > { %17357 = vmatprep.mubr.f32.mxu0 %v23602_v30 }
 0xd03   : > { %17358 = vmatmul.mubr.f32.gmra.mrb[0].mxu0 %v23617_v6 }
 0xd04   : > { %17360 = vmatprep.mubr.f32.mxu0 %v23634_v16 }
 0xd07   : > { %17361 = vmatmul.mubr.f32.gmra.mrb[2].mxu0 %v23649_v38 }
 0xd08   : > { %17363 = vmatprep.mubr.f32.mxu0 %v23666_v10 }
 0xd0b   : > { %17364 = vmatmul.mubr.f32.gmra.mrb[4].mxu0 %v23680_v44 }
 0xd0c   : > { %17366 = vmatprep.mubr.f32.mxu0 %v23694_v11 }
 0xd0f   : > { %17367 = vmatmul.mubr.f32.gmra.mrb[6].mxu0 %v23704_v34 }
 0xd10   : > { %17373 = vmatprep.mubr.f32.mxu0 %v23443_v5  ;;  %v23841_v5 = vand.u32 4294901760, %v11400_v40 }
 0xd12   : > { %v23921_v32 = vsub.f32 %v11400_v40, %v23841_v5  ;;  %v11671_v40 = vand.u32 4294901760, %v11670_v1 }
 0xd13   : > { %17374 = vmatmul.mubr.f32.vlgmr.msra.gmra.mrb[246].mxu0 %v23455_v7  ;;  %v23848_v7 = vpack.c.bf16 %v11664_v15, %v11657_v21  ;;  %v11678_v21 = vand.u32 4294901760, %v11677_v23 }
 0xd14   : > { %18355 = vmatpush3.bf16.msra.mxu0 %v23802_v48  ;;  %17376 = vmatprep.mubr.f32.mxu0 %v23472_v47  ;;  %v26103_v47 = vld [vmem:[#allocation49_spill] sm:$0xff]  ;;  %v23949_v15 = vand.u32 4294901760, %v23921_v32 }
 0xd15   : > { %18357 = vmatprep.subr.bf16.mxu0 %v23834_v56 }
 0xd17   : > { %17377 = vmatmul.mubr.f32.gmra.mrb[248].mxu0 %v23488_v39  ;;  %v7058_v39 = vsel %vm1137_vm2, %v26103_v47, 0  ;;  %v23952_v47 = vsub.f32 %v7079_v14, %v23928_v52 }
 0xd18   : > { %18359 = vmatpush3.bf16.msra.mxu0 %v23834_v56  ;;  %17379 = vmatprep.mubr.f32.mxu0 %v23505_v43  ;;  %v23857_v43 = vand.u32 4294901760, %v7058_v39 }
 0xd19   : > { %17408 = vmatprep.subr.mxu0 %v23841_v5  ;;  %v25414_v24 = vand.u32 4294901760, %v23952_v47 }
 0xd1a   : > { %v23868_v61 = vsub.f32 %v7058_v39, %v23857_v43 }
 0xd1b   : > { %17380 = vmatmul.mubr.f32.gmra.mrb[250].mxu0 %v23522_v41  ;;  %v7061_v41 = vsel %vm1137_vm2, %v26104_v26, 0  ;;  %v23957_v26 = vand.u32 4294901760, %v7085_v19 }
 0xd1c   : > { %17409 = vmatpush3.msra.mxu0 %v23841_v5  ;;  %17382 = vmatprep.mubr.f32.mxu0 %v23538_v55  ;;  %v23864_v55 = vand.u32 4294901760, %v7061_v41  ;;  %v11474_v2 = vand.u32 4294901760, %v23868_v61 }
 0xd1d   : > { %18361 = vmatprep.subr.bf16.mxu0 %v23848_v7 }
 0xd1e   : > { %v23880_v4 = vsub.f32 %v7061_v41, %v23864_v55  ;;  %v11475_v60 = vsub.f32 %v23868_v61, %v11474_v2 }
 0xd1f   : > { %17383 = vmatmul.mubr.f32.gmra.mrb[252].mxu0 %v23554_v53  ;;  %v23870_v53 = vand.u32 4294901760, %v7064_v9 }
 0xd20   : > { %17385 = vmatprep.mubr.f32.mxu0 %v23570_v0  ;;  %v26106_v0 = vld [vmem:[#allocation63_spill] sm:$0xff]  ;;  %v11484_v59 = vand.u32 4294901760, %v23880_v4  ;;  %v11476_v3 = vand.u32 4294901760, %v11475_v60 }
 0xd21   : > { %v7067_v46 = vsel %vm1137_vm2, %v26106_v0, 0  ;;  %v23885_v29 = vsub.f32 %v7064_v9, %v23870_v53  ;;  %v23963_v9 = vand.u32 4294901760, %v7088_v18  ;;  %v26118_v0 = vld [vmem:[#allocation85_spill] sm:$0xff] }
 0xd22   : > { %v11485_v12 = vsub.f32 %v23880_v4, %v11484_v59 }
 0xd23   : > { %17386 = vmatmul.mubr.f32.gmra.mrb[254].mxu0 %v23586_v33  ;;  %v7070_v33 = vsel %vm1137_vm2, %v26107_v13, 0  ;;  %v11494_v17 = vand.u32 4294901760, %v23885_v29  ;;  %v23987_v25 = vsub.f32 %v7088_v18, %v23963_v9  ;;  %v11545_v18 = vsub.f32 %v23952_v47, %v25414_v24 }
 0xd24   : > { %17388 = vmatprep.mubr.f32.mxu0 %v23602_v30  ;;  %v23882_v30 = vand.u32 4294901760, %v7067_v46  ;;  %v23887_v42 = vand.u32 4294901760, %v7070_v33  ;;  %v11486_v41 = vand.u32 4294901760, %v11485_v12 }
 0xd26   : > { %v23900_v58 = vsub.f32 %v7067_v46, %v23882_v30  ;;  %v7091_v46 = vsel %vm1137_vm2, %v26118_v0, 0 }
 0xd27   : > { %17389 = vmatmul.mubr.f32.gmra.mrb[0].mxu0 %v23617_v6  ;;  %v7073_v6 = vsel %vm1137_vm2, %v26108_v63, 0 }
 0xd28   : > { %17391 = vmatprep.mubr.f32.mxu0 %v23634_v16  ;;  %v7076_v16 = vsel %vm1137_vm2, %v26109_v50, 0  ;;  %v23902_v28 = vand.u32 4294901760, %v7073_v6  ;;  %v11504_v54 = vand.u32 4294901760, %v23900_v58  ;;  %v11684_v50 = vsub.f32 %v23921_v32, %v23949_v15 }
 0xd29   : > { %v23912_v35 = vand.u32 4294901760, %v7076_v16 }
 0xd2a   : > { %v23934_v31 = vsub.f32 %v7073_v6, %v23902_v28  ;;  %v11505_v8 = vsub.f32 %v23900_v58, %v11504_v54  ;;  %v18364_v6 = vpack.c.bf16 %v11678_v21, %v11671_v40 }
 0xd2b   : > { %17392 = vmatmul.mubr.f32.gmra.mrb[2].mxu0 %v23649_v38  ;;  %v26111_v38 = vld [vmem:[#allocation78_spill] sm:$0xff]  ;;  %v23943_v45 = vsub.f32 %v7076_v16, %v23912_v35  ;;  %v26119_v16 = vld [vmem:[#allocation87_spill] sm:$0xff] }
 0xd2c   : > { %17394 = vmatprep.mubr.f32.mxu0 %v23666_v10  ;;  %v7082_v37 = vsel %vm1137_vm2, %v26111_v38, 0  ;;  %v23910_v10 = vsub.f32 %v7070_v33, %v23887_v42  ;;  %v7094_v60 = vsel %vm1137_vm2, %v26119_v16, 0  ;;  %v23979_v38 = vsub.f32 %v7085_v19, %v23957_v26 }
 0xd2d   : > { %v23930_v62 = vand.u32 4294901760, %v7082_v37  ;;  %v11534_v63 = vand.u32 4294901760, %v23943_v45  ;;  %v11506_v20 = vand.u32 4294901760, %v11505_v8  ;;  %v23994_v51 = vand.u32 4294901760, %v7094_v60 }
 0xd2e   : > { %v11685_v19 = vand.u32 4294901760, %v11684_v50  ;;  %v25410_v21 = vand.u32 4294901760, %v23979_v38 }
 0xd2f   : > { %17395 = vmatmul.mubr.f32.gmra.mrb[4].mxu0 %v23680_v44  ;;  %v11495_v44 = vsub.f32 %v23885_v29, %v11494_v17  ;;  %v23955_v39 = vsub.f32 %v7082_v37, %v23930_v62  ;;  %v23981_v37 = vand.u32 4294901760, %v7091_v46  ;;  %v24014_v16 = vsub.f32 %v7094_v60, %v23994_v51 }
 0xd30   : > { %17397 = vmatprep.mubr.f32.mxu0 %v23694_v11  ;;  %v11514_v11 = vand.u32 4294901760, %v23910_v10 }
 0xd31   : > { %v11496_v13 = vand.u32 4294901760, %v11495_v44  ;;  %v25412_v14 = vand.u32 4294901760, %v23955_v39  ;;  %v26121_v44 = vld [vmem:[#allocation21_spill] sm:$0xff] }
 0xd32   : > { %v11515_v33 = vsub.f32 %v23910_v10, %v11514_v11  ;;  %v7100_v22 = vsel %vm1137_vm2, %v26121_v44, 0 }
 0xd33   : > { %17398 = vmatmul.mubr.f32.gmra.mrb[6].mxu0 %v23704_v34  ;;  %v11524_v34 = vand.u32 4294901760, %v23934_v31  ;;  %v11555_v40 = vsub.f32 %v23955_v39, %v25412_v14 }
 0xd34   : > { %17410 = vmatprep.mubr.f32.mxu0 %v11476_v3  ;;  %v11516_v12 = vand.u32 4294901760, %v11515_v33  ;;  %v11535_v3 = vsub.f32 %v23943_v45, %v11534_v63  ;;  %v26122_v33 = vld [vmem:[#allocation22_spill] sm:$0xff] }
 0xd35   : > { %v11525_v23 = vsub.f32 %v23934_v31, %v11524_v34  ;;  %v11556_v44 = vand.u32 4294901760, %v11555_v40  ;;  %v25415_v40 = vand.u32 4294901760, %v24014_v16 }
 0xd36   : > { %v11536_v50 = vand.u32 4294901760, %v11535_v3  ;;  %v11565_v3 = vsub.f32 %v23979_v38, %v25410_v21 }
 0xd37   : > { %17411 = vmatmul.mubr.f32.vlgmr.msra.gmra.mrb[246].mxu0 %v11486_v41  ;;  %v24006_v41 = vsub.f32 %v7091_v46, %v23981_v37  ;;  %v11526_v0 = vand.u32 4294901760, %v11525_v23  ;;  %v18368_v46 = vpack.c.bf16 %v26097_v57, %v26095_v36  ;;  %v11546_v23 = vand.u32 4294901760, %v11545_v18 }
 0xd38   : > { %18363 = vmatpush3.bf16.msra.mxu0 %v23848_v7  ;;  %17413 = vmatprep.mubr.f32.mxu0 %v11496_v13  ;;  %v26120_v7 = vld [vmem:[#allocation23_spill] sm:$0xff]  ;;  %v25411_v13 = vand.u32 4294901760, %v23987_v25 }
 0xd39   : > { %18365 = vmatprep.subr.bf16.mxu0 %v18364_v6  ;;  %v7097_v1 = vsel %vm1137_vm2, %v26120_v7, 0  ;;  %v26123_v7 = vld [vmem:[#allocation32_spill] sm:$0xff]  ;;  %v25413_v57 = vand.u32 4294901760, %v24006_v41 }
 0xd3a   : > { %v24008_v8 = vand.u32 4294901760, %v7097_v1  ;;  %v11575_v36 = vsub.f32 %v23987_v25, %v25411_v13 }
 0xd3b   : > { %17414 = vmatmul.mubr.f32.gmra.mrb[248].mxu0 %v11506_v20  ;;  %v24016_v20 = vand.u32 4294901760, %v7100_v22  ;;  %v11585_v13 = vsub.f32 %v24006_v41, %v25413_v57 }
 0xd3c   : > { %18367 = vmatpush3.bf16.msra.mxu0 %v18364_v6  ;;  %17416 = vmatprep.mubr.f32.mxu0 %v11516_v12  ;;  %v7103_v6 = vsel %vm1137_vm2, %v26122_v33, 0  ;;  %v7106_v12 = vsel %vm1137_vm2, %v26123_v7, 0  ;;  %v24026_v60 = vsub.f32 %v7097_v1, %v24008_v8  ;;  %v11566_v1 = vand.u32 4294901760, %v11565_v3 }
 0xd3d   : > { %17445 = vmatprep.subr.mxu0 %v11685_v19  ;;  %v24028_v33 = vand.u32 4294901760, %v7103_v6  ;;  %v11576_v14 = vand.u32 4294901760, %v11575_v36  ;;  %v11586_v3 = vand.u32 4294901760, %v11585_v13 }
 0xd3f   : > { %17417 = vmatmul.mubr.f32.gmra.mrb[250].mxu0 %v11526_v0  ;;  %v24038_v0 = vsub.f32 %v7100_v22, %v24016_v20  ;;  %v24043_v7 = vsub.f32 %v7103_v6, %v24028_v33  ;;  %v11595_v22 = vsub.f32 %v24014_v16, %v25415_v40 }
 0xd40   : > { %17446 = vmatpush3.msra.mxu0 %v11685_v19  ;;  %17419 = vmatprep.mubr.f32.mxu0 %v11536_v50  ;;  %v26124_v19 = vld [vmem:[#allocation31_spill] sm:$0xff]  ;;  %v24040_v50 = vand.u32 4294901760, %v7106_v12 }
 0xd41   : > { %18369 = vmatprep.subr.bf16.mxu0 %v18368_v46  ;;  %v7109_v18 = vsel %vm1137_vm2, %v26124_v19, 0  ;;  %v25416_v19 = vand.u32 4294901760, %v24026_v60  ;;  %v11624_v36 = vand.u32 4294901760, %v24043_v7  ;;  %v11596_v24 = vand.u32 4294901760, %v11595_v22 }
 0xd42   : > { %v24045_v21 = vand.u32 4294901760, %v7109_v18 }
 0xd43   : > { %17420 = vmatmul.mubr.f32.gmra.mrb[252].mxu0 %v11546_v23  ;;  %v11614_v23 = vand.u32 4294901760, %v24038_v0  ;;  %v11605_v57 = vsub.f32 %v24026_v60, %v25416_v19  ;;  %v11625_v13 = vsub.f32 %v24043_v7, %v11624_v36 }
 0xd44   : > { %17422 = vmatprep.mubr.f32.mxu0 %v11556_v44  ;;  %v24056_v44 = vsub.f32 %v7106_v12, %v24040_v50  ;;  %v24059_v6 = vsub.f32 %v7109_v18, %v24045_v21 }
 0xd45   : > { %v11615_v40 = vsub.f32 %v24038_v0, %v11614_v23  ;;  %v11626_v19 = vand.u32 4294901760, %v11625_v13 }
 0xd46   : > { %v11634_v12 = vand.u32 4294901760, %v24056_v44  ;;  %v11644_v18 = vand.u32 4294901760, %v24059_v6 }
 0xd47   : > { %17423 = vmatmul.mubr.f32.gmra.mrb[254].mxu0 %v11566_v1  ;;  %v11616_v1 = vand.u32 4294901760, %v11615_v40  ;;  %v18372_v40 = vpack.c.bf16 %v26112_v27, %v26114_v49  ;;  %v26125_v27 = vld [vmem:[#allocation56_spill] sm:$0xff]  ;;  %v299_v49 = vld [vmem:[%s25009_s2] sm:$0xff] }
 0xd48   : > { %17425 = vmatprep.mubr.f32.mxu0 %v11576_v14  ;;  %v11606_v14 = vand.u32 4294901760, %v11605_v57  ;;  %v11635_v22 = vsub.f32 %v24056_v44, %v11634_v12 }
 0xd4b   : > { %17426 = vmatmul.mubr.f32.gmra.mrb[0].mxu0 %v11586_v3  ;;  %v11645_v3 = vsub.f32 %v24059_v6, %v11644_v18 }
 0xd4c   : > { %17428 = vmatprep.mubr.f32.mxu0 %v11596_v24  ;;  %v11636_v24 = vand.u32 4294901760, %v11635_v22  ;;  %v26126_v22 = vmov 0.0|0.0  }
 0xd4d   : > { %v11646_v57 = vand.u32 4294901760, %v11645_v3  ;;  %v26127_v3 = vld [vmem:[#allocation54_spill] sm:$0xff] }
 0xd4f   : > { %17429 = vmatmul.mubr.f32.gmra.mrb[2].mxu0 %v11606_v14 }
 0xd50   : > { %17431 = vmatprep.mubr.f32.mxu0 %v11616_v1 }
 0xd53   : > { %17432 = vmatmul.mubr.f32.gmra.mrb[4].mxu0 %v11626_v19 }
 0xd54   : > { %17434 = vmatprep.mubr.f32.mxu0 %v11636_v24  ;;  %v19563_v24 = vld [vmem:[%s25009_s2 + $0xb0] sm:$0xff] }
 0xd57   : > { %17435 = vmatmul.mubr.f32.gmra.mrb[6].mxu0 %v11646_v57 }
 0xd58   : > { %17447 = vmatprep.mubr.f32.mxu0 %v23857_v43 }
 0xd5b   : > { %17448 = vmatmul.mubr.f32.vlgmr.msra.gmra.mrb[246].mxu0 %v23864_v55 }
 0xd5c   : > { %18371 = vmatpush3.bf16.msra.mxu0 %v18368_v46  ;;  %17450 = vmatprep.mubr.f32.mxu0 %v23870_v53  ;;  %v12723_v46 = vand.u32 4294901760, %v299_v49 }
 0xd5d   : > { %18373 = vmatprep.subr.bf16.mxu0 %v18372_v40 }
 0xd5e   : > { %v24125_v13 = vsub.f32 %v299_v49, %v12723_v46 }
 0xd5f   : > { %17451 = vmatmul.mubr.f32.gmra.mrb[248].mxu0 %v23882_v30 }
 0xd60   : > { %18375 = vmatpush3.bf16.msra.mxu0 %v18372_v40  ;;  %17453 = vmatprep.mubr.f32.mxu0 %v23887_v42 }
 0xd61   : > { %17482 = vmatprep.subr.mxu0 %v23921_v32 }
 0xd63   : > { %17454 = vmatmul.mubr.f32.gmra.mrb[250].mxu0 %v23902_v28 }
 0xd64   : > { %17483 = vmatpush3.msra.mxu0 %v23921_v32  ;;  %17456 = vmatprep.mubr.f32.mxu0 %v23912_v35  ;;  %v300_v32 = vld [vmem:[%s25009_s2 + $0x8] sm:$0xff] }
 0xd65   : > { %18377 = vmatprep.subr.bf16.mxu0 %v23802_v48  ;;  %v12726_v19 = vand.u32 4294901760, %v300_v32 }
 0xd67   : > { %17457 = vmatmul.mubr.f32.gmra.mrb[252].mxu0 %v23928_v52  ;;  %v24123_v14 = vpack.c.bf16 %v12726_v19, %v12723_v46  ;;  %v24127_v1 = vsub.f32 %v300_v32, %v12726_v19  ;;  %v19564_v19 = vld [vmem:[%s25009_s2 + $0x88] sm:$0xff] }
 0xd68   : > { %17459 = vmatprep.mubr.f32.mxu0 %v23930_v62 }
 0xd69   : > { %18402 = vmatpush3.bf16.msra.mxu1 %v24123_v14 }
 0xd6a   : > { %18403 = vmatprep.subr.bf16.mxu1 %v26126_v22 }
 0xd6b   : > { %17460 = vmatmul.mubr.f32.gmra.mrb[254].mxu0 %v23957_v26 }
 0xd6c   : > { %17462 = vmatprep.mubr.f32.mxu0 %v23963_v9 }
 0xd6f   : > { %17463 = vmatmul.mubr.f32.gmra.mrb[0].mxu0 %v23981_v37 }
 0xd70   : > { %17465 = vmatprep.mubr.f32.mxu0 %v23994_v51 }
 0xd73   : > { %17466 = vmatmul.mubr.f32.gmra.mrb[2].mxu0 %v24008_v8 }
 0xd74   : > { %17468 = vmatprep.mubr.f32.mxu0 %v24016_v20 }
 0xd77   : > { %17469 = vmatmul.mubr.f32.gmra.mrb[4].mxu0 %v24028_v33 }
 0xd78   : > { %17471 = vmatprep.mubr.f32.mxu0 %v24040_v50 }
 0xd7b   : > { %17472 = vmatmul.mubr.f32.gmra.mrb[6].mxu0 %v24045_v21 }
 0xd7c   : > { %17484 = vmatprep.mubr.f32.mxu0 %v23868_v61  ;;  %v26128_v61 = vand.u32 4294901760, %v23952_v47 }
 0xd7f   : > { %17485 = vmatmul.mubr.f32.vlgmr.msra.gmra.mrb[246].mxu0 %v23880_v4  ;;  %v26130_v4 = vand.u32 4294901760, %v23979_v38 }
 0xd80   : > { %18379 = vmatpush3.bf16.msra.mxu0 %v23802_v48  ;;  %17487 = vmatprep.mubr.f32.mxu0 %v23885_v29  ;;  %v26131_v29 = vand.u32 4294901760, %v23987_v25 }
 0xd81   : > { %18381 = vmatprep.subr.bf16.mxu0 %v23834_v56 }
 0xd83   : > { %17488 = vmatmul.mubr.f32.gmra.mrb[248].mxu0 %v23900_v58  ;;  %v26133_v58 = vand.u32 4294901760, %v24014_v16 }
 0xd84   : > { %18383 = vmatpush3.bf16.msra.mxu0 %v23834_v56  ;;  %17490 = vmatprep.mubr.f32.mxu0 %v23910_v10  ;;  %v12851_v10 = vand.u32 4294901760, %v24127_v1 }
 0xd85   : > { %17519 = vmatprep.subr.mxu0 %v23841_v5 }
 0xd87   : > { %17491 = vmatmul.mubr.f32.gmra.mrb[250].mxu0 %v23934_v31 }
 0xd88   : > { %17520 = vmatpush3.msra.mxu0 %v23841_v5  ;;  %17493 = vmatprep.mubr.f32.mxu0 %v23943_v45 }
 0xd89   : > { %18385 = vmatprep.subr.bf16.mxu0 %v26125_v27 }
 0xd8b   : > { %17494 = vmatmul.mubr.f32.gmra.mrb[252].mxu0 %v23952_v47 }
 0xd8c   : > { %17496 = vmatprep.mubr.f32.mxu0 %v23955_v39 }
 0xd8f   : > { %17497 = vmatmul.mubr.f32.gmra.mrb[254].mxu0 %v23979_v38 }
 0xd90   : > { %17499 = vmatprep.mubr.f32.mxu0 %v23987_v25 }
 0xd93   : > { %17500 = vmatmul.mubr.f32.gmra.mrb[0].mxu0 %v24006_v41 }
 0xd94   : > { %17502 = vmatprep.mubr.f32.mxu0 %v24014_v16  ;;  %v19559_v16 = vld [vmem:[%s25009_s2 + $0xa8] sm:$0xff] }
 0xd97   : > { %17503 = vmatmul.mubr.f32.gmra.mrb[2].mxu0 %v24026_v60 }
 0xd98   : > { %17505 = vmatprep.mubr.f32.mxu0 %v24038_v0 }
 0xd9b   : > { %17506 = vmatmul.mubr.f32.gmra.mrb[4].mxu0 %v24043_v7 }
 0xd9c   : > { %17508 = vmatprep.mubr.f32.mxu0 %v24056_v44  ;;  %v19561_v44 = vld [vmem:[%s25009_s2 + $0x80] sm:$0xff] }
 0xd9f   : > { %17509 = vmatmul.mubr.f32.gmra.mrb[6].mxu0 %v24059_v6 }
 0xda0   : > { %17521 = vmatprep.mubr.f32.mxu0 %v11474_v2  ;;  %v26129_v2 = vand.u32 4294901760, %v23955_v39 }
 0xda3   : > { %17522 = vmatmul.mubr.f32.vlgmr.msra.gmra.mrb[246].mxu0 %v11484_v59  ;;  %v26132_v59 = vand.u32 4294901760, %v24006_v41 }
 0xda4   : > { %18387 = vmatpush3.bf16.msra.mxu0 %v26125_v27  ;;  %17524 = vmatprep.mubr.f32.mxu0 %v11494_v17  ;;  %v26134_v17 = vand.u32 4294901760, %v24026_v60 }
 0xda5   : > { %18389 = vmatprep.subr.bf16.mxu0 %v26127_v3 }
 0xda7   : > { %17525 = vmatmul.mubr.f32.gmra.mrb[248].mxu0 %v11504_v54 }
 0xda8   : > { %18391 = vmatpush3.bf16.msra.mxu0 %v26127_v3  ;;  %17527 = vmatprep.mubr.f32.mxu0 %v11514_v11 }
 0xda9   : > { %17556 = vmatprep.subr.mxu0 %v23949_v15 }
 0xdab   : > { %17528 = vmatmul.mubr.f32.gmra.mrb[250].mxu0 %v11524_v34 }
 0xdac   : > { %17557 = vmatpush3.msra.mxu0 %v23949_v15  ;;  %17530 = vmatprep.mubr.f32.mxu0 %v11534_v63 }
 0xdad   : > { %18393 = vmatprep.subr.bf16.mxu0 %v23802_v48 }
 0xdaf   : > { %17531 = vmatmul.mubr.f32.gmra.mrb[252].mxu0 %v26128_v61  ;;  %v19565_v61 = vld [vmem:[%s25009_s2 + $0x90] sm:$0xff] }
 0xdb0   : > { %17533 = vmatprep.mubr.f32.mxu0 %v26129_v2 }
 0xdb3   : > { %17534 = vmatmul.mubr.f32.gmra.mrb[254].mxu0 %v26130_v4  ;;  %v19566_v4 = vld [vmem:[%s25009_s2 + $0xc8] sm:$0xff] }
 0xdb4   : > { %17536 = vmatprep.mubr.f32.mxu0 %v26131_v29 }
 0xdb7   : > { %17537 = vmatmul.mubr.f32.gmra.mrb[0].mxu0 %v26132_v59 }
 0xdb8   : > { %17539 = vmatprep.mubr.f32.mxu0 %v26133_v58  ;;  %v19567_v58 = vld [vmem:[%s25009_s2 + $0xc0] sm:$0xff] }
 0xdbb   : > { %17540 = vmatmul.mubr.f32.gmra.mrb[2].mxu0 %v26134_v17 }
 0xdbc   : > { %17542 = vmatprep.mubr.f32.mxu0 %v11614_v23 }
 0xdbf   : > { %17543 = vmatmul.mubr.f32.gmra.mrb[4].mxu0 %v11624_v36  ;;  %v19562_v36 = vld [vmem:[%s25009_s2 + $0xb8] sm:$0xff] }
 0xdc0   : > { %17545 = vmatprep.mubr.f32.mxu0 %v11634_v12 }
 0xdc3   : > { %17546 = vmatmul.mubr.f32.gmra.mrb[6].mxu0 %v11644_v18 }
 0xdc4   : > { %17558 = vmatprep.mubr.f32.mxu0 %v23857_v43 }
 0xdc7   : > { %17559 = vmatmul.mubr.f32.vlgmr.msra.gmra.mrb[246].mxu0 %v23864_v55 }
 0xdc8   : > { %18395 = vmatpush3.bf16.msra.mxu0 %v23802_v48  ;;  %17561 = vmatprep.mubr.f32.mxu0 %v23870_v53  ;;  %v26135_v48 = vmov 0.0  }
 0xdc9   : > { %18397 = vmatprep.subr.bf16.mxu0 %v23834_v56 }
 0xdcb   : > { %17562 = vmatmul.mubr.f32.gmra.mrb[248].mxu0 %v23882_v30 }
 0xdcc   : > { %18399 = vmatpush3.bf16.msra.mxu0 %v23834_v56  ;;  %17564 = vmatprep.mubr.f32.mxu0 %v23887_v42  ;;  %v301_v56 = vld [vmem:[%s25009_s2 + $0x10] sm:$0xff] }
 0xdcd   : > { %17593 = vmatprep.subr.mxu0 %v23841_v5 }
 0xdcf   : > { %17565 = vmatmul.mubr.f32.gmra.mrb[250].mxu0 %v23902_v28 }
 0xdd0   : > { %17594 = vmatpush3.msra.mxu0 %v23841_v5  ;;  %17567 = vmatprep.mubr.f32.mxu0 %v23912_v35  ;;  %v302_v5 = vld [vmem:[%s25009_s2 + $0x18] sm:$0xff] }
 0xdd1   : > { %18472 = vmatprep.subr.bf16.mxu0 %v26126_v22 }
 0xdd3   : > { %17568 = vmatmul.mubr.f32.gmra.mrb[252].mxu0 %v23928_v52 }
 0xdd4   : > { %17570 = vmatprep.mubr.f32.mxu0 %v23930_v62 }
 0xdd7   : > { %17571 = vmatmul.mubr.f32.gmra.mrb[254].mxu0 %v23957_v26 }
 0xdd8   : > { %17573 = vmatprep.mubr.f32.mxu0 %v23963_v9 }
 0xddb   : > { %17574 = vmatmul.mubr.f32.gmra.mrb[0].mxu0 %v23981_v37 }
 0xddc   : > { %17576 = vmatprep.mubr.f32.mxu0 %v23994_v51 }
 0xddf   : > { %17577 = vmatmul.mubr.f32.gmra.mrb[2].mxu0 %v24008_v8 }
 0xde0   : > { %17579 = vmatprep.mubr.f32.mxu0 %v24016_v20 }
 0xde3   : > { %17580 = vmatmul.mubr.f32.gmra.mrb[4].mxu0 %v24028_v33 }
 0xde4   : > { %17582 = vmatprep.mubr.f32.mxu0 %v24040_v50 }
 0xde7   : > { %17583 = vmatmul.mubr.f32.gmra.mrb[6].mxu0 %v24045_v21 }
 0xde8   : > { %17595 = vmatprep.mubr.f32.mxu0 %v23857_v43  ;;  %v12729_v43 = vand.u32 4294901760, %v301_v56 }
 0xdeb   : > { %17596 = vmatmul.mubr.f32.vlgmr.msra.gmra.mrb[246].mxu0 %v23864_v55  ;;  %v12732_v55 = vand.u32 4294901760, %v302_v5 }
 0xdec   : > { %17598 = vmatprep.mubr.f32.mxu0 %v23870_v53 }
 0xded   : > { %v24232_v53 = vpack.c.bf16 %v12732_v55, %v12729_v43 }
 0xdef   : > { %17599 = vmatmul.mubr.f32.gmra.mrb[248].mxu0 %v23882_v30  ;;  %v24234_v30 = vsub.f32 %v301_v56, %v12729_v43  ;;  %18405 = vmatpush3.bf16.msra.mxu1 %v24232_v53 }
 0xdf0   : > { %17601 = vmatprep.mubr.f32.mxu0 %v23887_v42  ;;  %v24236_v42 = vsub.f32 %v302_v5, %v12732_v55  ;;  %18406 = vmatprep.subr.bf16.mxu1 %v26126_v22 }
 0xdf1   : > { %v12858_v31 = vand.u32 4294901760, %v24234_v30 }
 0xdf2   : > { %v12865_v11 = vand.u32 4294901760, %v24236_v42  ;;  %v18416_v63 = vpack.c.bf16 %v24236_v42, %v24234_v30 }
 0xdf3   : > { %17602 = vmatmul.mubr.f32.gmra.mrb[250].mxu0 %v23902_v28  ;;  %v12844_v28 = vand.u32 4294901760, %v24125_v13  ;;  %v12859_v15 = vsub.f32 %v24234_v30, %v12858_v31 }
 0xdf4   : > { %17604 = vmatprep.mubr.f32.mxu0 %v23912_v35  ;;  %v12866_v47 = vsub.f32 %v24236_v42, %v12865_v11 }
 0xdf5   : > { %v12845_v35 = vsub.f32 %v24125_v13, %v12844_v28  ;;  %v12860_v39 = vand.u32 4294901760, %v12859_v15  ;;  %v24256_v38 = vpack.c.bf16 %v12851_v10, %v12844_v28 }
 0xdf7   : > { %17605 = vmatmul.mubr.f32.gmra.mrb[252].mxu0 %v23928_v52  ;;  %v12852_v52 = vsub.f32 %v24127_v1, %v12851_v10 }
 0xdf8   : > { %17607 = vmatprep.mubr.f32.mxu0 %v23930_v62  ;;  %v12846_v62 = vand.u32 4294901760, %v12845_v35 }
 0xdf9   : > { %v12853_v54 = vand.u32 4294901760, %v12852_v52  ;;  %v19568_v52 = vld [vmem:[%s25009_s2 + $0x98] sm:$0xff] }
 0xdfb   : > { %17608 = vmatmul.mubr.f32.gmra.mrb[254].mxu0 %v23957_v26  ;;  %v24246_v45 = vpack.c.bf16 %v12853_v54, %v12846_v62  ;;  %v12867_v26 = vand.u32 4294901760, %v12866_v47  ;;  %v19569_v54 = vld [vmem:[%s25009_s2 + $0xd8] sm:$0xff]  ;;  %v19570_v47 = vld [vmem:[%s25009_s2 + $0xd0] sm:$0xff] }
 0xdfc   : > { %17610 = vmatprep.mubr.f32.mxu0 %v23963_v9  ;;  %v18413_v9 = vpack.c.bf16 %v24127_v1, %v24125_v13 }
 0xdfd   : > { %v24250_v34 = vpack.c.bf16 %v12867_v26, %v12860_v39 }
 0xdff   : > { %17611 = vmatmul.mubr.f32.gmra.mrb[0].mxu0 %v23981_v37  ;;  %v24258_v37 = vpack.c.bf16 %v12865_v11, %v12858_v31 }
 0xe00   : > { %17613 = vmatprep.mubr.f32.mxu0 %v23994_v51 }
 0xe03   : > { %17614 = vmatmul.mubr.f32.gmra.mrb[2].mxu0 %v24008_v8 }
 0xe04   : > { %17616 = vmatprep.mubr.f32.mxu0 %v24016_v20 }
 0xe07   : > { %17617 = vmatmul.mubr.f32.gmra.mrb[4].mxu0 %v24028_v33  ;;  %v19560_v33 = vld [vmem:[%s25009_s2 + $0xa0] sm:$0xff] }
 0xe08   : > { %17619 = vmatprep.mubr.f32.mxu0 %v24040_v50 }
 0xe0b   : > { %17620 = vmatmul.mubr.f32.gmra.mrb[6].mxu0 %v24045_v21 }
 0xe0c   : > { %17914 = vmatprep.mubr.msk.f32.mxu0 %vm19591_vm0, %v26135_v48 }
 0xebe   : > { %v17597_v25 = vpop.f32.mrb[246].mxu0 }
 0xebf   : > { %v12525_v51 = vpop.f32.mrb[247].mxu0  ;;  %v12632_v3 = vmul.f32 %v19564_v19, %v17597_v25 }
 0xec0   : > { %v12631_v6 = vmul.f32 %v19561_v44, %v12525_v51 }
 0xec2   : > { %v17600_v21 = vpop.f32.mrb[248].mxu0 }
 0xec3   : > { %v12537_v41 = vpop.f32.mrb[249].mxu0  ;;  %v12634_v62 = vmul.f32 %v19568_v52, %v17600_v21  ;;  %v19571_v21 = vld [vmem:[%s25009_s2 + $0xe8] sm:$0xff] }
 0xec4   : > { %v12633_v2 = vmul.f32 %v19565_v61, %v12537_v41 }
 0xec6   : > { %v17603_v8 = vpop.f32.mrb[250].mxu0 }
 0xec7   : > { %v12636_v20 = vmul.f32 %v19559_v16, %v17603_v8  ;;  %v12549_v60 = vpop.f32.mrb[251].mxu0 }
 0xec8   : > { %v12635_v0 = vmul.f32 %v19560_v33, %v12549_v60  ;;  %v19572_v60 = vld [vmem:[%s25009_s2 + $0xe0] sm:$0xff] }
 0xec9   : > { %v12655_v50 = vrot.slane %v12636_v20, 4 }
 0xeca   : > { %v12654_v7 = vrot.slane %v12635_v0, 4  ;;  %v17606_v23 = vpop.f32.mrb[252].mxu0 }
 0xecb   : > { %v12638_v12 = vmul.f32 %v19562_v36, %v17606_v23  ;;  %v12561_v18 = vpop.f32.mrb[253].mxu0  ;;  %v19573_v23 = vld [vmem:[%s25009_s2 + $0xf8] sm:$0xff]  ;;  %v19574_v36 = vld [vmem:[%s25009_s2 + $0xf0] sm:$0xff] }
 0xecc   : > { %v12637_v57 = vmul.f32 %v19563_v24, %v12561_v18  ;;  %v12656_v40 = vsel %vm1192_vm3, %v12654_v7, %v12655_v50 }
 0xecd   : > { %v12659_v27 = vrot.slane %v12638_v12, 4  ;;  %v12668_v49 = vadd.f32 %v12656_v40, %v12631_v6 }
 0xece   : > { %v12657_v32 = vrot.slane %v12637_v57, 4  ;;  %v17609_v46 = vpop.f32.mrb[254].mxu0 }
 0xecf   : > { %v12640_v29 = vmul.f32 %v19566_v4, %v17609_v46  ;;  %v12573_v59 = vpop.f32.mrb[255].mxu0 }
 0xed0   : > { %v12639_v17 = vmul.f32 %v19567_v58, %v12573_v59  ;;  %v12660_v56 = vsel %vm1192_vm3, %v12657_v32, %v12659_v27  ;;  %v12658_v5 = vsel %vm1192_vm3, %v12655_v50, %v12657_v32 }
 0xed1   : > { %v12673_v43 = vadd.f32 %v12668_v49, %v12640_v29  ;;  %v12670_v55 = vadd.f32 %v12660_v56, %v12633_v2  ;;  %v12669_v28 = vadd.f32 %v12658_v5, %v12632_v3  ;;  %v19576_v3 = vld [vmem:[%s25009_s2 + $0x100] sm:$0xff] }
 0xed2   : > { %v12661_v10 = vrot.slane %v12639_v17, 4  ;;  %v17612_v35 = vpop.f32.mrb[0].mxu0 }
 0xed3   : > { %v12642_v31 = vmul.f32 %v19569_v54, %v17612_v35  ;;  %v12585_v11 = vpop.f32.mrb[1].mxu0 }
 0xed4   : > { %v12672_v15 = vadd.f32 %v12661_v10, %v12635_v0  ;;  %v12641_v39 = vmul.f32 %v19570_v47, %v12585_v11  ;;  %v12662_v26 = vsel %vm1192_vm3, %v12659_v27, %v12661_v10  ;;  %v19575_v27 = vld [vmem:[%s25009_s2 + $0x108] sm:$0xff] }
 0xed5   : > { %v12675_v25 = vadd.f32 %v12670_v55, %v12642_v31  ;;  %v12671_v51 = vadd.f32 %v12662_v26, %v12634_v62 }
 0xed6   : > { %v12674_v41 = vadd.f32 %v12669_v28, %v12641_v39  ;;  %v17615_v8 = vpop.f32.mrb[2].mxu0 }
 0xed7   : > { %v12644_v16 = vmul.f32 %v19571_v21, %v17615_v8  ;;  %v12597_v20 = vpop.f32.mrb[3].mxu0 }
 0xed8   : > { %v12643_v33 = vmul.f32 %v19572_v60, %v12597_v20 }
 0xed9   : > { %v12677_v0 = vadd.f32 %v12672_v15, %v12644_v16  ;;  %v12683_v24 = vrot.slane %v12644_v16, 4 }
 0xeda   : > { %v12676_v50 = vadd.f32 %v12671_v51, %v12643_v33  ;;  %v17618_v7 = vpop.f32.mrb[4].mxu0 }
 0xedb   : > { %v12646_v44 = vmul.f32 %v19573_v23, %v17618_v7  ;;  %v12609_v6 = vpop.f32.mrb[5].mxu0 }
 0xedc   : > { %v12645_v12 = vmul.f32 %v19574_v36, %v12609_v6 }
 0xedd   : > { %v12686_v18 = vrot.slane %v12646_v44, 4 }
 0xede   : > { %v12684_v57 = vrot.slane %v12645_v12, 4  ;;  %v17621_v40 = vpop.f32.mrb[6].mxu0 }
 0xedf   : > { %v12648_v49 = vmul.f32 %v19575_v27, %v17621_v40  ;;  %v12621_v32 = vpop.f32.mrb[7].mxu0 }
 0xee0   : > { %v12685_v46 = vsel %vm1192_vm3, %v12683_v24, %v12684_v57  ;;  %v12687_v19 = vsel %vm1192_vm3, %v12684_v57, %v12686_v18  ;;  %v12647_v61 = vmul.f32 %v19576_v3, %v12621_v32 }
 0xee1   : > { %v12697_v2 = vadd.f32 %v12685_v46, %v12673_v43  ;;  %v12698_v4 = vadd.f32 %v12687_v19, %v12674_v41  ;;  %v12690_v29 = vrot.slane %v12648_v49, 4 }
 0xee2   : > { %v12688_v59 = vrot.slane %v12647_v61, 4 }
 0xee3   : > { %v12708_v58 = vsel %vm464_vm1, %v12697_v2, 0  ;;  %v12711_v17 = vsel %vm464_vm1, %v12698_v4, 0  ;;  %v12701_v56 = vadd.f32 %v12690_v29, %v12677_v0 }
 0xee4   : > { %v24322_v5 = vand.u32 4294901760, %v12708_v58  ;;  %v24324_v55 = vand.u32 4294901760, %v12711_v17  ;;  %v12689_v28 = vsel %vm1192_vm3, %v12686_v18, %v12688_v59  ;;  %v12691_v10 = vsel %vm1192_vm3, %v12688_v59, %v12690_v29 }
 0xee5   : > { %v12699_v35 = vadd.f32 %v12689_v28, %v12675_v25  ;;  %v12700_v52 = vadd.f32 %v12691_v10, %v12676_v50  ;;  %v12720_v15 = vsel %vm464_vm1, %v12701_v56, 0 }
 0xee6   : > { %v24329_v43 = vsub.f32 %v12708_v58, %v24322_v5  ;;  %v24332_v62 = vsub.f32 %v12711_v17, %v24324_v55  ;;  %v24349_v41 = vand.u32 4294901760, %v12720_v15 }
 0xee7   : > { %v12714_v54 = vsel %vm464_vm1, %v12699_v35, 0  ;;  %v12717_v31 = vsel %vm464_vm1, %v12700_v52, 0 }
 0xee8   : > { %v12793_v11 = vand.u32 4294901760, %v24329_v43  ;;  %v24338_v47 = vand.u32 4294901760, %v12714_v54  ;;  %v24340_v39 = vand.u32 4294901760, %v12717_v31  ;;  %v12803_v26 = vand.u32 4294901760, %v24332_v62 }
 0xee9   : > { %v12832_v60 = vsub.f32 %v12720_v15, %v24349_v41 }
 0xeea   : > { %v12794_v25 = vsub.f32 %v24329_v43, %v12793_v11  ;;  %v24347_v51 = vsub.f32 %v12714_v54, %v24338_v47  ;;  %v12804_v21 = vsub.f32 %v24332_v62, %v12803_v26  ;;  %v24356_v20 = vsub.f32 %v12717_v31, %v24340_v39 }
 0xeeb   : > { %v12833_v44 = vand.u32 4294901760, %v12832_v60 }
 0xeec   : > { %v12795_v8 = vand.u32 4294901760, %v12794_v25  ;;  %v12813_v16 = vand.u32 4294901760, %v24347_v51  ;;  %v12805_v33 = vand.u32 4294901760, %v12804_v21  ;;  %v12823_v50 = vand.u32 4294901760, %v24356_v20 }
 0xeed   : > { %v12834_v6 = vsub.f32 %v12832_v60, %v12833_v44 }
 0xeee   : > { %17631 = vmatmul.mubr.f32.vlgmr.msra.gmra.mrb[214].mxu1 %v12795_v8  ;;  %v12814_v0 = vsub.f32 %v24347_v51, %v12813_v16  ;;  %v12824_v23 = vsub.f32 %v24356_v20, %v12823_v50 }
 0xeef   : > { %17633 = vmatprep.mubr.msk.f32.mxu1 %vm19591_vm0, %v26135_v48  ;;  %18408 = vmatpush3.bf16.msra.mxu1 %v24246_v45  ;;  %v12835_v36 = vand.u32 4294901760, %v12834_v6 }
 0xef0   : > { %18409 = vmatprep.subr.bf16.mxu1 %v26126_v22  ;;  %v12815_v7 = vand.u32 4294901760, %v12814_v0  ;;  %v12825_v45 = vand.u32 4294901760, %v12824_v23 }
 0xef2   : > { %17634 = vmatmul.mubr.f32.gmra.mrb[216].mxu1 %v12805_v33 }
 0xef3   : > { %17636 = vmatprep.mubr.msk.f32.mxu1 %vm19591_vm0, %v26135_v48  ;;  %18411 = vmatpush3.bf16.msra.mxu1 %v24250_v34 }
 0xef4   : > { %18412 = vmatprep.subr.bf16.mxu1 %v26126_v22 }
 0xef6   : > { %17637 = vmatmul.mubr.f32.gmra.mrb[218].mxu1 %v12815_v7 }
 0xef7   : > { %17639 = vmatprep.mubr.msk.f32.mxu1 %vm19591_vm0, %v26135_v48 }
 0xefa   : > { %17640 = vmatmul.mubr.f32.gmra.mrb[220].mxu1 %v12825_v45 }
 0xefb   : > { %17642 = vmatprep.mubr.msk.f32.mxu1 %vm19591_vm0, %v26135_v48 }
 0xefe   : > { %17643 = vmatmul.mubr.f32.gmra.mrb[222].mxu1 %v12835_v36 }
 0xeff   : > { %17653 = vmatprep.mubr.msk.f32.mxu1 %vm19591_vm0, %v26135_v48 }
 0xf02   : > { %17654 = vmatmul.mubr.f32.vlgmr.msra.gmra.mrb[224].mxu1 %v24322_v5 }
 0xf03   : > { %17656 = vmatprep.mubr.msk.f32.mxu1 %vm19591_vm0, %v26135_v48  ;;  %18414 = vmatpush3.bf16.msra.mxu1 %v18413_v9 }
 0xf04   : > { %18415 = vmatprep.subr.bf16.mxu1 %v26126_v22 }
 0xf06   : > { %17657 = vmatmul.mubr.f32.gmra.mrb[226].mxu1 %v24324_v55 }
 0xf07   : > { %17659 = vmatprep.mubr.msk.f32.mxu1 %vm19591_vm0, %v26135_v48  ;;  %18417 = vmatpush3.bf16.msra.mxu1 %v18416_v63  ;;  %v15111_v63 = vld [vmem:[%s25009_s2 + $0x110] ss:$0 sm:$0xff] }
 0xf08   : > { %18418 = vmatprep.subr.bf16.mxu1 %v26126_v22 }
 0xf0a   : > { %17660 = vmatmul.mubr.f32.gmra.mrb[228].mxu1 %v24338_v47 }
 0xf0b   : > { %17662 = vmatprep.mubr.msk.f32.mxu1 %vm19591_vm0, %v26135_v48 }
 0xf0e   : > { %17663 = vmatmul.mubr.f32.gmra.mrb[230].mxu1 %v24340_v39 }
 0xf0f   : > { %17665 = vmatprep.mubr.msk.f32.mxu1 %vm19591_vm0, %v26135_v48 }
 0xf12   : > { %17666 = vmatmul.mubr.f32.gmra.mrb[232].mxu1 %v24349_v41 }
 0xf13   : > { %17676 = vmatprep.mubr.msk.f32.mxu1 %vm19591_vm0, %v26135_v48 }
 0xf16   : > { %17677 = vmatmul.mubr.f32.vlgmr.msra.gmra.mrb[234].mxu1 %v24329_v43 }
 0xf17   : > { %17679 = vmatprep.mubr.msk.f32.mxu1 %vm19591_vm0, %v26135_v48  ;;  %18420 = vmatpush3.bf16.msra.mxu1 %v24123_v14 }
 0xf18   : > { %18421 = vmatprep.subr.bf16.mxu1 %v26126_v22 }
 0xf1a   : > { %17680 = vmatmul.mubr.f32.gmra.mrb[236].mxu1 %v24332_v62 }
 0xf1b   : > { %17682 = vmatprep.mubr.msk.f32.mxu1 %vm19591_vm0, %v26135_v48  ;;  %18423 = vmatpush3.bf16.msra.mxu1 %v24232_v53 }
 0xf1c   : > { %18424 = vmatprep.subr.bf16.mxu1 %v26126_v22 }
 0xf1e   : > { %17683 = vmatmul.mubr.f32.gmra.mrb[238].mxu1 %v24347_v51 }
 0xf1f   : > { %17685 = vmatprep.mubr.msk.f32.mxu1 %vm19591_vm0, %v26135_v48 }
 0xf22   : > { %17686 = vmatmul.mubr.f32.gmra.mrb[240].mxu1 %v24356_v20 }
 0xf23   : > { %17688 = vmatprep.mubr.msk.f32.mxu1 %vm19591_vm0, %v26135_v48 }
 0xf26   : > { %17689 = vmatmul.mubr.f32.gmra.mrb[242].mxu1 %v12832_v60 }
 0xf27   : > { %17699 = vmatprep.mubr.msk.f32.mxu1 %vm19591_vm0, %v26135_v48 }
 0xf2a   : > { %17700 = vmatmul.mubr.f32.vlgmr.msra.gmra.mrb[244].mxu1 %v12793_v11 }
 0xf2b   : > { %17702 = vmatprep.mubr.msk.f32.mxu1 %vm19591_vm0, %v26135_v48  ;;  %18426 = vmatpush3.bf16.msra.mxu1 %v24256_v38 }
 0xf2c   : > { %18427 = vmatprep.subr.bf16.mxu1 %v26126_v22 }
 0xf2e   : > { %17703 = vmatmul.mubr.f32.gmra.mrb[246].mxu1 %v12803_v26 }
 0xf2f   : > { %17705 = vmatprep.mubr.msk.f32.mxu1 %vm19591_vm0, %v26135_v48  ;;  %18429 = vmatpush3.bf16.msra.mxu1 %v24258_v37 }
 0xf30   : > { %18430 = vmatprep.subr.bf16.mxu1 %v26126_v22 }
 0xf32   : > { %17706 = vmatmul.mubr.f32.gmra.mrb[248].mxu1 %v12813_v16 }
 0xf33   : > { %17708 = vmatprep.mubr.msk.f32.mxu1 %vm19591_vm0, %v26135_v48 }
 0xf36   : > { %17709 = vmatmul.mubr.f32.gmra.mrb[250].mxu1 %v12823_v50 }
 0xf37   : > { %17711 = vmatprep.mubr.msk.f32.mxu1 %vm19591_vm0, %v26135_v48 }
 0xf3a   : > { %17712 = vmatmul.mubr.f32.gmra.mrb[252].mxu1 %v12833_v44 }
 0xf3b   : > { %17722 = vmatprep.mubr.msk.f32.mxu1 %vm19591_vm0, %v26135_v48 }
 0xf3e   : > { %17723 = vmatmul.mubr.f32.vlgmr.msra.gmra.mrb[254].mxu1 %v24322_v5 }
 0xf3f   : > { %17725 = vmatprep.mubr.msk.f32.mxu1 %vm19591_vm0, %v26135_v48  ;;  %18432 = vmatpush3.bf16.msra.mxu1 %v24123_v14 }
 0xf40   : > { %18433 = vmatprep.subr.bf16.mxu1 %v26126_v22 }
 0xf42   : > { %17726 = vmatmul.mubr.f32.gmra.mrb[0].mxu1 %v24324_v55 }
 0xf43   : > { %17728 = vmatprep.mubr.msk.f32.mxu1 %vm19591_vm0, %v26135_v48  ;;  %18435 = vmatpush3.bf16.msra.mxu1 %v24232_v53 }
 0xf44   : > { %18436 = vmatprep.subr.bf16.mxu1 %v26126_v22 }
 0xf46   : > { %17729 = vmatmul.mubr.f32.gmra.mrb[2].mxu1 %v24338_v47 }
 0xf47   : > { %17731 = vmatprep.mubr.msk.f32.mxu1 %vm19591_vm0, %v26135_v48 }
 0xf4a   : > { %17732 = vmatmul.mubr.f32.gmra.mrb[4].mxu1 %v24340_v39 }
 0xf4b   : > { %17734 = vmatprep.mubr.msk.f32.mxu1 %vm19591_vm0, %v26135_v48 }
 0xf4e   : > { %17735 = vmatmul.mubr.f32.gmra.mrb[6].mxu1 %v24349_v41 }
 0xf4f   : > { %17745 = vmatprep.mubr.msk.f32.mxu1 %vm19591_vm0, %v26135_v48 }
 0xf52   : > { %17746 = vmatmul.mubr.f32.vlgmr.msra.gmra.mrb[8].mxu1 %v24322_v5 }
 0xf53   : > { %17748 = vmatprep.mubr.msk.f32.mxu1 %vm19591_vm0, %v26135_v48 }
 0xf56   : > { %17749 = vmatmul.mubr.f32.gmra.mrb[10].mxu1 %v24324_v55 }
 0xf57   : > { %17751 = vmatprep.mubr.msk.f32.mxu1 %vm19591_vm0, %v26135_v48 }
 0xf5a   : > { %17752 = vmatmul.mubr.f32.gmra.mrb[12].mxu1 %v24338_v47 }
 0xf5b   : > { %17754 = vmatprep.mubr.msk.f32.mxu1 %vm19591_vm0, %v26135_v48 }
 0xf5e   : > { %17755 = vmatmul.mubr.f32.gmra.mrb[14].mxu1 %v24340_v39 }
 0xf5f   : > { %17757 = vmatprep.mubr.msk.f32.mxu1 %vm19591_vm0, %v26135_v48 }
 0xf62   : > { %17758 = vmatmul.mubr.f32.gmra.mrb[16].mxu1 %v24349_v41 }
 0xf63   : > { %17768 = vmatprep.mubr.msk.f32.mxu1 %vm19591_vm0, %v26135_v48 }
 0xfc1   : > { %v12797_v14 = vpop.f32.mrb[214].mxu1 }
 0xfc2   : > { %v17632_v13 = vpop.f32.mrb[215].mxu1  ;;  %v12798_v12 = vadd.f32 %v15111_v63, %v12797_v14 }
 0xfc5   : > { %v12807_v1 = vpop.f32.mrb[216].mxu1 }
 0xfc6   : > { %v17635_v53 = vpop.f32.mrb[217].mxu1  ;;  %v12808_v40 = vadd.f32 %v15111_v63, %v12807_v1 }
 0xfc9   : > { %v12817_v30 = vpop.f32.mrb[218].mxu1 }
 0xfca   : > { %v17638_v42 = vpop.f32.mrb[219].mxu1  ;;  %v12818_v46 = vadd.f32 %v15111_v63, %v12817_v30 }
 0xfcd   : > { %v12827_v34 = vpop.f32.mrb[220].mxu1 }
 0xfce   : > { %v17641_v9 = vpop.f32.mrb[221].mxu1  ;;  %v12828_v2 = vadd.f32 %v15111_v63, %v12827_v34 }
 0xfd1   : > { %v12837_v38 = vpop.f32.mrb[222].mxu1 }
 0xfd2   : > { %v17644_v37 = vpop.f32.mrb[223].mxu1  ;;  %v12838_v58 = vadd.f32 %v15111_v63, %v12837_v38 }
 0xfd5   : > { %v12928_v18 = vpop.f32.mrb[224].mxu1 }
 0xfd6   : > { %v12929_v24 = vadd.f32 %v12928_v18, %v12798_v12  ;;  %v17655_v57 = vpop.f32.mrb[225].mxu1 }
 0xfd9   : > { %v12934_v27 = vpop.f32.mrb[226].mxu1 }
 0xfda   : > { %v12935_v49 = vadd.f32 %v12934_v27, %v12808_v40  ;;  %v17658_v32 = vpop.f32.mrb[227].mxu1 }
 0xfdd   : > { %v12940_v19 = vpop.f32.mrb[228].mxu1 }
 0xfde   : > { %v12941_v3 = vadd.f32 %v12940_v19, %v12818_v46  ;;  %v17661_v61 = vpop.f32.mrb[229].mxu1 }
 0xfe1   : > { %v12946_v4 = vpop.f32.mrb[230].mxu1 }
 0xfe2   : > { %v12947_v29 = vadd.f32 %v12946_v4, %v12828_v2  ;;  %v17664_v59 = vpop.f32.mrb[231].mxu1  ;;  %v19578_v2 = vld [vmem:[%s19684_s14 + $0x8] sm:$0xff] }
 0xfe5   : > { %v12952_v17 = vpop.f32.mrb[232].mxu1 }
 0xfe6   : > { %v12953_v56 = vadd.f32 %v12952_v17, %v12838_v58  ;;  %v17667_v5 = vpop.f32.mrb[233].mxu1 }
 0xfe9   : > { %v13032_v55 = vpop.f32.mrb[234].mxu1 }
 0xfea   : > { %v13033_v28 = vadd.f32 %v13032_v55, %v12929_v24  ;;  %v17678_v10 = vpop.f32.mrb[235].mxu1 }
 0xfed   : > { %v13039_v35 = vpop.f32.mrb[236].mxu1 }
 0xfee   : > { %v13040_v52 = vadd.f32 %v13039_v35, %v12935_v49  ;;  %v17681_v43 = vpop.f32.mrb[237].mxu1  ;;  %v19577_v49 = vld [vmem:[%s19684_s14] sm:$0xff] }
 0xff1   : > { %v13046_v62 = vpop.f32.mrb[238].mxu1 }
 0xff2   : > { %v13047_v54 = vadd.f32 %v13046_v62, %v12941_v3  ;;  %v17684_v31 = vpop.f32.mrb[239].mxu1 }
 0xff5   : > { %v13053_v11 = vpop.f32.mrb[240].mxu1 }
 0xff6   : > { %v13054_v15 = vadd.f32 %v13053_v11, %v12947_v29  ;;  %v17687_v47 = vpop.f32.mrb[241].mxu1 }
 0xff9   : > { %v13060_v39 = vpop.f32.mrb[242].mxu1 }
 0xffa   : > { %v13061_v26 = vadd.f32 %v13060_v39, %v12953_v56  ;;  %v17690_v25 = vpop.f32.mrb[243].mxu1  ;;  %v19579_v56 = vld [vmem:[%s19684_s14 + $0x10] sm:$0xff] }
 0xffd   : > { %v13137_v51 = vpop.f32.mrb[244].mxu1 }
 0xffe   : > { %v13138_v41 = vadd.f32 %v13137_v51, %v13033_v28  ;;  %v17701_v8 = vpop.f32.mrb[245].mxu1 }
0x1001   : > { %v13145_v21 = vpop.f32.mrb[246].mxu1 }
0x1002   : > { %v13146_v16 = vadd.f32 %v13145_v21, %v13040_v52  ;;  %v17704_v20 = vpop.f32.mrb[247].mxu1  ;;  %v19580_v52 = vld [vmem:[%s19684_s14 + $0x18] sm:$0xff] }
0x1005   : > { %v13153_v60 = vpop.f32.mrb[248].mxu1 }
0x1006   : > { %v13154_v33 = vadd.f32 %v13153_v60, %v13047_v54  ;;  %v17707_v0 = vpop.f32.mrb[249].mxu1 }
0x1009   : > { %v13161_v50 = vpop.f32.mrb[250].mxu1 }
0x100a   : > { %v13162_v7 = vadd.f32 %v13161_v50, %v13054_v15  ;;  %v17710_v23 = vpop.f32.mrb[251].mxu1  ;;  %v19581_v15 = vld [vmem:[%s19684_s14 + $0x20] sm:$0xf] }
0x100d   : > { %v13169_v44 = vpop.f32.mrb[252].mxu1 }
0x100e   : > { %v13170_v45 = vadd.f32 %v13169_v44, %v13061_v26  ;;  %v17713_v6 = vpop.f32.mrb[253].mxu1 }
0x1011   : > { %v13252_v36 = vpop.f32.mrb[254].mxu1 }
0x1012   : > { %v13253_v14 = vadd.f32 %v13252_v36, %v13138_v41  ;;  %v17724_v13 = vpop.f32.mrb[255].mxu1 }
0x1015   : > { %v13258_v1 = vpop.f32.mrb[0].mxu1 }
0x1016   : > { %v13259_v53 = vadd.f32 %v13258_v1, %v13146_v16  ;;  %v17727_v30 = vpop.f32.mrb[1].mxu1 }
0x1019   : > { %v13264_v42 = vpop.f32.mrb[2].mxu1 }
0x101a   : > { %v13265_v34 = vadd.f32 %v13264_v42, %v13154_v33  ;;  %v17730_v9 = vpop.f32.mrb[3].mxu1 }
0x101b   : > { %v443_v9 = vld [vmem:[%s25013_s6] sm:$0xff] }
0x101d   : > { %v13270_v63 = vpop.f32.mrb[4].mxu1 }
0x101e   : > { %v13271_v38 = vadd.f32 %v13270_v63, %v13162_v7  ;;  %v17733_v37 = vpop.f32.mrb[5].mxu1  ;;  %v444_v63 = vld [vmem:[%s25013_s6 + $0x8] sm:$0xff] }
0x101f   : > { %v13494_v37 = vand.u32 4294901760, %v444_v63 }
0x1021   : > { %v13276_v12 = vpop.f32.mrb[6].mxu1 }
0x1022   : > { %v13277_v18 = vadd.f32 %v13276_v12, %v13170_v45  ;;  %v17736_v24 = vpop.f32.mrb[7].mxu1 }
0x1023   : > { %v446_v24 = vld [vmem:[%s25013_s6 + $0x18] sm:$0xff] }
0x1025   : > { %v13351_v57 = vpop.f32.mrb[8].mxu1 }
0x1026   : > { %v13352_v40 = vadd.f32 %v13351_v57, %v13253_v14  ;;  %v17747_v27 = vpop.f32.mrb[9].mxu1 }
0x1028   : > { %v13379_v32 = vadd.f32 %v19577_v49, %v13352_v40  ;;  %v13500_v40 = vand.u32 4294901760, %v446_v24 }
0x1029   : > { %v13357_v46 = vpop.f32.mrb[10].mxu1 }
0x102a   : > { %v13358_v19 = vadd.f32 %v13357_v46, %v13259_v53  ;;  %v17750_v3 = vpop.f32.mrb[11].mxu1  ;;  %v13386_v61 = vsel %vm464_vm1, %v13379_v32, 0.0 }
0x102b   : > { %13387 = vadd.xlane.f32.xlu0 %v13386_v61 }
0x102c   : > { %v13380_v4 = vadd.f32 %v19578_v2, %v13358_v19  ;;  %v24533_v19 = vsub.f32 %v446_v24, %v13500_v40 }
0x102d   : > { %v13363_v29 = vpop.f32.mrb[12].mxu1 }
0x102e   : > { %v13364_v59 = vadd.f32 %v13363_v29, %v13265_v34  ;;  %v17753_v58 = vpop.f32.mrb[13].mxu1  ;;  %v13389_v17 = vsel %vm464_vm1, %v13380_v4, 0.0 }
0x102f   : > { %13390 = vadd.xlane.f32.xlu1 %v13389_v17  ;;  %v13633_v17 = vand.u32 4294901760, %v24533_v19 }
0x1030   : > { %v13381_v5 = vadd.f32 %v19579_v56, %v13364_v59 }
0x1031   : > { %v13369_v55 = vpop.f32.mrb[14].mxu1 }
0x1032   : > { %v13370_v28 = vadd.f32 %v13369_v55, %v13271_v38  ;;  %v17756_v10 = vpop.f32.mrb[15].mxu1  ;;  %v13392_v35 = vsel %vm464_vm1, %v13381_v5, 0.0  ;;  %v13491_v38 = vand.u32 4294901760, %v443_v9  ;;  %v13634_v55 = vsub.f32 %v24533_v19, %v13633_v17 }
0x1033   : > { %13393 = vadd.xlane.f32.xlu0 %v13392_v35 }
0x1034   : > { %v13382_v43 = vadd.f32 %v19580_v52, %v13370_v28  ;;  %v24513_v12 = vpack.c.bf16 %v13494_v37, %v13491_v38  ;;  %v24527_v49 = vsub.f32 %v443_v9, %v13491_v38  ;;  %v13635_v10 = vand.u32 4294901760, %v13634_v55 }
0x1035   : > { %v13375_v62 = vpop.f32.mrb[16].mxu1 }
0x1036   : > { %v13376_v54 = vadd.f32 %v13375_v62, %v13277_v18  ;;  %v17759_v31 = vpop.f32.mrb[17].mxu1  ;;  %v13395_v11 = vsel %vm464_vm1, %v13382_v43, 0.0  ;;  %v445_v18 = vld [vmem:[%s25013_s6 + $0x10] sm:$0xff]  ;;  %18438 = vmatpush3.bf16.msra.mxu1 %v24513_v12  ;;  %v13612_v3 = vand.u32 4294901760, %v24527_v49 }
0x1037   : > { %13396 = vadd.xlane.f32.xlu0 %v13395_v11  ;;  %v13497_v57 = vand.u32 4294901760, %v445_v18  ;;  %18439 = vmatprep.subr.bf16.mxu1 %v26126_v22 }
0x1038   : > { %v13383_v47 = vadd.f32 %v19581_v15, %v13376_v54  ;;  %v13613_v2 = vsub.f32 %v24527_v49, %v13612_v3 }
0x1039   : > { %v24523_v27 = vpack.c.bf16 %v13500_v40, %v13497_v57  ;;  %v24531_v46 = vsub.f32 %v445_v18, %v13497_v57 }
0x103a   : > { %v13399_v39 = vsel %vm13398_vm5, %v13383_v47, 0.0  ;;  %v13614_v29 = vand.u32 4294901760, %v13613_v2 }
0x103b   : > { %13400 = vadd.xlane.f32.xlu1 %v13399_v39  ;;  %18441 = vmatpush3.bf16.msra.mxu1 %v24523_v27  ;;  %v13626_v58 = vand.u32 4294901760, %v24531_v46 }
0x103c   : > { %18442 = vmatprep.subr.bf16.mxu1 %v26126_v22 }
0x103d   : > { %v24553_v54 = vpack.c.bf16 %v13633_v17, %v13626_v58 }
0x10b8   : > { %v13388_v26 = vpop.xlane.xlu0 %13387 }
0x10b9   : > { %v13403_v25 = vmul.f32 0.03125, %v13388_v26 }
0x10bb   : > { %v24482_v51 = vsub.f32 %v13379_v32, %v13403_v25  ;;  %v24529_v32 = vsub.f32 %v444_v63, %v13494_v37 }
0x10bc   : > { %v13391_v41 = vpop.xlane.xlu1 %13390 }
0x10bd   : > { %v13404_v8 = vmul.f32 0.03125, %v13391_v41  ;;  %v13413_v21 = vmul.f32 %v24482_v51, %v24482_v51  ;;  %v13619_v61 = vand.u32 4294901760, %v24529_v32  ;;  %v18449_v52 = vpack.c.bf16 %v24529_v32, %v24527_v49 }
0x10bf   : > { %v24486_v16 = vsub.f32 %v13380_v4, %v13404_v8  ;;  %v13418_v20 = vsel %vm464_vm1, %v13413_v21, 0.0  ;;  %v13620_v4 = vsub.f32 %v24529_v32, %v13619_v61  ;;  %v24551_v62 = vpack.c.bf16 %v13619_v61, %v13612_v3 }
0x10c0   : > { %v13394_v60 = vpop.xlane.xlu0 %13393  ;;  %13419 = vadd.xlane.f32.xlu0 %v13418_v20 }
0x10c1   : > { %v13405_v33 = vmul.f32 0.03125, %v13394_v60  ;;  %v13414_v0 = vmul.f32 %v24486_v16, %v24486_v16  ;;  %v13621_v59 = vand.u32 4294901760, %v13620_v4 }
0x10c3   : > { %v24491_v50 = vsub.f32 %v13381_v5, %v13405_v33  ;;  %v13421_v7 = vsel %vm464_vm1, %v13414_v0, 0.0  ;;  %v24541_v56 = vpack.c.bf16 %v13621_v59, %v13614_v29  ;;  %v13627_v5 = vsub.f32 %v24531_v46, %v13626_v58  ;;  %v15112_v33 = vld [vmem:[%s25009_s2 + $0x112] ss:$0 sm:$0xff] }
0x10c4   : > { %v13397_v23 = vpop.xlane.xlu0 %13396  ;;  %13422 = vadd.xlane.f32.xlu1 %v13421_v7 }
0x10c5   : > { %v13406_v44 = vmul.f32 0.03125, %v13397_v23  ;;  %v13415_v45 = vmul.f32 %v24491_v50, %v24491_v50  ;;  %v13628_v28 = vand.u32 4294901760, %v13627_v5 }
0x10c7   : > { %v24496_v6 = vsub.f32 %v13382_v43, %v13406_v44  ;;  %v13424_v36 = vsel %vm464_vm1, %v13415_v45, 0.0  ;;  %v24545_v35 = vpack.c.bf16 %v13635_v10, %v13628_v28  ;;  %v18452_v43 = vpack.c.bf16 %v24533_v19, %v24531_v46  ;;  %v15113_v44 = vld [vmem:[%s25009_s2 + $0x113] ss:$0 sm:$0xff] }
0x10c8   : > { %13425 = vadd.xlane.f32.xlu0 %v13424_v36  ;;  %v13401_v14 = vpop.xlane.xlu1 %13400 }
0x10c9   : > { %v13407_v13 = vmul.f32 0.03125, %v13401_v14  ;;  %v13416_v1 = vmul.f32 %v24496_v6, %v24496_v6 }
0x10cb   : > { %v24501_v53 = vsub.f32 %v13383_v47, %v13407_v13  ;;  %v13427_v30 = vsel %vm464_vm1, %v13416_v1, 0.0 }
0x10cc   : > { %13428 = vadd.xlane.f32.xlu1 %v13427_v30 }
0x10cd   : > { %v13417_v42 = vmul.f32 %v24501_v53, %v24501_v53 }
0x10cf   : > { %v13430_v34 = vsel %vm13398_vm5, %v13417_v42, 0.0  ;;  %v303_v42 = vld [vmem:[%s25009_s2 + $0x20] sm:$0xff] }
0x10d0   : > { %13431 = vadd.xlane.f32.xlu0 %v13430_v34  ;;  %v305_v34 = vld [vmem:[%s25009_s2 + $0x30] sm:$0xff]  ;;  %v14174_v38 = vand.u32 4294901760, %v303_v42 }
0x10d1   : > { %v14180_v57 = vand.u32 4294901760, %v305_v34 }
0x10d2   : > { %v24586_v4 = vsub.f32 %v303_v42, %v14174_v38 }
0x10d3   : > { %v24593_v58 = vsub.f32 %v305_v34, %v14180_v57 }
0x10d4   : > { %v14299_v49 = vand.u32 4294901760, %v24586_v4 }
0x114d   : > { %v13420_v31 = vpop.xlane.xlu0 %13419 }
0x114e   : > { %v13433_v11 = vmul.f32 0.03125, %v13420_v31 }
0x1150   : > { %v13438_v15 = vadd.f32 1e-05, %v13433_v11 }
0x1151   : > { %v13423_v47 = vpop.xlane.xlu1 %13422 }
0x1152   : > { %19485 = vrsqrt.f32 %v13438_v15  ;;  %v13434_v39 = vmul.f32 0.03125, %v13423_v47 }
0x1154   : > { %v13439_v26 = vadd.f32 1e-05, %v13434_v39 }
0x1155   : > { %v13426_v25 = vpop.xlane.xlu0 %13425 }
0x1156   : > { %19487 = vrsqrt.f32 %v13439_v26  ;;  %v13435_v41 = vmul.f32 0.03125, %v13426_v25 }
0x1158   : > { %v13440_v8 = vadd.f32 1e-05, %v13435_v41 }
0x1159   : > { %v13429_v21 = vpop.xlane.xlu1 %13428 }
0x115a   : > { %19489 = vrsqrt.f32 %v13440_v8  ;;  %v13436_v20 = vmul.f32 0.03125, %v13429_v21 }
0x115c   : > { %v19486_v60 = vpop.eup %19485  ;;  %v13441_v0 = vadd.f32 1e-05, %v13436_v20 }
0x115d   : > { %v13448_v7 = vmul.f32 %v19486_v60, %v24482_v51  ;;  %v13432_v23 = vpop.xlane.xlu0 %13431  ;;  %v304_v51 = vld [vmem:[%s25009_s2 + $0x28] sm:$0xff] }
0x115e   : > { %19491 = vrsqrt.f32 %v13441_v0  ;;  %v13437_v45 = vmul.f32 0.03125, %v13432_v23  ;;  %v14177_v37 = vand.u32 4294901760, %v304_v51 }
0x115f   : > { %v13457_v36 = vmul.f32 %v15112_v33, %v13448_v7 }
0x1160   : > { %v19488_v14 = vpop.eup %19487  ;;  %v13442_v13 = vadd.f32 1e-05, %v13437_v45  ;;  %v24584_v2 = vpack.c.bf16 %v14177_v37, %v14174_v38  ;;  %v24591_v59 = vsub.f32 %v304_v51, %v14177_v37 }
0x1161   : > { %v24562_v1 = vadd.f32 %v15113_v44, %v13457_v36  ;;  %v13449_v30 = vmul.f32 %v19488_v14, %v24486_v16  ;;  %v306_v16 = vld [vmem:[%s25009_s2 + $0x38] sm:$0xff] }
0x1162   : > { %19493 = vrsqrt.f32 %v13442_v13  ;;  %v14183_v40 = vand.u32 4294901760, %v306_v16  ;;  %18474 = vmatpush3.bf16.msra.mxu0 %v24584_v2  ;;  %v14306_v32 = vand.u32 4294901760, %v24591_v59 }
0x1163   : > { %v13476_v9 = vsel %vm464_vm1, %v24562_v1, 0  ;;  %v13458_v63 = vmul.f32 %v15112_v33, %v13449_v30  ;;  %18475 = vmatprep.subr.bf16.mxu0 %v26126_v22 }
0x1164   : > { %v19490_v18 = vpop.eup %19489  ;;  %v24579_v24 = vand.u32 4294901760, %v13476_v9  ;;  %v24598_v55 = vpack.c.bf16 %v14183_v40, %v14180_v57  ;;  %v14307_v46 = vsub.f32 %v24591_v59, %v14306_v32 }
0x1165   : > { %v24581_v3 = vadd.f32 %v15113_v44, %v13458_v63  ;;  %v13450_v61 = vmul.f32 %v19490_v18, %v24491_v50  ;;  %v24600_v50 = vsub.f32 %v306_v16, %v14183_v40 }
0x1166   : > { %v24589_v29 = vsub.f32 %v13476_v9, %v24579_v24  ;;  %18477 = vmatpush3.bf16.msra.mxu0 %v24598_v55 }
0x1167   : > { %v13459_v17 = vmul.f32 %v15112_v33, %v13450_v61  ;;  %v13479_v5 = vsel %vm464_vm1, %v24581_v3, 0  ;;  %18478 = vmatprep.subr.bf16.mxu0 %v26126_v22  ;;  %v14320_v19 = vand.u32 4294901760, %v24600_v50  ;;  %v308_v61 = vld [vmem:[%s25009_s2 + $0x48] sm:$0xff] }
0x1168   : > { %v19492_v28 = vpop.eup %19491  ;;  %v13561_v10 = vand.u32 4294901760, %v24589_v29  ;;  %v24603_v31 = vand.u32 4294901760, %v13479_v5 }
0x1169   : > { %v24606_v11 = vadd.f32 %v15113_v44, %v13459_v17  ;;  %v13451_v15 = vmul.f32 %v19492_v28, %v24496_v6  ;;  %v14189_v17 = vand.u32 4294901760, %v308_v61 }
0x116a   : > { %v13562_v47 = vsub.f32 %v24589_v29, %v13561_v10  ;;  %v24613_v39 = vsub.f32 %v13479_v5, %v24603_v31 }
0x116b   : > { %v13460_v26 = vmul.f32 %v15112_v33, %v13451_v15  ;;  %v13482_v25 = vsel %vm464_vm1, %v24606_v11, 0  ;;  %v24777_v28 = vsub.f32 %v308_v61, %v14189_v17 }
0x116c   : > { %v19494_v41 = vpop.eup %19493  ;;  %v13563_v8 = vand.u32 4294901760, %v13562_v47  ;;  %v13571_v21 = vand.u32 4294901760, %v24613_v39  ;;  %v24619_v20 = vand.u32 4294901760, %v13482_v25 }
0x116d   : > { %v24622_v6 = vadd.f32 %v15113_v44, %v13460_v26  ;;  %v13452_v60 = vmul.f32 %v19494_v41, %v24501_v53  ;;  %v14334_v47 = vand.u32 4294901760, %v24777_v28 }
0x116e   : > { %17769 = vmatmul.mubr.f32.vlgmr.msra.gmra.mrb[18].mxu1 %v13563_v8  ;;  %v13572_v0 = vsub.f32 %v24613_v39, %v13571_v21  ;;  %v24629_v7 = vsub.f32 %v13482_v25, %v24619_v20 }
0x116f   : > { %v13461_v23 = vmul.f32 %v15112_v33, %v13452_v60  ;;  %17771 = vmatprep.mubr.msk.f32.mxu1 %vm19591_vm0, %v26135_v48  ;;  %18444 = vmatpush3.bf16.msra.mxu1 %v24541_v56  ;;  %v13485_v45 = vsel %vm464_vm1, %v24622_v6, 0  ;;  %v14335_v41 = vsub.f32 %v24777_v28, %v14334_v47 }
0x1170   : > { %v13573_v36 = vand.u32 4294901760, %v13572_v0  ;;  %v13581_v53 = vand.u32 4294901760, %v24629_v7  ;;  %v24637_v14 = vand.u32 4294901760, %v13485_v45  ;;  %18445 = vmatprep.subr.bf16.mxu1 %v26126_v22 }
0x1171   : > { %v24640_v13 = vadd.f32 %v15113_v44, %v13461_v23  ;;  %v14336_v60 = vand.u32 4294901760, %v14335_v41 }
0x1172   : > { %17772 = vmatmul.mubr.f32.gmra.mrb[20].mxu1 %v13573_v36  ;;  %v13582_v33 = vsub.f32 %v24629_v7, %v13581_v53  ;;  %v13590_v30 = vsub.f32 %v13485_v45, %v24637_v14 }
0x1173   : > { %17774 = vmatprep.mubr.msk.f32.mxu1 %vm19591_vm0, %v26135_v48  ;;  %v13488_v56 = vsel %vm464_vm1, %v24640_v13, 0  ;;  %18447 = vmatpush3.bf16.msra.mxu1 %v24545_v35 }
0x1174   : > { %v13583_v42 = vand.u32 4294901760, %v13582_v33  ;;  %v13591_v51 = vand.u32 4294901760, %v13590_v30  ;;  %v24649_v34 = vand.u32 4294901760, %v13488_v56  ;;  %18448 = vmatprep.subr.bf16.mxu1 %v26126_v22 }
0x1176   : > { %17775 = vmatmul.mubr.f32.gmra.mrb[22].mxu1 %v13583_v42  ;;  %v13592_v44 = vsub.f32 %v13590_v30, %v13591_v51  ;;  %v13600_v9 = vsub.f32 %v13488_v56, %v24649_v34 }
0x1177   : > { %17777 = vmatprep.mubr.msk.f32.mxu1 %vm19591_vm0, %v26135_v48 }
0x1178   : > { %v13593_v63 = vand.u32 4294901760, %v13592_v44  ;;  %v13601_v38 = vand.u32 4294901760, %v13600_v9 }
0x117a   : > { %17778 = vmatmul.mubr.f32.gmra.mrb[24].mxu1 %v13593_v63  ;;  %v13602_v37 = vsub.f32 %v13600_v9, %v13601_v38 }
0x117b   : > { %17780 = vmatprep.mubr.msk.f32.mxu1 %vm19591_vm0, %v26135_v48 }
0x117c   : > { %v13603_v35 = vand.u32 4294901760, %v13602_v37 }
0x117e   : > { %17781 = vmatmul.mubr.f32.gmra.mrb[26].mxu1 %v13603_v35 }
0x117f   : > { %17791 = vmatprep.mubr.msk.f32.mxu1 %vm19591_vm0, %v26135_v48 }
0x1182   : > { %17792 = vmatmul.mubr.f32.vlgmr.msra.gmra.mrb[18].mxu1 %v24579_v24 }
0x1183   : > { %17794 = vmatprep.mubr.msk.f32.mxu1 %vm19591_vm0, %v26135_v48  ;;  %18450 = vmatpush3.bf16.msra.mxu1 %v18449_v52 }
0x1184   : > { %18451 = vmatprep.subr.bf16.mxu1 %v26126_v22 }
0x1186   : > { %17795 = vmatmul.mubr.f32.gmra.mrb[20].mxu1 %v24603_v31 }
0x1187   : > { %17797 = vmatprep.mubr.msk.f32.mxu1 %vm19591_vm0, %v26135_v48  ;;  %18453 = vmatpush3.bf16.msra.mxu1 %v18452_v43  ;;  %v14308_v43 = vand.u32 4294901760, %v14307_v46 }
0x1188   : > { %18454 = vmatprep.subr.bf16.mxu1 %v26126_v22 }
0x118a   : > { %17798 = vmatmul.mubr.f32.gmra.mrb[22].mxu1 %v24619_v20 }
0x118b   : > { %17800 = vmatprep.mubr.msk.f32.mxu1 %vm19591_vm0, %v26135_v48 }
0x118e   : > { %17801 = vmatmul.mubr.f32.gmra.mrb[24].mxu1 %v24637_v14 }
0x118f   : > { %17803 = vmatprep.mubr.msk.f32.mxu1 %vm19591_vm0, %v26135_v48 }
0x1192   : > { %17804 = vmatmul.mubr.f32.gmra.mrb[26].mxu1 %v24649_v34 }
0x1193   : > { %17814 = vmatprep.mubr.msk.f32.mxu1 %vm19591_vm0, %v26135_v48 }
0x1196   : > { %17815 = vmatmul.mubr.f32.vlgmr.msra.gmra.mrb[18].mxu1 %v24589_v29 }
0x1197   : > { %17817 = vmatprep.mubr.msk.f32.mxu1 %vm19591_vm0, %v26135_v48  ;;  %18456 = vmatpush3.bf16.msra.mxu1 %v24513_v12 }
0x1198   : > { %18457 = vmatprep.subr.bf16.mxu1 %v26126_v22 }
0x119a   : > { %17818 = vmatmul.mubr.f32.gmra.mrb[20].mxu1 %v24613_v39 }
0x119b   : > { %17820 = vmatprep.mubr.msk.f32.mxu1 %vm19591_vm0, %v26135_v48  ;;  %18459 = vmatpush3.bf16.msra.mxu1 %v24523_v27 }
0x119c   : > { %18460 = vmatprep.subr.bf16.mxu1 %v26126_v22 }
0x119e   : > { %17821 = vmatmul.mubr.f32.gmra.mrb[22].mxu1 %v24629_v7 }
0x119f   : > { %17823 = vmatprep.mubr.msk.f32.mxu1 %vm19591_vm0, %v26135_v48 }
0x11a2   : > { %17824 = vmatmul.mubr.f32.gmra.mrb[24].mxu1 %v13590_v30 }
0x11a3   : > { %17826 = vmatprep.mubr.msk.f32.mxu1 %vm19591_vm0, %v26135_v48 }
0x11a6   : > { %17827 = vmatmul.mubr.f32.gmra.mrb[26].mxu1 %v13600_v9  ;;  %v15114_v9 = vld [vmem:[%s25013_s6 + $0x20] ss:$0 sm:$0xff] }
0x11a7   : > { %17837 = vmatprep.mubr.msk.f32.mxu1 %vm19591_vm0, %v26135_v48 }
0x11aa   : > { %17838 = vmatmul.mubr.f32.vlgmr.msra.gmra.mrb[18].mxu1 %v13561_v10  ;;  %v309_v10 = vld [vmem:[%s25009_s2 + $0x50] sm:$0xff] }
0x11ab   : > { %17840 = vmatprep.mubr.msk.f32.mxu1 %vm19591_vm0, %v26135_v48  ;;  %18462 = vmatpush3.bf16.msra.mxu1 %v24551_v62  ;;  %v14192_v39 = vand.u32 4294901760, %v309_v10 }
0x11ac   : > { %18463 = vmatprep.subr.bf16.mxu1 %v26126_v22 }
0x11ad   : > { %v24789_v8 = vsub.f32 %v309_v10, %v14192_v39 }
0x11ae   : > { %17841 = vmatmul.mubr.f32.gmra.mrb[20].mxu1 %v13571_v21 }
0x11af   : > { %17843 = vmatprep.mubr.msk.f32.mxu1 %vm19591_vm0, %v26135_v48  ;;  %18465 = vmatpush3.bf16.msra.mxu1 %v24553_v54  ;;  %v14321_v54 = vsub.f32 %v24600_v50, %v14320_v19  ;;  %v14341_v0 = vand.u32 4294901760, %v24789_v8 }
0x11b0   : > { %18466 = vmatprep.subr.bf16.mxu1 %v26126_v22 }
0x11b1   : > { %v14322_v57 = vand.u32 4294901760, %v14321_v54  ;;  %v14342_v45 = vsub.f32 %v24789_v8, %v14341_v0 }
0x11b2   : > { %17844 = vmatmul.mubr.f32.gmra.mrb[22].mxu1 %v13581_v53 }
0x11b3   : > { %17846 = vmatprep.mubr.msk.f32.mxu1 %vm19591_vm0, %v26135_v48  ;;  %v14343_v53 = vand.u32 4294901760, %v14342_v45 }
0x11b6   : > { %17847 = vmatmul.mubr.f32.gmra.mrb[24].mxu1 %v13591_v51 }
0x11b7   : > { %17849 = vmatprep.mubr.msk.f32.mxu1 %vm19591_vm0, %v26135_v48 }
0x11ba   : > { %17850 = vmatmul.mubr.f32.gmra.mrb[26].mxu1 %v13601_v38 }
0x11bb   : > { %17860 = vmatprep.mubr.msk.f32.mxu1 %vm19591_vm0, %v26135_v48 }
0x11be   : > { %17861 = vmatmul.mubr.f32.vlgmr.msra.gmra.mrb[18].mxu1 %v24579_v24 }
0x11bf   : > { %17863 = vmatprep.mubr.msk.f32.mxu1 %vm19591_vm0, %v26135_v48  ;;  %18468 = vmatpush3.bf16.msra.mxu1 %v24513_v12  ;;  %v14300_v12 = vsub.f32 %v24586_v4, %v14299_v49 }
0x11c0   : > { %18469 = vmatprep.subr.bf16.mxu1 %v26126_v22 }
0x11c1   : > { %v14301_v52 = vand.u32 4294901760, %v14300_v12 }
0x11c2   : > { %17864 = vmatmul.mubr.f32.gmra.mrb[20].mxu1 %v24603_v31 }
0x11c3   : > { %17866 = vmatprep.mubr.msk.f32.mxu1 %vm19591_vm0, %v26135_v48  ;;  %18471 = vmatpush3.bf16.msra.mxu1 %v24523_v27  ;;  %v14313_v27 = vand.u32 4294901760, %v24593_v58  ;;  %v18485_v16 = vpack.c.bf16 %v14308_v43, %v14301_v52 }
0x11c4   : > { %18484 = vmatprep.subr.bf16.mxu1 %v26126_v22 }
0x11c5   : > { %v14314_v62 = vsub.f32 %v24593_v58, %v14313_v27 }
0x11c6   : > { %17867 = vmatmul.mubr.f32.gmra.mrb[22].mxu1 %v24619_v20 }
0x11c7   : > { %17869 = vmatprep.mubr.msk.f32.mxu1 %vm19591_vm0, %v26135_v48  ;;  %v14315_v18 = vand.u32 4294901760, %v14314_v62 }
0x11c9   : > { %v18488_v40 = vpack.c.bf16 %v14322_v57, %v14315_v18 }
0x11ca   : > { %17870 = vmatmul.mubr.f32.gmra.mrb[24].mxu1 %v24637_v14 }
0x11cb   : > { %17872 = vmatprep.mubr.msk.f32.mxu1 %vm19591_vm0, %v26135_v48 }
0x11ce   : > { %17873 = vmatmul.mubr.f32.gmra.mrb[26].mxu1 %v24649_v34 }
0x11cf   : > { %17883 = vmatprep.mubr.msk.f32.mxu1 %vm19591_vm0, %v26135_v48 }
0x11d2   : > { %17884 = vmatmul.mubr.f32.vlgmr.msra.gmra.mrb[18].mxu1 %v24579_v24  ;;  %v307_v24 = vld [vmem:[%s25009_s2 + $0x40] sm:$0xff] }
0x11d3   : > { %17886 = vmatprep.mubr.msk.f32.mxu1 %vm19591_vm0, %v26135_v48  ;;  %18486 = vmatpush3.bf16.msra.mxu1 %v18485_v16  ;;  %v14186_v29 = vand.u32 4294901760, %v307_v24 }
0x11d4   : > { %18487 = vmatprep.subr.bf16.mxu1 %v26126_v22 }
0x11d5   : > { %v24775_v5 = vsub.f32 %v307_v24, %v14186_v29  ;;  %v24799_v30 = vpack.c.bf16 %v14189_v17, %v14186_v29 }
0x11d6   : > { %17887 = vmatmul.mubr.f32.gmra.mrb[20].mxu1 %v24603_v31  ;;  %v310_v31 = vld [vmem:[%s25009_s2 + $0x58] sm:$0xff] }
0x11d7   : > { %17889 = vmatprep.mubr.msk.f32.mxu1 %vm19591_vm0, %v26135_v48  ;;  %18489 = vmatpush3.bf16.msra.mxu1 %v18488_v40  ;;  %v14327_v15 = vand.u32 4294901760, %v24775_v5  ;;  %v14195_v26 = vand.u32 4294901760, %v310_v31  ;;  %v18503_v42 = vpack.c.bf16 %v24777_v28, %v24775_v5 }
0x11d8   : > { %18490 = vmatprep.subr.bf16.mxu1 %v26126_v22  ;;  %18480 = vmatpush3.bf16.msra.mxu0 %v24799_v30 }
0x11d9   : > { %v14328_v25 = vsub.f32 %v24775_v5, %v14327_v15  ;;  %v24791_v21 = vsub.f32 %v310_v31, %v14195_v26  ;;  %18481 = vmatprep.subr.bf16.mxu0 %v26126_v22  ;;  %v24803_v56 = vpack.c.bf16 %v14195_v26, %v14192_v39  ;;  %v18521_v5 = vpack.c.bf16 %v14306_v32, %v14299_v49 }
0x11da   : > { %17890 = vmatmul.mubr.f32.gmra.mrb[22].mxu1 %v24619_v20 }
0x11db   : > { %17892 = vmatprep.mubr.msk.f32.mxu1 %vm19591_vm0, %v26135_v48  ;;  %v14329_v20 = vand.u32 4294901760, %v14328_v25  ;;  %v14348_v7 = vand.u32 4294901760, %v24791_v21  ;;  %v18506_v51 = vpack.c.bf16 %v24791_v21, %v24789_v8 }
0x11dc   : > { %18483 = vmatpush3.bf16.msra.mxu0 %v24803_v56 }
0x11dd   : > { %v18491_v23 = vpack.c.bf16 %v14336_v60, %v14329_v20  ;;  %v14349_v36 = vsub.f32 %v24791_v21, %v14348_v7  ;;  %18496 = vmatprep.subr.bf16.mxu0 %v26126_v22  ;;  %v24813_v44 = vpack.c.bf16 %v14348_v7, %v14341_v0  ;;  %v18497_v60 = vpack.c.bf16 %v24591_v59, %v24586_v4 }
0x11de   : > { %17893 = vmatmul.mubr.f32.gmra.mrb[24].mxu1 %v24637_v14 }
0x11df   : > { %17895 = vmatprep.mubr.msk.f32.mxu1 %vm19591_vm0, %v26135_v48  ;;  %18492 = vmatpush3.bf16.msra.mxu1 %v18491_v23  ;;  %v14350_v14 = vand.u32 4294901760, %v14349_v36 }
0x11e0   : > { %18493 = vmatprep.subr.bf16.mxu1 %v26126_v22 }
0x11e1   : > { %v18494_v33 = vpack.c.bf16 %v14350_v14, %v14343_v53 }
0x11e2   : > { %17896 = vmatmul.mubr.f32.gmra.mrb[26].mxu1 %v24649_v34  ;;  %v24811_v34 = vpack.c.bf16 %v14334_v47, %v14327_v15 }
0x11e3   : > { %17945 = vmatprep.mubr.msk.f32.mxu1 %vm19591_vm0, %v26135_v48  ;;  %18495 = vmatpush3.bf16.msra.mxu1 %v18494_v33 }
0x11e4   : > { %18508 = vmatprep.subr.bf16.mxu1 %v26126_v22 }
0x12a5   : > { %v14119_v63 = vpop.f32.mrb[18].mxu1 }
0x12a6   : > { %v18555_v38 = vadd.f32 %v15114_v9, %v14119_v63  ;;  %v17885_v37 = vpop.f32.mrb[19].mxu1 }
0x12a7   : > { %v18500_v37 = vpack.c.bf16 %v24600_v50, %v24593_v58 }
0x12a8   : > { %v14147_v35 = vmax.f32 %v18555_v38, 0.0 }
0x12a9   : > { %v14125_v12 = vpop.f32.mrb[20].mxu1 }
0x12aa   : > { %v14159_v46 = vsel %vm14157_vm6, %v14147_v35, 0  ;;  %v18556_v52 = vadd.f32 %v15114_v9, %v14125_v12  ;;  %v17888_v43 = vpop.f32.mrb[21].mxu1 }
0x12ab   : > { %v24819_v62 = vand.u32 4294901760, %v14159_v46 }
0x12ac   : > { %v14148_v54 = vmax.f32 %v18556_v52, 0.0 }
0x12ad   : > { %v24822_v16 = vsub.f32 %v14159_v46, %v24819_v62  ;;  %v14131_v18 = vpop.f32.mrb[22].mxu1  ;;  %17946 = vmatmul.mubr.f32.vlgmr.msra.gmra.mrb[28].mxu1 %v24819_v62 }
0x12ae   : > { %v14162_v57 = vsel %vm14157_vm6, %v14148_v54, 0  ;;  %v18557_v40 = vadd.f32 %v15114_v9, %v14131_v18  ;;  %v17891_v24 = vpop.f32.mrb[23].mxu1  ;;  %17948 = vmatprep.mubr.msk.f32.mxu1 %vm19591_vm0, %v26135_v48  ;;  %18510 = vmatpush3.bf16.msra.mxu1 %v24584_v2 }
0x12af   : > { %v14248_v61 = vand.u32 4294901760, %v24822_v16  ;;  %v24830_v29 = vand.u32 4294901760, %v14162_v57  ;;  %18511 = vmatprep.subr.bf16.mxu1 %v26126_v22 }
0x12b0   : > { %v14149_v17 = vmax.f32 %v18557_v40, 0.0 }
0x12b1   : > { %v14249_v10 = vsub.f32 %v24822_v16, %v14248_v61  ;;  %v24837_v31 = vsub.f32 %v14162_v57, %v24830_v29  ;;  %v14137_v15 = vpop.f32.mrb[24].mxu1  ;;  %17949 = vmatmul.mubr.f32.gmra.mrb[30].mxu1 %v24830_v29 }
0x12b2   : > { %v14165_v47 = vsel %vm14157_vm6, %v14149_v17, 0  ;;  %v18558_v39 = vadd.f32 %v15114_v9, %v14137_v15  ;;  %v17894_v26 = vpop.f32.mrb[25].mxu1  ;;  %17951 = vmatprep.mubr.msk.f32.mxu1 %vm19591_vm0, %v26135_v48  ;;  %18513 = vmatpush3.bf16.msra.mxu1 %v24598_v55 }
0x12b3   : > { %v14250_v25 = vand.u32 4294901760, %v14249_v10  ;;  %v14258_v41 = vand.u32 4294901760, %v24837_v31  ;;  %v24845_v20 = vand.u32 4294901760, %v14165_v47  ;;  %18514 = vmatprep.subr.bf16.mxu1 %v26126_v22 }
0x12b4   : > { %v14150_v0 = vmax.f32 %v18558_v39, 0.0 }
0x12b5   : > { %v14259_v7 = vsub.f32 %v24837_v31, %v14258_v41  ;;  %v24852_v23 = vsub.f32 %v14165_v47, %v24845_v20  ;;  %v14143_v45 = vpop.f32.mrb[26].mxu1  ;;  %17915 = vmatmul.mubr.f32.vlgmr.msra.gmra.mrb[8].mxu0 %v14250_v25  ;;  %17952 = vmatmul.mubr.f32.gmra.mrb[32].mxu1 %v24845_v20 }
0x12b6   : > { %v14168_v36 = vsel %vm14157_vm6, %v14150_v0, 0  ;;  %v18559_v53 = vadd.f32 %v15114_v9, %v14143_v45  ;;  %v17897_v14 = vpop.f32.mrb[27].mxu1  ;;  %17917 = vmatprep.mubr.msk.f32.mxu0 %vm19591_vm0, %v26135_v48  ;;  %17954 = vmatprep.mubr.msk.f32.mxu1 %vm19591_vm0, %v26135_v48 }
0x12b7   : > { %v14260_v33 = vand.u32 4294901760, %v14259_v7  ;;  %v14268_v63 = vand.u32 4294901760, %v24852_v23  ;;  %v24861_v38 = vand.u32 4294901760, %v14168_v36  ;;  %18498 = vmatpush3.bf16.msra.mxu0 %v18497_v60  ;;  %18516 = vmatpush3.bf16.msra.mxu1 %v24799_v30 }
0x12b8   : > { %v14151_v35 = vmax.f32 %v18559_v53, 0.0  ;;  %18499 = vmatprep.subr.bf16.mxu0 %v26126_v22  ;;  %18517 = vmatprep.subr.bf16.mxu1 %v26126_v22 }
0x12b9   : > { %v14269_v9 = vsub.f32 %v24852_v23, %v14268_v63  ;;  %v14277_v12 = vsub.f32 %v14168_v36, %v24861_v38  ;;  %17918 = vmatmul.mubr.f32.gmra.mrb[10].mxu0 %v14260_v33  ;;  %17955 = vmatmul.mubr.f32.gmra.mrb[34].mxu1 %v24861_v38 }
0x12ba   : > { %v14171_v46 = vsel %vm14157_vm6, %v14151_v35, 0  ;;  %17920 = vmatprep.mubr.msk.f32.mxu0 %vm19591_vm0, %v26135_v48  ;;  %17957 = vmatprep.mubr.msk.f32.mxu1 %vm19591_vm0, %v26135_v48 }
0x12bb   : > { %v14270_v52 = vand.u32 4294901760, %v14269_v9  ;;  %v14278_v43 = vand.u32 4294901760, %v14277_v12  ;;  %v24876_v54 = vand.u32 4294901760, %v14171_v46  ;;  %18501 = vmatpush3.bf16.msra.mxu0 %v18500_v37  ;;  %18519 = vmatpush3.bf16.msra.mxu1 %v24803_v56 }
0x12bc   : > { %18502 = vmatprep.subr.bf16.mxu0 %v26126_v22  ;;  %18532 = vmatprep.subr.bf16.mxu1 %v26126_v22 }
0x12bd   : > { %v14279_v18 = vsub.f32 %v14277_v12, %v14278_v43  ;;  %v14287_v57 = vsub.f32 %v14171_v46, %v24876_v54  ;;  %17921 = vmatmul.mubr.f32.gmra.mrb[12].mxu0 %v14270_v52  ;;  %17958 = vmatmul.mubr.f32.gmra.mrb[36].mxu1 %v24876_v54 }
0x12be   : > { %17923 = vmatprep.mubr.msk.f32.mxu0 %vm19591_vm0, %v26135_v48  ;;  %18007 = vmatprep.mubr.msk.f32.mxu1 %vm19591_vm0, %v26135_v48 }
0x12bf   : > { %v14280_v40 = vand.u32 4294901760, %v14279_v18  ;;  %v14288_v24 = vand.u32 4294901760, %v14287_v57  ;;  %18504 = vmatpush3.bf16.msra.mxu0 %v18503_v42 }
0x12c0   : > { %18505 = vmatprep.subr.bf16.mxu0 %v26126_v22 }
0x12c1   : > { %v14289_v17 = vsub.f32 %v14287_v57, %v14288_v24  ;;  %17924 = vmatmul.mubr.f32.gmra.mrb[14].mxu0 %v14280_v40  ;;  %18008 = vmatmul.mubr.f32.vlgmr.msra.gmra.mrb[38].mxu1 %v14248_v61 }
0x12c2   : > { %17926 = vmatprep.mubr.msk.f32.mxu0 %vm19591_vm0, %v26135_v48  ;;  %18010 = vmatprep.mubr.msk.f32.mxu1 %vm19591_vm0, %v26135_v48 }
0x12c3   : > { %v14290_v10 = vand.u32 4294901760, %v14289_v17  ;;  %18507 = vmatpush3.bf16.msra.mxu0 %v18506_v51  ;;  %18534 = vmatpush3.bf16.msra.mxu1 %v24584_v2  ;;  %v18524_v2 = vpack.c.bf16 %v14320_v19, %v14313_v27 }
0x12c4   : > { %18535 = vmatprep.subr.bf16.mxu1 %v26126_v22  ;;  %18520 = vmatprep.subr.bf16.mxu0 %v26126_v22 }
0x12c5   : > { %17927 = vmatmul.mubr.f32.gmra.mrb[16].mxu0 %v14290_v10  ;;  %18011 = vmatmul.mubr.f32.gmra.mrb[40].mxu1 %v14258_v41 }
0x12c6   : > { %17976 = vmatprep.mubr.msk.f32.mxu0 %vm19591_vm0, %v26135_v48  ;;  %18013 = vmatprep.mubr.msk.f32.mxu1 %vm19591_vm0, %v26135_v48 }
0x12c7   : > { %18537 = vmatpush3.bf16.msra.mxu1 %v24598_v55  ;;  %v15115_v55 = vld [vmem:[%s25009_s2 + $0x111] ss:$0 sm:$0xff] }
0x12c8   : > { %18538 = vmatprep.subr.bf16.mxu1 %v26126_v22 }
0x12c9   : > { %17977 = vmatmul.mubr.f32.vlgmr.msra.gmra.mrb[18].mxu0 %v24822_v16  ;;  %18014 = vmatmul.mubr.f32.gmra.mrb[42].mxu1 %v14268_v63 }
0x12ca   : > { %17979 = vmatprep.mubr.msk.f32.mxu0 %vm19591_vm0, %v26135_v48  ;;  %18016 = vmatprep.mubr.msk.f32.mxu1 %vm19591_vm0, %v26135_v48 }
0x12cb   : > { %18522 = vmatpush3.bf16.msra.mxu0 %v18521_v5  ;;  %18540 = vmatpush3.bf16.msra.mxu1 %v24799_v30 }
0x12cc   : > { %18523 = vmatprep.subr.bf16.mxu0 %v26126_v22  ;;  %18541 = vmatprep.subr.bf16.mxu1 %v26126_v22 }
0x12cd   : > { %17980 = vmatmul.mubr.f32.gmra.mrb[20].mxu0 %v24837_v31  ;;  %18017 = vmatmul.mubr.f32.gmra.mrb[44].mxu1 %v14278_v43 }
0x12ce   : > { %17982 = vmatprep.mubr.msk.f32.mxu0 %vm19591_vm0, %v26135_v48  ;;  %18019 = vmatprep.mubr.msk.f32.mxu1 %vm19591_vm0, %v26135_v48 }
0x12cf   : > { %18525 = vmatpush3.bf16.msra.mxu0 %v18524_v2  ;;  %18543 = vmatpush3.bf16.msra.mxu1 %v24803_v56 }
0x12d0   : > { %18526 = vmatprep.subr.bf16.mxu0 %v26126_v22 }
0x12d1   : > { %17983 = vmatmul.mubr.f32.gmra.mrb[22].mxu0 %v24852_v23  ;;  %18020 = vmatmul.mubr.f32.gmra.mrb[46].mxu1 %v14288_v24 }
0x12d2   : > { %17985 = vmatprep.mubr.msk.f32.mxu0 %vm19591_vm0, %v26135_v48  ;;  %18069 = vmatprep.mubr.msk.f32.mxu1 %vm19591_vm0, %v26135_v48 }
0x12d3   : > { %18528 = vmatpush3.bf16.msra.mxu0 %v24811_v34 }
0x12d4   : > { %18529 = vmatprep.subr.bf16.mxu0 %v26126_v22 }
0x12d5   : > { %17986 = vmatmul.mubr.f32.gmra.mrb[24].mxu0 %v14277_v12  ;;  %18070 = vmatmul.mubr.f32.vlgmr.msra.gmra.mrb[48].mxu1 %v24819_v62 }
0x12d6   : > { %17988 = vmatprep.mubr.msk.f32.mxu0 %vm19591_vm0, %v26135_v48  ;;  %18072 = vmatprep.mubr.msk.f32.mxu1 %vm19591_vm0, %v26135_v48 }
0x12d7   : > { %18531 = vmatpush3.bf16.msra.mxu0 %v24813_v44 }
0x12d9   : > { %17989 = vmatmul.mubr.f32.gmra.mrb[26].mxu0 %v14287_v57  ;;  %18073 = vmatmul.mubr.f32.gmra.mrb[50].mxu1 %v24830_v29 }
0x12da   : > { %18038 = vmatprep.mubr.msk.f32.mxu0 %vm19591_vm0, %v26135_v48  ;;  %18075 = vmatprep.mubr.msk.f32.mxu1 %vm19591_vm0, %v26135_v48 }
0x12dd   : > { %18039 = vmatmul.mubr.f32.vlgmr.msra.gmra.mrb[28].mxu0 %v24819_v62  ;;  %18076 = vmatmul.mubr.f32.gmra.mrb[52].mxu1 %v24845_v20 }
0x12de   : > { %18041 = vmatprep.mubr.msk.f32.mxu0 %vm19591_vm0, %v26135_v48  ;;  %18078 = vmatprep.mubr.msk.f32.mxu1 %vm19591_vm0, %v26135_v48 }
0x12e1   : > { %18042 = vmatmul.mubr.f32.gmra.mrb[30].mxu0 %v24830_v29  ;;  %18079 = vmatmul.mubr.f32.gmra.mrb[54].mxu1 %v24861_v38 }
0x12e2   : > { %18044 = vmatprep.mubr.msk.f32.mxu0 %vm19591_vm0, %v26135_v48  ;;  %18081 = vmatprep.mubr.msk.f32.mxu1 %vm19591_vm0, %v26135_v48 }
0x12e5   : > { %18045 = vmatmul.mubr.f32.gmra.mrb[32].mxu0 %v24845_v20  ;;  %18082 = vmatmul.mubr.f32.gmra.mrb[56].mxu1 %v24876_v54 }
0x12e6   : > { %18047 = vmatprep.mubr.msk.f32.mxu0 %vm19591_vm0, %v26135_v48 }
0x12e9   : > { %18048 = vmatmul.mubr.f32.gmra.mrb[34].mxu0 %v24861_v38 }
0x12ea   : > { %18050 = vmatprep.mubr.msk.f32.mxu0 %vm19591_vm0, %v26135_v48 }
0x12ed   : > { %18051 = vmatmul.mubr.f32.gmra.mrb[36].mxu0 %v24876_v54 }
0x1380   : > { %v14403_v22 = vpop.f32.mrb[28].mxu1 }
0x1381   : > { %v17947_v4 = vpop.f32.mrb[29].mxu1 }
0x1384   : > { %v14409_v59 = vpop.f32.mrb[30].mxu1 }
0x1385   : > { %v17950_v58 = vpop.f32.mrb[31].mxu1 }
0x1388   : > { %v14252_v50 = vpop.f32.mrb[8].mxu0  ;;  %v14415_v49 = vpop.f32.mrb[32].mxu1 }
0x1389   : > { %v14253_v32 = vadd.f32 %v15115_v55, %v14252_v50  ;;  %v17916_v27 = vpop.f32.mrb[9].mxu0  ;;  %v17953_v19 = vpop.f32.mrb[33].mxu1 }
0x138b   : > { %v14404_v28 = vadd.f32 %v14403_v22, %v14253_v32 }
0x138c   : > { %v14262_v8 = vpop.f32.mrb[10].mxu0  ;;  %v14421_v21 = vpop.f32.mrb[34].mxu1 }
0x138d   : > { %v14263_v30 = vadd.f32 %v15115_v55, %v14262_v8  ;;  %v17919_v48 = vpop.f32.mrb[11].mxu0  ;;  %v17956_v56 = vpop.f32.mrb[35].mxu1 }
0x138f   : > { %v14410_v42 = vadd.f32 %v14409_v59, %v14263_v30 }
0x1390   : > { %v14272_v51 = vpop.f32.mrb[12].mxu0  ;;  %v14427_v34 = vpop.f32.mrb[36].mxu1 }
0x1391   : > { %v14273_v44 = vadd.f32 %v15115_v55, %v14272_v51  ;;  %v17922_v62 = vpop.f32.mrb[13].mxu0  ;;  %v17959_v16 = vpop.f32.mrb[37].mxu1 }
0x1393   : > { %v14416_v61 = vadd.f32 %v14415_v49, %v14273_v44 }
0x1394   : > { %v14282_v29 = vpop.f32.mrb[14].mxu0  ;;  %v14624_v31 = vpop.f32.mrb[38].mxu1 }
0x1395   : > { %v14283_v15 = vadd.f32 %v15115_v55, %v14282_v29  ;;  %v17925_v47 = vpop.f32.mrb[15].mxu0  ;;  %v18009_v39 = vpop.f32.mrb[39].mxu1 }
0x1397   : > { %v14422_v26 = vadd.f32 %v14421_v21, %v14283_v15 }
0x1398   : > { %v14292_v25 = vpop.f32.mrb[16].mxu0  ;;  %v14632_v41 = vpop.f32.mrb[40].mxu1 }
0x1399   : > { %v14293_v20 = vadd.f32 %v15115_v55, %v14292_v25  ;;  %v17928_v60 = vpop.f32.mrb[17].mxu0  ;;  %v18012_v0 = vpop.f32.mrb[41].mxu1 }
0x139b   : > { %v14428_v7 = vadd.f32 %v14427_v34, %v14293_v20 }
0x139c   : > { %v14515_v23 = vpop.f32.mrb[18].mxu0  ;;  %v14640_v45 = vpop.f32.mrb[42].mxu1 }
0x139d   : > { %v14516_v36 = vadd.f32 %v14515_v23, %v14404_v28  ;;  %v17978_v53 = vpop.f32.mrb[19].mxu0  ;;  %v18015_v14 = vpop.f32.mrb[43].mxu1 }
0x139f   : > { %v14625_v33 = vadd.f32 %v14624_v31, %v14516_v36 }
0x13a0   : > { %v14522_v63 = vpop.f32.mrb[20].mxu0  ;;  %v14648_v38 = vpop.f32.mrb[44].mxu1 }
0x13a1   : > { %v14523_v37 = vadd.f32 %v14522_v63, %v14410_v42  ;;  %v17981_v35 = vpop.f32.mrb[21].mxu0  ;;  %v18018_v9 = vpop.f32.mrb[45].mxu1 }
0x13a3   : > { %v14633_v12 = vadd.f32 %v14632_v41, %v14523_v37 }
0x13a4   : > { %v14529_v46 = vpop.f32.mrb[22].mxu0  ;;  %v14656_v52 = vpop.f32.mrb[46].mxu1 }
0x13a5   : > { %v14530_v43 = vadd.f32 %v14529_v46, %v14416_v61  ;;  %v17984_v54 = vpop.f32.mrb[23].mxu0  ;;  %v18021_v18 = vpop.f32.mrb[47].mxu1 }
0x13a7   : > { %v14641_v57 = vadd.f32 %v14640_v45, %v14530_v43 }
0x13a8   : > { %v14536_v40 = vpop.f32.mrb[24].mxu0  ;;  %v14854_v24 = vpop.f32.mrb[48].mxu1 }
0x13a9   : > { %v14537_v17 = vadd.f32 %v14536_v40, %v14422_v26  ;;  %v17987_v10 = vpop.f32.mrb[25].mxu0  ;;  %v18071_v5 = vpop.f32.mrb[49].mxu1 }
0x13ab   : > { %v14649_v2 = vadd.f32 %v14648_v38, %v14537_v17 }
0x13ac   : > { %v14543_v22 = vpop.f32.mrb[26].mxu0  ;;  %v14860_v4 = vpop.f32.mrb[50].mxu1 }
0x13ad   : > { %v14544_v59 = vadd.f32 %v14543_v22, %v14428_v7  ;;  %v17990_v58 = vpop.f32.mrb[27].mxu0  ;;  %v18074_v55 = vpop.f32.mrb[51].mxu1 }
0x13af   : > { %v14657_v50 = vadd.f32 %v14656_v52, %v14544_v59 }
0x13b0   : > { %v14751_v49 = vpop.f32.mrb[28].mxu0  ;;  %v14866_v32 = vpop.f32.mrb[52].mxu1 }
0x13b1   : > { %v14752_v27 = vadd.f32 %v14751_v49, %v14625_v33  ;;  %v18040_v19 = vpop.f32.mrb[29].mxu0  ;;  %v18077_v28 = vpop.f32.mrb[53].mxu1 }
0x13b3   : > { %v14855_v8 = vadd.f32 %v14854_v24, %v14752_v27 }
0x13b4   : > { %v14757_v21 = vpop.f32.mrb[30].mxu0  ;;  %v14872_v30 = vpop.f32.mrb[54].mxu1 }
0x13b5   : > { %v14758_v48 = vadd.f32 %v14757_v21, %v14633_v12  ;;  %v18043_v56 = vpop.f32.mrb[31].mxu0  ;;  %v18080_v42 = vpop.f32.mrb[55].mxu1  ;;  %v14882_v51 = vadd.f32 %v14855_v8, %v24562_v1 }
0x13b6   : > { %v15116_v56 = vld [vmem:[%s25009_s2 + $0x114] ss:$0 sm:$0xff] }
0x13b7   : > { %v14861_v34 = vadd.f32 %v14860_v4, %v14758_v48  ;;  %v14889_v44 = vsel %vm464_vm1, %v14882_v51, 0.0 }
0x13b8   : > { %v14763_v62 = vpop.f32.mrb[32].mxu0  ;;  %14890 = vadd.xlane.f32.xlu1 %v14889_v44  ;;  %v14878_v16 = vpop.f32.mrb[56].mxu1  ;;  %v15117_v44 = vld [vmem:[%s25009_s2 + $0x115] ss:$0 sm:$0xff] }
0x13b9   : > { %v14764_v61 = vadd.f32 %v14763_v62, %v14641_v57  ;;  %v18046_v29 = vpop.f32.mrb[33].mxu0  ;;  %v18083_v31 = vpop.f32.mrb[57].mxu1  ;;  %v14883_v15 = vadd.f32 %v14861_v34, %v24581_v3 }
0x13bb   : > { %v14867_v47 = vadd.f32 %v14866_v32, %v14764_v61  ;;  %v14892_v39 = vsel %vm464_vm1, %v14883_v15, 0.0 }
0x13bc   : > { %v14769_v26 = vpop.f32.mrb[34].mxu0  ;;  %14893 = vadd.xlane.f32.xlu0 %v14892_v39 }
0x13bd   : > { %v14770_v25 = vadd.f32 %v14769_v26, %v14649_v2  ;;  %v18049_v41 = vpop.f32.mrb[35].mxu0  ;;  %v14884_v1 = vadd.f32 %v14867_v47, %v24606_v11 }
0x13bf   : > { %v14873_v20 = vadd.f32 %v14872_v30, %v14770_v25  ;;  %v14895_v60 = vsel %vm464_vm1, %v14884_v1, 0.0 }
0x13c0   : > { %v14775_v0 = vpop.f32.mrb[36].mxu0  ;;  %14896 = vadd.xlane.f32.xlu1 %v14895_v60 }
0x13c1   : > { %v14776_v7 = vadd.f32 %v14775_v0, %v14657_v50  ;;  %v18052_v23 = vpop.f32.mrb[37].mxu0  ;;  %v14885_v45 = vadd.f32 %v14873_v20, %v24622_v6 }
0x13c3   : > { %v14879_v36 = vadd.f32 %v14878_v16, %v14776_v7  ;;  %v14898_v3 = vsel %vm464_vm1, %v14885_v45, 0.0 }
0x13c4   : > { %14899 = vadd.xlane.f32.xlu0 %v14898_v3 }
0x13c5   : > { %v14886_v53 = vadd.f32 %v14879_v36, %v24640_v13 }
0x13c7   : > { %v14901_v14 = vsel %vm13398_vm5, %v14886_v53, 0.0 }
0x13c8   : > { %14902 = vadd.xlane.f32.xlu1 %v14901_v14 }
0x1445   : > { %v14891_v33 = vpop.xlane.xlu1 %14890 }
0x1446   : > { %v14904_v11 = vmul.f32 0.03125, %v14891_v33 }
0x1448   : > { %v14909_v63 = vsub.f32 %v14882_v51, %v14904_v11 }
0x1449   : > { %v14894_v38 = vpop.xlane.xlu0 %14893 }
0x144a   : > { %v14905_v37 = vmul.f32 0.03125, %v14894_v38  ;;  %v14914_v35 = vmul.f32 %v14909_v63, %v14909_v63 }
0x144c   : > { %v14910_v9 = vsub.f32 %v14883_v15, %v14905_v37  ;;  %v14919_v12 = vsel %vm464_vm1, %v14914_v35, 0.0 }
0x144d   : > { %v14897_v46 = vpop.xlane.xlu1 %14896  ;;  %14920 = vadd.xlane.f32.xlu0 %v14919_v12 }
0x144e   : > { %v14906_v6 = vmul.f32 0.03125, %v14897_v46  ;;  %v14915_v52 = vmul.f32 %v14910_v9, %v14910_v9 }
0x1450   : > { %v14911_v43 = vsub.f32 %v14884_v1, %v14906_v6  ;;  %v14922_v54 = vsel %vm464_vm1, %v14915_v52, 0.0 }
0x1451   : > { %v14900_v13 = vpop.xlane.xlu0 %14899  ;;  %14923 = vadd.xlane.f32.xlu1 %v14922_v54 }
0x1452   : > { %v14907_v18 = vmul.f32 0.03125, %v14900_v13  ;;  %v14916_v57 = vmul.f32 %v14911_v43, %v14911_v43 }
0x1454   : > { %v14912_v40 = vsub.f32 %v14885_v45, %v14907_v18  ;;  %v14925_v24 = vsel %vm464_vm1, %v14916_v57, 0.0 }
0x1455   : > { %14926 = vadd.xlane.f32.xlu0 %v14925_v24  ;;  %v14903_v17 = vpop.xlane.xlu1 %14902 }
0x1456   : > { %v14908_v10 = vmul.f32 0.03125, %v14903_v17  ;;  %v14917_v5 = vmul.f32 %v14912_v40, %v14912_v40 }
0x1458   : > { %v14913_v2 = vsub.f32 %v14886_v53, %v14908_v10  ;;  %v14928_v22 = vsel %vm464_vm1, %v14917_v5, 0.0 }
0x1459   : > { %14929 = vadd.xlane.f32.xlu1 %v14928_v22 }
0x145a   : > { %v14918_v4 = vmul.f32 %v14913_v2, %v14913_v2 }
0x145c   : > { %v14931_v59 = vsel %vm13398_vm5, %v14918_v4, 0.0 }
0x145d   : > { %14932 = vadd.xlane.f32.xlu0 %v14931_v59 }
0x14da   : > { %v14921_v58 = vpop.xlane.xlu0 %14920 }
0x14db   : > { %v14934_v55 = vmul.f32 0.03125, %v14921_v58 }
0x14dd   : > { %v14939_v50 = vadd.f32 1e-05, %v14934_v55 }
0x14de   : > { %v14924_v49 = vpop.xlane.xlu1 %14923 }
0x14df   : > { %19495 = vrsqrt.f32 %v14939_v50  ;;  %v14935_v32 = vmul.f32 0.03125, %v14924_v49 }
0x14e1   : > { %v14940_v27 = vadd.f32 1e-05, %v14935_v32 }
0x14e2   : > { %v14927_v19 = vpop.xlane.xlu0 %14926 }
0x14e3   : > { %19497 = vrsqrt.f32 %v14940_v27  ;;  %v14936_v28 = vmul.f32 0.03125, %v14927_v19 }
0x14e5   : > { %v14941_v8 = vadd.f32 1e-05, %v14936_v28 }
0x14e6   : > { %v14930_v21 = vpop.xlane.xlu1 %14929 }
0x14e7   : > { %19499 = vrsqrt.f32 %v14941_v8  ;;  %v14937_v30 = vmul.f32 0.03125, %v14930_v21 }
0x14e9   : > { %v19496_v48 = vpop.eup %19495  ;;  %v14942_v42 = vadd.f32 1e-05, %v14937_v30 }
0x14ea   : > { %v14949_v51 = vmul.f32 %v19496_v48, %v14909_v63  ;;  %v14933_v34 = vpop.xlane.xlu0 %14932 }
0x14eb   : > { %19501 = vrsqrt.f32 %v14942_v42  ;;  %v14938_v62 = vmul.f32 0.03125, %v14933_v34 }
0x14ec   : > { %v14958_v16 = vmul.f32 %v15116_v56, %v14949_v51 }
0x14ed   : > { %v19498_v61 = vpop.eup %19497  ;;  %v14943_v29 = vadd.f32 1e-05, %v14938_v62 }
0x14ee   : > { %v14967_v31 = vadd.f32 %v15117_v44, %v14958_v16  ;;  %v14950_v15 = vmul.f32 %v19498_v61, %v14910_v9 }
0x14ef   : > { %19503 = vrsqrt.f32 %v14943_v29 }
0x14f0   : > { %14972 = vst.msk [vmem:[%s298_s18] sm:$0xff] %vm464_vm1, %v14967_v31  ;;  %v14959_v47 = vmul.f32 %v15116_v56, %v14950_v15 }
0x14f1   : > { %v19500_v39 = vpop.eup %19499 }
0x14f2   : > { %v14968_v26 = vadd.f32 %v15117_v44, %v14959_v47  ;;  %v14951_v25 = vmul.f32 %v19500_v39, %v14911_v43 }
0x14f4   : > { %14973 = vst.msk [vmem:[%s298_s18 + $0x8] sm:$0xff] %vm464_vm1, %v14968_v26  ;;  %v14960_v41 = vmul.f32 %v15116_v56, %v14951_v25 }
0x14f5   : > { %v19502_v1 = vpop.eup %19501 }
0x14f6   : > { %v14969_v20 = vadd.f32 %v15117_v44, %v14960_v41  ;;  %v14952_v60 = vmul.f32 %v19502_v1, %v14912_v40 }
0x14f8   : > { %14974 = vst.msk [vmem:[%s298_s18 + $0x10] sm:$0xff] %vm464_vm1, %v14969_v20  ;;  %v14961_v0 = vmul.f32 %v15116_v56, %v14952_v60 }
0x14f9   : > { %v19504_v7 = vpop.eup %19503 }
0x14fa   : > { %v14970_v23 = vadd.f32 %v15117_v44, %v14961_v0  ;;  %v14953_v45 = vmul.f32 %v19504_v7, %v14913_v2 }
0x14fc   : > { %14975 = vst.msk [vmem:[%s298_s18 + $0x18] sm:$0xff] %vm464_vm1, %v14970_v23  ;;  %v14962_v36 = vmul.f32 %v15116_v56, %v14953_v45 }
0x14fe   : > { %v14971_v3 = vadd.f32 %v15117_v44, %v14962_v36 }
0x1500   : > { %14976 = vst.msk [vmem:[%s298_s18 + $0x20] sm:$0xf] %vm13398_vm5, %v14971_v3 }
0x1501 PF: > { %s17_s24 = sadd.s32 1, %s19588_s24  }
0x1502   : > { %p14_p4 = scmp.ge.s32.totalorder %s17_s24, 4  }
0x1504   :  { %16 = sbr.rel (!%p14_p4) target bundleno = 1 (0x1), region = 81 }

</bundles_post_ra>
